<compile_context>
chip_gen: v7x
topology: tpu7x:2x2x1
jax: 0.10.0
libtpu: 0.0.40
codegen_flags: <defaults>
</compile_context>

<pallas_src>
import functools

import jax
import jax.numpy as jnp
from jax.experimental import pallas as pl
from jax.experimental.pallas import tpu as pltpu


# ----------------------------- fused SSH kernel ------------------------------

def _ssh_kernel(x_ref,
                w_in_ref, b_in_ref,
                w_mid_ref, b_mid_ref,
                w73_ref, b73_ref,
                o_ref,
                pad_in, pad_mid,
                *, H, W, oc2, oc4, leaky):
    """One image per grid step.

    Weights are im2col-packed (9*Cin, Cout) with the eval-BN scale already
    folded in; b*_ref hold the folded biases as (1, Cout).  w_in/w_mid pack
    two sibling convs side-by-side along Cout so each padded buffer feeds a
    single MXU matmul.
    """
    HW = H * W

    def zero_border(pad_ref):
        # Interior is fully overwritten every step; only the 1-px halo needs
        # zeroing.  Done every grid step (scratch is per-core under megacore,
        # so a program_id==0 guard would be unsafe), but it is only
        # 2 rows + 2 cols of stores.
        Hp, Wp, C = pad_ref.shape
        row0 = jnp.zeros((1, Wp, C), jnp.float32)
        col0 = jnp.zeros((Hp, 1, C), jnp.float32)
        pad_ref[0:1, :, :] = row0
        pad_ref[Hp - 1:Hp, :, :] = row0
        pad_ref[:, 0:1, :] = col0
        pad_ref[:, Wp - 1:Wp, :] = col0

    def im2col(pad_ref):
        # 9 shifted (H, W, C) windows -> one (HW, 9C) LHS.  The reshapes only
        # collapse leading dims (channel/lane dim unchanged) -> layout-cheap.
        C = pad_ref.shape[-1]
        cols = [pad_ref[kh:kh + H, kw:kw + W, :].reshape(HW, C)
                for kh in range(3) for kw in range(3)]
        return jnp.concatenate(cols, axis=-1)

    def leaky_relu(y):
        return jnp.where(y > 0, y, leaky * y)

    # The final F.relu(cat(...)) commutes with the channel concat, so it is
    # folded into each branch's terminal (no-relu) conv as a plain relu.

    # Stage 1: conv3X3 (-> relu) and conv5X5_1 (-> leaky) share the padded
    # input; one fused dot.
    zero_border(pad_in)
    pad_in[1:H + 1, 1:W + 1, :] = x_ref[...]
    y_in = jnp.dot(im2col(pad_in), w_in_ref[...],
                   preferred_element_type=jnp.float32) + b_in_ref[...]
    b3 = jnp.maximum(y_in[:, :oc2], 0.0)              # (HW, oc/2)
    b5_1 = leaky_relu(y_in[:, oc2:])                  # (HW, oc/4)

    # Stage 2: conv5X5_2 (-> relu) and conv7X7_2 (-> leaky) share padded b5_1.
    zero_border(pad_mid)
    pad_mid[1:H + 1, 1:W + 1, :] = b5_1.reshape(H, W, oc4)
    y_mid = jnp.dot(im2col(pad_mid), w_mid_ref[...],
                    preferred_element_type=jnp.float32) + b_mid_ref[...]
    b5 = jnp.maximum(y_mid[:, :oc4], 0.0)             # (HW, oc/4)
    b7_2 = leaky_relu(y_mid[:, oc4:])                 # (HW, oc/4)

    # Stage 3: conv7x7_3 (-> relu).  Border of pad_mid is still zero; only the
    # interior needs rewriting.
    pad_mid[1:H + 1, 1:W + 1, :] = b7_2.reshape(H, W, oc4)
    y7 = jnp.dot(im2col(pad_mid), w73_ref[...],
                 preferred_element_type=jnp.float32) + b73_ref[...]
    b7 = jnp.maximum(y7, 0.0)                         # (HW, oc/4)

    # Direct per-branch stores (no channel concat): output block is (oc, HW);
    # the last dim H*W is lane-dense (multiple of 128) and already NCHW.
    o_ref[0:oc2, :] = b3.T.astype(o_ref.dtype)
    o_ref[oc2:oc2 + oc4, :] = b5.T.astype(o_ref.dtype)
    o_ref[oc2 + oc4:oc2 + 2 * oc4, :] = b7.T.astype(o_ref.dtype)


@functools.partial(jax.jit, static_argnames=("leaky",))
def ssh_forward(params, x_nchw, *, leaky):
    """x_nchw: (N, Cin, H, W) float32 -> (N, out_channel, H, W) float32."""
    N, Cin, H, W = x_nchw.shape

    def fold(name):
        p = params[name]
        w = (p["w_col"] * p["scale"][None, :]).astype(jnp.float32)  # (9Cin,Cout)
        b = p["bias"][None, :].astype(jnp.float32)                  # (1, Cout)
        return w, b

    w3, bb3 = fold("conv3X3")
    w51, bb51 = fold("conv5X5_1")
    w52, bb52 = fold("conv5X5_2")
    w72, bb72 = fold("conv7X7_2")
    w73, bb73 = fold("conv7x7_3")

    oc2, oc4 = w3.shape[1], w51.shape[1]
    oc = oc2 + 2 * oc4

    # Fuse sibling convs that consume the same padded buffer.
    w_in = jnp.concatenate([w3, w51], axis=1)      # (9*Cin,  oc/2 + oc/4)
    b_in = jnp.concatenate([bb3, bb51], axis=1)
    w_mid = jnp.concatenate([w52, w72], axis=1)    # (9*oc/4, oc/2)
    b_mid = jnp.concatenate([bb52, bb72], axis=1)

    # Single NCHW -> NHWC layout change for the input (channels on lanes).
    x = jnp.transpose(x_nchw, (0, 2, 3, 1)).astype(jnp.float32)

    kernel = functools.partial(_ssh_kernel, H=H, W=W, oc2=oc2, oc4=oc4,
                               leaky=float(leaky))
    out = pl.pallas_call(
        kernel,
        out_shape=jax.ShapeDtypeStruct((N, oc, H * W), jnp.float32),
        grid_spec=pltpu.PrefetchScalarGridSpec(
            num_scalar_prefetch=0,
            grid=(N,),
            in_specs=[
                pl.BlockSpec((None, H, W, Cin), lambda n: (n, 0, 0, 0)),
                pl.BlockSpec(w_in.shape, lambda n: (0, 0)),
                pl.BlockSpec(b_in.shape, lambda n: (0, 0)),
                pl.BlockSpec(w_mid.shape, lambda n: (0, 0)),
                pl.BlockSpec(b_mid.shape, lambda n: (0, 0)),
                pl.BlockSpec(w73.shape, lambda n: (0, 0)),
                pl.BlockSpec(bb73.shape, lambda n: (0, 0)),
            ],
            out_specs=pl.BlockSpec((None, oc, H * W), lambda n: (n, 0, 0)),
            scratch_shapes=[
                pltpu.VMEM((H + 2, W + 2, Cin), jnp.float32),  # halo'd input
                pltpu.VMEM((H + 2, W + 2, oc4), jnp.float32),  # halo'd b5_1/b7_2
            ],
        ),
        compiler_params=pltpu.CompilerParams(
            dimension_semantics=("parallel",),          # v7x: 2 TensorCores
            vmem_limit_bytes=32 * 1024 * 1024,
        ),
    )(x, w_in, b_in, w_mid, b_mid, w73, bb73)
    return out.reshape(N, oc, H, W)                    # free; already NCHW


# ---------------- deterministic parameter construction (synthetic) -----------

def _init_conv_bn(key, cin, cout):
    """PyTorch Conv2d(cin,cout,3,1,1,bias=False) + eval BatchNorm2d(cout)."""
    kw, kg, kb, km, kv = jax.random.split(key, 5)
    w_oihw = 0.1 * jax.random.normal(kw, (cout, cin, 3, 3), jnp.float32)
    gamma = 1.0 + 0.1 * jax.random.normal(kg, (cout,), jnp.float32)
    beta = 0.1 * jax.random.normal(kb, (cout,), jnp.float32)
    mean = 0.1 * jax.random.normal(km, (cout,), jnp.float32)
    var = jnp.abs(jax.random.normal(kv, (cout,), jnp.float32)) + 0.5
    eps = 1e-5
    scale = gamma / jnp.sqrt(var + eps)
    bias = beta - mean * scale
    w_hwio = jnp.transpose(w_oihw, (2, 3, 1, 0))        # (3,3,Cin,Cout) for ref
    w_col = w_hwio.reshape(9 * cin, cout)               # im2col-packed (tap-major)
    return {"w_col": w_col, "w_hwio": w_hwio, "scale": scale, "bias": bias}


def init_ssh_params(key, in_channel, out_channel):
    assert out_channel % 4 == 0
    keys = jax.random.split(key, 5)
    return {
        "conv3X3":   _init_conv_bn(keys[0], in_channel, out_channel // 2),
        "conv5X5_1": _init_conv_bn(keys[1], in_channel, out_channel // 4),
        "conv5X5_2": _init_conv_bn(keys[2], out_channel // 4, out_channel // 4),
        "conv7X7_2": _init_conv_bn(keys[3], out_channel // 4, out_channel // 4),
        "conv7x7_3": _init_conv_bn(keys[4], out_channel // 4, out_channel // 4),
    }


# ---------------------------- pure-JAX reference ------------------------------

def _conv3x3_bn_ref(x_nhwc, p, act, leaky):
    y = jax.lax.conv_general_dilated(
        x_nhwc, p["w_hwio"], window_strides=(1, 1), padding="SAME",
        dimension_numbers=("NHWC", "HWIO", "NHWC"))
    y = y * p["scale"] + p["bias"]
    if act == "relu":
        return jnp.maximum(y, 0.0)
    return jnp.where(y > 0, y, leaky * y)


def ssh_forward_ref(params, x_nchw, *, leaky):
    x = jnp.transpose(x_nchw, (0, 2, 3, 1)).astype(jnp.float32)
    b3 = _conv3x3_bn_ref(x, params["conv3X3"], "relu", 0.0)
    b5_1 = _conv3x3_bn_ref(x, params["conv5X5_1"], "leaky", leaky)
    b5 = _conv3x3_bn_ref(b5_1, params["conv5X5_2"], "relu", 0.0)
    b7_2 = _conv3x3_bn_ref(b5_1, params["conv7X7_2"], "leaky", leaky)
    b7 = _conv3x3_bn_ref(b7_2, params["conv7x7_3"], "relu", 0.0)
    out = jnp.concatenate([b3, b5, b7], axis=-1)
    return jnp.transpose(out, (0, 3, 1, 2))


if __name__ == "__main__":
    key = jax.random.PRNGKey(0)
    k_param, k_x = jax.random.split(key)

    N, in_channel, H, W = 2, 8, 16, 16
    out_channel = 16                      # out_channel <= 64 -> leaky = 0.1
    leaky = 0.1 if out_channel <= 64 else 0.0

    params = init_ssh_params(k_param, in_channel, out_channel)
    x = jax.random.normal(k_x, (N, in_channel, H, W), jnp.float32)

    out = jax.block_until_ready(ssh_forward(params, x, leaky=leaky))
    ref = jax.block_until_ready(ssh_forward_ref(params, x, leaky=leaky))

    assert out.shape == (N, out_channel, H, W), out.shape
    err = float(jnp.max(jnp.abs(out - ref)))
    assert jnp.allclose(out, ref, atol=2e-4, rtol=2e-4), err
    print("KERNEL_OK")
</pallas_src>

<mosaic_0001>
module attributes {stable_mosaic.version = 11 : i64} {
  func.func @_ssh_kernel(%arg0: i32, %arg1: memref<1x16x16x8xf32, #tpu.memory_space<vmem>>, %arg2: memref<72x12xf32, #tpu.memory_space<vmem>>, %arg3: memref<1x12xf32, #tpu.memory_space<vmem>>, %arg4: memref<36x8xf32, #tpu.memory_space<vmem>>, %arg5: memref<1x8xf32, #tpu.memory_space<vmem>>, %arg6: memref<36x4xf32, #tpu.memory_space<vmem>>, %arg7: memref<1x4xf32, #tpu.memory_space<vmem>>, %arg8: memref<1x16x256xf32, #tpu.memory_space<vmem>>, %arg9: memref<18x18x8xf32, #tpu.memory_space<vmem>>, %arg10: memref<18x18x4xf32, #tpu.memory_space<vmem>>) attributes {dimension_semantics = [#tpu.dimension_semantics<parallel>], iteration_bounds = array<i64: 2>, scalar_prefetch = 0 : i64, scratch_operands = 2 : i64, tpu.core_type = #tpu.core_type<tc>, window_params = [{transform_indices = @transform_0, window_bounds = array<i64: 1, 16, 16, 8>}, {pipeline_mode = #tpu.pipeline_mode<synchronous>, transform_indices = @transform_1, window_bounds = array<i64: 72, 12>}, {pipeline_mode = #tpu.pipeline_mode<synchronous>, transform_indices = @transform_2, window_bounds = array<i64: 1, 12>}, {pipeline_mode = #tpu.pipeline_mode<synchronous>, transform_indices = @transform_3, window_bounds = array<i64: 36, 8>}, {pipeline_mode = #tpu.pipeline_mode<synchronous>, transform_indices = @transform_4, window_bounds = array<i64: 1, 8>}, {pipeline_mode = #tpu.pipeline_mode<synchronous>, transform_indices = @transform_5, window_bounds = array<i64: 36, 4>}, {pipeline_mode = #tpu.pipeline_mode<synchronous>, transform_indices = @transform_6, window_bounds = array<i64: 1, 4>}, {transform_indices = @transform_7, window_bounds = array<i64: 1, 16, 256>}]} {
    %cst = arith.constant 0.000000e+00 : f32
    %0 = vector.broadcast %cst : f32 to vector<1x18x8xf32>
    %cst_0 = arith.constant 0.000000e+00 : f32
    %1 = vector.broadcast %cst_0 : f32 to vector<18x1x8xf32>
    %c0 = arith.constant 0 : index
    %c0_1 = arith.constant 0 : index
    %c0_2 = arith.constant 0 : index
    %2 = vector.load %arg9[%c0, %c0_1, %c0_2] : memref<18x18x8xf32, #tpu.memory_space<vmem>>, vector<1x18x8xf32>
    tpu.vector_store %arg9[%c0, %c0_1, %c0_2], %0 {strides = array<i32>} : memref<18x18x8xf32, #tpu.memory_space<vmem>>, vector<1x18x8xf32>,
    %c17 = arith.constant 17 : index
    %c0_3 = arith.constant 0 : index
    %c0_4 = arith.constant 0 : index
    %3 = vector.load %arg9[%c17, %c0_3, %c0_4] : memref<18x18x8xf32, #tpu.memory_space<vmem>>, vector<1x18x8xf32>
    tpu.vector_store %arg9[%c17, %c0_3, %c0_4], %0 {strides = array<i32>} : memref<18x18x8xf32, #tpu.memory_space<vmem>>, vector<1x18x8xf32>,
    %c0_5 = arith.constant 0 : index
    %c0_6 = arith.constant 0 : index
    %c0_7 = arith.constant 0 : index
    %4 = vector.load %arg9[%c0_5, %c0_6, %c0_7] : memref<18x18x8xf32, #tpu.memory_space<vmem>>, vector<18x1x8xf32>
    tpu.vector_store %arg9[%c0_5, %c0_6, %c0_7], %1 {strides = array<i32>} : memref<18x18x8xf32, #tpu.memory_space<vmem>>, vector<18x1x8xf32>,
    %c0_8 = arith.constant 0 : index
    %c17_9 = arith.constant 17 : index
    %c0_10 = arith.constant 0 : index
    %5 = vector.load %arg9[%c0_8, %c17_9, %c0_10] : memref<18x18x8xf32, #tpu.memory_space<vmem>>, vector<18x1x8xf32>
    tpu.vector_store %arg9[%c0_8, %c17_9, %c0_10], %1 {strides = array<i32>} : memref<18x18x8xf32, #tpu.memory_space<vmem>>, vector<18x1x8xf32>,
    %c0_11 = arith.constant 0 : index
    %c0_12 = arith.constant 0 : index
    %c0_13 = arith.constant 0 : index
    %c0_14 = arith.constant 0 : index
    %6 = vector.load %arg1[%c0_11, %c0_12, %c0_13, %c0_14] : memref<1x16x16x8xf32, #tpu.memory_space<vmem>>, vector<1x16x16x8xf32>
    %7 = vector.shape_cast %6 : vector<1x16x16x8xf32> to vector<16x16x8xf32>
    %c1 = arith.constant 1 : index
    %c1_15 = arith.constant 1 : index
    %c0_16 = arith.constant 0 : index
    %8 = vector.load %arg9[%c1, %c1_15, %c0_16] : memref<18x18x8xf32, #tpu.memory_space<vmem>>, vector<16x16x8xf32>
    tpu.vector_store %arg9[%c1, %c1_15, %c0_16], %7 {strides = array<i32>} : memref<18x18x8xf32, #tpu.memory_space<vmem>>, vector<16x16x8xf32>,
    %c0_17 = arith.constant 0 : index
    %c0_18 = arith.constant 0 : index
    %c0_19 = arith.constant 0 : index
    %9 = vector.load %arg9[%c0_17, %c0_18, %c0_19] : memref<18x18x8xf32, #tpu.memory_space<vmem>>, vector<16x16x8xf32>
    %10 = vector.shape_cast %9 : vector<16x16x8xf32> to vector<256x8xf32>
    %c0_20 = arith.constant 0 : index
    %c1_21 = arith.constant 1 : index
    %c0_22 = arith.constant 0 : index
    %11 = vector.load %arg9[%c0_20, %c1_21, %c0_22] : memref<18x18x8xf32, #tpu.memory_space<vmem>>, vector<16x16x8xf32>
    %12 = vector.shape_cast %11 : vector<16x16x8xf32> to vector<256x8xf32>
    %c0_23 = arith.constant 0 : index
    %c2 = arith.constant 2 : index
    %c0_24 = arith.constant 0 : index
    %13 = vector.load %arg9[%c0_23, %c2, %c0_24] : memref<18x18x8xf32, #tpu.memory_space<vmem>>, vector<16x16x8xf32>
    %14 = vector.shape_cast %13 : vector<16x16x8xf32> to vector<256x8xf32>
    %c1_25 = arith.constant 1 : index
    %c0_26 = arith.constant 0 : index
    %c0_27 = arith.constant 0 : index
    %15 = vector.load %arg9[%c1_25, %c0_26, %c0_27] : memref<18x18x8xf32, #tpu.memory_space<vmem>>, vector<16x16x8xf32>
    %16 = vector.shape_cast %15 : vector<16x16x8xf32> to vector<256x8xf32>
    %c1_28 = arith.constant 1 : index
    %c1_29 = arith.constant 1 : index
    %c0_30 = arith.constant 0 : index
    %17 = vector.load %arg9[%c1_28, %c1_29, %c0_30] : memref<18x18x8xf32, #tpu.memory_space<vmem>>, vector<16x16x8xf32>
    %18 = vector.shape_cast %17 : vector<16x16x8xf32> to vector<256x8xf32>
    %c1_31 = arith.constant 1 : index
    %c2_32 = arith.constant 2 : index
    %c0_33 = arith.constant 0 : index
    %19 = vector.load %arg9[%c1_31, %c2_32, %c0_33] : memref<18x18x8xf32, #tpu.memory_space<vmem>>, vector<16x16x8xf32>
    %20 = vector.shape_cast %19 : vector<16x16x8xf32> to vector<256x8xf32>
    %c2_34 = arith.constant 2 : index
    %c0_35 = arith.constant 0 : index
    %c0_36 = arith.constant 0 : index
    %21 = vector.load %arg9[%c2_34, %c0_35, %c0_36] : memref<18x18x8xf32, #tpu.memory_space<vmem>>, vector<16x16x8xf32>
    %22 = vector.shape_cast %21 : vector<16x16x8xf32> to vector<256x8xf32>
    %c2_37 = arith.constant 2 : index
    %c1_38 = arith.constant 1 : index
    %c0_39 = arith.constant 0 : index
    %23 = vector.load %arg9[%c2_37, %c1_38, %c0_39] : memref<18x18x8xf32, #tpu.memory_space<vmem>>, vector<16x16x8xf32>
    %24 = vector.shape_cast %23 : vector<16x16x8xf32> to vector<256x8xf32>
    %c2_40 = arith.constant 2 : index
    %c2_41 = arith.constant 2 : index
    %c0_42 = arith.constant 0 : index
    %25 = vector.load %arg9[%c2_40, %c2_41, %c0_42] : memref<18x18x8xf32, #tpu.memory_space<vmem>>, vector<16x16x8xf32>
    %26 = vector.shape_cast %25 : vector<16x16x8xf32> to vector<256x8xf32>
    %27 = tpu.concatenate %10, %12, %14, %16, %18, %20, %22, %24, %26 in 1 : vector<256x8xf32>, vector<256x8xf32>, vector<256x8xf32>, vector<256x8xf32>, vector<256x8xf32>, vector<256x8xf32>, vector<256x8xf32>, vector<256x8xf32>, vector<256x8xf32> -> vector<256x72xf32>
    %c0_43 = arith.constant 0 : index
    %c0_44 = arith.constant 0 : index
    %28 = vector.load %arg2[%c0_43, %c0_44] : memref<72x12xf32, #tpu.memory_space<vmem>>, vector<72x12xf32>
    %cst_45 = arith.constant dense<0.000000e+00> : vector<256x12xf32>
    %29 = tpu.matmul %27, %28, %cst_45 {dimension_numbers = #tpu.dot_dimension_numbers<[1], [0], [0], [1], [0, 0, 1, 1], [], []>} : vector<256x72xf32>, vector<72x12xf32>, vector<256x12xf32> -> vector<256x12xf32>
    %c0_46 = arith.constant 0 : index
    %c0_47 = arith.constant 0 : index
    %30 = vector.load %arg3[%c0_46, %c0_47] : memref<1x12xf32, #tpu.memory_space<vmem>>, vector<1x12xf32>
    %31 = vector.broadcast %30 : vector<1x12xf32> to vector<256x12xf32>
    %32 = arith.addf %29, %31 : vector<256x12xf32>
    %33 = vector.extract_strided_slice %32 {offsets = [0, 0], sizes = [256, 8], strides = [1, 1]} : vector<256x12xf32> to vector<256x8xf32>
    %cst_48 = arith.constant 0.000000e+00 : f32
    %34 = vector.broadcast %cst_48 : f32 to vector<256x8xf32>
    %35 = arith.maximumf %33, %34 : vector<256x8xf32>
    %36 = vector.extract_strided_slice %32 {offsets = [0, 8], sizes = [256, 4], strides = [1, 1]} : vector<256x12xf32> to vector<256x4xf32>
    %cst_49 = arith.constant 0.000000e+00 : f32
    %37 = vector.broadcast %cst_49 : f32 to vector<256x4xf32>
    %38 = arith.cmpf ogt, %36, %37 : vector<256x4xf32>
    %cst_50 = arith.constant 1.000000e-01 : f32
    %39 = vector.broadcast %cst_50 : f32 to vector<256x4xf32>
    %40 = arith.mulf %39, %36 : vector<256x4xf32>
    %41 = arith.select %38, %36, %40 : vector<256x4xi1>, vector<256x4xf32>
    %cst_51 = arith.constant 0.000000e+00 : f32
    %42 = vector.broadcast %cst_51 : f32 to vector<1x18x4xf32>
    %cst_52 = arith.constant 0.000000e+00 : f32
    %43 = vector.broadcast %cst_52 : f32 to vector<18x1x4xf32>
    %c0_53 = arith.constant 0 : index
    %c0_54 = arith.constant 0 : index
    %c0_55 = arith.constant 0 : index
    %44 = vector.load %arg10[%c0_53, %c0_54, %c0_55] : memref<18x18x4xf32, #tpu.memory_space<vmem>>, vector<1x18x4xf32>
    tpu.vector_store %arg10[%c0_53, %c0_54, %c0_55], %42 {strides = array<i32>} : memref<18x18x4xf32, #tpu.memory_space<vmem>>, vector<1x18x4xf32>,
    %c17_56 = arith.constant 17 : index
    %c0_57 = arith.constant 0 : index
    %c0_58 = arith.constant 0 : index
    %45 = vector.load %arg10[%c17_56, %c0_57, %c0_58] : memref<18x18x4xf32, #tpu.memory_space<vmem>>, vector<1x18x4xf32>
    tpu.vector_store %arg10[%c17_56, %c0_57, %c0_58], %42 {strides = array<i32>} : memref<18x18x4xf32, #tpu.memory_space<vmem>>, vector<1x18x4xf32>,
    %c0_59 = arith.constant 0 : index
    %c0_60 = arith.constant 0 : index
    %c0_61 = arith.constant 0 : index
    %46 = vector.load %arg10[%c0_59, %c0_60, %c0_61] : memref<18x18x4xf32, #tpu.memory_space<vmem>>, vector<18x1x4xf32>
    tpu.vector_store %arg10[%c0_59, %c0_60, %c0_61], %43 {strides = array<i32>} : memref<18x18x4xf32, #tpu.memory_space<vmem>>, vector<18x1x4xf32>,
    %c0_62 = arith.constant 0 : index
    %c17_63 = arith.constant 17 : index
    %c0_64 = arith.constant 0 : index
    %47 = vector.load %arg10[%c0_62, %c17_63, %c0_64] : memref<18x18x4xf32, #tpu.memory_space<vmem>>, vector<18x1x4xf32>
    tpu.vector_store %arg10[%c0_62, %c17_63, %c0_64], %43 {strides = array<i32>} : memref<18x18x4xf32, #tpu.memory_space<vmem>>, vector<18x1x4xf32>,
    %48 = vector.shape_cast %41 : vector<256x4xf32> to vector<16x16x4xf32>
    %c1_65 = arith.constant 1 : index
    %c1_66 = arith.constant 1 : index
    %c0_67 = arith.constant 0 : index
    %49 = vector.load %arg10[%c1_65, %c1_66, %c0_67] : memref<18x18x4xf32, #tpu.memory_space<vmem>>, vector<16x16x4xf32>
    tpu.vector_store %arg10[%c1_65, %c1_66, %c0_67], %48 {strides = array<i32>} : memref<18x18x4xf32, #tpu.memory_space<vmem>>, vector<16x16x4xf32>,
    %c0_68 = arith.constant 0 : index
    %c0_69 = arith.constant 0 : index
    %c0_70 = arith.constant 0 : index
    %50 = vector.load %arg10[%c0_68, %c0_69, %c0_70] : memref<18x18x4xf32, #tpu.memory_space<vmem>>, vector<16x16x4xf32>
    %51 = vector.shape_cast %50 : vector<16x16x4xf32> to vector<256x4xf32>
    %c0_71 = arith.constant 0 : index
    %c1_72 = arith.constant 1 : index
    %c0_73 = arith.constant 0 : index
    %52 = vector.load %arg10[%c0_71, %c1_72, %c0_73] : memref<18x18x4xf32, #tpu.memory_space<vmem>>, vector<16x16x4xf32>
    %53 = vector.shape_cast %52 : vector<16x16x4xf32> to vector<256x4xf32>
    %c0_74 = arith.constant 0 : index
    %c2_75 = arith.constant 2 : index
    %c0_76 = arith.constant 0 : index
    %54 = vector.load %arg10[%c0_74, %c2_75, %c0_76] : memref<18x18x4xf32, #tpu.memory_space<vmem>>, vector<16x16x4xf32>
    %55 = vector.shape_cast %54 : vector<16x16x4xf32> to vector<256x4xf32>
    %c1_77 = arith.constant 1 : index
    %c0_78 = arith.constant 0 : index
    %c0_79 = arith.constant 0 : index
    %56 = vector.load %arg10[%c1_77, %c0_78, %c0_79] : memref<18x18x4xf32, #tpu.memory_space<vmem>>, vector<16x16x4xf32>
    %57 = vector.shape_cast %56 : vector<16x16x4xf32> to vector<256x4xf32>
    %c1_80 = arith.constant 1 : index
    %c1_81 = arith.constant 1 : index
    %c0_82 = arith.constant 0 : index
    %58 = vector.load %arg10[%c1_80, %c1_81, %c0_82] : memref<18x18x4xf32, #tpu.memory_space<vmem>>, vector<16x16x4xf32>
    %59 = vector.shape_cast %58 : vector<16x16x4xf32> to vector<256x4xf32>
    %c1_83 = arith.constant 1 : index
    %c2_84 = arith.constant 2 : index
    %c0_85 = arith.constant 0 : index
    %60 = vector.load %arg10[%c1_83, %c2_84, %c0_85] : memref<18x18x4xf32, #tpu.memory_space<vmem>>, vector<16x16x4xf32>
    %61 = vector.shape_cast %60 : vector<16x16x4xf32> to vector<256x4xf32>
    %c2_86 = arith.constant 2 : index
    %c0_87 = arith.constant 0 : index
    %c0_88 = arith.constant 0 : index
    %62 = vector.load %arg10[%c2_86, %c0_87, %c0_88] : memref<18x18x4xf32, #tpu.memory_space<vmem>>, vector<16x16x4xf32>
    %63 = vector.shape_cast %62 : vector<16x16x4xf32> to vector<256x4xf32>
    %c2_89 = arith.constant 2 : index
    %c1_90 = arith.constant 1 : index
    %c0_91 = arith.constant 0 : index
    %64 = vector.load %arg10[%c2_89, %c1_90, %c0_91] : memref<18x18x4xf32, #tpu.memory_space<vmem>>, vector<16x16x4xf32>
    %65 = vector.shape_cast %64 : vector<16x16x4xf32> to vector<256x4xf32>
    %c2_92 = arith.constant 2 : index
    %c2_93 = arith.constant 2 : index
    %c0_94 = arith.constant 0 : index
    %66 = vector.load %arg10[%c2_92, %c2_93, %c0_94] : memref<18x18x4xf32, #tpu.memory_space<vmem>>, vector<16x16x4xf32>
    %67 = vector.shape_cast %66 : vector<16x16x4xf32> to vector<256x4xf32>
    %68 = tpu.concatenate %51, %53, %55, %57, %59, %61, %63, %65, %67 in 1 : vector<256x4xf32>, vector<256x4xf32>, vector<256x4xf32>, vector<256x4xf32>, vector<256x4xf32>, vector<256x4xf32>, vector<256x4xf32>, vector<256x4xf32>, vector<256x4xf32> -> vector<256x36xf32>
    %c0_95 = arith.constant 0 : index
    %c0_96 = arith.constant 0 : index
    %69 = vector.load %arg4[%c0_95, %c0_96] : memref<36x8xf32, #tpu.memory_space<vmem>>, vector<36x8xf32>
    %cst_97 = arith.constant dense<0.000000e+00> : vector<256x8xf32>
    %70 = tpu.matmul %68, %69, %cst_97 {dimension_numbers = #tpu.dot_dimension_numbers<[1], [0], [0], [1], [0, 0, 1, 1], [], []>} : vector<256x36xf32>, vector<36x8xf32>, vector<256x8xf32> -> vector<256x8xf32>
    %c0_98 = arith.constant 0 : index
    %c0_99 = arith.constant 0 : index
    %71 = vector.load %arg5[%c0_98, %c0_99] : memref<1x8xf32, #tpu.memory_space<vmem>>, vector<1x8xf32>
    %72 = vector.broadcast %71 : vector<1x8xf32> to vector<256x8xf32>
    %73 = arith.addf %70, %72 : vector<256x8xf32>
    %74 = vector.extract_strided_slice %73 {offsets = [0, 0], sizes = [256, 4], strides = [1, 1]} : vector<256x8xf32> to vector<256x4xf32>
    %cst_100 = arith.constant 0.000000e+00 : f32
    %75 = vector.broadcast %cst_100 : f32 to vector<256x4xf32>
    %76 = arith.maximumf %74, %75 : vector<256x4xf32>
    %77 = vector.extract_strided_slice %73 {offsets = [0, 4], sizes = [256, 4], strides = [1, 1]} : vector<256x8xf32> to vector<256x4xf32>
    %cst_101 = arith.constant 0.000000e+00 : f32
    %78 = vector.broadcast %cst_101 : f32 to vector<256x4xf32>
    %79 = arith.cmpf ogt, %77, %78 : vector<256x4xf32>
    %cst_102 = arith.constant 1.000000e-01 : f32
    %80 = vector.broadcast %cst_102 : f32 to vector<256x4xf32>
    %81 = arith.mulf %80, %77 : vector<256x4xf32>
    %82 = arith.select %79, %77, %81 : vector<256x4xi1>, vector<256x4xf32>
    %83 = vector.shape_cast %82 : vector<256x4xf32> to vector<16x16x4xf32>
    %c1_103 = arith.constant 1 : index
    %c1_104 = arith.constant 1 : index
    %c0_105 = arith.constant 0 : index
    %84 = vector.load %arg10[%c1_103, %c1_104, %c0_105] : memref<18x18x4xf32, #tpu.memory_space<vmem>>, vector<16x16x4xf32>
    tpu.vector_store %arg10[%c1_103, %c1_104, %c0_105], %83 {strides = array<i32>} : memref<18x18x4xf32, #tpu.memory_space<vmem>>, vector<16x16x4xf32>,
    %c0_106 = arith.constant 0 : index
    %c0_107 = arith.constant 0 : index
    %c0_108 = arith.constant 0 : index
    %85 = vector.load %arg10[%c0_106, %c0_107, %c0_108] : memref<18x18x4xf32, #tpu.memory_space<vmem>>, vector<16x16x4xf32>
    %86 = vector.shape_cast %85 : vector<16x16x4xf32> to vector<256x4xf32>
    %c0_109 = arith.constant 0 : index
    %c1_110 = arith.constant 1 : index
    %c0_111 = arith.constant 0 : index
    %87 = vector.load %arg10[%c0_109, %c1_110, %c0_111] : memref<18x18x4xf32, #tpu.memory_space<vmem>>, vector<16x16x4xf32>
    %88 = vector.shape_cast %87 : vector<16x16x4xf32> to vector<256x4xf32>
    %c0_112 = arith.constant 0 : index
    %c2_113 = arith.constant 2 : index
    %c0_114 = arith.constant 0 : index
    %89 = vector.load %arg10[%c0_112, %c2_113, %c0_114] : memref<18x18x4xf32, #tpu.memory_space<vmem>>, vector<16x16x4xf32>
    %90 = vector.shape_cast %89 : vector<16x16x4xf32> to vector<256x4xf32>
    %c1_115 = arith.constant 1 : index
    %c0_116 = arith.constant 0 : index
    %c0_117 = arith.constant 0 : index
    %91 = vector.load %arg10[%c1_115, %c0_116, %c0_117] : memref<18x18x4xf32, #tpu.memory_space<vmem>>, vector<16x16x4xf32>
    %92 = vector.shape_cast %91 : vector<16x16x4xf32> to vector<256x4xf32>
    %c1_118 = arith.constant 1 : index
    %c1_119 = arith.constant 1 : index
    %c0_120 = arith.constant 0 : index
    %93 = vector.load %arg10[%c1_118, %c1_119, %c0_120] : memref<18x18x4xf32, #tpu.memory_space<vmem>>, vector<16x16x4xf32>
    %94 = vector.shape_cast %93 : vector<16x16x4xf32> to vector<256x4xf32>
    %c1_121 = arith.constant 1 : index
    %c2_122 = arith.constant 2 : index
    %c0_123 = arith.constant 0 : index
    %95 = vector.load %arg10[%c1_121, %c2_122, %c0_123] : memref<18x18x4xf32, #tpu.memory_space<vmem>>, vector<16x16x4xf32>
    %96 = vector.shape_cast %95 : vector<16x16x4xf32> to vector<256x4xf32>
    %c2_124 = arith.constant 2 : index
    %c0_125 = arith.constant 0 : index
    %c0_126 = arith.constant 0 : index
    %97 = vector.load %arg10[%c2_124, %c0_125, %c0_126] : memref<18x18x4xf32, #tpu.memory_space<vmem>>, vector<16x16x4xf32>
    %98 = vector.shape_cast %97 : vector<16x16x4xf32> to vector<256x4xf32>
    %c2_127 = arith.constant 2 : index
    %c1_128 = arith.constant 1 : index
    %c0_129 = arith.constant 0 : index
    %99 = vector.load %arg10[%c2_127, %c1_128, %c0_129] : memref<18x18x4xf32, #tpu.memory_space<vmem>>, vector<16x16x4xf32>
    %100 = vector.shape_cast %99 : vector<16x16x4xf32> to vector<256x4xf32>
    %c2_130 = arith.constant 2 : index
    %c2_131 = arith.constant 2 : index
    %c0_132 = arith.constant 0 : index
    %101 = vector.load %arg10[%c2_130, %c2_131, %c0_132] : memref<18x18x4xf32, #tpu.memory_space<vmem>>, vector<16x16x4xf32>
    %102 = vector.shape_cast %101 : vector<16x16x4xf32> to vector<256x4xf32>
    %103 = tpu.concatenate %86, %88, %90, %92, %94, %96, %98, %100, %102 in 1 : vector<256x4xf32>, vector<256x4xf32>, vector<256x4xf32>, vector<256x4xf32>, vector<256x4xf32>, vector<256x4xf32>, vector<256x4xf32>, vector<256x4xf32>, vector<256x4xf32> -> vector<256x36xf32>
    %c0_133 = arith.constant 0 : index
    %c0_134 = arith.constant 0 : index
    %104 = vector.load %arg6[%c0_133, %c0_134] : memref<36x4xf32, #tpu.memory_space<vmem>>, vector<36x4xf32>
    %cst_135 = arith.constant dense<0.000000e+00> : vector<256x4xf32>
    %105 = tpu.matmul %103, %104, %cst_135 {dimension_numbers = #tpu.dot_dimension_numbers<[1], [0], [0], [1], [0, 0, 1, 1], [], []>} : vector<256x36xf32>, vector<36x4xf32>, vector<256x4xf32> -> vector<256x4xf32>
    %c0_136 = arith.constant 0 : index
    %c0_137 = arith.constant 0 : index
    %106 = vector.load %arg7[%c0_136, %c0_137] : memref<1x4xf32, #tpu.memory_space<vmem>>, vector<1x4xf32>
    %107 = vector.broadcast %106 : vector<1x4xf32> to vector<256x4xf32>
    %108 = arith.addf %105, %107 : vector<256x4xf32>
    %cst_138 = arith.constant 0.000000e+00 : f32
    %109 = vector.broadcast %cst_138 : f32 to vector<256x4xf32>
    %110 = arith.maximumf %108, %109 : vector<256x4xf32>
    %111 = tpu.transpose %35, [1, 0] : vector<256x8xf32> -> vector<8x256xf32>
    %c0_139 = arith.constant 0 : index
    %c0_140 = arith.constant 0 : index
    %c0_141 = arith.constant 0 : index
    %112 = vector.load %arg8[%c0_139, %c0_140, %c0_141] : memref<1x16x256xf32, #tpu.memory_space<vmem>>, vector<1x8x256xf32>
    %113 = vector.shape_cast %112 : vector<1x8x256xf32> to vector<8x256xf32>
    %114 = vector.shape_cast %111 : vector<8x256xf32> to vector<1x8x256xf32>
    tpu.vector_store %arg8[%c0_139, %c0_140, %c0_141], %114 {strides = array<i32>} : memref<1x16x256xf32, #tpu.memory_space<vmem>>, vector<1x8x256xf32>,
    %115 = tpu.transpose %76, [1, 0] : vector<256x4xf32> -> vector<4x256xf32>
    %c0_142 = arith.constant 0 : index
    %c8 = arith.constant 8 : index
    %c0_143 = arith.constant 0 : index
    %116 = vector.load %arg8[%c0_142, %c8, %c0_143] : memref<1x16x256xf32, #tpu.memory_space<vmem>>, vector<1x4x256xf32>
    %117 = vector.shape_cast %116 : vector<1x4x256xf32> to vector<4x256xf32>
    %118 = vector.shape_cast %115 : vector<4x256xf32> to vector<1x4x256xf32>
    tpu.vector_store %arg8[%c0_142, %c8, %c0_143], %118 {strides = array<i32>} : memref<1x16x256xf32, #tpu.memory_space<vmem>>, vector<1x4x256xf32>,
    %119 = tpu.transpose %110, [1, 0] : vector<256x4xf32> -> vector<4x256xf32>
    %c0_144 = arith.constant 0 : index
    %c12 = arith.constant 12 : index
    %c0_145 = arith.constant 0 : index
    %120 = vector.load %arg8[%c0_144, %c12, %c0_145] : memref<1x16x256xf32, #tpu.memory_space<vmem>>, vector<1x4x256xf32>
    %121 = vector.shape_cast %120 : vector<1x4x256xf32> to vector<4x256xf32>
    %122 = vector.shape_cast %119 : vector<4x256xf32> to vector<1x4x256xf32>
    tpu.vector_store %arg8[%c0_144, %c12, %c0_145], %122 {strides = array<i32>} : memref<1x16x256xf32, #tpu.memory_space<vmem>>, vector<1x4x256xf32>,
    return
  }
  func.func @transform_0(%arg0: i32) -> (i32, i32, i32, i32) {
    %c0_i32 = arith.constant 0 : i32
    %c0_i32_0 = arith.constant 0 : i32
    %c0_i32_1 = arith.constant 0 : i32
    %c0_i32_2 = arith.constant 0 : i32
    return %arg0, %c0_i32, %c0_i32_0, %c0_i32_1 : i32, i32, i32, i32
  }
  func.func @transform_1(%arg0: i32) -> (i32, i32) {
    %c0_i32 = arith.constant 0 : i32
    %c0_i32_0 = arith.constant 0 : i32
    %c0_i32_1 = arith.constant 0 : i32
    return %c0_i32, %c0_i32_0 : i32, i32
  }
  func.func @transform_2(%arg0: i32) -> (i32, i32) {
    %c0_i32 = arith.constant 0 : i32
    %c0_i32_0 = arith.constant 0 : i32
    %c0_i32_1 = arith.constant 0 : i32
    return %c0_i32, %c0_i32_0 : i32, i32
  }
  func.func @transform_3(%arg0: i32) -> (i32, i32) {
    %c0_i32 = arith.constant 0 : i32
    %c0_i32_0 = arith.constant 0 : i32
    %c0_i32_1 = arith.constant 0 : i32
    return %c0_i32, %c0_i32_0 : i32, i32
  }
  func.func @transform_4(%arg0: i32) -> (i32, i32) {
    %c0_i32 = arith.constant 0 : i32
    %c0_i32_0 = arith.constant 0 : i32
    %c0_i32_1 = arith.constant 0 : i32
    return %c0_i32, %c0_i32_0 : i32, i32
  }
  func.func @transform_5(%arg0: i32) -> (i32, i32) {
    %c0_i32 = arith.constant 0 : i32
    %c0_i32_0 = arith.constant 0 : i32
    %c0_i32_1 = arith.constant 0 : i32
    return %c0_i32, %c0_i32_0 : i32, i32
  }
  func.func @transform_6(%arg0: i32) -> (i32, i32) {
    %c0_i32 = arith.constant 0 : i32
    %c0_i32_0 = arith.constant 0 : i32
    %c0_i32_1 = arith.constant 0 : i32
    return %c0_i32, %c0_i32_0 : i32, i32
  }
  func.func @transform_7(%arg0: i32) -> (i32, i32, i32) {
    %c0_i32 = arith.constant 0 : i32
    %c0_i32_0 = arith.constant 0 : i32
    %c0_i32_1 = arith.constant 0 : i32
    return %arg0, %c0_i32, %c0_i32_0 : i32, i32, i32
  }
}

</mosaic_0001>

<bundles_post_ra>
// kernel: ssh_forward.1
= control target key start
LH: loop header
LB: loop body
LE: loop exit
PB: predicated region body
PF: predicated region fallthrough
CT: control target
= control target key end

     0   :  { %s7651_s24 = smov 0   ;;  %s13159_s0 = inlined_call_operand.vmem [shape: f32[2,16,16,8], index: 0, kind: input, shape index: {}]   ;;  %s13160_s1 = inlined_call_operand.vmem [shape: f32[72,12], index: 1, kind: input, shape index: {}]   ;;  %s13161_s2 = inlined_call_operand.vmem [shape: f32[1,12], index: 2, kind: input, shape index: {}]   ;;  %s13162_s3 = inlined_call_operand.vmem [shape: f32[36,8], index: 3, kind: input, shape index: {}]   ;;  %s13163_s4 = inlined_call_operand.vmem [shape: f32[1,8], index: 4, kind: input, shape index: {}]   ;;  %s13164_s5 = inlined_call_operand.vmem [shape: f32[36,4], index: 5, kind: input, shape index: {}]   ;;  %s13165_s6 = inlined_call_operand.vmem [shape: f32[1,4], index: 6, kind: input, shape index: {}]   ;;  %s13166_s7 = inlined_call_operand.vmem [shape: f32[2,16,256], index: 7, kind: output, shape index: {}]  }
   0x1 LB: > { %s7032_s25 = sadd.s32 4294967295, %s7594_s24   ;;  %p7036_p0 = scmp.ge.s32.totalorder %s7594_s24, 1  ;;  %s7594_s24 = sphi %s7651_s24, %s17_s24  }
   0x2   : > { %p237_p1 = scmp.lt.s32.totalorder %s7594_s24, 3 }
   0x4   : > { %p238_p2 = pnand %p7036_p0, %p237_p1 }
   0x6   : > { %241 = sbr.rel (%p238_p2) target bundleno = 2777 (0xad9), region = 48 }
   0xd   : > { %vm279_vm0 = vcmask 64512   ;;  %vm282_vm1 = vcmask 58368   ;;  %p7661_p3 = scmp.lt.s32.totalorder %s7032_s25, 1  ;;  %vm288_vm2 = vcmask 57344   ;;  %v13167_v0 = vmov 0.0   ;;  %s7597_s8 = smov 8  }
   0xe   : > { %280 = vst.msk [vmem:[#allocation2] sm:$0xff] %vm279_vm0, %v13167_v0  ;;  %281 = vst.msk [vmem:[#allocation2 + $0x8] sm:$0xff] %vm279_vm0, %v13167_v0  ;;  %s7598_s9 = smov 16   ;;  %s7599_s10 = smov 24   ;;  %vm1735_vm3 = vcmask 130048   ;;  %vm1768_vm4 = vcmask 195584  }
   0xf   : > { %285 = vst.msk [vmem:[#allocation2 + $0x198] sm:$0xff] %vm279_vm0, %v13167_v0  ;;  %286 = vst.msk [vmem:[#allocation2 + $0x1a0] sm:$0xff] %vm279_vm0, %v13167_v0  ;;  %s14563_s25 = smov (!%p7661_p3, %s7032_s25), 1  ;;  %s7600_s11 = smov 32   ;;  %vm1801_vm5 = vcmask 261120   ;;  %vm1834_vm6 = vcmask 326656  }
  0x10   : > { %283 = vst.msk [vmem:[#allocation2 + $0x10] sm:$0x3] %vm282_vm1, %v13167_v0  ;;  %287 = vst.msk [vmem:[#allocation2 + $0x1a8] sm:$0x3] %vm282_vm1, %v13167_v0  ;;  %s7144_s27 = sshll.u32 %s14563_s25, 8  ;;  %s7601_s12 = smov 40  }
  0x11   : > { %290 = vst.msk [vmem:[#allocation2 + $0x18] sm:$0x1] %vm288_vm2, %v13167_v0  ;;  %291 = vst.msk [vmem:[#allocation2 + $0x30] sm:$0x1] %vm288_vm2, %v13167_v0  ;;  %s7757_s30 = scalar_lea.vmem %s13159_s0, %s7144_s27  ;;  %s7602_s13 = smov 48   ;;  %vm1867_vm7 = vcmask 392192  }
  0x12   : > { %292 = vst.msk [vmem:[#allocation2 + $0x48] sm:$0x1] %vm288_vm2, %v13167_v0  ;;  %293 = vst.msk [vmem:[#allocation2 + $0x60] sm:$0x1] %vm288_vm2, %v13167_v0  ;;  %v325_v1 = vld [vmem:[%s7757_s30] sm:$0xff]  ;;  %v327_v2 = vld [vmem:[%s7757_s30 + $0x10] sm:$0xff] }
  0x13   : > { %294 = vst.msk [vmem:[#allocation2 + $0x78] sm:$0x1] %vm288_vm2, %v13167_v0  ;;  %295 = vst.msk [vmem:[#allocation2 + $0x90] sm:$0x1] %vm288_vm2, %v13167_v0  ;;  %v326_v3 = vld [vmem:[%s7757_s30 + $0x8] sm:$0xff]  ;;  %v329_v4 = vld [vmem:[%s7757_s30 + $0x20] sm:$0xff] }
  0x14   : > { %296 = vst.msk [vmem:[#allocation2 + $0xa8] sm:$0x1] %vm288_vm2, %v13167_v0  ;;  %297 = vst.msk [vmem:[#allocation2 + $0xc0] sm:$0x1] %vm288_vm2, %v13167_v0  ;;  %v328_v5 = vld [vmem:[%s7757_s30 + $0x18] sm:$0xff]  ;;  %v331_v6 = vld [vmem:[%s7757_s30 + $0x30] sm:$0xff] }
  0x15   : > { %298 = vst.msk [vmem:[#allocation2 + $0xd8] sm:$0x1] %vm288_vm2, %v13167_v0  ;;  %299 = vst.msk [vmem:[#allocation2 + $0xf0] sm:$0x1] %vm288_vm2, %v13167_v0  ;;  %v422_v7 = vld [vmem:[#allocation2 + $0x1] sm:$0xff]  ;;  %v332_v11 = vld [vmem:[%s7757_s30 + $0x38] sm:$0xff] }
  0x16   : > { %300 = vst.msk [vmem:[#allocation2 + $0x108] sm:$0x1] %vm288_vm2, %v13167_v0  ;;  %301 = vst.msk [vmem:[#allocation2 + $0x120] sm:$0x1] %vm288_vm2, %v13167_v0  ;;  %v330_v9 = vld [vmem:[%s7757_s30 + $0x28] sm:$0xff]  ;;  %711 = vrot.lane.b32.xlu0 %v422_v7, %s7597_s8  ;;  %v333_v10 = vld [vmem:[%s7757_s30 + $0x40] sm:$0xff] }
  0x17   : > { %302 = vst.msk [vmem:[#allocation2 + $0x138] sm:$0x1] %vm288_vm2, %v13167_v0  ;;  %303 = vst.msk [vmem:[#allocation2 + $0x150] sm:$0x1] %vm288_vm2, %v13167_v0  ;;  %v423_v8 = vld [vmem:[#allocation2 + $0x9] sm:$0xff]  ;;  %v337_v14 = vld [vmem:[%s7757_s30 + $0x60] sm:$0xff] }
  0x18   : > { %304 = vst.msk [vmem:[#allocation2 + $0x168] sm:$0x1] %vm288_vm2, %v13167_v0  ;;  %305 = vst.msk [vmem:[#allocation2 + $0x180] sm:$0x1] %vm288_vm2, %v13167_v0  ;;  %v335_v12 = vld [vmem:[%s7757_s30 + $0x50] sm:$0xff]  ;;  %v334_v13 = vld [vmem:[%s7757_s30 + $0x48] sm:$0xff] }
  0x19   : > { %308 = vst.msk [vmem:[#allocation2 + $0x29] sm:$0x1] %vm288_vm2, %v13167_v0  ;;  %309 = vst.msk [vmem:[#allocation2 + $0x41] sm:$0x1] %vm288_vm2, %v13167_v0  ;;  %v336_v15 = vld [vmem:[%s7757_s30 + $0x58] sm:$0xff]  ;;  %v339_v16 = vld [vmem:[%s7757_s30 + $0x70] sm:$0xff] }
  0x1a   : > { %310 = vst.msk [vmem:[#allocation2 + $0x59] sm:$0x1] %vm288_vm2, %v13167_v0  ;;  %311 = vst.msk [vmem:[#allocation2 + $0x71] sm:$0x1] %vm288_vm2, %v13167_v0  ;;  %v338_v17 = vld [vmem:[%s7757_s30 + $0x68] sm:$0xff]  ;;  %v341_v18 = vld [vmem:[%s7757_s30 + $0x80] sm:$0xff]  ;;  %713 = vrot.lane.b32.xlu0 %v423_v8, %s7597_s8 }
  0x1b   : > { %312 = vst.msk [vmem:[#allocation2 + $0x89] sm:$0x1] %vm288_vm2, %v13167_v0  ;;  %313 = vst.msk [vmem:[#allocation2 + $0xa1] sm:$0x1] %vm288_vm2, %v13167_v0  ;;  %v340_v19 = vld [vmem:[%s7757_s30 + $0x78] sm:$0xff]  ;;  %v343_v20 = vld [vmem:[%s7757_s30 + $0x90] sm:$0xff] }
  0x1c   : > { %314 = vst.msk [vmem:[#allocation2 + $0xb9] sm:$0x1] %vm288_vm2, %v13167_v0  ;;  %315 = vst.msk [vmem:[#allocation2 + $0xd1] sm:$0x1] %vm288_vm2, %v13167_v0  ;;  %v342_v21 = vld [vmem:[%s7757_s30 + $0x88] sm:$0xff]  ;;  %v345_v22 = vld [vmem:[%s7757_s30 + $0xa0] sm:$0xff] }
  0x1d   : > { %316 = vst.msk [vmem:[#allocation2 + $0xe9] sm:$0x1] %vm288_vm2, %v13167_v0  ;;  %317 = vst.msk [vmem:[#allocation2 + $0x101] sm:$0x1] %vm288_vm2, %v13167_v0  ;;  %v344_v23 = vld [vmem:[%s7757_s30 + $0x98] sm:$0xff]  ;;  %v347_v24 = vld [vmem:[%s7757_s30 + $0xb0] sm:$0xff] }
  0x1e   : > { %318 = vst.msk [vmem:[#allocation2 + $0x119] sm:$0x1] %vm288_vm2, %v13167_v0  ;;  %319 = vst.msk [vmem:[#allocation2 + $0x131] sm:$0x1] %vm288_vm2, %v13167_v0  ;;  %v346_v28 = vld [vmem:[%s7757_s30 + $0xa8] sm:$0xff]  ;;  %v349_v29 = vld [vmem:[%s7757_s30 + $0xc0] sm:$0xff] }
  0x1f   : > { %320 = vst.msk [vmem:[#allocation2 + $0x149] sm:$0x1] %vm288_vm2, %v13167_v0  ;;  %321 = vst.msk [vmem:[#allocation2 + $0x161] sm:$0x1] %vm288_vm2, %v13167_v0  ;;  %v348_v33 = vld [vmem:[%s7757_s30 + $0xb8] sm:$0xff]  ;;  %v351_v34 = vld [vmem:[%s7757_s30 + $0xd0] sm:$0xff] }
  0x20   : > { %322 = vst.msk [vmem:[#allocation2 + $0x179] sm:$0x1] %vm288_vm2, %v13167_v0  ;;  %323 = vst.msk [vmem:[#allocation2 + $0x191] sm:$0x1] %vm288_vm2, %v13167_v0  ;;  %v350_v35 = vld [vmem:[%s7757_s30 + $0xc8] sm:$0xff]  ;;  %v353_v36 = vld [vmem:[%s7757_s30 + $0xe0] sm:$0xff] }
  0x21   : > { %307 = vst.msk [vmem:[#allocation2 + $0x11] sm:$0x1] %vm288_vm2, %v13167_v0  ;;  %289 = vst.msk [vmem:[#allocation2] sm:$0x1] %vm288_vm2, %v13167_v0  ;;  %v352_v37 = vld [vmem:[%s7757_s30 + $0xd8] sm:$0xff]  ;;  %v354_v39 = vld [vmem:[%s7757_s30 + $0xe8] sm:$0xff] }
  0x22   : > { %306 = vst.msk [vmem:[#allocation2 + $0x198] sm:$0x1] %vm288_vm2, %v13167_v0  ;;  %324 = vst.msk [vmem:[#allocation2 + $0x1a9] sm:$0x1] %vm288_vm2, %v13167_v0  ;;  %v355_v58 = vld [vmem:[%s7757_s30 + $0xf0] sm:$0xff]  ;;  %v356_v62 = vld [vmem:[%s7757_s30 + $0xf8] sm:$0xff] }
  0x23   : > { %358 = vst.msk [vmem:[#allocation2 + $0x19] sm:$0xff] %vm279_vm0, %v325_v1  ;;  %360 = vst.msk [vmem:[#allocation2 + $0x31] sm:$0xff] %vm279_vm0, %v327_v2  ;;  %v454_v1 = vld [vmem:[#allocation2 + $0x2] sm:$0xff]  ;;  %s7603_s14 = smov 56   ;;  %s7604_s17 = smov 64   ;;  %vm1900_vm8 = vcmask 457728  }
  0x24   : > { %359 = vst.msk [vmem:[#allocation2 + $0x21] sm:$0xff] %vm279_vm0, %v326_v3  ;;  %362 = vst.msk [vmem:[#allocation2 + $0x49] sm:$0xff] %vm279_vm0, %v329_v4  ;;  %vm1933_vm9 = vcmask 523264   ;;  %vm1982_vm10 = vcmask 588800   ;;  %vm2432_vm11 = vcmask 31744   ;;  %vm2435_vm12 = vcmask 25600  }
  0x25   : > { %361 = vst.msk [vmem:[#allocation2 + $0x39] sm:$0xff] %vm279_vm0, %v328_v5  ;;  %364 = vst.msk [vmem:[#allocation2 + $0x61] sm:$0xff] %vm279_vm0, %v331_v6  ;;  %vm2441_vm13 = vcmask 24576   ;;  %s7605_s19 = smov 120   ;;  %s7606_s20 = smov 4  }
  0x26   : > { %363 = vst.msk [vmem:[#allocation2 + $0x51] sm:$0xff] %vm279_vm0, %v330_v9  ;;  %366 = vst.msk [vmem:[#allocation2 + $0x79] sm:$0xff] %vm279_vm0, %v333_v10  ;;  %s7607_s21 = smov 12   ;;  %s7608_s22 = smov 20  }
  0x27   : > { %365 = vst.msk [vmem:[#allocation2 + $0x69] sm:$0xff] %vm279_vm0, %v332_v11  ;;  %368 = vst.msk [vmem:[#allocation2 + $0x91] sm:$0xff] %vm279_vm0, %v335_v12  ;;  %s7609_s29 = smov 28  }
  0x28   : > { %367 = vst.msk [vmem:[#allocation2 + $0x81] sm:$0xff] %vm279_vm0, %v334_v13  ;;  %370 = vst.msk [vmem:[#allocation2 + $0xa9] sm:$0xff] %vm279_vm0, %v337_v14  ;;  %v455_v4 = vld [vmem:[#allocation2 + $0xa] sm:$0xff] }
  0x29   : > { %369 = vst.msk [vmem:[#allocation2 + $0x99] sm:$0xff] %vm279_vm0, %v336_v15  ;;  %372 = vst.msk [vmem:[#allocation2 + $0xc1] sm:$0xff] %vm279_vm0, %v339_v16 }
  0x2a   : > { %371 = vst.msk [vmem:[#allocation2 + $0xb1] sm:$0xff] %vm279_vm0, %v338_v17  ;;  %374 = vst.msk [vmem:[#allocation2 + $0xd9] sm:$0xff] %vm279_vm0, %v341_v18  ;;  %v7802_v25 = vld [vmem:[#allocation2 + $0x19] sm:$0xff]  ;;  %v7804_v26 = vld [vmem:[#allocation2 + $0x31] sm:$0xff] }
  0x2b   : > { %373 = vst.msk [vmem:[#allocation2 + $0xc9] sm:$0xff] %vm279_vm0, %v340_v19  ;;  %376 = vst.msk [vmem:[#allocation2 + $0xf1] sm:$0xff] %vm279_vm0, %v343_v20  ;;  %715 = vrot.lane.b32.xlu1 %v7802_v25, %s7597_s8  ;;  %v7811_v27 = vld [vmem:[#allocation2 + $0x21] sm:$0xff]  ;;  %719 = vrot.lane.b32.xlu0 %v7804_v26, %s7597_s8  ;;  %v7819_v30 = vld [vmem:[#allocation2 + $0x49] sm:$0xff] }
  0x2c   : > { %375 = vst.msk [vmem:[#allocation2 + $0xe1] sm:$0xff] %vm279_vm0, %v342_v21  ;;  %378 = vst.msk [vmem:[#allocation2 + $0x109] sm:$0xff] %vm279_vm0, %v345_v22  ;;  %v7823_v31 = vld [vmem:[#allocation2 + $0x39] sm:$0xff]  ;;  %v7827_v32 = vld [vmem:[#allocation2 + $0x61] sm:$0xff] }
  0x2d   : > { %377 = vst.msk [vmem:[#allocation2 + $0xf9] sm:$0xff] %vm279_vm0, %v344_v23  ;;  %380 = vst.msk [vmem:[#allocation2 + $0x121] sm:$0xff] %vm279_vm0, %v347_v24  ;;  %v7839_v38 = vld [vmem:[#allocation2 + $0x51] sm:$0xff]  ;;  %v7847_v40 = vld [vmem:[#allocation2 + $0x79] sm:$0xff] }
  0x2e   : > { %379 = vst.msk [vmem:[#allocation2 + $0x111] sm:$0xff] %vm279_vm0, %v346_v28  ;;  %382 = vst.msk [vmem:[#allocation2 + $0x139] sm:$0xff] %vm279_vm0, %v349_v29  ;;  %v7851_v41 = vld [vmem:[#allocation2 + $0x69] sm:$0xff]  ;;  %v7855_v42 = vld [vmem:[#allocation2 + $0x91] sm:$0xff] }
  0x2f   : > { %717 = vrot.lane.b32.xlu1 %v7811_v27, %s7597_s8  ;;  %723 = vrot.lane.b32.xlu0 %v7819_v30, %s7597_s8  ;;  %381 = vst.msk [vmem:[#allocation2 + $0x129] sm:$0xff] %vm279_vm0, %v348_v33  ;;  %384 = vst.msk [vmem:[#allocation2 + $0x151] sm:$0xff] %vm279_vm0, %v351_v34  ;;  %v7859_v43 = vld [vmem:[#allocation2 + $0x81] sm:$0xff]  ;;  %v7863_v44 = vld [vmem:[#allocation2 + $0xa9] sm:$0xff] }
  0x30   : > { %383 = vst.msk [vmem:[#allocation2 + $0x141] sm:$0xff] %vm279_vm0, %v350_v35  ;;  %386 = vst.msk [vmem:[#allocation2 + $0x169] sm:$0xff] %vm279_vm0, %v353_v36  ;;  %v7867_v45 = vld [vmem:[#allocation2 + $0x99] sm:$0xff]  ;;  %v7871_v46 = vld [vmem:[#allocation2 + $0xc1] sm:$0xff] }
  0x31   : > { %385 = vst.msk [vmem:[#allocation2 + $0x159] sm:$0xff] %vm279_vm0, %v352_v37  ;;  %387 = vst.msk [vmem:[#allocation2 + $0x171] sm:$0xff] %vm279_vm0, %v354_v39  ;;  %v7875_v47 = vld [vmem:[#allocation2 + $0xb1] sm:$0xff]  ;;  %v7879_v48 = vld [vmem:[#allocation2 + $0xd9] sm:$0xff] }
  0x32   : > { %v7883_v49 = vld [vmem:[#allocation2 + $0xc9] sm:$0xff]  ;;  %v7887_v50 = vld [vmem:[#allocation2 + $0xf1] sm:$0xff]  ;;  %388 = vst.msk [vmem:[#allocation2 + $0x181] sm:$0xff] %vm279_vm0, %v355_v58  ;;  %389 = vst.msk [vmem:[#allocation2 + $0x189] sm:$0xff] %vm279_vm0, %v356_v62 }
  0x33   : > { %721 = vrot.lane.b32.xlu1 %v7823_v31, %s7597_s8  ;;  %727 = vrot.lane.b32.xlu0 %v7827_v32, %s7597_s8  ;;  %v7891_v51 = vld [vmem:[#allocation2 + $0xe1] sm:$0xff]  ;;  %v7895_v52 = vld [vmem:[#allocation2 + $0x109] sm:$0xff]  ;;  %v7950_v5 = vld [vmem:[#allocation2 + $0x32] sm:$0xff] }
  0x34   : > { %v7899_v53 = vld [vmem:[#allocation2 + $0xf9] sm:$0xff]  ;;  %v7903_v54 = vld [vmem:[#allocation2 + $0x121] sm:$0xff]  ;;  %v7957_v7 = vld [vmem:[#allocation2 + $0x4a] sm:$0xff] }
  0x35   : > { %v7907_v55 = vld [vmem:[#allocation2 + $0x111] sm:$0xff]  ;;  %v7911_v56 = vld [vmem:[#allocation2 + $0x139] sm:$0xff]  ;;  %v7953_v6 = vld [vmem:[#allocation2 + $0x22] sm:$0xff] }
  0x36   : > { %v7915_v57 = vld [vmem:[#allocation2 + $0x129] sm:$0xff]  ;;  %v7921_v59 = vld [vmem:[#allocation2 + $0x151] sm:$0xff]  ;;  %v7944_v3 = vld [vmem:[#allocation2 + $0x1a] sm:$0xff] }
  0x37   : > { %725 = vrot.lane.b32.xlu1 %v7839_v38, %s7597_s8  ;;  %731 = vrot.lane.b32.xlu0 %v7847_v40, %s7597_s8  ;;  %v7925_v60 = vld [vmem:[#allocation2 + $0x141] sm:$0xff]  ;;  %v7929_v61 = vld [vmem:[#allocation2 + $0x169] sm:$0xff]  ;;  %v7969_v10 = vld [vmem:[#allocation2 + $0x52] sm:$0xff] }
  0x38   : > { %v7935_v63 = vld [vmem:[#allocation2 + $0x159] sm:$0xff]  ;;  %v7941_v2 = vld [vmem:[#allocation2 + $0x171] sm:$0xff]  ;;  %v7965_v9 = vld [vmem:[#allocation2 + $0x62] sm:$0xff] }
  0x39   : > { %v7961_v8 = vld [vmem:[#allocation2 + $0x3a] sm:$0xff]  ;;  %v7977_v12 = vld [vmem:[#allocation2 + $0x6a] sm:$0xff]  ;;  %v7981_v13 = vld [vmem:[#allocation2 + $0x92] sm:$0xff] }
  0x3a   : > { %v7973_v11 = vld [vmem:[#allocation2 + $0x7a] sm:$0xff]  ;;  %v7985_v14 = vld [vmem:[#allocation2 + $0x82] sm:$0xff]  ;;  %v7989_v15 = vld [vmem:[#allocation2 + $0xaa] sm:$0xff] }
  0x3b   : > { %729 = vrot.lane.b32.xlu1 %v7851_v41, %s7597_s8  ;;  %735 = vrot.lane.b32.xlu0 %v7855_v42, %s7597_s8  ;;  %v7993_v16 = vld [vmem:[#allocation2 + $0x9a] sm:$0xff]  ;;  %v7997_v17 = vld [vmem:[#allocation2 + $0xc2] sm:$0xff]  ;;  %v8001_v18 = vld [vmem:[#allocation2 + $0xb2] sm:$0xff] }
  0x3c   : > { %v8005_v19 = vld [vmem:[#allocation2 + $0xda] sm:$0xff]  ;;  %v8009_v20 = vld [vmem:[#allocation2 + $0xca] sm:$0xff]  ;;  %v8013_v21 = vld [vmem:[#allocation2 + $0xf2] sm:$0xff] }
  0x3d   : > { %v8017_v22 = vld [vmem:[#allocation2 + $0xe2] sm:$0xff]  ;;  %v8021_v23 = vld [vmem:[#allocation2 + $0x10a] sm:$0xff]  ;;  %v8025_v24 = vld [vmem:[#allocation2 + $0xfa] sm:$0xff] }
  0x3e   : > { %v8029_v28 = vld [vmem:[#allocation2 + $0x122] sm:$0xff]  ;;  %v8033_v29 = vld [vmem:[#allocation2 + $0x112] sm:$0xff]  ;;  %v8037_v33 = vld [vmem:[#allocation2 + $0x13a] sm:$0xff] }
  0x3f   : > { %733 = vrot.lane.b32.xlu1 %v7859_v43, %s7597_s8  ;;  %739 = vrot.lane.b32.xlu0 %v7863_v44, %s7597_s8  ;;  %v8043_v35 = vld [vmem:[#allocation2 + $0x12a] sm:$0xff]  ;;  %v8047_v36 = vld [vmem:[#allocation2 + $0x152] sm:$0xff]  ;;  %v8053_v39 = vld [vmem:[#allocation2 + $0x142] sm:$0xff] }
  0x40   : > { %13327 = vst [vmem:[#allocation6_spill] sm:$0xff] %v8053_v39  ;;  %v8059_v62 = vld [vmem:[#allocation2 + $0x16a] sm:$0xff] }
  0x41   : > { %13329 = vst [vmem:[#allocation8_spill] sm:$0xff] %v8059_v62 }
  0x43   : > { %737 = vrot.lane.b32.xlu1 %v7867_v45, %s7597_s8  ;;  %743 = vrot.lane.b32.xlu0 %v7871_v46, %s7597_s8 }
  0x47   : > { %741 = vrot.lane.b32.xlu1 %v7875_v47, %s7597_s8  ;;  %747 = vrot.lane.b32.xlu0 %v7879_v48, %s7597_s8 }
  0x4b   : > { %745 = vrot.lane.b32.xlu1 %v7883_v49, %s7597_s8  ;;  %751 = vrot.lane.b32.xlu0 %v7887_v50, %s7597_s8 }
  0x4f   : > { %749 = vrot.lane.b32.xlu1 %v7891_v51, %s7597_s8  ;;  %755 = vrot.lane.b32.xlu0 %v7895_v52, %s7597_s8 }
  0x53   : > { %753 = vrot.lane.b32.xlu1 %v7899_v53, %s7597_s8  ;;  %759 = vrot.lane.b32.xlu0 %v7903_v54, %s7597_s8 }
  0x57   : > { %757 = vrot.lane.b32.xlu1 %v7907_v55, %s7597_s8  ;;  %763 = vrot.lane.b32.xlu0 %v7911_v56, %s7597_s8 }
  0x5b   : > { %761 = vrot.lane.b32.xlu1 %v7915_v57, %s7597_s8  ;;  %767 = vrot.lane.b32.xlu0 %v7921_v59, %s7597_s8 }
  0x5f   : > { %765 = vrot.lane.b32.xlu1 %v7925_v60, %s7597_s8  ;;  %771 = vrot.lane.b32.xlu0 %v7929_v61, %s7597_s8 }
  0x63   : > { %769 = vrot.lane.b32.xlu1 %v7935_v63, %s7597_s8  ;;  %839 = vrot.lane.b32.xlu0 %v454_v1, %s7598_s9 }
  0x67   : > { %773 = vrot.lane.b32.xlu1 %v7941_v2, %s7597_s8  ;;  %843 = vrot.lane.b32.xlu0 %v7944_v3, %s7598_s9 }
  0x6b   : > { %841 = vrot.lane.b32.xlu1 %v455_v4, %s7598_s9  ;;  %847 = vrot.lane.b32.xlu0 %v7950_v5, %s7598_s9  ;;  %v8065_v4 = vld [vmem:[#allocation2 + $0x15a] sm:$0xff] }
  0x6c   : > { %13331 = vst [vmem:[#allocation10_spill] sm:$0xff] %v8065_v4 }
  0x6f   : > { %845 = vrot.lane.b32.xlu1 %v7953_v6, %s7598_s9  ;;  %851 = vrot.lane.b32.xlu0 %v7957_v7, %s7598_s9 }
  0x73   : > { %849 = vrot.lane.b32.xlu1 %v7961_v8, %s7598_s9  ;;  %855 = vrot.lane.b32.xlu0 %v7965_v9, %s7598_s9 }
  0x77   : > { %853 = vrot.lane.b32.xlu1 %v7969_v10, %s7598_s9  ;;  %859 = vrot.lane.b32.xlu0 %v7973_v11, %s7598_s9 }
  0x7b   : > { %857 = vrot.lane.b32.xlu1 %v7977_v12, %s7598_s9  ;;  %863 = vrot.lane.b32.xlu0 %v7981_v13, %s7598_s9 }
  0x7f   : > { %861 = vrot.lane.b32.xlu1 %v7985_v14, %s7598_s9  ;;  %867 = vrot.lane.b32.xlu0 %v7989_v15, %s7598_s9 }
  0x83   : > { %865 = vrot.lane.b32.xlu1 %v7993_v16, %s7598_s9  ;;  %871 = vrot.lane.b32.xlu0 %v7997_v17, %s7598_s9 }
  0x87   : > { %869 = vrot.lane.b32.xlu1 %v8001_v18, %s7598_s9  ;;  %875 = vrot.lane.b32.xlu0 %v8005_v19, %s7598_s9 }
  0x88   : > { %v8039_v34 = vpop.permute.xlu0 %711 }
  0x89   : > { %13325 = vst [vmem:[#allocation4_spill] sm:$0xff] %v8039_v34  ;;  %v8075_v34 = vld [vmem:[#allocation2 + $0x172] sm:$0xff] }
  0x8a   : > { %13334 = vst [vmem:[#allocation13_spill] sm:$0xff] %v8075_v34 }
  0x8b   : > { %873 = vrot.lane.b32.xlu1 %v8009_v20, %s7598_s9  ;;  %879 = vrot.lane.b32.xlu0 %v8013_v21, %s7598_s9 }
  0x8c   : > { %v8049_v37 = vpop.permute.xlu0 %713 }
  0x8d   : > { %13326 = vst [vmem:[#allocation5_spill] sm:$0xff] %v8049_v37 }
  0x8f   : > { %877 = vrot.lane.b32.xlu1 %v8017_v22, %s7598_s9  ;;  %883 = vrot.lane.b32.xlu0 %v8021_v23, %s7598_s9 }
  0x93   : > { %881 = vrot.lane.b32.xlu1 %v8025_v24, %s7598_s9  ;;  %887 = vrot.lane.b32.xlu0 %v8029_v28, %s7598_s9 }
  0x97   : > { %885 = vrot.lane.b32.xlu1 %v8033_v29, %s7598_s9  ;;  %891 = vrot.lane.b32.xlu0 %v8037_v33, %s7598_s9 }
  0x9b   : > { %889 = vrot.lane.b32.xlu1 %v8043_v35, %s7598_s9  ;;  %895 = vrot.lane.b32.xlu0 %v8047_v36, %s7598_s9 }
  0x9d   : > { %v8057_v58 = vpop.permute.xlu1 %715  ;;  %v8061_v1 = vpop.permute.xlu0 %719 }
  0x9e   : > { %13328 = vst [vmem:[#allocation7_spill] sm:$0xff] %v8057_v58  ;;  %13330 = vst [vmem:[#allocation9_spill] sm:$0xff] %v8061_v1  ;;  %v392_v58 = vld [vmem:[#allocation2 + $0x18] sm:$0xff] }
  0x9f   : > { %893 = vrot.lane.b32.xlu1 %v8053_v39, %s7598_s9  ;;  %899 = vrot.lane.b32.xlu0 %v8059_v62, %s7598_s9  ;;  %v8084_v62 = vld [vmem:[#allocation2 + $0x30] sm:$0xff] }
  0xa0   : > { %13337 = vst [vmem:[#allocation16_spill] sm:$0xff] %v8084_v62 }
  0xa1   : > { %v8069_v0 = vpop.permute.xlu1 %717  ;;  %v8071_v37 = vpop.permute.xlu0 %723 }
  0xa2   : > { %13332 = vst [vmem:[#allocation11_spill] sm:$0xff] %v8069_v0  ;;  %13333 = vst [vmem:[#allocation12_spill] sm:$0xff] %v8071_v37  ;;  %v393_v0 = vld [vmem:[#allocation2 + $0x20] sm:$0xff] }
  0xa3   : > { %897 = vrot.lane.b32.xlu1 %v8065_v4, %s7598_s9  ;;  %967 = vrot.lane.b32.xlu0 %v392_v58, %s7599_s10  ;;  %v8093_v58 = vld [vmem:[#allocation2 + $0x48] sm:$0xff] }
  0xa4   : > { %13340 = vst [vmem:[#allocation19_spill] sm:$0xff] %v8093_v58 }
  0xa5   : > { %v8078_v1 = vpop.permute.xlu1 %721  ;;  %v8080_v39 = vpop.permute.xlu0 %727 }
  0xa6   : > { %13335 = vst [vmem:[#allocation14_spill] sm:$0xff] %v8078_v1  ;;  %13336 = vst [vmem:[#allocation15_spill] sm:$0xff] %v8080_v39  ;;  %v8099_v1 = vld [vmem:[#allocation2 + $0x38] sm:$0xff] }
  0xa7   : > { %901 = vrot.lane.b32.xlu1 %v8075_v34, %s7598_s9  ;;  %971 = vrot.lane.b32.xlu0 %v8084_v62, %s7599_s10  ;;  %13342 = vst [vmem:[#allocation21_spill] sm:$0xff] %v8099_v1 }
  0xa9   : > { %v8088_v37 = vpop.permute.xlu1 %725  ;;  %v8090_v4 = vpop.permute.xlu0 %731 }
  0xaa   : > { %13338 = vst [vmem:[#allocation17_spill] sm:$0xff] %v8088_v37  ;;  %13339 = vst [vmem:[#allocation18_spill] sm:$0xff] %v8090_v4  ;;  %v8105_v37 = vld [vmem:[#allocation2 + $0x60] sm:$0xff]  ;;  %v8111_v4 = vld [vmem:[#allocation2 + $0x50] sm:$0xff] }
  0xab   : > { %969 = vrot.lane.b32.xlu1 %v393_v0, %s7599_s10  ;;  %975 = vrot.lane.b32.xlu0 %v8093_v58, %s7599_s10  ;;  %13344 = vst [vmem:[#allocation23_spill] sm:$0xff] %v8105_v37  ;;  %13346 = vst [vmem:[#allocation25_spill] sm:$0xff] %v8111_v4 }
  0xad   : > { %v8097_v39 = vpop.permute.xlu1 %729  ;;  %v8101_v34 = vpop.permute.xlu0 %735 }
  0xae   : > { %13341 = vst [vmem:[#allocation20_spill] sm:$0xff] %v8097_v39  ;;  %13343 = vst [vmem:[#allocation22_spill] sm:$0xff] %v8101_v34  ;;  %v8117_v39 = vld [vmem:[#allocation2 + $0x78] sm:$0xff] }
  0xaf   : > { %973 = vrot.lane.b32.xlu1 %v8099_v1, %s7599_s10  ;;  %979 = vrot.lane.b32.xlu0 %v8105_v37, %s7599_s10  ;;  %13348 = vst [vmem:[#allocation27_spill] sm:$0xff] %v8117_v39  ;;  %v8123_v1 = vld [vmem:[#allocation2 + $0x68] sm:$0xff] }
  0xb0   : > { %13350 = vst [vmem:[#allocation29_spill] sm:$0xff] %v8123_v1 }
  0xb1   : > { %v8109_v0 = vpop.permute.xlu1 %733  ;;  %v8113_v62 = vpop.permute.xlu0 %739 }
  0xb2   : > { %13345 = vst [vmem:[#allocation24_spill] sm:$0xff] %v8109_v0  ;;  %13347 = vst [vmem:[#allocation26_spill] sm:$0xff] %v8113_v62  ;;  %v8129_v0 = vld [vmem:[#allocation2 + $0x90] sm:$0xff] }
  0xb3   : > { %977 = vrot.lane.b32.xlu1 %v8111_v4, %s7599_s10  ;;  %983 = vrot.lane.b32.xlu0 %v8117_v39, %s7599_s10  ;;  %13352 = vst [vmem:[#allocation31_spill] sm:$0xff] %v8129_v0  ;;  %v8135_v4 = vld [vmem:[#allocation2 + $0x80] sm:$0xff] }
  0xb4   : > { %13354 = vst [vmem:[#allocation33_spill] sm:$0xff] %v8135_v4 }
  0xb5   : > { %v8121_v34 = vpop.permute.xlu1 %737  ;;  %v8125_v58 = vpop.permute.xlu0 %743 }
  0xb6   : > { %13349 = vst [vmem:[#allocation28_spill] sm:$0xff] %v8121_v34  ;;  %13351 = vst [vmem:[#allocation30_spill] sm:$0xff] %v8125_v58  ;;  %v8141_v34 = vld [vmem:[#allocation2 + $0xa8] sm:$0xff] }
  0xb7   : > { %981 = vrot.lane.b32.xlu1 %v8123_v1, %s7599_s10  ;;  %987 = vrot.lane.b32.xlu0 %v8129_v0, %s7599_s10  ;;  %13356 = vst [vmem:[#allocation35_spill] sm:$0xff] %v8141_v34  ;;  %v8147_v1 = vld [vmem:[#allocation2 + $0x98] sm:$0xff] }
  0xb8   : > { %13358 = vst [vmem:[#allocation37_spill] sm:$0xff] %v8147_v1 }
  0xb9   : > { %v8133_v62 = vpop.permute.xlu1 %741  ;;  %v8137_v37 = vpop.permute.xlu0 %747 }
  0xba   : > { %13353 = vst [vmem:[#allocation32_spill] sm:$0xff] %v8133_v62  ;;  %13355 = vst [vmem:[#allocation34_spill] sm:$0xff] %v8137_v37  ;;  %v8153_v62 = vld [vmem:[#allocation2 + $0xc0] sm:$0xff] }
  0xbb   : > { %985 = vrot.lane.b32.xlu1 %v8135_v4, %s7599_s10  ;;  %991 = vrot.lane.b32.xlu0 %v8141_v34, %s7599_s10  ;;  %13360 = vst [vmem:[#allocation39_spill] sm:$0xff] %v8153_v62  ;;  %v8159_v4 = vld [vmem:[#allocation2 + $0xb0] sm:$0xff] }
  0xbc   : > { %13362 = vst [vmem:[#allocation41_spill] sm:$0xff] %v8159_v4 }
  0xbd   : > { %v8145_v58 = vpop.permute.xlu1 %745  ;;  %v8149_v39 = vpop.permute.xlu0 %751 }
  0xbe   : > { %13357 = vst [vmem:[#allocation36_spill] sm:$0xff] %v8145_v58  ;;  %13359 = vst [vmem:[#allocation38_spill] sm:$0xff] %v8149_v39  ;;  %v8165_v58 = vld [vmem:[#allocation2 + $0xd8] sm:$0xff] }
  0xbf   : > { %989 = vrot.lane.b32.xlu1 %v8147_v1, %s7599_s10  ;;  %995 = vrot.lane.b32.xlu0 %v8153_v62, %s7599_s10  ;;  %13364 = vst [vmem:[#allocation43_spill] sm:$0xff] %v8165_v58  ;;  %v8171_v1 = vld [vmem:[#allocation2 + $0xc8] sm:$0xff] }
  0xc0   : > { %13366 = vst [vmem:[#allocation45_spill] sm:$0xff] %v8171_v1 }
  0xc1   : > { %v8157_v37 = vpop.permute.xlu1 %749  ;;  %v8161_v0 = vpop.permute.xlu0 %755 }
  0xc2   : > { %13361 = vst [vmem:[#allocation40_spill] sm:$0xff] %v8157_v37  ;;  %13363 = vst [vmem:[#allocation42_spill] sm:$0xff] %v8161_v0  ;;  %v8177_v37 = vld [vmem:[#allocation2 + $0xf0] sm:$0xff] }
  0xc3   : > { %993 = vrot.lane.b32.xlu1 %v8159_v4, %s7599_s10  ;;  %999 = vrot.lane.b32.xlu0 %v8165_v58, %s7599_s10  ;;  %13368 = vst [vmem:[#allocation47_spill] sm:$0xff] %v8177_v37  ;;  %v8183_v4 = vld [vmem:[#allocation2 + $0xe0] sm:$0xff] }
  0xc4   : > { %13370 = vst [vmem:[#allocation49_spill] sm:$0xff] %v8183_v4 }
  0xc5   : > { %v8169_v39 = vpop.permute.xlu1 %753  ;;  %v8173_v34 = vpop.permute.xlu0 %759 }
  0xc6   : > { %13365 = vst [vmem:[#allocation44_spill] sm:$0xff] %v8169_v39  ;;  %13367 = vst [vmem:[#allocation46_spill] sm:$0xff] %v8173_v34  ;;  %v8189_v39 = vld [vmem:[#allocation2 + $0x108] sm:$0xff] }
  0xc7   : > { %997 = vrot.lane.b32.xlu1 %v8171_v1, %s7599_s10  ;;  %1003 = vrot.lane.b32.xlu0 %v8177_v37, %s7599_s10  ;;  %13372 = vst [vmem:[#allocation51_spill] sm:$0xff] %v8189_v39  ;;  %v8195_v1 = vld [vmem:[#allocation2 + $0xf8] sm:$0xff] }
  0xc8   : > { %13374 = vst [vmem:[#allocation53_spill] sm:$0xff] %v8195_v1 }
  0xc9   : > { %v8181_v0 = vpop.permute.xlu1 %757  ;;  %v8185_v62 = vpop.permute.xlu0 %763 }
  0xca   : > { %13369 = vst [vmem:[#allocation48_spill] sm:$0xff] %v8181_v0  ;;  %13371 = vst [vmem:[#allocation50_spill] sm:$0xff] %v8185_v62  ;;  %v8201_v0 = vld [vmem:[#allocation2 + $0x120] sm:$0xff] }
  0xcb   : > { %1001 = vrot.lane.b32.xlu1 %v8183_v4, %s7599_s10  ;;  %1007 = vrot.lane.b32.xlu0 %v8189_v39, %s7599_s10  ;;  %13376 = vst [vmem:[#allocation55_spill] sm:$0xff] %v8201_v0  ;;  %v8207_v4 = vld [vmem:[#allocation2 + $0x110] sm:$0xff] }
  0xcc   : > { %13378 = vst [vmem:[#allocation57_spill] sm:$0xff] %v8207_v4 }
  0xcd   : > { %v8193_v34 = vpop.permute.xlu1 %761  ;;  %v8197_v58 = vpop.permute.xlu0 %767 }
  0xce   : > { %13373 = vst [vmem:[#allocation52_spill] sm:$0xff] %v8193_v34  ;;  %13375 = vst [vmem:[#allocation54_spill] sm:$0xff] %v8197_v58  ;;  %v8213_v34 = vld [vmem:[#allocation2 + $0x138] sm:$0xff] }
  0xcf   : > { %1005 = vrot.lane.b32.xlu1 %v8195_v1, %s7599_s10  ;;  %1011 = vrot.lane.b32.xlu0 %v8201_v0, %s7599_s10  ;;  %13380 = vst [vmem:[#allocation59_spill] sm:$0xff] %v8213_v34  ;;  %v8219_v1 = vld [vmem:[#allocation2 + $0x128] sm:$0xff] }
  0xd0   : > { %13382 = vst [vmem:[#allocation61_spill] sm:$0xff] %v8219_v1 }
  0xd1   : > { %v8205_v62 = vpop.permute.xlu1 %765  ;;  %v8209_v37 = vpop.permute.xlu0 %771 }
  0xd2   : > { %13377 = vst [vmem:[#allocation56_spill] sm:$0xff] %v8205_v62  ;;  %13379 = vst [vmem:[#allocation58_spill] sm:$0xff] %v8209_v37  ;;  %v8225_v62 = vld [vmem:[#allocation2 + $0x150] sm:$0xff] }
  0xd3   : > { %1009 = vrot.lane.b32.xlu1 %v8207_v4, %s7599_s10  ;;  %1015 = vrot.lane.b32.xlu0 %v8213_v34, %s7599_s10  ;;  %13384 = vst [vmem:[#allocation63_spill] sm:$0xff] %v8225_v62  ;;  %v8231_v4 = vld [vmem:[#allocation2 + $0x140] sm:$0xff] }
  0xd4   : > { %13386 = vst [vmem:[#allocation65_spill] sm:$0xff] %v8231_v4  ;;  %v8245_v34 = vld [vmem:[#allocation2 + $0x180] sm:$0xff] }
  0xd5   : > { %v8217_v58 = vpop.permute.xlu1 %769  ;;  %v8221_v39 = vpop.permute.xlu0 %839 }
  0xd6   : > { %13381 = vst [vmem:[#allocation60_spill] sm:$0xff] %v8217_v58  ;;  %13383 = vst [vmem:[#allocation62_spill] sm:$0xff] %v8221_v39  ;;  %v8237_v58 = vld [vmem:[#allocation2 + $0x168] sm:$0xff] }
  0xd7   : > { %1013 = vrot.lane.b32.xlu1 %v8219_v1, %s7599_s10  ;;  %1019 = vrot.lane.b32.xlu0 %v8225_v62, %s7599_s10  ;;  %v8243_v1 = vld [vmem:[#allocation2 + $0x158] sm:$0xff] }
  0xd8   : > { %13389 = vst [vmem:[#allocation68_spill] sm:$0xff] %v8243_v1 }
  0xd9   : > { %v8229_v37 = vpop.permute.xlu1 %773  ;;  %v8233_v0 = vpop.permute.xlu0 %843 }
  0xda   : > { %13385 = vst [vmem:[#allocation64_spill] sm:$0xff] %v8229_v37  ;;  %13387 = vst [vmem:[#allocation66_spill] sm:$0xff] %v8233_v0  ;;  %v8255_v0 = vld [vmem:[#allocation2 + $0x170] sm:$0xff] }
  0xdb   : > { %1017 = vrot.lane.b32.xlu1 %v8231_v4, %s7599_s10  ;;  %1023 = vrot.lane.b32.xlu0 %v8237_v58, %s7599_s10 }
  0xdd   : > { %v8241_v39 = vpop.permute.xlu1 %841  ;;  %v8247_v62 = vpop.permute.xlu0 %847 }
  0xde   : > { %13388 = vst [vmem:[#allocation67_spill] sm:$0xff] %v8241_v39  ;;  %13390 = vst [vmem:[#allocation69_spill] sm:$0xff] %v8247_v62  ;;  %v8261_v39 = vld [vmem:[#allocation2 + $0x188] sm:$0xff] }
  0xdf   : > { %1021 = vrot.lane.b32.xlu1 %v8243_v1, %s7599_s10  ;;  %1027 = vrot.lane.b32.xlu0 %v8245_v34, %s7599_s10 }
  0xe1   : > { %v8253_v37 = vpop.permute.xlu1 %845  ;;  %v8257_v4 = vpop.permute.xlu0 %851 }
  0xe2   : > { %13391 = vst [vmem:[#allocation70_spill] sm:$0xff] %v8253_v37  ;;  %13392 = vst [vmem:[#allocation71_spill] sm:$0xff] %v8257_v4 }
  0xe3   : > { %1025 = vrot.lane.b32.xlu1 %v8255_v0, %s7599_s10  ;;  %1095 = vrot.lane.b32.xlu0 %v7802_v25, %s7600_s11 }
  0xe5   : > { %v8265_v62 = vpop.permute.xlu1 %849  ;;  %v8267_v1 = vpop.permute.xlu0 %855 }
  0xe6   : > { %13393 = vst [vmem:[#allocation72_spill] sm:$0xff] %v8265_v62  ;;  %13394 = vst [vmem:[#allocation73_spill] sm:$0xff] %v8267_v1 }
  0xe7   : > { %1029 = vrot.lane.b32.xlu1 %v8261_v39, %s7599_s10  ;;  %1099 = vrot.lane.b32.xlu0 %v7804_v26, %s7600_s11 }
  0xe9   : > { %v8273_v4 = vpop.permute.xlu1 %853  ;;  %v8275_v37 = vpop.permute.xlu0 %859 }
  0xeb   : > { %1097 = vrot.lane.b32.xlu1 %v7811_v27, %s7600_s11  ;;  %1103 = vrot.lane.b32.xlu0 %v7819_v30, %s7600_s11 }
  0xed   : > { %v8281_v25 = vpop.permute.xlu1 %857  ;;  %v8283_v62 = vpop.permute.xlu0 %863 }
  0xee   : > { %13395 = vst [vmem:[#allocation74_spill] sm:$0xff] %v8283_v62 }
  0xef   : > { %1101 = vrot.lane.b32.xlu1 %v7823_v31, %s7600_s11  ;;  %1107 = vrot.lane.b32.xlu0 %v7827_v32, %s7600_s11 }
  0xf1   : > { %v8289_v26 = vpop.permute.xlu1 %861  ;;  %v8291_v1 = vpop.permute.xlu0 %867 }
  0xf2   : > { %13396 = vst [vmem:[#allocation75_spill] sm:$0xff] %v8289_v26  ;;  %13397 = vst [vmem:[#allocation76_spill] sm:$0xff] %v8291_v1  ;;  %v653_v1 = vld [vmem:[#allocation2 + $0x7a] sm:$0xff] }
  0xf3   : > { %1105 = vrot.lane.b32.xlu1 %v7839_v38, %s7600_s11  ;;  %1111 = vrot.lane.b32.xlu0 %v7847_v40, %s7600_s11 }
  0xf5   : > { %v8297_v27 = vpop.permute.xlu1 %865  ;;  %v8299_v30 = vpop.permute.xlu0 %871 }
  0xf6   : > { %13398 = vst [vmem:[#allocation77_spill] sm:$0xff] %v8297_v27  ;;  %13399 = vst [vmem:[#allocation78_spill] sm:$0xff] %v8299_v30  ;;  %v655_v27 = vld [vmem:[#allocation2 + $0x92] sm:$0xff] }
  0xf7   : > { %1109 = vrot.lane.b32.xlu1 %v7851_v41, %s7600_s11  ;;  %1115 = vrot.lane.b32.xlu0 %v7855_v42, %s7600_s11 }
  0xf9   : > { %v8305_v31 = vpop.permute.xlu1 %869  ;;  %v8307_v32 = vpop.permute.xlu0 %875 }
  0xfa   : > { %13400 = vst [vmem:[#allocation79_spill] sm:$0xff] %v8305_v31  ;;  %13401 = vst [vmem:[#allocation80_spill] sm:$0xff] %v8307_v32  ;;  %v627_v31 = vld [vmem:[#allocation2 + $0xc1] sm:$0xff] }
  0xfb   : > { %1113 = vrot.lane.b32.xlu1 %v7859_v43, %s7600_s11  ;;  %1119 = vrot.lane.b32.xlu0 %v7863_v44, %s7600_s11 }
  0xfd   : > { %v8313_v38 = vpop.permute.xlu1 %873  ;;  %v8315_v40 = vpop.permute.xlu0 %879 }
  0xfe   : > { %13402 = vst [vmem:[#allocation81_spill] sm:$0xff] %v8313_v38  ;;  %13403 = vst [vmem:[#allocation82_spill] sm:$0xff] %v8315_v40  ;;  %v13462_v40 = vld [vmem:[#allocation41_spill] sm:$0xff]  ;;  %v621_v38 = vld [vmem:[#allocation2 + $0x79] sm:$0xff] }
  0xff   : > { %1117 = vrot.lane.b32.xlu1 %v7867_v45, %s7600_s11  ;;  %1123 = vrot.lane.b32.xlu0 %v7871_v46, %s7600_s11 }
 0x101   : > { %v8321_v41 = vpop.permute.xlu1 %877  ;;  %v8323_v42 = vpop.permute.xlu0 %883 }
 0x102   : > { %13404 = vst [vmem:[#allocation83_spill] sm:$0xff] %v8321_v41  ;;  %13405 = vst [vmem:[#allocation84_spill] sm:$0xff] %v8323_v42  ;;  %v13454_v42 = vld [vmem:[#allocation33_spill] sm:$0xff] }
 0x103   : > { %1121 = vrot.lane.b32.xlu1 %v7875_v47, %s7600_s11  ;;  %1127 = vrot.lane.b32.xlu0 %v7879_v48, %s7600_s11 }
 0x105   : > { %v8329_v43 = vpop.permute.xlu1 %881  ;;  %v8331_v44 = vpop.permute.xlu0 %887 }
 0x106   : > { %13406 = vst [vmem:[#allocation85_spill] sm:$0xff] %v8329_v43  ;;  %13407 = vst [vmem:[#allocation86_spill] sm:$0xff] %v8331_v44  ;;  %v13447_v44 = vld [vmem:[#allocation27_spill] sm:$0xff] }
 0x107   : > { %1125 = vrot.lane.b32.xlu1 %v7883_v49, %s7600_s11  ;;  %1131 = vrot.lane.b32.xlu0 %v7887_v50, %s7600_s11 }
 0x109   : > { %v8337_v45 = vpop.permute.xlu1 %885  ;;  %v8339_v46 = vpop.permute.xlu0 %891 }
 0x10a   : > { %13408 = vst [vmem:[#allocation87_spill] sm:$0xff] %v8337_v45  ;;  %13409 = vst [vmem:[#allocation88_spill] sm:$0xff] %v8339_v46 }
 0x10b   : > { %1129 = vrot.lane.b32.xlu1 %v7891_v51, %s7600_s11  ;;  %1135 = vrot.lane.b32.xlu0 %v7895_v52, %s7600_s11 }
 0x10d   : > { %v8345_v47 = vpop.permute.xlu1 %889  ;;  %v8347_v48 = vpop.permute.xlu0 %895 }
 0x10e   : > { %13410 = vst [vmem:[#allocation89_spill] sm:$0xff] %v8345_v47  ;;  %13411 = vst [vmem:[#allocation90_spill] sm:$0xff] %v8347_v48  ;;  %v13444_v47 = vld [vmem:[#allocation23_spill] sm:$0xff] }
 0x10f   : > { %1133 = vrot.lane.b32.xlu1 %v7899_v53, %s7600_s11  ;;  %1139 = vrot.lane.b32.xlu0 %v7903_v54, %s7600_s11 }
 0x111   : > { %v8353_v49 = vpop.permute.xlu1 %893  ;;  %v8355_v50 = vpop.permute.xlu0 %899 }
 0x112   : > { %13412 = vst [vmem:[#allocation91_spill] sm:$0xff] %v8353_v49  ;;  %13413 = vst [vmem:[#allocation92_spill] sm:$0xff] %v8355_v50 }
 0x113   : > { %1137 = vrot.lane.b32.xlu1 %v7907_v55, %s7600_s11  ;;  %1143 = vrot.lane.b32.xlu0 %v7911_v56, %s7600_s11  ;;  %v8379_v56 = vld [vmem:[#allocation2 + $0x181] sm:$0xff] }
 0x115   : > { %v8361_v51 = vpop.permute.xlu1 %897  ;;  %v8363_v52 = vpop.permute.xlu0 %967 }
 0x116   : > { %13414 = vst [vmem:[#allocation93_spill] sm:$0xff] %v8361_v51 }
 0x117   : > { %1141 = vrot.lane.b32.xlu1 %v7915_v57, %s7600_s11  ;;  %1147 = vrot.lane.b32.xlu0 %v7921_v59, %s7600_s11 }
 0x119   : > { %v8369_v53 = vpop.permute.xlu1 %901  ;;  %v8371_v54 = vpop.permute.xlu0 %971 }
 0x11a   : > { %13415 = vst [vmem:[#allocation94_spill] sm:$0xff] %v8369_v53 }
 0x11b   : > { %1145 = vrot.lane.b32.xlu1 %v7925_v60, %s7600_s11  ;;  %1151 = vrot.lane.b32.xlu0 %v7929_v61, %s7600_s11  ;;  %v8393_v60 = vld [vmem:[#allocation2 + $0x189] sm:$0xff] }
 0x11d   : > { %v8377_v55 = vpop.permute.xlu1 %969  ;;  %v8381_v50 = vpop.permute.xlu0 %975 }
 0x11f   : > { %1149 = vrot.lane.b32.xlu1 %v7935_v63, %s7600_s11  ;;  %1155 = vrot.lane.b32.xlu0 %v8379_v56, %s7600_s11 }
 0x121   : > { %v8387_v57 = vpop.permute.xlu1 %973  ;;  %v8389_v59 = vpop.permute.xlu0 %979 }
 0x123   : > { %1153 = vrot.lane.b32.xlu1 %v7941_v2, %s7600_s11  ;;  %1223 = vrot.lane.b32.xlu0 %v7944_v3, %s7601_s12 }
 0x125   : > { %v8397_v61 = vpop.permute.xlu1 %977  ;;  %v8399_v53 = vpop.permute.xlu0 %983 }
 0x127   : > { %1157 = vrot.lane.b32.xlu1 %v8393_v60, %s7600_s11  ;;  %1227 = vrot.lane.b32.xlu0 %v7950_v5, %s7601_s12 }
 0x129   : > { %v8405_v63 = vpop.permute.xlu1 %981  ;;  %v8407_v51 = vpop.permute.xlu0 %987 }
 0x12b   : > { %1225 = vrot.lane.b32.xlu1 %v7953_v6, %s7601_s12  ;;  %1231 = vrot.lane.b32.xlu0 %v7957_v7, %s7601_s12 }
 0x12d   : > { %v8413_v2 = vpop.permute.xlu1 %985  ;;  %v8415_v3 = vpop.permute.xlu0 %991 }
 0x12e   : > { %13416 = vst [vmem:[#allocation95_spill] sm:$0xff] %v8415_v3 }
 0x12f   : > { %1229 = vrot.lane.b32.xlu1 %v7961_v8, %s7601_s12  ;;  %1235 = vrot.lane.b32.xlu0 %v7965_v9, %s7601_s12 }
 0x131   : > { %v8421_v5 = vpop.permute.xlu1 %989  ;;  %v8423_v48 = vpop.permute.xlu0 %995 }
 0x132   : > { %13417 = vst [vmem:[#allocation96_spill] sm:$0xff] %v8421_v5  ;;  %13418 = vst [vmem:[#allocation97_spill] sm:$0xff] %v8423_v48  ;;  %v651_v48 = vld [vmem:[#allocation2 + $0x62] sm:$0xff] }
 0x133   : > { %1233 = vrot.lane.b32.xlu1 %v7969_v10, %s7601_s12  ;;  %1239 = vrot.lane.b32.xlu0 %v7973_v11, %s7601_s12 }
 0x135   : > { %v8429_v6 = vpop.permute.xlu1 %993  ;;  %v8431_v7 = vpop.permute.xlu0 %999 }
 0x136   : > { %13419 = vst [vmem:[#allocation98_spill] sm:$0xff] %v8429_v6  ;;  %13420 = vst [vmem:[#allocation99_spill] sm:$0xff] %v8431_v7 }
 0x137   : > { %1237 = vrot.lane.b32.xlu1 %v7977_v12, %s7601_s12  ;;  %1243 = vrot.lane.b32.xlu0 %v7981_v13, %s7601_s12 }
 0x139   : > { %v8437_v8 = vpop.permute.xlu1 %997  ;;  %v8439_v9 = vpop.permute.xlu0 %1003 }
 0x13a   : > { %13421 = vst [vmem:[#allocation100_spill] sm:$0xff] %v8437_v8  ;;  %13422 = vst [vmem:[#allocation101_spill] sm:$0xff] %v8439_v9  ;;  %v625_v8 = vld [vmem:[#allocation2 + $0xa9] sm:$0xff] }
 0x13b   : > { %1241 = vrot.lane.b32.xlu1 %v7985_v14, %s7601_s12  ;;  %1247 = vrot.lane.b32.xlu0 %v7989_v15, %s7601_s12 }
 0x13d   : > { %v8445_v10 = vpop.permute.xlu1 %1001  ;;  %v8447_v11 = vpop.permute.xlu0 %1007 }
 0x13e   : > { %13423 = vst [vmem:[#allocation102_spill] sm:$0xff] %v8445_v10  ;;  %13424 = vst [vmem:[#allocation103_spill] sm:$0xff] %v8447_v11  ;;  %v13458_v11 = vld [vmem:[#allocation37_spill] sm:$0xff] }
 0x13f   : > { %1245 = vrot.lane.b32.xlu1 %v7993_v16, %s7601_s12  ;;  %1251 = vrot.lane.b32.xlu0 %v7997_v17, %s7601_s12  ;;  %v619_v10 = vld [vmem:[#allocation2 + $0x61] sm:$0xff] }
 0x141   : > { %v8453_v12 = vpop.permute.xlu1 %1005  ;;  %v8455_v13 = vpop.permute.xlu0 %1011 }
 0x142   : > { %13425 = vst [vmem:[#allocation104_spill] sm:$0xff] %v8453_v12  ;;  %13426 = vst [vmem:[#allocation105_spill] sm:$0xff] %v8455_v13  ;;  %v13450_v13 = vld [vmem:[#allocation29_spill] sm:$0xff] }
 0x143   : > { %1249 = vrot.lane.b32.xlu1 %v8001_v18, %s7601_s12  ;;  %1255 = vrot.lane.b32.xlu0 %v8005_v19, %s7601_s12 }
 0x145   : > { %v8461_v14 = vpop.permute.xlu1 %1009  ;;  %v8463_v15 = vpop.permute.xlu0 %1015 }
 0x146   : > { %13427 = vst [vmem:[#allocation106_spill] sm:$0xff] %v8461_v14  ;;  %13428 = vst [vmem:[#allocation107_spill] sm:$0xff] %v8463_v15 }
 0x147   : > { %1253 = vrot.lane.b32.xlu1 %v8009_v20, %s7601_s12  ;;  %1259 = vrot.lane.b32.xlu0 %v8013_v21, %s7601_s12 }
 0x149   : > { %v8469_v16 = vpop.permute.xlu1 %1013  ;;  %v8471_v17 = vpop.permute.xlu0 %1019 }
 0x14a   : > { %13429 = vst [vmem:[#allocation108_spill] sm:$0xff] %v8469_v16  ;;  %13430 = vst [vmem:[#allocation109_spill] sm:$0xff] %v8471_v17  ;;  %v13446_v16 = vld [vmem:[#allocation25_spill] sm:$0xff] }
 0x14b   : > { %1257 = vrot.lane.b32.xlu1 %v8017_v22, %s7601_s12  ;;  %1263 = vrot.lane.b32.xlu0 %v8021_v23, %s7601_s12 }
 0x14d   : > { %v8477_v18 = vpop.permute.xlu1 %1017  ;;  %v8479_v19 = vpop.permute.xlu0 %1023 }
 0x14e   : > { %13431 = vst [vmem:[#allocation110_spill] sm:$0xff] %v8477_v18  ;;  %13432 = vst [vmem:[#allocation111_spill] sm:$0xff] %v8479_v19 }
 0x14f   : > { %1261 = vrot.lane.b32.xlu1 %v8025_v24, %s7601_s12  ;;  %1267 = vrot.lane.b32.xlu0 %v8029_v28, %s7601_s12 }
 0x151   : > { %v8485_v20 = vpop.permute.xlu1 %1021  ;;  %v8487_v21 = vpop.permute.xlu0 %1027 }
 0x152   : > { %13433 = vst [vmem:[#allocation112_spill] sm:$0xff] %v8485_v20  ;;  %13434 = vst [vmem:[#allocation113_spill] sm:$0xff] %v8487_v21  ;;  %v13437_v21 = vld [vmem:[#allocation6_spill] sm:$0xff]  ;;  %v13441_v20 = vld [vmem:[#allocation16_spill] sm:$0xff] }
 0x153   : > { %1265 = vrot.lane.b32.xlu1 %v8033_v29, %s7601_s12  ;;  %1271 = vrot.lane.b32.xlu0 %v8037_v33, %s7601_s12  ;;  %v13438_v29 = vld [vmem:[#allocation8_spill] sm:$0xff] }
 0x155   : > { %v8493_v22 = vpop.permute.xlu1 %1025  ;;  %v8495_v23 = vpop.permute.xlu0 %1095 }
 0x156   : > { %13435 = vst [vmem:[#allocation114_spill] sm:$0xff] %v8493_v22  ;;  %v8511_v22 = vld [vmem:[#allocation2 + $0x182] sm:$0xff] }
 0x157   : > { %1269 = vrot.lane.b32.xlu1 %v8043_v35, %s7601_s12  ;;  %1275 = vrot.lane.b32.xlu0 %v8047_v36, %s7601_s12  ;;  %v13439_v35 = vld [vmem:[#allocation10_spill] sm:$0xff] }
 0x159   : > { %v8501_v24 = vpop.permute.xlu1 %1029  ;;  %v8503_v28 = vpop.permute.xlu0 %1099 }
 0x15a   : > { %13436 = vst [vmem:[#allocation115_spill] sm:$0xff] %v8501_v24 }
 0x15b   : > { %1273 = vrot.lane.b32.xlu1 %v13437_v21, %s7601_s12  ;;  %1279 = vrot.lane.b32.xlu0 %v13438_v29, %s7601_s12  ;;  %v13440_v21 = vld [vmem:[#allocation13_spill] sm:$0xff] }
 0x15c   : > { %v8525_v29 = vld [vmem:[#allocation2 + $0x18a] sm:$0xff] }
 0x15d   : > { %v8509_v33 = vpop.permute.xlu1 %1097  ;;  %v8513_v19 = vpop.permute.xlu0 %1103 }
 0x15f   : > { %1277 = vrot.lane.b32.xlu1 %v13439_v35, %s7601_s12  ;;  %1283 = vrot.lane.b32.xlu0 %v8511_v22, %s7601_s12  ;;  %v13442_v35 = vld [vmem:[#allocation19_spill] sm:$0xff] }
 0x161   : > { %v8519_v36 = vpop.permute.xlu1 %1101  ;;  %v8521_v24 = vpop.permute.xlu0 %1107 }
 0x163   : > { %1281 = vrot.lane.b32.xlu1 %v13440_v21, %s7601_s12  ;;  %1351 = vrot.lane.b32.xlu0 %v13441_v20, %s7602_s13  ;;  %v13443_v21 = vld [vmem:[#allocation21_spill] sm:$0xff] }
 0x165   : > { %v8529_v49 = vpop.permute.xlu1 %1105  ;;  %v8531_v17 = vpop.permute.xlu0 %1111 }
 0x167   : > { %1285 = vrot.lane.b32.xlu1 %v8525_v29, %s7601_s12  ;;  %1355 = vrot.lane.b32.xlu0 %v13442_v35, %s7602_s13 }
 0x169   : > { %v8537_v18 = vpop.permute.xlu1 %1109  ;;  %v8539_v46 = vpop.permute.xlu0 %1115 }
 0x16b   : > { %1353 = vrot.lane.b32.xlu1 %v13443_v21, %s7602_s13  ;;  %1359 = vrot.lane.b32.xlu0 %v13444_v47, %s7602_s13  ;;  %v13451_v21 = vld [vmem:[#allocation31_spill] sm:$0xff] }
 0x16d   : > { %v8545_v20 = vpop.permute.xlu1 %1113  ;;  %v8547_v15 = vpop.permute.xlu0 %1119 }
 0x16e   : > { %13445 = vst [vmem:[#allocation6_spill] sm:$0xff] %v8547_v15  ;;  %v657_v15 = vld [vmem:[#allocation2 + $0xaa] sm:$0xff] }
 0x16f   : > { %1357 = vrot.lane.b32.xlu1 %v13446_v16, %s7602_s13  ;;  %1363 = vrot.lane.b32.xlu0 %v13447_v44, %s7602_s13  ;;  %v13455_v16 = vld [vmem:[#allocation35_spill] sm:$0xff] }
 0x171   : > { %v8553_v35 = vpop.permute.xlu1 %1117  ;;  %v8555_v45 = vpop.permute.xlu0 %1123 }
 0x172   : > { %13448 = vst [vmem:[#allocation8_spill] sm:$0xff] %v8553_v35  ;;  %13449 = vst [vmem:[#allocation10_spill] sm:$0xff] %v8555_v45 }
 0x173   : > { %1361 = vrot.lane.b32.xlu1 %v13450_v13, %s7602_s13  ;;  %1367 = vrot.lane.b32.xlu0 %v13451_v21, %s7602_s13  ;;  %v13459_v13 = vld [vmem:[#allocation39_spill] sm:$0xff] }
 0x175   : > { %v8561_v47 = vpop.permute.xlu1 %1121  ;;  %v8563_v14 = vpop.permute.xlu0 %1127 }
 0x176   : > { %13452 = vst [vmem:[#allocation13_spill] sm:$0xff] %v8561_v47  ;;  %13453 = vst [vmem:[#allocation16_spill] sm:$0xff] %v8563_v14 }
 0x177   : > { %1365 = vrot.lane.b32.xlu1 %v13454_v42, %s7602_s13  ;;  %1371 = vrot.lane.b32.xlu0 %v13455_v16, %s7602_s13  ;;  %v13463_v42 = vld [vmem:[#allocation43_spill] sm:$0xff] }
 0x179   : > { %v8569_v44 = vpop.permute.xlu1 %1125  ;;  %v8571_v43 = vpop.permute.xlu0 %1131 }
 0x17a   : > { %13456 = vst [vmem:[#allocation19_spill] sm:$0xff] %v8569_v44  ;;  %13457 = vst [vmem:[#allocation21_spill] sm:$0xff] %v8571_v43  ;;  %v13466_v43 = vld [vmem:[#allocation45_spill] sm:$0xff]  ;;  %v623_v44 = vld [vmem:[#allocation2 + $0x91] sm:$0xff] }
 0x17b   : > { %1369 = vrot.lane.b32.xlu1 %v13458_v11, %s7602_s13  ;;  %1375 = vrot.lane.b32.xlu0 %v13459_v13, %s7602_s13  ;;  %v13467_v11 = vld [vmem:[#allocation47_spill] sm:$0xff] }
 0x17d   : > { %v8577_v21 = vpop.permute.xlu1 %1129  ;;  %v8579_v12 = vpop.permute.xlu0 %1135 }
 0x17e   : > { %13460 = vst [vmem:[#allocation23_spill] sm:$0xff] %v8577_v21  ;;  %13461 = vst [vmem:[#allocation25_spill] sm:$0xff] %v8579_v12  ;;  %v13470_v12 = vld [vmem:[#allocation49_spill] sm:$0xff] }
 0x17f   : > { %1373 = vrot.lane.b32.xlu1 %v13462_v40, %s7602_s13  ;;  %1379 = vrot.lane.b32.xlu0 %v13463_v42, %s7602_s13  ;;  %v13471_v40 = vld [vmem:[#allocation51_spill] sm:$0xff] }
 0x181   : > { %v8585_v16 = vpop.permute.xlu1 %1133  ;;  %v8587_v41 = vpop.permute.xlu0 %1139 }
 0x182   : > { %13464 = vst [vmem:[#allocation27_spill] sm:$0xff] %v8585_v16  ;;  %13465 = vst [vmem:[#allocation29_spill] sm:$0xff] %v8587_v41  ;;  %v13474_v41 = vld [vmem:[#allocation53_spill] sm:$0xff] }
 0x183   : > { %1377 = vrot.lane.b32.xlu1 %v13466_v43, %s7602_s13  ;;  %1383 = vrot.lane.b32.xlu0 %v13467_v11, %s7602_s13  ;;  %v13475_v43 = vld [vmem:[#allocation55_spill] sm:$0xff] }
 0x185   : > { %v8593_v13 = vpop.permute.xlu1 %1137  ;;  %v8595_v21 = vpop.permute.xlu0 %1143 }
 0x186   : > { %13468 = vst [vmem:[#allocation31_spill] sm:$0xff] %v8593_v13  ;;  %13469 = vst [vmem:[#allocation33_spill] sm:$0xff] %v8595_v21  ;;  %v13478_v21 = vld [vmem:[#allocation57_spill] sm:$0xff] }
 0x187   : > { %1381 = vrot.lane.b32.xlu1 %v13470_v12, %s7602_s13  ;;  %1387 = vrot.lane.b32.xlu0 %v13471_v40, %s7602_s13  ;;  %v13479_v12 = vld [vmem:[#allocation59_spill] sm:$0xff] }
 0x189   : > { %v8601_v42 = vpop.permute.xlu1 %1141  ;;  %v8603_v16 = vpop.permute.xlu0 %1147 }
 0x18a   : > { %13472 = vst [vmem:[#allocation35_spill] sm:$0xff] %v8601_v42  ;;  %13473 = vst [vmem:[#allocation37_spill] sm:$0xff] %v8603_v16  ;;  %v13482_v16 = vld [vmem:[#allocation61_spill] sm:$0xff] }
 0x18b   : > { %1385 = vrot.lane.b32.xlu1 %v13474_v41, %s7602_s13  ;;  %1391 = vrot.lane.b32.xlu0 %v13475_v43, %s7602_s13  ;;  %v13483_v41 = vld [vmem:[#allocation63_spill] sm:$0xff] }
 0x18d   : > { %v8609_v11 = vpop.permute.xlu1 %1145  ;;  %v8611_v13 = vpop.permute.xlu0 %1151 }
 0x18e   : > { %13476 = vst [vmem:[#allocation39_spill] sm:$0xff] %v8609_v11  ;;  %13477 = vst [vmem:[#allocation41_spill] sm:$0xff] %v8611_v13  ;;  %v13485_v13 = vld [vmem:[#allocation65_spill] sm:$0xff] }
 0x18f   : > { %1389 = vrot.lane.b32.xlu1 %v13478_v21, %s7602_s13  ;;  %1395 = vrot.lane.b32.xlu0 %v13479_v12, %s7602_s13 }
 0x191   : > { %v8617_v40 = vpop.permute.xlu1 %1149  ;;  %v8619_v42 = vpop.permute.xlu0 %1155 }
 0x192   : > { %13480 = vst [vmem:[#allocation43_spill] sm:$0xff] %v8617_v40  ;;  %13481 = vst [vmem:[#allocation45_spill] sm:$0xff] %v8619_v42  ;;  %v13487_v42 = vld [vmem:[#allocation68_spill] sm:$0xff]  ;;  %v617_v40 = vld [vmem:[#allocation2 + $0x49] sm:$0xff] }
 0x193   : > { %1393 = vrot.lane.b32.xlu1 %v13482_v16, %s7602_s13  ;;  %1399 = vrot.lane.b32.xlu0 %v13483_v41, %s7602_s13  ;;  %v613_v41 = vld [vmem:[#allocation2 + $0x198] sm:$0xff] }
 0x195   : > { %v8625_v43 = vpop.permute.xlu1 %1153  ;;  %v8627_v11 = vpop.permute.xlu0 %1223 }
 0x196   : > { %13484 = vst [vmem:[#allocation47_spill] sm:$0xff] %v8625_v43 }
 0x197   : > { %1397 = vrot.lane.b32.xlu1 %v13485_v13, %s7602_s13  ;;  %1403 = vrot.lane.b32.xlu0 %v8237_v58, %s7602_s13  ;;  %v615_v13 = vld [vmem:[#allocation2 + $0x31] sm:$0xff] }
 0x199   : > { %v8633_v21 = vpop.permute.xlu1 %1157  ;;  %v8635_v12 = vpop.permute.xlu0 %1227 }
 0x19a   : > { %13486 = vst [vmem:[#allocation49_spill] sm:$0xff] %v8633_v21 }
 0x19b   : > { %1401 = vrot.lane.b32.xlu1 %v13487_v42, %s7602_s13  ;;  %1407 = vrot.lane.b32.xlu0 %v8245_v34, %s7602_s13  ;;  %v614_v42 = vld [vmem:[#allocation2 + $0x1a0] sm:$0xff] }
 0x19d   : > { %v8641_v16 = vpop.permute.xlu1 %1225  ;;  %v8643_v43 = vpop.permute.xlu0 %1231 }
 0x19f   : > { %1405 = vrot.lane.b32.xlu1 %v8255_v0, %s7602_s13  ;;  %1411 = vrot.lane.b32.xlu0 %v613_v41, %s7602_s13  ;;  %v616_v0 = vld [vmem:[#allocation2 + $0x39] sm:$0xff] }
 0x1a1   : > { %v8648_v58 = vpop.permute.xlu1 %1229  ;;  %v8650_v21 = vpop.permute.xlu0 %1235 }
 0x1a3   : > { %1409 = vrot.lane.b32.xlu1 %v8261_v39, %s7602_s13  ;;  %1479 = vrot.lane.b32.xlu0 %v615_v13, %s7603_s14  ;;  %v618_v39 = vld [vmem:[#allocation2 + $0x51] sm:$0xff] }
 0x1a5   : > { %v8655_v34 = vpop.permute.xlu1 %1233  ;;  %v8657_v9 = vpop.permute.xlu0 %1239 }
 0x1a7   : > { %1413 = vrot.lane.b32.xlu1 %v614_v42, %s7602_s13  ;;  %1483 = vrot.lane.b32.xlu0 %v617_v40, %s7603_s14  ;;  %v620_v42 = vld [vmem:[#allocation2 + $0x69] sm:$0xff] }
 0x1a9   : > { %v8661_v41 = vpop.permute.xlu1 %1237  ;;  %v8663_v32 = vpop.permute.xlu0 %1243 }
 0x1aa   : > { %13488 = vst [vmem:[#allocation51_spill] sm:$0xff] %v8663_v32 }
 0x1ab   : > { %1481 = vrot.lane.b32.xlu1 %v616_v0, %s7603_s14  ;;  %1487 = vrot.lane.b32.xlu0 %v619_v10, %s7603_s14  ;;  %v622_v0 = vld [vmem:[#allocation2 + $0x81] sm:$0xff] }
 0x1ad   : > { %v8667_v13 = vpop.permute.xlu1 %1241  ;;  %v8669_v14 = vpop.permute.xlu0 %1247 }
 0x1ae   : > { %13489 = vst [vmem:[#allocation53_spill] sm:$0xff] %v8667_v13  ;;  %13490 = vst [vmem:[#allocation55_spill] sm:$0xff] %v8669_v14 }
 0x1af   : > { %1485 = vrot.lane.b32.xlu1 %v618_v39, %s7603_s14  ;;  %1491 = vrot.lane.b32.xlu0 %v621_v38, %s7603_s14  ;;  %v624_v39 = vld [vmem:[#allocation2 + $0x99] sm:$0xff] }
 0x1b1   : > { %v8673_v40 = vpop.permute.xlu1 %1245  ;;  %v8675_v7 = vpop.permute.xlu0 %1251 }
 0x1b2   : > { %13491 = vst [vmem:[#allocation57_spill] sm:$0xff] %v8673_v40  ;;  %13492 = vst [vmem:[#allocation59_spill] sm:$0xff] %v8675_v7  ;;  %v629_v7 = vld [vmem:[#allocation2 + $0xd9] sm:$0xff] }
 0x1b3   : > { %1489 = vrot.lane.b32.xlu1 %v620_v42, %s7603_s14  ;;  %1495 = vrot.lane.b32.xlu0 %v623_v44, %s7603_s14  ;;  %v626_v42 = vld [vmem:[#allocation2 + $0xb1] sm:$0xff] }
 0x1b5   : > { %v8679_v10 = vpop.permute.xlu1 %1249  ;;  %v8681_v30 = vpop.permute.xlu0 %1255 }
 0x1b6   : > { %13493 = vst [vmem:[#allocation61_spill] sm:$0xff] %v8679_v10  ;;  %13494 = vst [vmem:[#allocation63_spill] sm:$0xff] %v8681_v30  ;;  %v631_v30 = vld [vmem:[#allocation2 + $0xf1] sm:$0xff] }
 0x1b7   : > { %1493 = vrot.lane.b32.xlu1 %v622_v0, %s7603_s14  ;;  %1499 = vrot.lane.b32.xlu0 %v625_v8, %s7603_s14  ;;  %v628_v0 = vld [vmem:[#allocation2 + $0xc9] sm:$0xff] }
 0x1b9   : > { %v8685_v38 = vpop.permute.xlu1 %1253  ;;  %v8687_v45 = vpop.permute.xlu0 %1259 }
 0x1ba   : > { %13495 = vst [vmem:[#allocation65_spill] sm:$0xff] %v8685_v38  ;;  %13496 = vst [vmem:[#allocation68_spill] sm:$0xff] %v8687_v45  ;;  %v633_v45 = vld [vmem:[#allocation2 + $0x109] sm:$0xff] }
 0x1bb   : > { %1497 = vrot.lane.b32.xlu1 %v624_v39, %s7603_s14  ;;  %1503 = vrot.lane.b32.xlu0 %v627_v31, %s7603_s14  ;;  %v630_v39 = vld [vmem:[#allocation2 + $0xe1] sm:$0xff] }
 0x1bd   : > { %v8691_v44 = vpop.permute.xlu1 %1257  ;;  %v8693_v10 = vpop.permute.xlu0 %1263 }
 0x1be   : > { %13497 = vst [vmem:[#allocation116_spill] sm:$0xff] %v8691_v44  ;;  %13498 = vst [vmem:[#allocation117_spill] sm:$0xff] %v8693_v10  ;;  %v635_v10 = vld [vmem:[#allocation2 + $0x121] sm:$0xff] }
 0x1bf   : > { %1501 = vrot.lane.b32.xlu1 %v626_v42, %s7603_s14  ;;  %1507 = vrot.lane.b32.xlu0 %v629_v7, %s7603_s14  ;;  %v632_v42 = vld [vmem:[#allocation2 + $0xf9] sm:$0xff] }
 0x1c1   : > { %v8697_v8 = vpop.permute.xlu1 %1261  ;;  %v8699_v38 = vpop.permute.xlu0 %1267 }
 0x1c2   : > { %13499 = vst [vmem:[#allocation118_spill] sm:$0xff] %v8697_v8  ;;  %13500 = vst [vmem:[#allocation119_spill] sm:$0xff] %v8699_v38  ;;  %v1969_v8 = vld [vmem:[%s13160_s1 + $0x18] sm:$0xff] }
 0x1c3   : > { %1505 = vrot.lane.b32.xlu1 %v628_v0, %s7603_s14  ;;  %1511 = vrot.lane.b32.xlu0 %v631_v30, %s7603_s14  ;;  %v1966_v0 = vld [vmem:[%s13160_s1] sm:$0xff]  ;;  %v1967_v30 = vld [vmem:[%s13160_s1 + $0x8] sm:$0xff] }
 0x1c5   : > { %v8703_v31 = vpop.permute.xlu1 %1265  ;;  %v8705_v44 = vpop.permute.xlu0 %1271 }
 0x1c6   : > { %13501 = vst [vmem:[#allocation120_spill] sm:$0xff] %v8703_v31  ;;  %13502 = vst [vmem:[#allocation121_spill] sm:$0xff] %v8705_v44  ;;  %v7443_v44 = vpack.c.bf16 %v1967_v30, %v1966_v0  ;;  %v1968_v31 = vld [vmem:[%s13160_s1 + $0x10] sm:$0xff]  ;;  %v1970_v30 = vld [vmem:[%s13160_s1 + $0x20] sm:$0xff] }
 0x1c7   : > { %1509 = vrot.lane.b32.xlu1 %v630_v39, %s7603_s14  ;;  %1515 = vrot.lane.b32.xlu0 %v633_v45, %s7603_s14  ;;  %v634_v39 = vld [vmem:[#allocation2 + $0x111] sm:$0xff]  ;;  %v636_v0 = vld [vmem:[#allocation2 + $0x129] sm:$0xff] }
 0x1c8   : > { %7444 = vmatprep.subr.bf16.mxu0 %v7443_v44 }
 0x1c9   : > { %v8709_v7 = vpop.permute.xlu1 %1269  ;;  %v8717_v38 = vpop.permute.xlu0 %1275  ;;  %7446 = vmatpush3.bf16.msra.mxu0 %v7443_v44  ;;  %v639_v44 = vld [vmem:[#allocation2 + $0x151] sm:$0xff] }
 0x1ca   : > { %13503 = vst [vmem:[#allocation122_spill] sm:$0xff] %v8709_v7  ;;  %13504 = vst [vmem:[#allocation123_spill] sm:$0xff] %v8717_v38  ;;  %v637_v7 = vld [vmem:[#allocation2 + $0x139] sm:$0xff] }
 0x1cb   : > { %1513 = vrot.lane.b32.xlu1 %v632_v42, %s7603_s14  ;;  %1519 = vrot.lane.b32.xlu0 %v635_v10, %s7603_s14  ;;  %v7447_v42 = vpack.c.bf16 %v1969_v8, %v1968_v31  ;;  %v638_v31 = vld [vmem:[#allocation2 + $0x141] sm:$0xff] }
 0x1cd   : > { %v8721_v45 = vpop.permute.xlu1 %1273  ;;  %v8729_v38 = vpop.permute.xlu0 %1279  ;;  %7448 = vmatprep.subr.bf16.mxu0 %v7447_v42 }
 0x1ce   : > { %13505 = vst [vmem:[#allocation124_spill] sm:$0xff] %v8721_v45  ;;  %13506 = vst [vmem:[#allocation125_spill] sm:$0xff] %v8729_v38  ;;  %7450 = vmatpush3.bf16.msra.mxu0 %v7447_v42  ;;  %v1971_v45 = vld [vmem:[%s13160_s1 + $0x28] sm:$0xff]  ;;  %v1972_v42 = vld [vmem:[%s13160_s1 + $0x30] sm:$0xff] }
 0x1cf   : > { %1517 = vrot.lane.b32.xlu1 %v634_v39, %s7603_s14  ;;  %1523 = vrot.lane.b32.xlu0 %v637_v7, %s7603_s14  ;;  %v7451_v8 = vpack.c.bf16 %v1971_v45, %v1970_v30  ;;  %v641_v39 = vld [vmem:[#allocation2 + $0x169] sm:$0xff] }
 0x1d1   : > { %v8733_v10 = vpop.permute.xlu1 %1277  ;;  %v8741_v38 = vpop.permute.xlu0 %1283  ;;  %7452 = vmatprep.subr.bf16.mxu0 %v7451_v8 }
 0x1d2   : > { %13507 = vst [vmem:[#allocation126_spill] sm:$0xff] %v8733_v10  ;;  %13508 = vst [vmem:[#allocation127_spill] sm:$0xff] %v8741_v38  ;;  %7454 = vmatpush3.bf16.msra.mxu0 %v7451_v8  ;;  %v1973_v10 = vld [vmem:[%s13160_s1 + $0x38] sm:$0xff] }
 0x1d3   : > { %1521 = vrot.lane.b32.xlu1 %v636_v0, %s7603_s14  ;;  %1527 = vrot.lane.b32.xlu0 %v639_v44, %s7603_s14  ;;  %v7455_v45 = vpack.c.bf16 %v1973_v10, %v1972_v42  ;;  %v640_v0 = vld [vmem:[#allocation2 + $0x159] sm:$0xff]  ;;  %v642_v8 = vld [vmem:[#allocation2 + $0x171] sm:$0xff] }
 0x1d5   : > { %v8745_v7 = vpop.permute.xlu1 %1281  ;;  %v8753_v38 = vpop.permute.xlu0 %1351  ;;  %7456 = vmatprep.subr.bf16.mxu0 %v7455_v45 }
 0x1d6   : > { %13509 = vst [vmem:[#allocation128_spill] sm:$0xff] %v8745_v7  ;;  %7458 = vmatpush3.bf16.msra.mxu0 %v7455_v45  ;;  %v1974_v7 = vld [vmem:[%s13160_s1 + $0x40] sm:$0xff]  ;;  %v647_v45 = vld [vmem:[#allocation2 + $0x32] sm:$0xff] }
 0x1d7   : > { %1525 = vrot.lane.b32.xlu1 %v638_v31, %s7603_s14  ;;  %1531 = vrot.lane.b32.xlu0 %v641_v39, %s7603_s14  ;;  %v645_v31 = vld [vmem:[#allocation2 + $0x199] sm:$0xff] }
 0x1d8   : > { %7277 = vmatprep.subr.mxu0 %v1974_v7 }
 0x1d9   : > { %v8757_v44 = vpop.permute.xlu1 %1285  ;;  %v8759_v30 = vpop.permute.xlu0 %1355 }
 0x1da   : > { %13510 = vst [vmem:[#allocation129_spill] sm:$0xff] %v8757_v44  ;;  %7278 = vmatpush3.msra.mxu0 %v1974_v7  ;;  %v649_v7 = vld [vmem:[#allocation2 + $0x4a] sm:$0xff] }
 0x1db   : > { %1529 = vrot.lane.b32.xlu1 %v640_v0, %s7603_s14  ;;  %1535 = vrot.lane.b32.xlu0 %v8379_v56, %s7603_s14  ;;  %v646_v56 = vld [vmem:[#allocation2 + $0x1a1] sm:$0xff] }
 0x1dd   : > { %v8767_v10 = vpop.permute.xlu1 %1353  ;;  %v8769_v39 = vpop.permute.xlu0 %1359 }
 0x1df   : > { %1533 = vrot.lane.b32.xlu1 %v642_v8, %s7603_s14  ;;  %1539 = vrot.lane.b32.xlu0 %v645_v31, %s7603_s14  ;;  %v648_v8 = vld [vmem:[#allocation2 + $0x3a] sm:$0xff] }
 0x1e1   : > { %v8773_v42 = vpop.permute.xlu1 %1357  ;;  %v8775_v0 = vpop.permute.xlu0 %1363 }
 0x1e3   : > { %1537 = vrot.lane.b32.xlu1 %v8393_v60, %s7603_s14  ;;  %1607 = vrot.lane.b32.xlu0 %v647_v45, %s7604_s17  ;;  %v650_v60 = vld [vmem:[#allocation2 + $0x52] sm:$0xff] }
 0x1e5   : > { %v8780_v44 = vpop.permute.xlu1 %1361  ;;  %v8782_v47 = vpop.permute.xlu0 %1367 }
 0x1e7   : > { %1541 = vrot.lane.b32.xlu1 %v646_v56, %s7603_s14  ;;  %1611 = vrot.lane.b32.xlu0 %v649_v7, %s7604_s17  ;;  %v652_v56 = vld [vmem:[#allocation2 + $0x6a] sm:$0xff] }
 0x1e9   : > { %v8786_v31 = vpop.permute.xlu1 %1365  ;;  %v8788_v6 = vpop.permute.xlu0 %1371 }
 0x1ea   : > { %13511 = vst [vmem:[#allocation130_spill] sm:$0xff] %v8788_v6 }
 0x1eb   : > { %1609 = vrot.lane.b32.xlu1 %v648_v8, %s7604_s17  ;;  %1615 = vrot.lane.b32.xlu0 %v651_v48, %s7604_s17  ;;  %v654_v8 = vld [vmem:[#allocation2 + $0x82] sm:$0xff] }
 0x1ed   : > { %v8792_v45 = vpop.permute.xlu1 %1369  ;;  %v8794_v14 = vpop.permute.xlu0 %1375 }
 0x1ee   : > { %13512 = vst [vmem:[#allocation131_spill] sm:$0xff] %v8792_v45  ;;  %13513 = vst [vmem:[#allocation132_spill] sm:$0xff] %v8794_v14  ;;  %v659_v14 = vld [vmem:[#allocation2 + $0xc2] sm:$0xff] }
 0x1ef   : > { %1613 = vrot.lane.b32.xlu1 %v650_v60, %s7604_s17  ;;  %1619 = vrot.lane.b32.xlu0 %v653_v1, %s7604_s17  ;;  %v656_v60 = vld [vmem:[#allocation2 + $0x9a] sm:$0xff] }
 0x1f1   : > { %v8798_v7 = vpop.permute.xlu1 %1373  ;;  %v8800_v40 = vpop.permute.xlu0 %1379 }
 0x1f2   : > { %13514 = vst [vmem:[#allocation133_spill] sm:$0xff] %v8798_v7  ;;  %13515 = vst [vmem:[#allocation134_spill] sm:$0xff] %v8800_v40  ;;  %v661_v40 = vld [vmem:[#allocation2 + $0xda] sm:$0xff] }
 0x1f3   : > { %1617 = vrot.lane.b32.xlu1 %v652_v56, %s7604_s17  ;;  %1623 = vrot.lane.b32.xlu0 %v655_v27, %s7604_s17  ;;  %v658_v56 = vld [vmem:[#allocation2 + $0xb2] sm:$0xff] }
 0x1f5   : > { %v8804_v48 = vpop.permute.xlu1 %1377  ;;  %v8806_v35 = vpop.permute.xlu0 %1383 }
 0x1f6   : > { %13516 = vst [vmem:[#allocation135_spill] sm:$0xff] %v8804_v48  ;;  %13517 = vst [vmem:[#allocation136_spill] sm:$0xff] %v8806_v35  ;;  %v663_v35 = vld [vmem:[#allocation2 + $0xf2] sm:$0xff] }
 0x1f7   : > { %1621 = vrot.lane.b32.xlu1 %v654_v8, %s7604_s17  ;;  %1627 = vrot.lane.b32.xlu0 %v657_v15, %s7604_s17  ;;  %v660_v8 = vld [vmem:[#allocation2 + $0xca] sm:$0xff] }
 0x1f9   : > { %v8810_v1 = vpop.permute.xlu1 %1381  ;;  %v8812_v7 = vpop.permute.xlu0 %1387 }
 0x1fa   : > { %13518 = vst [vmem:[#allocation137_spill] sm:$0xff] %v8810_v1  ;;  %13519 = vst [vmem:[#allocation138_spill] sm:$0xff] %v8812_v7  ;;  %v665_v7 = vld [vmem:[#allocation2 + $0x10a] sm:$0xff] }
 0x1fb   : > { %1625 = vrot.lane.b32.xlu1 %v656_v60, %s7604_s17  ;;  %1631 = vrot.lane.b32.xlu0 %v659_v14, %s7604_s17  ;;  %v662_v60 = vld [vmem:[#allocation2 + $0xe2] sm:$0xff] }
 0x1fd   : > { %v8816_v27 = vpop.permute.xlu1 %1385  ;;  %v8818_v48 = vpop.permute.xlu0 %1391 }
 0x1fe   : > { %13520 = vst [vmem:[#allocation139_spill] sm:$0xff] %v8816_v27  ;;  %13521 = vst [vmem:[#allocation140_spill] sm:$0xff] %v8818_v48  ;;  %v667_v48 = vld [vmem:[#allocation2 + $0x122] sm:$0xff] }
 0x1ff   : > { %1629 = vrot.lane.b32.xlu1 %v658_v56, %s7604_s17  ;;  %1635 = vrot.lane.b32.xlu0 %v661_v40, %s7604_s17  ;;  %v664_v56 = vld [vmem:[#allocation2 + $0xfa] sm:$0xff] }
 0x201   : > { %v8822_v15 = vpop.permute.xlu1 %1389  ;;  %v8824_v1 = vpop.permute.xlu0 %1395 }
 0x202   : > { %13522 = vst [vmem:[#allocation141_spill] sm:$0xff] %v8822_v15  ;;  %13523 = vst [vmem:[#allocation142_spill] sm:$0xff] %v8824_v1  ;;  %v669_v1 = vld [vmem:[#allocation2 + $0x13a] sm:$0xff] }
 0x203   : > { %1633 = vrot.lane.b32.xlu1 %v660_v8, %s7604_s17  ;;  %1639 = vrot.lane.b32.xlu0 %v663_v35, %s7604_s17  ;;  %v666_v8 = vld [vmem:[#allocation2 + $0x112] sm:$0xff] }
 0x205   : > { %v8828_v14 = vpop.permute.xlu1 %1393  ;;  %v8830_v27 = vpop.permute.xlu0 %1399 }
 0x206   : > { %13524 = vst [vmem:[#allocation143_spill] sm:$0xff] %v8828_v14  ;;  %13525 = vst [vmem:[#allocation144_spill] sm:$0xff] %v8830_v27  ;;  %v671_v27 = vld [vmem:[#allocation2 + $0x152] sm:$0xff] }
 0x207   : > { %1637 = vrot.lane.b32.xlu1 %v662_v60, %s7604_s17  ;;  %1643 = vrot.lane.b32.xlu0 %v665_v7, %s7604_s17  ;;  %v668_v60 = vld [vmem:[#allocation2 + $0x12a] sm:$0xff] }
 0x209   : > { %v8834_v40 = vpop.permute.xlu1 %1397  ;;  %v8836_v15 = vpop.permute.xlu0 %1403 }
 0x20a   : > { %13526 = vst [vmem:[#allocation145_spill] sm:$0xff] %v8834_v40  ;;  %13527 = vst [vmem:[#allocation146_spill] sm:$0xff] %v8836_v15  ;;  %v673_v15 = vld [vmem:[#allocation2 + $0x16a] sm:$0xff] }
 0x20b   : > { %1641 = vrot.lane.b32.xlu1 %v664_v56, %s7604_s17  ;;  %1647 = vrot.lane.b32.xlu0 %v667_v48, %s7604_s17  ;;  %v670_v56 = vld [vmem:[#allocation2 + $0x142] sm:$0xff] }
 0x20d   : > { %v8840_v35 = vpop.permute.xlu1 %1401  ;;  %v8842_v14 = vpop.permute.xlu0 %1407 }
 0x20e   : > { %13528 = vst [vmem:[#allocation147_spill] sm:$0xff] %v8840_v35  ;;  %13529 = vst [vmem:[#allocation148_spill] sm:$0xff] %v8842_v14 }
 0x20f   : > { %1645 = vrot.lane.b32.xlu1 %v666_v8, %s7604_s17  ;;  %1651 = vrot.lane.b32.xlu0 %v669_v1, %s7604_s17  ;;  %v672_v8 = vld [vmem:[#allocation2 + $0x15a] sm:$0xff] }
 0x211   : > { %v8846_v7 = vpop.permute.xlu1 %1405  ;;  %v8848_v40 = vpop.permute.xlu0 %1411 }
 0x212   : > { %13530 = vst [vmem:[#allocation149_spill] sm:$0xff] %v8846_v7  ;;  %13531 = vst [vmem:[#allocation150_spill] sm:$0xff] %v8848_v40  ;;  %v674_v40 = vld [vmem:[#allocation2 + $0x172] sm:$0xff] }
 0x213   : > { %1649 = vrot.lane.b32.xlu1 %v668_v60, %s7604_s17  ;;  %1655 = vrot.lane.b32.xlu0 %v671_v27, %s7604_s17  ;;  %v677_v60 = vld [vmem:[#allocation2 + $0x19a] sm:$0xff] }
 0x215   : > { %v8852_v48 = vpop.permute.xlu1 %1409  ;;  %v1480_v35 = vpop.permute.xlu0 %1479 }
 0x216   : > { %13532 = vst [vmem:[#allocation151_spill] sm:$0xff] %v8852_v48 }
 0x217   : > { %1653 = vrot.lane.b32.xlu1 %v670_v56, %s7604_s17  ;;  %1659 = vrot.lane.b32.xlu0 %v673_v15, %s7604_s17 }
 0x219   : > { %v8856_v1 = vpop.permute.xlu1 %1413  ;;  %v8858_v14 = vpop.permute.xlu0 %1483 }
 0x21a   : > { %13533 = vst [vmem:[#allocation152_spill] sm:$0xff] %v8856_v1 }
 0x21b   : > { %1657 = vrot.lane.b32.xlu1 %v672_v8, %s7604_s17  ;;  %1663 = vrot.lane.b32.xlu0 %v8511_v22, %s7604_s17  ;;  %v678_v8 = vld [vmem:[#allocation2 + $0x1a2] sm:$0xff] }
 0x21d   : > { %v8863_v27 = vpop.permute.xlu1 %1481  ;;  %v8865_v48 = vpop.permute.xlu0 %1487 }
 0x21f   : > { %1661 = vrot.lane.b32.xlu1 %v674_v40, %s7604_s17  ;;  %1667 = vrot.lane.b32.xlu0 %v677_v60, %s7604_s17 }
 0x221   : > { %v8869_v15 = vpop.permute.xlu1 %1485  ;;  %v8871_v56 = vpop.permute.xlu0 %1491 }
 0x223   : > { %1665 = vrot.lane.b32.xlu1 %v8525_v29, %s7604_s17 }
 0x225   : > { %v8875_v1 = vpop.permute.xlu1 %1489  ;;  %v8877_v22 = vpop.permute.xlu0 %1495 }
 0x227   : > { %1669 = vrot.lane.b32.xlu1 %v678_v8, %s7604_s17 }
 0x229   : > { %v8880_v7 = vpop.permute.xlu1 %1493  ;;  %v8882_v3 = vpop.permute.xlu0 %1499 }
 0x22a   : > { %13534 = vst [vmem:[#allocation153_spill] sm:$0xff] %v8882_v3 }
 0x22d   : > { %v8884_v40 = vpop.permute.xlu1 %1497  ;;  %v8886_v60 = vpop.permute.xlu0 %1503 }
 0x22e   : > { %13535 = vst [vmem:[#allocation154_spill] sm:$0xff] %v8884_v40  ;;  %13536 = vst [vmem:[#allocation155_spill] sm:$0xff] %v8886_v60 }
 0x231   : > { %v8888_v6 = vpop.permute.xlu1 %1501  ;;  %v8890_v5 = vpop.permute.xlu0 %1507 }
 0x232   : > { %13537 = vst [vmem:[#allocation156_spill] sm:$0xff] %v8888_v6  ;;  %13538 = vst [vmem:[#allocation157_spill] sm:$0xff] %v8890_v5 }
 0x235   : > { %v8892_v29 = vpop.permute.xlu1 %1505  ;;  %v8894_v62 = vpop.permute.xlu0 %1511 }
 0x236   : > { %13539 = vst [vmem:[#allocation158_spill] sm:$0xff] %v8892_v29  ;;  %13540 = vst [vmem:[#allocation159_spill] sm:$0xff] %v8894_v62 }
 0x239   : > { %v8896_v45 = vpop.permute.xlu1 %1509  ;;  %v8898_v32 = vpop.permute.xlu0 %1515 }
 0x23a   : > { %13541 = vst [vmem:[#allocation160_spill] sm:$0xff] %v8896_v45  ;;  %13542 = vst [vmem:[#allocation161_spill] sm:$0xff] %v8898_v32  ;;  %v390_v45 = vld [vmem:[#allocation2] sm:$0xff] }
 0x23d   : > { %v8900_v8 = vpop.permute.xlu1 %1513  ;;  %v8902_v26 = vpop.permute.xlu0 %1519 }
 0x23e   : > { %13543 = vst [vmem:[#allocation162_spill] sm:$0xff] %v8900_v8  ;;  %13544 = vst [vmem:[#allocation163_spill] sm:$0xff] %v8902_v26  ;;  %v13553_v26 = vld [vmem:[#allocation4_spill] sm:$0xff]  ;;  %v13559_v8 = vld [vmem:[#allocation7_spill] sm:$0xff] }
 0x241   : > { %v8904_v3 = vpop.permute.xlu1 %1517  ;;  %v8906_v40 = vpop.permute.xlu0 %1523 }
 0x242   : > { %13545 = vst [vmem:[#allocation164_spill] sm:$0xff] %v8904_v3  ;;  %13546 = vst [vmem:[#allocation165_spill] sm:$0xff] %v8906_v40  ;;  %v1703_v3 = vsel %vm279_vm0, %v390_v45, %v13553_v26 }
 0x245   : > { %v8908_v60 = vpop.permute.xlu1 %1521  ;;  %v8910_v6 = vpop.permute.xlu0 %1527 }
 0x246   : > { %13547 = vst [vmem:[#allocation166_spill] sm:$0xff] %v8908_v60  ;;  %13548 = vst [vmem:[#allocation167_spill] sm:$0xff] %v8910_v6  ;;  %v13555_v60 = vld [vmem:[#allocation62_spill] sm:$0xff] }
 0x247   : > { %v1736_v6 = vsel %vm1735_vm3, %v1703_v3, %v13555_v60  ;;  %v13558_v60 = vld [vmem:[#allocation5_spill] sm:$0xff] }
 0x249   : > { %v8912_v5 = vpop.permute.xlu1 %1525  ;;  %v8914_v29 = vpop.permute.xlu0 %1531 }
 0x24a   : > { %13549 = vst [vmem:[#allocation168_spill] sm:$0xff] %v8912_v5  ;;  %13550 = vst [vmem:[#allocation169_spill] sm:$0xff] %v8914_v29  ;;  %v1769_v29 = vsel %vm1768_vm4, %v1736_v6, %v8363_v52  ;;  %v391_v5 = vld [vmem:[#allocation2 + $0x8] sm:$0xff] }
 0x24b   : > { %v1704_v52 = vsel %vm279_vm0, %v391_v5, %v13558_v60  ;;  %v7506_v60 = vld [vmem:[#allocation2 + $0x30] sm:$0xff] }
 0x24d   : > { %v8916_v62 = vpop.permute.xlu1 %1529  ;;  %v8918_v32 = vpop.permute.xlu0 %1535 }
 0x24e   : > { %13551 = vst [vmem:[#allocation170_spill] sm:$0xff] %v8916_v62  ;;  %13552 = vst [vmem:[#allocation171_spill] sm:$0xff] %v8918_v32  ;;  %v1802_v32 = vsel %vm1801_vm5, %v1769_v29, %v8495_v23  ;;  %v13560_v29 = vld [vmem:[#allocation67_spill] sm:$0xff] }
 0x24f   : > { %v1835_v26 = vsel %vm1834_vm6, %v1802_v32, %v8627_v11  ;;  %v1737_v32 = vsel %vm1735_vm3, %v1704_v52, %v13560_v29  ;;  %v13563_v52 = vld [vmem:[#allocation9_spill] sm:$0xff] }
 0x250   : > { %v1868_v3 = vsel %vm1867_vm7, %v1835_v26, %v8753_v38  ;;  %v1770_v38 = vsel %vm1768_vm4, %v1737_v32, %v8377_v55  ;;  %v13562_v26 = vld [vmem:[#allocation11_spill] sm:$0xff]  ;;  %v13565_v29 = vld [vmem:[#allocation69_spill] sm:$0xff] }
 0x251   : > { %v8922_v40 = vpop.permute.xlu1 %1533  ;;  %v8928_v62 = vpop.permute.xlu0 %1539  ;;  %v1901_v6 = vsel %vm1900_vm8, %v1868_v3, %v1480_v35 }
 0x252   : > { %13554 = vst [vmem:[#allocation4_spill] sm:$0xff] %v8922_v40  ;;  %13556 = vst [vmem:[#allocation62_spill] sm:$0xff] %v8928_v62  ;;  %v7504_v40 = vld [vmem:[#allocation2 + $0x18] sm:$0xff] }
 0x253   : > { %v1705_v23 = vsel %vm279_vm0, %v7504_v40, %v13559_v8  ;;  %v1803_v40 = vsel %vm1801_vm5, %v1770_v38, %v8509_v33  ;;  %v7505_v8 = vld [vmem:[#allocation2 + $0x20] sm:$0xff] }
 0x254   : > { %v1836_v55 = vsel %vm1834_vm6, %v1803_v40, %v8641_v16 }
 0x255   : > { %v8934_v45 = vpop.permute.xlu1 %1537  ;;  %v1608_v62 = vpop.permute.xlu0 %1607 }
 0x256   : > { %13557 = vst [vmem:[#allocation172_spill] sm:$0xff] %v8934_v45  ;;  %v1934_v11 = vsel %vm1933_vm9, %v1901_v6, %v1608_v62  ;;  %v13561_v45 = vld [vmem:[#allocation66_spill] sm:$0xff]  ;;  %v1706_v62 = vsel %vm279_vm0, %v7505_v8, %v13562_v26  ;;  %v1707_v6 = vsel %vm279_vm0, %v7506_v60, %v13563_v52  ;;  %v7507_v8 = vld [vmem:[#allocation2 + $0x38] sm:$0xff] }
 0x257   : > { %v1738_v13 = vsel %vm1735_vm3, %v1705_v23, %v13561_v45  ;;  %7279 = vmatprep.mubr.msk.f32.mxu0 %vm1982_vm10, %v1934_v11  ;;  %v13564_v23 = vld [vmem:[#allocation70_spill] sm:$0xff] }
 0x258   : > { %v1771_v35 = vsel %vm1768_vm4, %v1738_v13, %v8371_v54  ;;  %v1739_v54 = vsel %vm1735_vm3, %v1706_v62, %v13564_v23  ;;  %v1869_v13 = vsel %vm1867_vm7, %v1836_v55, %v8767_v10  ;;  %v13568_v55 = vld [vmem:[#allocation72_spill] sm:$0xff] }
 0x259   : > { %v8951_v5 = vpop.permute.xlu1 %1541  ;;  %v1804_v45 = vsel %vm1801_vm5, %v1771_v35, %v8503_v28  ;;  %v1612_v3 = vpop.permute.xlu0 %1611  ;;  %v1740_v28 = vsel %vm1735_vm3, %v1707_v6, %v13565_v29  ;;  %v1772_v16 = vsel %vm1768_vm4, %v1739_v54, %v8387_v57  ;;  %v1902_v11 = vsel %vm1900_vm8, %v1869_v13, %v8863_v27  ;;  %v13566_v57 = vld [vmem:[#allocation14_spill] sm:$0xff] }
 0x25a   : > { %v1837_v33 = vsel %vm1834_vm6, %v1804_v45, %v8635_v12  ;;  %v1773_v35 = vsel %vm1768_vm4, %v1740_v28, %v8381_v50  ;;  %v1805_v12 = vsel %vm1801_vm5, %v1772_v16, %v8519_v36  ;;  %v1708_v26 = vsel %vm279_vm0, %v7507_v8, %v13566_v57  ;;  %v7508_v36 = vld [vmem:[#allocation2 + $0x48] sm:$0xff]  ;;  %v13567_v45 = vld [vmem:[#allocation12_spill] sm:$0xff]  ;;  %v7509_v28 = vld [vmem:[#allocation2 + $0x50] sm:$0xff] }
 0x25b   : > { %v1870_v32 = vsel %vm1867_vm7, %v1837_v33, %v8759_v30  ;;  %v1806_v30 = vsel %vm1801_vm5, %v1773_v35, %v8513_v19  ;;  %v1838_v27 = vsel %vm1834_vm6, %v1805_v12, %v8648_v58  ;;  %v1741_v60 = vsel %vm1735_vm3, %v1708_v26, %v13568_v55  ;;  %v13569_v58 = vld [vmem:[#allocation71_spill] sm:$0xff] }
 0x25c   : > { %v1903_v10 = vsel %vm1900_vm8, %v1870_v32, %v8858_v14  ;;  %v1709_v14 = vsel %vm279_vm0, %v7508_v36, %v13567_v45  ;;  %v1839_v52 = vsel %vm1834_vm6, %v1806_v30, %v8643_v43  ;;  %v1871_v19 = vsel %vm1867_vm7, %v1838_v27, %v8773_v42  ;;  %v7511_v30 = vld [vmem:[#allocation2 + $0x68] sm:$0xff] }
 0x25d   : > { %v1610_v38 = vpop.permute.xlu1 %1609  ;;  %v1936_v50 = vsel %vm1933_vm9, %v1903_v10, %v1612_v3  ;;  %v1616_v62 = vpop.permute.xlu0 %1615  ;;  %v1742_v3 = vsel %vm1735_vm3, %v1709_v14, %v13569_v58  ;;  %v1774_v6 = vsel %vm1768_vm4, %v1741_v60, %v8397_v61  ;;  %v1872_v23 = vsel %vm1867_vm7, %v1839_v52, %v8769_v39  ;;  %v13570_v61 = vld [vmem:[#allocation17_spill] sm:$0xff] }
 0x25e   : > { %v1935_v40 = vsel %vm1933_vm9, %v1902_v11, %v1610_v38  ;;  %v1904_v54 = vsel %vm1900_vm8, %v1871_v19, %v8869_v15  ;;  %v1775_v43 = vsel %vm1768_vm4, %v1742_v3, %v8389_v59  ;;  %v1807_v42 = vsel %vm1801_vm5, %v1774_v6, %v8529_v49  ;;  %v7510_v49 = vld [vmem:[#allocation2 + $0x60] sm:$0xff]  ;;  %v13571_v11 = vld [vmem:[#allocation15_spill] sm:$0xff] }
 0x25f   : > { %7280 = vmatmul.mubr.msk.f32.vlgmr.msra.gmra.mrb[0].mxu0 %vm1982_vm10, %v1935_v40  ;;  %v1905_v13 = vsel %vm1900_vm8, %v1872_v23, %v8865_v48  ;;  %v1710_v16 = vsel %vm279_vm0, %v7509_v28, %v13570_v61  ;;  %v1808_v39 = vsel %vm1801_vm5, %v1775_v43, %v8521_v24  ;;  %v1840_v15 = vsel %vm1834_vm6, %v1807_v42, %v8655_v34  ;;  %v13572_v34 = vld [vmem:[#allocation73_spill] sm:$0xff]  ;;  %v7513_v19 = vld [vmem:[#allocation2 + $0x80] sm:$0xff]  ;;  %v13577_v23 = vld [vmem:[#allocation22_spill] sm:$0xff] }
 0x260   : > { %7282 = vmatprep.mubr.msk.f32.mxu0 %vm1982_vm10, %v1936_v50  ;;  %v1938_v59 = vsel %vm1933_vm9, %v1905_v13, %v1616_v62  ;;  %v1711_v48 = vsel %vm279_vm0, %v7510_v49, %v13571_v11  ;;  %v1743_v38 = vsel %vm1735_vm3, %v1710_v16, %v8273_v4  ;;  %v1841_v35 = vsel %vm1834_vm6, %v1808_v39, %v8650_v21  ;;  %v13574_v62 = vld [vmem:[#allocation18_spill] sm:$0xff]  ;;  %v13579_v43 = vld [vmem:[#allocation51_spill] sm:$0xff]  ;;  %v13582_v61 = vld [vmem:[#allocation96_spill] sm:$0xff] }
 0x261   : > { %v1614_v33 = vpop.permute.xlu1 %1613  ;;  %v1620_v32 = vpop.permute.xlu0 %1619  ;;  %v1873_v24 = vsel %vm1867_vm7, %v1840_v15, %v8780_v44  ;;  %v1744_v12 = vsel %vm1735_vm3, %v1711_v48, %v13572_v34  ;;  %v1776_v10 = vsel %vm1768_vm4, %v1743_v38, %v8405_v63  ;;  %v1874_v40 = vsel %vm1867_vm7, %v1841_v35, %v8775_v0  ;;  %v13573_v63 = vld [vmem:[#allocation20_spill] sm:$0xff]  ;;  %v13580_v13 = vld [vmem:[#allocation131_spill] sm:$0xff]  ;;  %v13583_v39 = vld [vmem:[#allocation130_spill] sm:$0xff] }
 0x262   : > { %v1937_v29 = vsel %vm1933_vm9, %v1904_v54, %v1614_v33  ;;  %v1906_v4 = vsel %vm1900_vm8, %v1873_v24, %v8875_v1  ;;  %v1777_v21 = vsel %vm1768_vm4, %v1744_v12, %v8399_v53  ;;  %v1809_v44 = vsel %vm1801_vm5, %v1776_v10, %v8537_v18  ;;  %v7512_v18 = vld [vmem:[#allocation2 + $0x78] sm:$0xff]  ;;  %v13586_v38 = vld [vmem:[#allocation8_spill] sm:$0xff]  ;;  %v13587_v24 = vld [vmem:[#allocation153_spill] sm:$0xff] }
 0x263   : > { %7283 = vmatmul.mubr.msk.f32.gmra.mrb[2].mxu0 %vm1982_vm10, %v1937_v29  ;;  %v1907_v57 = vsel %vm1900_vm8, %v1874_v40, %v8871_v56  ;;  %v1712_v27 = vsel %vm279_vm0, %v7511_v30, %v13573_v63  ;;  %v1810_v0 = vsel %vm1801_vm5, %v1777_v21, %v8531_v17  ;;  %v1842_v1 = vsel %vm1834_vm6, %v1809_v44, %v8661_v41  ;;  %v13578_v54 = vld [vmem:[#allocation75_spill] sm:$0xff]  ;;  %v13581_v29 = vld [vmem:[#allocation74_spill] sm:$0xff]  ;;  %v13588_v40 = vld [vmem:[#allocation28_spill] sm:$0xff] }
 0x264   : > { %7285 = vmatprep.mubr.msk.f32.mxu0 %vm1982_vm10, %v1938_v59  ;;  %v1940_v53 = vsel %vm1933_vm9, %v1907_v57, %v1620_v32  ;;  %v1713_v56 = vsel %vm279_vm0, %v7512_v18, %v13574_v62  ;;  %v1745_v36 = vsel %vm1735_vm3, %v1712_v27, %v8281_v25  ;;  %v1843_v45 = vsel %vm1834_vm6, %v1810_v0, %v8657_v9  ;;  %v13584_v59 = vld [vmem:[#allocation154_spill] sm:$0xff]  ;;  %v13585_v11 = vld [vmem:[#allocation95_spill] sm:$0xff]  ;;  %v13590_v44 = vld [vmem:[#allocation57_spill] sm:$0xff] }
 0x265   : > { %v1618_v8 = vpop.permute.xlu1 %1617  ;;  %v1624_v50 = vpop.permute.xlu0 %1623  ;;  %v1875_v17 = vsel %vm1867_vm7, %v1842_v1, %v8786_v31  ;;  %v1746_v41 = vsel %vm1735_vm3, %v1713_v56, %v8275_v37  ;;  %v1778_v14 = vsel %vm1768_vm4, %v1745_v36, %v8413_v2  ;;  %v1876_v55 = vsel %vm1867_vm7, %v1843_v45, %v8782_v47  ;;  %v13575_v2 = vld [vmem:[#allocation24_spill] sm:$0xff]  ;;  %v7515_v10 = vld [vmem:[#allocation2 + $0x98] sm:$0xff]  ;;  %v7516_v63 = vld [vmem:[#allocation2 + $0xa8] sm:$0xff] }
 0x266   : > { %v1939_v26 = vsel %vm1933_vm9, %v1906_v4, %v1618_v8  ;;  %v1908_v25 = vsel %vm1900_vm8, %v1875_v17, %v8880_v7  ;;  %v1779_v9 = vsel %vm1768_vm4, %v1746_v41, %v8407_v51  ;;  %v1811_v31 = vsel %vm1801_vm5, %v1778_v14, %v8545_v20  ;;  %v13576_v7 = vld [vmem:[#allocation53_spill] sm:$0xff]  ;;  %v7514_v20 = vld [vmem:[#allocation2 + $0x90] sm:$0xff]  ;;  %v13595_v36 = vld [vmem:[#allocation76_spill] sm:$0xff] }
 0x267   : > { %7286 = vmatmul.mubr.msk.f32.gmra.mrb[4].mxu0 %vm1982_vm10, %v1939_v26  ;;  %v1909_v52 = vsel %vm1900_vm8, %v1876_v55, %v8877_v22  ;;  %v1714_v58 = vsel %vm279_vm0, %v7513_v19, %v13575_v2  ;;  %v1812_v47 = vsel %vm1801_vm5, %v1779_v9, %v8539_v46  ;;  %v1844_v3 = vsel %vm1834_vm6, %v1811_v31, %v13576_v7  ;;  %v13589_v8 = vld [vmem:[#allocation6_spill] sm:$0xff]  ;;  %v13592_v1 = vld [vmem:[#allocation77_spill] sm:$0xff]  ;;  %v13597_v14 = vld [vmem:[#allocation132_spill] sm:$0xff] }
 0x268   : > { %7288 = vmatprep.mubr.msk.f32.mxu0 %vm1982_vm10, %v1940_v53  ;;  %v1942_v51 = vsel %vm1933_vm9, %v1909_v52, %v1624_v50  ;;  %v1715_v22 = vsel %vm279_vm0, %v7514_v20, %v13577_v23  ;;  %v1747_v33 = vsel %vm1735_vm3, %v1714_v58, %v13578_v54  ;;  %v1845_v42 = vsel %vm1834_vm6, %v1812_v47, %v13579_v43  ;;  %v13591_v27 = vld [vmem:[#allocation26_spill] sm:$0xff]  ;;  %v13593_v50 = vld [vmem:[#allocation55_spill] sm:$0xff]  ;;  %v13594_v62 = vld [vmem:[#allocation133_spill] sm:$0xff] }
 0x269   : > { %v1622_v60 = vpop.permute.xlu1 %1621  ;;  %v1628_v6 = vpop.permute.xlu0 %1627  ;;  %v1877_v46 = vsel %vm1867_vm7, %v1844_v3, %v13580_v13  ;;  %v1748_v28 = vsel %vm1735_vm3, %v1715_v22, %v13581_v29  ;;  %v1780_v16 = vsel %vm1768_vm4, %v1747_v33, %v13582_v61  ;;  %v1878_v15 = vsel %vm1867_vm7, %v1845_v42, %v13583_v39  ;;  %v13596_v17 = vld [vmem:[#allocation98_spill] sm:$0xff]  ;;  %v13599_v31 = vld [vmem:[#allocation97_spill] sm:$0xff]  ;;  %v13601_v2 = vld [vmem:[#allocation155_spill] sm:$0xff] }
 0x26a   : > { %v1941_v37 = vsel %vm1933_vm9, %v1908_v25, %v1622_v60  ;;  %v1910_v32 = vsel %vm1900_vm8, %v1877_v46, %v13584_v59  ;;  %v1781_v48 = vsel %vm1768_vm4, %v1748_v28, %v13585_v11  ;;  %v1813_v35 = vsel %vm1801_vm5, %v1780_v16, %v13586_v38  ;;  %v13598_v25 = vld [vmem:[#allocation156_spill] sm:$0xff]  ;;  %v7517_v7 = vld [vmem:[#allocation2 + $0xb0] sm:$0xff]  ;;  %v13604_v23 = vld [vmem:[#allocation61_spill] sm:$0xff] }
 0x26b   : > { %7289 = vmatmul.mubr.msk.f32.gmra.mrb[6].mxu0 %vm1982_vm10, %v1941_v37  ;;  %v1911_v34 = vsel %vm1900_vm8, %v1878_v15, %v13587_v24  ;;  %v1716_v4 = vsel %vm279_vm0, %v7515_v10, %v13588_v40  ;;  %v1814_v21 = vsel %vm1801_vm5, %v1781_v48, %v13589_v8  ;;  %v1846_v57 = vsel %vm1834_vm6, %v1813_v35, %v13590_v44  ;;  %v13600_v37 = vld [vmem:[#allocation13_spill] sm:$0xff]  ;;  %v13602_v3 = vld [vmem:[#allocation32_spill] sm:$0xff]  ;;  %v13605_v42 = vld [vmem:[#allocation30_spill] sm:$0xff] }
 0x26c   : > { %7291 = vmatprep.mubr.msk.f32.mxu0 %vm1982_vm10, %v1942_v51  ;;  %v1944_v26 = vsel %vm1933_vm9, %v1911_v34, %v1628_v6  ;;  %v1717_v0 = vsel %vm279_vm0, %v7516_v63, %v13591_v27  ;;  %v1749_v53 = vsel %vm1735_vm3, %v1716_v4, %v13592_v1  ;;  %v1847_v18 = vsel %vm1834_vm6, %v1814_v21, %v13593_v50  ;;  %v13603_v6 = vld [vmem:[#allocation10_spill] sm:$0xff]  ;;  %v7518_v43 = vld [vmem:[#allocation2 + $0xc0] sm:$0xff]  ;;  %v13606_v46 = vld [vmem:[#allocation79_spill] sm:$0xff] }
 0x26d   : > { %v1626_v49 = vpop.permute.xlu1 %1625  ;;  %v1632_v30 = vpop.permute.xlu0 %1631  ;;  %v1879_v56 = vsel %vm1867_vm7, %v1846_v57, %v13594_v62  ;;  %v1750_v45 = vsel %vm1735_vm3, %v1717_v0, %v13595_v36  ;;  %v1782_v41 = vsel %vm1768_vm4, %v1749_v53, %v13596_v17  ;;  %v1880_v55 = vsel %vm1867_vm7, %v1847_v18, %v13597_v14  ;;  %v13607_v28 = vld [vmem:[#allocation59_spill] sm:$0xff]  ;;  %v13609_v15 = vld [vmem:[#allocation78_spill] sm:$0xff]  ;;  %v13615_v4 = vld [vmem:[#allocation157_spill] sm:$0xff] }
 0x26e   : > { %v1943_v12 = vsel %vm1933_vm9, %v1910_v32, %v1626_v49  ;;  %v1912_v60 = vsel %vm1900_vm8, %v1879_v56, %v13598_v25  ;;  %v1783_v52 = vsel %vm1768_vm4, %v1750_v45, %v13599_v31  ;;  %v1815_v19 = vsel %vm1801_vm5, %v1782_v41, %v13600_v37  ;;  %v13608_v16 = vld [vmem:[#allocation135_spill] sm:$0xff]  ;;  %v13610_v32 = vld [vmem:[#allocation100_spill] sm:$0xff]  ;;  %v13611_v11 = vld [vmem:[#allocation134_spill] sm:$0xff] }
 0x26f   : > { %7292 = vmatmul.mubr.msk.f32.gmra.mrb[8].mxu0 %vm1982_vm10, %v1943_v12  ;;  %v1913_v58 = vsel %vm1900_vm8, %v1880_v55, %v13601_v2  ;;  %v1718_v51 = vsel %vm279_vm0, %v7517_v7, %v13602_v3  ;;  %v1816_v20 = vsel %vm1801_vm5, %v1783_v52, %v13603_v6  ;;  %v1848_v22 = vsel %vm1834_vm6, %v1815_v19, %v13604_v23  ;;  %v13612_v38 = vld [vmem:[#allocation158_spill] sm:$0xff]  ;;  %v13613_v34 = vld [vmem:[#allocation99_spill] sm:$0xff]  ;;  %v7519_v44 = vld [vmem:[#allocation2 + $0xc8] sm:$0xff] }
 0x270   : > { %7294 = vmatprep.mubr.msk.f32.mxu0 %vm1982_vm10, %v1944_v26  ;;  %v1946_v54 = vsel %vm1933_vm9, %v1913_v58, %v1632_v30  ;;  %v1719_v13 = vsel %vm279_vm0, %v7518_v43, %v13605_v42  ;;  %v1751_v29 = vsel %vm1735_vm3, %v1718_v51, %v13606_v46  ;;  %v1849_v61 = vsel %vm1834_vm6, %v1816_v20, %v13607_v28  ;;  %v13614_v10 = vld [vmem:[#allocation19_spill] sm:$0xff]  ;;  %v13616_v57 = vld [vmem:[#allocation36_spill] sm:$0xff]  ;;  %v13618_v27 = vld [vmem:[#allocation65_spill] sm:$0xff] }
 0x271   : > { %v1630_v9 = vpop.permute.xlu1 %1629  ;;  %v1636_v33 = vpop.permute.xlu0 %1635  ;;  %v1881_v39 = vsel %vm1867_vm7, %v1848_v22, %v13608_v16  ;;  %v1752_v59 = vsel %vm1735_vm3, %v1719_v13, %v13609_v15  ;;  %v1784_v49 = vsel %vm1768_vm4, %v1751_v29, %v13610_v32  ;;  %v1882_v48 = vsel %vm1867_vm7, %v1849_v61, %v13611_v11  ;;  %v13617_v30 = vld [vmem:[#allocation16_spill] sm:$0xff]  ;;  %v7520_v50 = vld [vmem:[#allocation2 + $0xd8] sm:$0xff]  ;;  %v13619_v18 = vld [vmem:[#allocation34_spill] sm:$0xff] }
 0x272   : > { %v1945_v47 = vsel %vm1933_vm9, %v1912_v60, %v1630_v9  ;;  %v1914_v35 = vsel %vm1900_vm8, %v1881_v39, %v13612_v38  ;;  %v1785_v12 = vsel %vm1768_vm4, %v1752_v59, %v13613_v34  ;;  %v1817_v40 = vsel %vm1801_vm5, %v1784_v49, %v13614_v10  ;;  %v13620_v56 = vld [vmem:[#allocation81_spill] sm:$0xff]  ;;  %v13621_v45 = vld [vmem:[#allocation63_spill] sm:$0xff]  ;;  %v13623_v55 = vld [vmem:[#allocation80_spill] sm:$0xff] }
 0x273   : > { %7295 = vmatmul.mubr.msk.f32.gmra.mrb[10].mxu0 %vm1982_vm10, %v1945_v47  ;;  %v1915_v8 = vsel %vm1900_vm8, %v1882_v48, %v13615_v4  ;;  %v1720_v26 = vsel %vm279_vm0, %v7519_v44, %v13616_v57  ;;  %v1818_v63 = vsel %vm1801_vm5, %v1785_v12, %v13617_v30  ;;  %v1850_v0 = vsel %vm1834_vm6, %v1817_v40, %v13618_v27  ;;  %v13622_v41 = vld [vmem:[#allocation137_spill] sm:$0xff]  ;;  %v13624_v60 = vld [vmem:[#allocation102_spill] sm:$0xff]  ;;  %v13625_v31 = vld [vmem:[#allocation136_spill] sm:$0xff] }
 0x274   : > { %7297 = vmatprep.mubr.msk.f32.mxu0 %vm1982_vm10, %v1946_v54  ;;  %v1948_v1 = vsel %vm1933_vm9, %v1915_v8, %v1636_v33  ;;  %v1721_v62 = vsel %vm279_vm0, %v7520_v50, %v13619_v18  ;;  %v1753_v36 = vsel %vm1735_vm3, %v1720_v26, %v13620_v56  ;;  %v1851_v17 = vsel %vm1834_vm6, %v1818_v63, %v13621_v45  ;;  %v13626_v37 = vld [vmem:[#allocation160_spill] sm:$0xff]  ;;  %v13627_v58 = vld [vmem:[#allocation101_spill] sm:$0xff]  ;;  %v13628_v7 = vld [vmem:[#allocation23_spill] sm:$0xff] }
 0x275   : > { %v1634_v24 = vpop.permute.xlu1 %1633  ;;  %v1640_v53 = vpop.permute.xlu0 %1639  ;;  %v1883_v14 = vsel %vm1867_vm7, %v1850_v0, %v13622_v41  ;;  %v1754_v25 = vsel %vm1735_vm3, %v1721_v62, %v13623_v55  ;;  %v1786_v9 = vsel %vm1768_vm4, %v1753_v36, %v13624_v60  ;;  %v1884_v52 = vsel %vm1867_vm7, %v1851_v17, %v13625_v31  ;;  %v13629_v51 = vld [vmem:[#allocation159_spill] sm:$0xff]  ;;  %v7521_v23 = vld [vmem:[#allocation2 + $0xe0] sm:$0xff]  ;;  %v13631_v33 = vld [vmem:[#allocation21_spill] sm:$0xff] }
 0x276   : > { %v1947_v21 = vsel %vm1933_vm9, %v1914_v35, %v1634_v24  ;;  %v1916_v19 = vsel %vm1900_vm8, %v1883_v14, %v13626_v37  ;;  %v1787_v47 = vsel %vm1768_vm4, %v1754_v25, %v13627_v58  ;;  %v1819_v3 = vsel %vm1801_vm5, %v1786_v9, %v13628_v7  ;;  %v13630_v22 = vld [vmem:[#allocation40_spill] sm:$0xff]  ;;  %v7522_v28 = vld [vmem:[#allocation2 + $0xf0] sm:$0xff]  ;;  %v13634_v39 = vld [vmem:[#allocation83_spill] sm:$0xff] }
 0x277   : > { %7298 = vmatmul.mubr.msk.f32.gmra.mrb[12].mxu0 %vm1982_vm10, %v1947_v21  ;;  %v1917_v6 = vsel %vm1900_vm8, %v1884_v52, %v13629_v51  ;;  %v1722_v54 = vsel %vm279_vm0, %v7521_v23, %v13630_v22  ;;  %v1820_v43 = vsel %vm1801_vm5, %v1787_v47, %v13631_v33  ;;  %v13632_v42 = vld [vmem:[#allocation116_spill] sm:$0xff]  ;;  %v13633_v61 = vld [vmem:[#allocation38_spill] sm:$0xff]  ;;  %v13636_v49 = vld [vmem:[#allocation139_spill] sm:$0xff] }
 0x278   : > { %7300 = vmatprep.mubr.msk.f32.mxu0 %vm1982_vm10, %v1948_v1  ;;  %v1852_v13 = vsel %vm1834_vm6, %v1819_v3, %v13632_v42  ;;  %v1950_v46 = vsel %vm1933_vm9, %v1917_v6, %v1640_v53  ;;  %v1723_v16 = vsel %vm279_vm0, %v7522_v28, %v13633_v61  ;;  %v1755_v15 = vsel %vm1735_vm3, %v1722_v54, %v13634_v39  ;;  %v13635_v59 = vld [vmem:[#allocation68_spill] sm:$0xff]  ;;  %v13637_v48 = vld [vmem:[#allocation82_spill] sm:$0xff]  ;;  %v13641_v8 = vld [vmem:[#allocation103_spill] sm:$0xff] }
 0x279   : > { %v1638_v2 = vpop.permute.xlu1 %1637  ;;  %v1644_v29 = vpop.permute.xlu0 %1643  ;;  %v1853_v32 = vsel %vm1834_vm6, %v1820_v43, %v13635_v59  ;;  %v1885_v11 = vsel %vm1867_vm7, %v1852_v13, %v13636_v49  ;;  %v1756_v38 = vsel %vm1735_vm3, %v1723_v16, %v13637_v48  ;;  %v13638_v35 = vld [vmem:[#allocation104_spill] sm:$0xff]  ;;  %v13639_v34 = vld [vmem:[#allocation138_spill] sm:$0xff]  ;;  %v13642_v44 = vld [vmem:[#allocation27_spill] sm:$0xff] }
 0x27a   : > { %v1949_v20 = vsel %vm1933_vm9, %v1916_v19, %v1638_v2  ;;  %v1788_v24 = vsel %vm1768_vm4, %v1755_v15, %v13638_v35  ;;  %v1886_v12 = vsel %vm1867_vm7, %v1853_v32, %v13639_v34  ;;  %v13640_v10 = vld [vmem:[#allocation162_spill] sm:$0xff]  ;;  %v1789_v21 = vsel %vm1768_vm4, %v1756_v38, %v13641_v8  ;;  %v13643_v26 = vld [vmem:[#allocation161_spill] sm:$0xff]  ;;  %v7523_v27 = vld [vmem:[#allocation2 + $0xf8] sm:$0xff] }
 0x27b   : > { %7301 = vmatmul.mubr.msk.f32.gmra.mrb[14].mxu0 %vm1982_vm10, %v1949_v20  ;;  %v1918_v40 = vsel %vm1900_vm8, %v1885_v11, %v13640_v10  ;;  %v1821_v57 = vsel %vm1801_vm5, %v1788_v24, %v13642_v44  ;;  %v1919_v30 = vsel %vm1900_vm8, %v1886_v12, %v13643_v26  ;;  %v13644_v0 = vld [vmem:[#allocation44_spill] sm:$0xff]  ;;  %v13645_v53 = vld [vmem:[#allocation25_spill] sm:$0xff]  ;;  %v13646_v18 = vld [vmem:[#allocation118_spill] sm:$0xff] }
 0x27c   : > { %7303 = vmatprep.mubr.msk.f32.mxu0 %vm1982_vm10, %v1950_v46  ;;  %v1724_v1 = vsel %vm279_vm0, %v7523_v27, %v13644_v0  ;;  %v1822_v50 = vsel %vm1801_vm5, %v1789_v21, %v13645_v53  ;;  %v1854_v62 = vsel %vm1834_vm6, %v1821_v57, %v13646_v18  ;;  %v1952_v56 = vsel %vm1933_vm9, %v1919_v30, %v1644_v29  ;;  %v7524_v45 = vld [vmem:[#allocation2 + $0x108] sm:$0xff]  ;;  %v13647_v17 = vld [vmem:[#allocation42_spill] sm:$0xff]  ;;  %v13651_v52 = vld [vmem:[#allocation84_spill] sm:$0xff] }
 0x27d   : > { %v1642_v4 = vpop.permute.xlu1 %1641  ;;  %v1648_v36 = vpop.permute.xlu0 %1647  ;;  %v1725_v41 = vsel %vm279_vm0, %v7524_v45, %v13647_v17  ;;  %v13648_v14 = vld [vmem:[#allocation85_spill] sm:$0xff]  ;;  %v13652_v19 = vld [vmem:[#allocation106_spill] sm:$0xff]  ;;  %v13653_v58 = vld [vmem:[#allocation140_spill] sm:$0xff] }
 0x27e   : > { %v1951_v63 = vsel %vm1933_vm9, %v1918_v40, %v1642_v4  ;;  %v1757_v55 = vsel %vm1735_vm3, %v1724_v1, %v13648_v14  ;;  %v13649_v25 = vld [vmem:[#allocation117_spill] sm:$0xff]  ;;  %v1758_v37 = vsel %vm1735_vm3, %v1725_v41, %v13651_v52  ;;  %v13654_v7 = vld [vmem:[#allocation164_spill] sm:$0xff]  ;;  %v13656_v23 = vld [vmem:[#allocation31_spill] sm:$0xff] }
 0x27f   : > { %7304 = vmatmul.mubr.msk.f32.gmra.mrb[16].mxu0 %vm1982_vm10, %v1951_v63  ;;  %v1855_v60 = vsel %vm1834_vm6, %v1822_v50, %v13649_v25  ;;  %v13650_v9 = vld [vmem:[#allocation141_spill] sm:$0xff]  ;;  %v1790_v2 = vsel %vm1768_vm4, %v1757_v55, %v13652_v19  ;;  %v13657_v54 = vld [vmem:[#allocation163_spill] sm:$0xff]  ;;  %v7525_v42 = vld [vmem:[#allocation2 + $0x110] sm:$0xff] }
 0x280   : > { %v1887_v31 = vsel %vm1867_vm7, %v1854_v62, %v13650_v9  ;;  %7306 = vmatprep.mubr.msk.f32.mxu0 %vm1982_vm10, %v1952_v56  ;;  %v1888_v47 = vsel %vm1867_vm7, %v1855_v60, %v13653_v58  ;;  %v13655_v6 = vld [vmem:[#allocation105_spill] sm:$0xff]  ;;  %v1823_v22 = vsel %vm1801_vm5, %v1790_v2, %v13656_v23  ;;  %v13658_v13 = vld [vmem:[#allocation48_spill] sm:$0xff]  ;;  %v13661_v32 = vld [vmem:[#allocation46_spill] sm:$0xff] }
 0x281   : > { %v1920_v3 = vsel %vm1900_vm8, %v1887_v31, %v13654_v7  ;;  %v1646_v51 = vpop.permute.xlu1 %1645  ;;  %v1791_v20 = vsel %vm1768_vm4, %v1758_v37, %v13655_v6  ;;  %v1921_v33 = vsel %vm1900_vm8, %v1888_v47, %v13657_v54  ;;  %v1726_v46 = vsel %vm279_vm0, %v7525_v42, %v13658_v13  ;;  %v13659_v29 = vld [vmem:[#allocation29_spill] sm:$0xff]  ;;  %v13660_v61 = vld [vmem:[#allocation120_spill] sm:$0xff]  ;;  %v1652_v15 = vpop.permute.xlu0 %1651  ;;  %v13662_v11 = vld [vmem:[#allocation87_spill] sm:$0xff] }
 0x282   : > { %v1953_v43 = vsel %vm1933_vm9, %v1920_v3, %v1646_v51  ;;  %v1824_v28 = vsel %vm1801_vm5, %v1791_v20, %v13659_v29  ;;  %v1856_v16 = vsel %vm1834_vm6, %v1823_v22, %v13660_v61  ;;  %v1954_v39 = vsel %vm1933_vm9, %v1921_v33, %v1648_v36  ;;  %v7526_v59 = vld [vmem:[#allocation2 + $0x120] sm:$0xff]  ;;  %v13663_v38 = vld [vmem:[#allocation119_spill] sm:$0xff]  ;;  %v13665_v12 = vld [vmem:[#allocation86_spill] sm:$0xff] }
 0x283   : > { %7307 = vmatmul.mubr.msk.f32.gmra.mrb[18].mxu0 %vm1982_vm10, %v1953_v43  ;;  %v1727_v49 = vsel %vm279_vm0, %v7526_v59, %v13661_v32  ;;  %v1759_v48 = vsel %vm1735_vm3, %v1726_v46, %v13662_v11  ;;  %v1857_v35 = vsel %vm1834_vm6, %v1824_v28, %v13663_v38  ;;  %v13664_v24 = vld [vmem:[#allocation143_spill] sm:$0xff]  ;;  %v13666_v40 = vld [vmem:[#allocation108_spill] sm:$0xff]  ;;  %v13667_v8 = vld [vmem:[#allocation142_spill] sm:$0xff] }
 0x284   : > { %v1889_v34 = vsel %vm1867_vm7, %v1856_v16, %v13664_v24  ;;  %7309 = vmatprep.mubr.msk.f32.mxu0 %vm1982_vm10, %v1954_v39  ;;  %v1760_v10 = vsel %vm1735_vm3, %v1727_v49, %v13665_v12  ;;  %v1792_v4 = vsel %vm1768_vm4, %v1759_v48, %v13666_v40  ;;  %v1890_v21 = vsel %vm1867_vm7, %v1857_v35, %v13667_v8  ;;  %v13668_v44 = vld [vmem:[#allocation166_spill] sm:$0xff]  ;;  %v13669_v30 = vld [vmem:[#allocation107_spill] sm:$0xff]  ;;  %v13671_v1 = vld [vmem:[#allocation165_spill] sm:$0xff] }
 0x285   : > { %v1922_v57 = vsel %vm1900_vm8, %v1889_v34, %v13668_v44  ;;  %v1650_v26 = vpop.permute.xlu1 %1649  ;;  %v1793_v63 = vsel %vm1768_vm4, %v1760_v10, %v13669_v30  ;;  %v13670_v27 = vld [vmem:[#allocation35_spill] sm:$0xff]  ;;  %v1923_v53 = vsel %vm1900_vm8, %v1890_v21, %v13671_v1  ;;  %v7527_v18 = vld [vmem:[#allocation2 + $0x128] sm:$0xff]  ;;  %v13672_v62 = vld [vmem:[#allocation52_spill] sm:$0xff]  ;;  %v1656_v55 = vpop.permute.xlu0 %1655 }
 0x286   : > { %v1825_v0 = vsel %vm1801_vm5, %v1792_v4, %v13670_v27  ;;  %v1955_v50 = vsel %vm1933_vm9, %v1922_v57, %v1650_v26  ;;  %v1728_v56 = vsel %vm279_vm0, %v7527_v18, %v13672_v62  ;;  %v13673_v36 = vld [vmem:[#allocation33_spill] sm:$0xff]  ;;  %v13674_v17 = vld [vmem:[#allocation122_spill] sm:$0xff]  ;;  %v1956_v14 = vsel %vm1933_vm9, %v1923_v53, %v1652_v15  ;;  %v7528_v25 = vld [vmem:[#allocation2 + $0x138] sm:$0xff] }
 0x287   : > { %v1826_v45 = vsel %vm1801_vm5, %v1793_v63, %v13673_v36  ;;  %v1858_v41 = vsel %vm1834_vm6, %v1825_v0, %v13674_v17  ;;  %7310 = vmatmul.mubr.msk.f32.gmra.mrb[20].mxu0 %vm1982_vm10, %v1955_v50  ;;  %v13675_v60 = vld [vmem:[#allocation50_spill] sm:$0xff]  ;;  %v13676_v31 = vld [vmem:[#allocation89_spill] sm:$0xff]  ;;  %v13679_v47 = vld [vmem:[#allocation88_spill] sm:$0xff] }
 0x288   : > { %v1729_v9 = vsel %vm279_vm0, %v7528_v25, %v13675_v60  ;;  %v1761_v52 = vsel %vm1735_vm3, %v1728_v56, %v13676_v31  ;;  %v13677_v37 = vld [vmem:[#allocation121_spill] sm:$0xff]  ;;  %7312 = vmatprep.mubr.msk.f32.mxu0 %vm1982_vm10, %v1956_v14  ;;  %v13680_v3 = vld [vmem:[#allocation110_spill] sm:$0xff]  ;;  %v13681_v6 = vld [vmem:[#allocation144_spill] sm:$0xff] }
 0x289   : > { %v1859_v19 = vsel %vm1834_vm6, %v1826_v45, %v13677_v37  ;;  %v13678_v2 = vld [vmem:[#allocation145_spill] sm:$0xff]  ;;  %v1762_v7 = vsel %vm1735_vm3, %v1729_v9, %v13679_v47  ;;  %v1794_v51 = vsel %vm1768_vm4, %v1761_v52, %v13680_v3  ;;  %v13682_v23 = vld [vmem:[#allocation168_spill] sm:$0xff]  ;;  %v1654_v54 = vpop.permute.xlu1 %1653  ;;  %v13684_v42 = vld [vmem:[#allocation39_spill] sm:$0xff]  ;;  %v1660_v48 = vpop.permute.xlu0 %1659 }
 0x28a   : > { %v1891_v58 = vsel %vm1867_vm7, %v1858_v41, %v13678_v2  ;;  %v1892_v20 = vsel %vm1867_vm7, %v1859_v19, %v13681_v6  ;;  %v13683_v33 = vld [vmem:[#allocation109_spill] sm:$0xff]  ;;  %v1827_v13 = vsel %vm1801_vm5, %v1794_v51, %v13684_v42  ;;  %v13685_v46 = vld [vmem:[#allocation167_spill] sm:$0xff]  ;;  %v7529_v61 = vld [vmem:[#allocation2 + $0x140] sm:$0xff] }
 0x28b   : > { %v1924_v22 = vsel %vm1900_vm8, %v1891_v58, %v13682_v23  ;;  %v1795_v43 = vsel %vm1768_vm4, %v1762_v7, %v13683_v33  ;;  %v1925_v29 = vsel %vm1900_vm8, %v1892_v20, %v13685_v46  ;;  %v13686_v16 = vld [vmem:[#allocation56_spill] sm:$0xff]  ;;  %v13687_v15 = vld [vmem:[#allocation37_spill] sm:$0xff]  ;;  %v7530_v38 = vld [vmem:[#allocation2 + $0x150] sm:$0xff] }
 0x28c   : > { %v1957_v28 = vsel %vm1933_vm9, %v1924_v22, %v1654_v54  ;;  %v1730_v39 = vsel %vm279_vm0, %v7529_v61, %v13686_v16  ;;  %v1828_v59 = vsel %vm1801_vm5, %v1795_v43, %v13687_v15  ;;  %v13688_v32 = vld [vmem:[#allocation124_spill] sm:$0xff]  ;;  %v1958_v11 = vsel %vm1933_vm9, %v1925_v29, %v1656_v55  ;;  %v13689_v35 = vld [vmem:[#allocation54_spill] sm:$0xff]  ;;  %v13690_v34 = vld [vmem:[#allocation91_spill] sm:$0xff] }
 0x28d   : > { %v1860_v49 = vsel %vm1834_vm6, %v1827_v13, %v13688_v32  ;;  %7313 = vmatmul.mubr.msk.f32.gmra.mrb[22].mxu0 %vm1982_vm10, %v1957_v28  ;;  %v1731_v24 = vsel %vm279_vm0, %v7530_v38, %v13689_v35  ;;  %v1763_v12 = vsel %vm1735_vm3, %v1730_v39, %v13690_v34  ;;  %v13691_v10 = vld [vmem:[#allocation123_spill] sm:$0xff]  ;;  %v13693_v21 = vld [vmem:[#allocation90_spill] sm:$0xff]  ;;  %v13694_v57 = vld [vmem:[#allocation112_spill] sm:$0xff]  ;;  %v1658_v1 = vpop.permute.xlu1 %1657  ;;  %v1664_v52 = vpop.permute.xlu0 %1663 }
 0x28e   : > { %v1861_v40 = vsel %vm1834_vm6, %v1828_v59, %v13691_v10  ;;  %v13692_v4 = vld [vmem:[#allocation147_spill] sm:$0xff]  ;;  %7315 = vmatprep.mubr.msk.f32.mxu0 %vm1982_vm10, %v1958_v11  ;;  %v1764_v44 = vsel %vm1735_vm3, %v1731_v24, %v13693_v21  ;;  %v1796_v26 = vsel %vm1768_vm4, %v1763_v12, %v13694_v57  ;;  %v13695_v30 = vld [vmem:[#allocation146_spill] sm:$0xff]  ;;  %v13699_v56 = vld [vmem:[#allocation169_spill] sm:$0xff] }
 0x28f   : > { %v1893_v8 = vsel %vm1867_vm7, %v1860_v49, %v13692_v4  ;;  %v1894_v63 = vsel %vm1867_vm7, %v1861_v40, %v13695_v30  ;;  %v13696_v27 = vld [vmem:[#allocation170_spill] sm:$0xff]  ;;  %v13697_v53 = vld [vmem:[#allocation111_spill] sm:$0xff]  ;;  %v13700_v41 = vld [vmem:[#allocation60_spill] sm:$0xff] }
 0x290   : > { %v1926_v0 = vsel %vm1900_vm8, %v1893_v8, %v13696_v27  ;;  %v1797_v50 = vsel %vm1768_vm4, %v1764_v44, %v13697_v53  ;;  %v13698_v18 = vld [vmem:[#allocation43_spill] sm:$0xff]  ;;  %v1927_v36 = vsel %vm1900_vm8, %v1894_v63, %v13699_v56  ;;  %v13701_v55 = vld [vmem:[#allocation41_spill] sm:$0xff]  ;;  %v13702_v60 = vld [vmem:[#allocation126_spill] sm:$0xff] }
 0x291   : > { %v1829_v62 = vsel %vm1801_vm5, %v1796_v26, %v13698_v18  ;;  %v1959_v45 = vsel %vm1933_vm9, %v1926_v0, %v1658_v1  ;;  %v7531_v17 = vld [vmem:[#allocation2 + $0x158] sm:$0xff]  ;;  %v1830_v25 = vsel %vm1801_vm5, %v1797_v50, %v13701_v55  ;;  %v1960_v31 = vsel %vm1933_vm9, %v1927_v36, %v1660_v48  ;;  %v7532_v37 = vld [vmem:[#allocation2 + $0x168] sm:$0xff]  ;;  %v13703_v19 = vld [vmem:[#allocation58_spill] sm:$0xff]  ;;  %v1662_v46 = vpop.permute.xlu1 %1661  ;;  %v1668_v44 = vpop.permute.xlu0 %1667 }
 0x292   : > { %v1732_v14 = vsel %vm279_vm0, %v7531_v17, %v13700_v41  ;;  %v1862_v9 = vsel %vm1834_vm6, %v1829_v62, %v13702_v60  ;;  %7316 = vmatmul.mubr.msk.f32.gmra.mrb[24].mxu0 %vm1982_vm10, %v1959_v45  ;;  %v1733_v2 = vsel %vm279_vm0, %v7532_v37, %v13703_v19  ;;  %v13704_v58 = vld [vmem:[#allocation93_spill] sm:$0xff]  ;;  %v13707_v20 = vld [vmem:[#allocation92_spill] sm:$0xff]  ;;  %v13708_v22 = vld [vmem:[#allocation114_spill] sm:$0xff] }
 0x293   : > { %v1765_v47 = vsel %vm1735_vm3, %v1732_v14, %v13704_v58  ;;  %v13705_v7 = vld [vmem:[#allocation125_spill] sm:$0xff]  ;;  %7318 = vmatprep.mubr.msk.f32.mxu0 %vm1982_vm10, %v1960_v31  ;;  %v1766_v23 = vsel %vm1735_vm3, %v1733_v2, %v13707_v20  ;;  %v13709_v33 = vld [vmem:[#allocation148_spill] sm:$0xff]  ;;  %v13712_v61 = vld [vmem:[#allocation47_spill] sm:$0xff] }
 0x294   : > { %v1863_v3 = vsel %vm1834_vm6, %v1830_v25, %v13705_v7  ;;  %v13706_v51 = vld [vmem:[#allocation149_spill] sm:$0xff]  ;;  %v1798_v54 = vsel %vm1768_vm4, %v1765_v47, %v13708_v22  ;;  %v13710_v42 = vld [vmem:[#allocation4_spill] sm:$0xff]  ;;  %v13713_v39 = vld [vmem:[#allocation171_spill] sm:$0xff] }
 0x295   : > { %v1895_v6 = vsel %vm1867_vm7, %v1862_v9, %v13706_v51  ;;  %v1896_v43 = vsel %vm1867_vm7, %v1863_v3, %v13709_v33  ;;  %v13711_v29 = vld [vmem:[#allocation113_spill] sm:$0xff]  ;;  %v1831_v16 = vsel %vm1801_vm5, %v1798_v54, %v13712_v61  ;;  %v7533_v32 = vld [vmem:[#allocation2 + $0x170] sm:$0xff]  ;;  %v13714_v49 = vld [vmem:[#allocation64_spill] sm:$0xff]  ;;  %v1666_v1 = vpop.permute.xlu1 %1665  ;;  %v13727_v9 = vmov 0.0  }
 0x296   : > { %v1928_v13 = vsel %vm1900_vm8, %v1895_v6, %v13710_v42  ;;  %v1799_v28 = vsel %vm1768_vm4, %v1766_v23, %v13711_v29  ;;  %v1929_v15 = vsel %vm1900_vm8, %v1896_v43, %v13713_v39  ;;  %v1734_v11 = vsel %vm279_vm0, %v7533_v32, %v13714_v49  ;;  %v13715_v48 = vld [vmem:[#allocation45_spill] sm:$0xff]  ;;  %v13716_v35 = vld [vmem:[#allocation128_spill] sm:$0xff]  ;;  %v13717_v12 = vld [vmem:[#allocation94_spill] sm:$0xff]  ;;  %2433 = vst.msk [vmem:[#allocation3] sm:$0xff] %vm2432_vm11, %v13727_v9 }
 0x297   : > { %v1961_v59 = vsel %vm1933_vm9, %v1928_v13, %v1662_v46  ;;  %v1832_v38 = vsel %vm1801_vm5, %v1799_v28, %v13715_v48  ;;  %v1864_v24 = vsel %vm1834_vm6, %v1831_v16, %v13716_v35  ;;  %v1962_v34 = vsel %vm1933_vm9, %v1929_v15, %v1664_v52  ;;  %v13718_v40 = vld [vmem:[#allocation127_spill] sm:$0xff]  ;;  %v13721_v30 = vld [vmem:[#allocation150_spill] sm:$0xff]  ;;  %v13722_v27 = vld [vmem:[#allocation172_spill] sm:$0xff]  ;;  %2434 = vst.msk [vmem:[#allocation3 + $0x8] sm:$0xff] %vm2432_vm11, %v13727_v9 }
 0x298   : > { %7319 = vmatmul.mubr.msk.f32.gmra.mrb[26].mxu0 %vm1982_vm10, %v1961_v59  ;;  %v1767_v10 = vsel %vm1735_vm3, %v1734_v11, %v13717_v12  ;;  %v1865_v4 = vsel %vm1834_vm6, %v1832_v38, %v13718_v40  ;;  %v13719_v8 = vld [vmem:[#allocation151_spill] sm:$0xff]  ;;  %v13723_v53 = vld [vmem:[#allocation49_spill] sm:$0xff]  ;;  %v13724_v18 = vld [vmem:[#allocation62_spill] sm:$0xff]  ;;  %2438 = vst.msk [vmem:[#allocation3 + $0x198] sm:$0xff] %vm2432_vm11, %v13727_v9 }
 0x299   : > { %v1897_v21 = vsel %vm1867_vm7, %v1864_v24, %v13719_v8  ;;  %7321 = vmatprep.mubr.msk.f32.mxu0 %vm1982_vm10, %v1962_v34  ;;  %v13720_v57 = vld [vmem:[#allocation115_spill] sm:$0xff]  ;;  %v1898_v63 = vsel %vm1867_vm7, %v1865_v4, %v13721_v30  ;;  %v13725_v36 = vld [vmem:[#allocation129_spill] sm:$0xff]  ;;  %v13726_v41 = vld [vmem:[#allocation152_spill] sm:$0xff]  ;;  %v1670_v25 = vpop.permute.xlu1 %1669  ;;  %2439 = vst.msk [vmem:[#allocation3 + $0x1a0] sm:$0xff] %vm2432_vm11, %v13727_v9 }
 0x29a   : > { %v1800_v26 = vsel %vm1768_vm4, %v1767_v10, %v13720_v57  ;;  %v1930_v0 = vsel %vm1900_vm8, %v1897_v21, %v13722_v27  ;;  %v1931_v62 = vsel %vm1900_vm8, %v1898_v63, %v13724_v18  ;;  %2436 = vst.msk [vmem:[#allocation3 + $0x10] sm:$0x3] %vm2435_vm12, %v13727_v9  ;;  %2440 = vst.msk [vmem:[#allocation3 + $0x1a8] sm:$0x3] %vm2435_vm12, %v13727_v9 }
 0x29b   : > { %v1833_v50 = vsel %vm1801_vm5, %v1800_v26, %v13723_v53  ;;  %v1963_v56 = vsel %vm1933_vm9, %v1930_v0, %v1666_v1  ;;  %v1964_v17 = vsel %vm1933_vm9, %v1931_v62, %v1668_v44  ;;  %2460 = vst.msk [vmem:[#allocation3 + $0x11] sm:$0x1] %vm2441_vm13, %v13727_v9  ;;  %2442 = vst.msk [vmem:[#allocation3] sm:$0x1] %vm2441_vm13, %v13727_v9 }
 0x29c   : > { %v1866_v45 = vsel %vm1834_vm6, %v1833_v50, %v13725_v36  ;;  %7322 = vmatmul.mubr.msk.f32.gmra.mrb[28].mxu0 %vm1982_vm10, %v1963_v56  ;;  %2443 = vst.msk [vmem:[#allocation3 + $0x18] sm:$0x1] %vm2441_vm13, %v13727_v9  ;;  %2444 = vst.msk [vmem:[#allocation3 + $0x30] sm:$0x1] %vm2441_vm13, %v13727_v9 }
 0x29d   : > { %v1899_v14 = vsel %vm1867_vm7, %v1866_v45, %v13726_v41  ;;  %7324 = vmatprep.mubr.msk.f32.mxu0 %vm1982_vm10, %v1964_v17  ;;  %2445 = vst.msk [vmem:[#allocation3 + $0x48] sm:$0x1] %vm2441_vm13, %v13727_v9  ;;  %2446 = vst.msk [vmem:[#allocation3 + $0x60] sm:$0x1] %vm2441_vm13, %v13727_v9 }
 0x29e   : > { %v1932_v55 = vsel %vm1900_vm8, %v1899_v14, %v8951_v5  ;;  %2447 = vst.msk [vmem:[#allocation3 + $0x78] sm:$0x1] %vm2441_vm13, %v13727_v9  ;;  %2448 = vst.msk [vmem:[#allocation3 + $0x90] sm:$0x1] %vm2441_vm13, %v13727_v9  ;;  %v9524_v5 = vld [vmem:[%s13161_s2] ss:$0 sm:$0xff] }
 0x29f   : > { %v1965_v60 = vsel %vm1933_vm9, %v1932_v55, %v1670_v25  ;;  %2449 = vst.msk [vmem:[#allocation3 + $0xa8] sm:$0x1] %vm2441_vm13, %v13727_v9  ;;  %2450 = vst.msk [vmem:[#allocation3 + $0xc0] sm:$0x1] %vm2441_vm13, %v13727_v9 }
 0x2a0   : > { %7325 = vmatmul.mubr.msk.f32.gmra.mrb[30].mxu0 %vm1982_vm10, %v1965_v60  ;;  %2451 = vst.msk [vmem:[#allocation3 + $0xd8] sm:$0x1] %vm2441_vm13, %v13727_v9  ;;  %2452 = vst.msk [vmem:[#allocation3 + $0xf0] sm:$0x1] %vm2441_vm13, %v13727_v9 }
 0x2a1   : > { %2453 = vst.msk [vmem:[#allocation3 + $0x108] sm:$0x1] %vm2441_vm13, %v13727_v9  ;;  %2454 = vst.msk [vmem:[#allocation3 + $0x120] sm:$0x1] %vm2441_vm13, %v13727_v9 }
 0x2a2   : > { %2455 = vst.msk [vmem:[#allocation3 + $0x138] sm:$0x1] %vm2441_vm13, %v13727_v9  ;;  %2456 = vst.msk [vmem:[#allocation3 + $0x150] sm:$0x1] %vm2441_vm13, %v13727_v9 }
 0x2a3   : > { %2457 = vst.msk [vmem:[#allocation3 + $0x168] sm:$0x1] %vm2441_vm13, %v13727_v9  ;;  %2458 = vst.msk [vmem:[#allocation3 + $0x180] sm:$0x1] %vm2441_vm13, %v13727_v9 }
 0x2a4   : > { %2459 = vst.msk [vmem:[#allocation3 + $0x198] sm:$0x1] %vm2441_vm13, %v13727_v9  ;;  %2461 = vst.msk [vmem:[#allocation3 + $0x29] sm:$0x1] %vm2441_vm13, %v13727_v9 }
 0x2a5   : > { %2462 = vst.msk [vmem:[#allocation3 + $0x41] sm:$0x1] %vm2441_vm13, %v13727_v9  ;;  %2463 = vst.msk [vmem:[#allocation3 + $0x59] sm:$0x1] %vm2441_vm13, %v13727_v9 }
 0x2a6   : > { %2464 = vst.msk [vmem:[#allocation3 + $0x71] sm:$0x1] %vm2441_vm13, %v13727_v9  ;;  %2465 = vst.msk [vmem:[#allocation3 + $0x89] sm:$0x1] %vm2441_vm13, %v13727_v9 }
 0x2a7   : > { %2466 = vst.msk [vmem:[#allocation3 + $0xa1] sm:$0x1] %vm2441_vm13, %v13727_v9  ;;  %2467 = vst.msk [vmem:[#allocation3 + $0xb9] sm:$0x1] %vm2441_vm13, %v13727_v9 }
 0x2a8   : > { %2468 = vst.msk [vmem:[#allocation3 + $0xd1] sm:$0x1] %vm2441_vm13, %v13727_v9  ;;  %2469 = vst.msk [vmem:[#allocation3 + $0xe9] sm:$0x1] %vm2441_vm13, %v13727_v9 }
 0x2a9   : > { %2470 = vst.msk [vmem:[#allocation3 + $0x101] sm:$0x1] %vm2441_vm13, %v13727_v9  ;;  %2471 = vst.msk [vmem:[#allocation3 + $0x119] sm:$0x1] %vm2441_vm13, %v13727_v9 }
 0x2aa   : > { %2472 = vst.msk [vmem:[#allocation3 + $0x131] sm:$0x1] %vm2441_vm13, %v13727_v9  ;;  %2473 = vst.msk [vmem:[#allocation3 + $0x149] sm:$0x1] %vm2441_vm13, %v13727_v9 }
 0x2ab   : > { %2474 = vst.msk [vmem:[#allocation3 + $0x161] sm:$0x1] %vm2441_vm13, %v13727_v9  ;;  %2475 = vst.msk [vmem:[#allocation3 + $0x179] sm:$0x1] %vm2441_vm13, %v13727_v9 }
 0x2ac   : > { %2476 = vst.msk [vmem:[#allocation3 + $0x191] sm:$0x1] %vm2441_vm13, %v13727_v9  ;;  %2477 = vst.msk [vmem:[#allocation3 + $0x1a9] sm:$0x1] %vm2441_vm13, %v13727_v9 }
 0x332   : > { %v7281_v31 = vpop.f32.mrb[0].mxu0 }
 0x333   : > { %v9527_v52 = vadd.f32 %v7281_v31, %v9524_v5  ;;  %v2145_v37 = vpop.f32.mrb[1].mxu0 }
 0x334   : > { %v9530_v19 = vadd.f32 %v9524_v5, %v2145_v37 }
 0x335   : > { %13728 = vst [vmem:[#allocation5_spill] sm:$0xff] %v9527_v52  ;;  %vm2337_vm14 = vcmp.gt.f32.partialorder %v9527_v52, 0.0  ;;  %v2369_v2 = vmul.f32 0.1, %v9527_v52 }
 0x336   : > { %13729 = vst [vmem:[#allocation7_spill] sm:$0xff] %v9530_v19  ;;  %v7284_v58 = vpop.f32.mrb[2].mxu0  ;;  %vm2336_vm15 = vcmp.gt.f32.partialorder %v9530_v19, 0.0  ;;  %v2368_v47 = vmul.f32 0.1, %v9530_v19 }
 0x337   : > { %v9537_v7 = vadd.f32 %v7284_v58, %v9524_v5  ;;  %v2155_v3 = vpop.f32.mrb[3].mxu0  ;;  %v2401_v51 = vsel %vm2337_vm14, %v9527_v52, %v2369_v2 }
 0x338   : > { %v9541_v6 = vadd.f32 %v9524_v5, %v2155_v3  ;;  %2512 = vrot.lane.b32.xlu1 %v2401_v51, %s7605_s19  ;;  %v2400_v20 = vsel %vm2336_vm15, %v9530_v19, %v2368_v47 }
 0x339   : > { %13730 = vst [vmem:[#allocation67_spill] sm:$0xff] %v9537_v7  ;;  %2510 = vrot.lane.b32.xlu0 %v2400_v20, %s7605_s19  ;;  %vm2339_vm1 = vcmp.gt.f32.partialorder %v9537_v7, 0.0  ;;  %v2371_v23 = vmul.f32 0.1, %v9537_v7 }
 0x33a   : > { %13731 = vst [vmem:[#allocation66_spill] sm:$0xff] %v9541_v6  ;;  %v7287_v22 = vpop.f32.mrb[4].mxu0  ;;  %vm2338_vm2 = vcmp.gt.f32.partialorder %v9541_v6, 0.0  ;;  %v2370_v54 = vmul.f32 0.1, %v9541_v6 }
 0x33b   : > { %v9551_v33 = vadd.f32 %v7287_v22, %v9524_v5  ;;  %v2165_v43 = vpop.f32.mrb[5].mxu0  ;;  %v2403_v42 = vsel %vm2339_vm1, %v9537_v7, %v2371_v23 }
 0x33c   : > { %v9555_v13 = vadd.f32 %v9524_v5, %v2165_v43  ;;  %2516 = vrot.lane.b32.xlu1 %v2403_v42, %s7605_s19  ;;  %v2402_v46 = vsel %vm2338_vm2, %v9541_v6, %v2370_v54 }
 0x33d   : > { %13732 = vst [vmem:[#allocation11_spill] sm:$0xff] %v9551_v33  ;;  %2514 = vrot.lane.b32.xlu0 %v2402_v46, %s7605_s19  ;;  %vm2341_vm6 = vcmp.gt.f32.partialorder %v9551_v33, 0.0  ;;  %v2373_v29 = vmul.f32 0.1, %v9551_v33 }
 0x33e   : > { %13733 = vst [vmem:[#allocation9_spill] sm:$0xff] %v9555_v13  ;;  %v7290_v28 = vpop.f32.mrb[6].mxu0  ;;  %vm2340_vm7 = vcmp.gt.f32.partialorder %v9555_v13, 0.0  ;;  %v2372_v61 = vmul.f32 0.1, %v9555_v13 }
 0x33f   : > { %v9565_v16 = vadd.f32 %v7290_v28, %v9524_v5  ;;  %v2175_v39 = vpop.f32.mrb[7].mxu0  ;;  %v2405_v15 = vsel %vm2341_vm6, %v9551_v33, %v2373_v29 }
 0x340   : > { %v9569_v59 = vadd.f32 %v9524_v5, %v2175_v39  ;;  %2520 = vrot.lane.b32.xlu1 %v2405_v15, %s7605_s19  ;;  %v2404_v32 = vsel %vm2340_vm7, %v9555_v13, %v2372_v61 }
 0x341   : > { %13734 = vst [vmem:[#allocation70_spill] sm:$0xff] %v9565_v16  ;;  %2518 = vrot.lane.b32.xlu0 %v2404_v32, %s7605_s19  ;;  %vm2343_vm8 = vcmp.gt.f32.partialorder %v9565_v16, 0.0  ;;  %v2375_v49 = vmul.f32 0.1, %v9565_v16 }
 0x342   : > { %13735 = vst [vmem:[#allocation69_spill] sm:$0xff] %v9569_v59  ;;  %v7293_v11 = vpop.f32.mrb[8].mxu0  ;;  %vm2342_vm9 = vcmp.gt.f32.partialorder %v9569_v59, 0.0  ;;  %v2374_v48 = vmul.f32 0.1, %v9569_v59 }
 0x343   : > { %v9579_v38 = vadd.f32 %v7293_v11, %v9524_v5  ;;  %v2185_v35 = vpop.f32.mrb[9].mxu0  ;;  %v2407_v24 = vsel %vm2343_vm8, %v9565_v16, %v2375_v49 }
 0x344   : > { %v9583_v34 = vadd.f32 %v9524_v5, %v2185_v35  ;;  %2524 = vrot.lane.b32.xlu1 %v2407_v24, %s7605_s19  ;;  %v2406_v12 = vsel %vm2342_vm9, %v9569_v59, %v2374_v48 }
 0x345   : > { %13736 = vst [vmem:[#allocation14_spill] sm:$0xff] %v9579_v38  ;;  %2522 = vrot.lane.b32.xlu0 %v2406_v12, %s7605_s19  ;;  %vm2345_vm10 = vcmp.gt.f32.partialorder %v9579_v38, 0.0  ;;  %v2377_v10 = vmul.f32 0.1, %v9579_v38 }
 0x346   : > { %13737 = vst [vmem:[#allocation12_spill] sm:$0xff] %v9583_v34  ;;  %v7296_v40 = vpop.f32.mrb[10].mxu0  ;;  %vm2344_vm12 = vcmp.gt.f32.partialorder %v9583_v34, 0.0  ;;  %v2376_v4 = vmul.f32 0.1, %v9583_v34 }
 0x347   : > { %v9593_v8 = vadd.f32 %v7296_v40, %v9524_v5  ;;  %v2195_v21 = vpop.f32.mrb[11].mxu0  ;;  %v2409_v44 = vsel %vm2345_vm10, %v9579_v38, %v2377_v10 }
 0x348   : > { %v9597_v57 = vadd.f32 %v9524_v5, %v2195_v21  ;;  %2528 = vrot.lane.b32.xlu1 %v2409_v44, %s7605_s19  ;;  %v2408_v26 = vsel %vm2344_vm12, %v9583_v34, %v2376_v4 }
 0x349   : > { %13738 = vst [vmem:[#allocation72_spill] sm:$0xff] %v9593_v8  ;;  %2526 = vrot.lane.b32.xlu0 %v2408_v26, %s7605_s19  ;;  %vm2347_vm13 = vcmp.gt.f32.partialorder %v9593_v8, 0.0  ;;  %v2379_v30 = vmul.f32 0.1, %v9593_v8 }
 0x34a   : > { %13739 = vst [vmem:[#allocation71_spill] sm:$0xff] %v9597_v57  ;;  %v7299_v63 = vpop.f32.mrb[12].mxu0  ;;  %vm2346_vm14 = vcmp.gt.f32.partialorder %v9597_v57, 0.0  ;;  %v2378_v27 = vmul.f32 0.1, %v9597_v57 }
 0x34b   : > { %v9607_v0 = vadd.f32 %v7299_v63, %v9524_v5  ;;  %v2205_v1 = vpop.f32.mrb[13].mxu0  ;;  %v2411_v53 = vsel %vm2347_vm13, %v9593_v8, %v2379_v30 }
 0x34c   : > { %v9611_v50 = vadd.f32 %v9524_v5, %v2205_v1  ;;  %2532 = vrot.lane.b32.xlu1 %v2411_v53, %s7605_s19  ;;  %v2410_v18 = vsel %vm2346_vm14, %v9597_v57, %v2378_v27 }
 0x34d   : > { %13740 = vst [vmem:[#allocation17_spill] sm:$0xff] %v9607_v0  ;;  %2530 = vrot.lane.b32.xlu0 %v2410_v18, %s7605_s19  ;;  %vm2349_vm15 = vcmp.gt.f32.partialorder %v9607_v0, 0.0  ;;  %v2381_v62 = vmul.f32 0.1, %v9607_v0 }
 0x34e   : > { %13741 = vst [vmem:[#allocation15_spill] sm:$0xff] %v9611_v50  ;;  %v7302_v56 = vpop.f32.mrb[14].mxu0  ;;  %vm2348_vm1 = vcmp.gt.f32.partialorder %v9611_v50, 0.0  ;;  %v2380_v36 = vmul.f32 0.1, %v9611_v50 }
 0x34f   : > { %v9621_v45 = vadd.f32 %v7302_v56, %v9524_v5  ;;  %v2215_v17 = vpop.f32.mrb[15].mxu0  ;;  %v2413_v41 = vsel %vm2349_vm15, %v9607_v0, %v2381_v62 }
 0x350   : > { %v9625_v14 = vadd.f32 %v9524_v5, %v2215_v17  ;;  %2536 = vrot.lane.b32.xlu1 %v2413_v41, %s7605_s19  ;;  %v2412_v55 = vsel %vm2348_vm1, %v9611_v50, %v2380_v36 }
 0x351   : > { %13742 = vst [vmem:[#allocation73_spill] sm:$0xff] %v9621_v45  ;;  %2534 = vrot.lane.b32.xlu0 %v2412_v55, %s7605_s19  ;;  %vm2351_vm2 = vcmp.gt.f32.partialorder %v9621_v45, 0.0  ;;  %v2383_v25 = vmul.f32 0.1, %v9621_v45 }
 0x352   : > { %13743 = vst [vmem:[#allocation20_spill] sm:$0xff] %v9625_v14  ;;  %v7305_v60 = vpop.f32.mrb[16].mxu0  ;;  %vm2350_vm6 = vcmp.gt.f32.partialorder %v9625_v14, 0.0  ;;  %v2382_v9 = vmul.f32 0.1, %v9625_v14 }
 0x353   : > { %v9635_v31 = vadd.f32 %v7305_v60, %v9524_v5  ;;  %v2225_v37 = vpop.f32.mrb[17].mxu0  ;;  %v2415_v2 = vsel %vm2351_vm2, %v9621_v45, %v2383_v25 }
 0x354   : > { %v9639_v58 = vadd.f32 %v9524_v5, %v2225_v37  ;;  %2540 = vrot.lane.b32.xlu1 %v2415_v2, %s7605_s19  ;;  %v2414_v47 = vsel %vm2350_vm6, %v9625_v14, %v2382_v9 }
 0x355   : > { %13744 = vst [vmem:[#allocation18_spill] sm:$0xff] %v9635_v31  ;;  %2538 = vrot.lane.b32.xlu0 %v2414_v47, %s7605_s19  ;;  %vm2353_vm7 = vcmp.gt.f32.partialorder %v9635_v31, 0.0  ;;  %v2385_v3 = vmul.f32 0.1, %v9635_v31 }
 0x356   : > { %13745 = vst [vmem:[#allocation24_spill] sm:$0xff] %v9639_v58  ;;  %v7308_v51 = vpop.f32.mrb[18].mxu0  ;;  %vm2352_vm8 = vcmp.gt.f32.partialorder %v9639_v58, 0.0  ;;  %v2384_v20 = vmul.f32 0.1, %v9639_v58 }
 0x357   : > { %v9649_v23 = vadd.f32 %v7308_v51, %v9524_v5  ;;  %v2235_v22 = vpop.f32.mrb[19].mxu0  ;;  %v2417_v54 = vsel %vm2353_vm7, %v9635_v31, %v2385_v3 }
 0x358   : > { %v9653_v43 = vadd.f32 %v9524_v5, %v2235_v22  ;;  %2544 = vrot.lane.b32.xlu1 %v2417_v54, %s7605_s19  ;;  %v2416_v42 = vsel %vm2352_vm8, %v9639_v58, %v2384_v20 }
 0x359   : > { %13746 = vst [vmem:[#allocation53_spill] sm:$0xff] %v9649_v23  ;;  %2542 = vrot.lane.b32.xlu0 %v2416_v42, %s7605_s19  ;;  %vm2355_vm9 = vcmp.gt.f32.partialorder %v9649_v23, 0.0  ;;  %v2387_v46 = vmul.f32 0.1, %v9649_v23 }
 0x35a   : > { %13747 = vst [vmem:[#allocation22_spill] sm:$0xff] %v9653_v43  ;;  %v7311_v29 = vpop.f32.mrb[20].mxu0  ;;  %vm2354_vm10 = vcmp.gt.f32.partialorder %v9653_v43, 0.0  ;;  %v2386_v28 = vmul.f32 0.1, %v9653_v43 }
 0x35b   : > { %v9663_v61 = vadd.f32 %v7311_v29, %v9524_v5  ;;  %v2245_v39 = vpop.f32.mrb[21].mxu0  ;;  %v2419_v15 = vsel %vm2355_vm9, %v9649_v23, %v2387_v46 }
 0x35c   : > { %v9667_v32 = vadd.f32 %v9524_v5, %v2245_v39  ;;  %2548 = vrot.lane.b32.xlu1 %v2419_v15, %s7605_s19  ;;  %v2418_v49 = vsel %vm2354_vm10, %v9653_v43, %v2386_v28 }
 0x35d   : > { %13748 = vst [vmem:[#allocation75_spill] sm:$0xff] %v9663_v61  ;;  %2546 = vrot.lane.b32.xlu0 %v2418_v49, %s7605_s19  ;;  %vm2357_vm12 = vcmp.gt.f32.partialorder %v9663_v61, 0.0  ;;  %v2389_v11 = vmul.f32 0.1, %v9663_v61 }
 0x35e   : > { %13749 = vst [vmem:[#allocation51_spill] sm:$0xff] %v9667_v32  ;;  %vm2356_vm13 = vcmp.gt.f32.partialorder %v9667_v32, 0.0  ;;  %v2388_v35 = vmul.f32 0.1, %v9667_v32 }
 0x35f   : > { %v2421_v10 = vsel %vm2357_vm12, %v9663_v61, %v2389_v11 }
 0x360   : > { %v7314_v48 = vpop.f32.mrb[22].mxu0  ;;  %2552 = vrot.lane.b32.xlu1 %v2421_v10, %s7605_s19  ;;  %v2420_v4 = vsel %vm2356_vm13, %v9667_v32, %v2388_v35  ;;  %v2672_v35 = vld [vmem:[#allocation3 + $0x9] sm:$0xff]  ;;  %vm4320_vm13 = vcmask 1043456  }
 0x361   : > { %v9677_v24 = vadd.f32 %v7314_v48, %v9524_v5  ;;  %v2255_v12 = vpop.f32.mrb[23].mxu0  ;;  %2550 = vrot.lane.b32.xlu0 %v2420_v4, %s7605_s19 }
 0x362   : > { %v9681_v40 = vadd.f32 %v9524_v5, %v2255_v12  ;;  %v2671_v12 = vld [vmem:[#allocation3 + $0x1] sm:$0xff] }
 0x363   : > { %13750 = vst [vmem:[#allocation131_spill] sm:$0xff] %v9677_v24  ;;  %vm2359_vm14 = vcmp.gt.f32.partialorder %v9677_v24, 0.0  ;;  %v2391_v21 = vmul.f32 0.1, %v9677_v24 }
 0x364   : > { %13751 = vst [vmem:[#allocation74_spill] sm:$0xff] %v9681_v40  ;;  %vm2358_vm15 = vcmp.gt.f32.partialorder %v9681_v40, 0.0  ;;  %v2390_v26 = vmul.f32 0.1, %v9681_v40 }
 0x365   : > { %v7317_v44 = vpop.f32.mrb[24].mxu0  ;;  %v2423_v27 = vsel %vm2359_vm14, %v9677_v24, %v2391_v21  ;;  %vm4016_vm14 = vcmask 97280  }
 0x366   : > { %v9691_v30 = vadd.f32 %v7317_v44, %v9524_v5  ;;  %v2265_v63 = vpop.f32.mrb[25].mxu0  ;;  %2556 = vrot.lane.b32.xlu1 %v2423_v27, %s7605_s19  ;;  %v2422_v53 = vsel %vm2358_vm15, %v9681_v40, %v2390_v26  ;;  %vm4081_vm15 = vcmask 162816  }
 0x367   : > { %v9695_v1 = vadd.f32 %v9524_v5, %v2265_v63  ;;  %2554 = vrot.lane.b32.xlu0 %v2422_v53, %s7605_s19 }
 0x368   : > { %13752 = vst [vmem:[#allocation96_spill] sm:$0xff] %v9691_v30  ;;  %vm2361_vm1 = vcmp.gt.f32.partialorder %v9691_v30, 0.0  ;;  %v2393_v18 = vmul.f32 0.1, %v9691_v30 }
 0x369   : > { %13753 = vst [vmem:[#allocation130_spill] sm:$0xff] %v9695_v1  ;;  %vm2360_vm2 = vcmp.gt.f32.partialorder %v9695_v1, 0.0  ;;  %v2392_v56 = vmul.f32 0.1, %v9695_v1 }
 0x36a   : > { %v2425_v41 = vsel %vm2361_vm1, %v9691_v30, %v2393_v18  ;;  %vm4146_vm1 = vcmask 228352  }
 0x36b   : > { %v7320_v62 = vpop.f32.mrb[26].mxu0  ;;  %2560 = vrot.lane.b32.xlu1 %v2425_v41, %s7605_s19  ;;  %v2424_v25 = vsel %vm2360_vm2, %v9695_v1, %v2392_v56  ;;  %vm4223_vm2 = vcmask 293888  }
 0x36c   : > { %v9705_v36 = vadd.f32 %v7320_v62, %v9524_v5  ;;  %v2275_v17 = vpop.f32.mrb[27].mxu0  ;;  %2558 = vrot.lane.b32.xlu0 %v2424_v25, %s7605_s19 }
 0x36d   : > { %v9709_v55 = vadd.f32 %v9524_v5, %v2275_v17 }
 0x36e   : > { %13754 = vst [vmem:[#allocation154_spill] sm:$0xff] %v9705_v36  ;;  %vm2363_vm6 = vcmp.gt.f32.partialorder %v9705_v36, 0.0  ;;  %v2395_v60 = vmul.f32 0.1, %v9705_v36 }
 0x36f   : > { %13755 = vst [vmem:[#allocation95_spill] sm:$0xff] %v9709_v55  ;;  %v7323_v9 = vpop.f32.mrb[28].mxu0  ;;  %vm2362_vm7 = vcmp.gt.f32.partialorder %v9709_v55, 0.0  ;;  %v2394_v37 = vmul.f32 0.1, %v9709_v55 }
 0x370   : > { %v9719_v2 = vadd.f32 %v7323_v9, %v9524_v5  ;;  %v2285_v47 = vpop.f32.mrb[29].mxu0  ;;  %v2427_v3 = vsel %vm2363_vm6, %v9705_v36, %v2395_v60 }
 0x371   : > { %v9723_v51 = vadd.f32 %v9524_v5, %v2285_v47  ;;  %2564 = vrot.lane.b32.xlu1 %v2427_v3, %s7605_s19  ;;  %v2426_v20 = vsel %vm2362_vm7, %v9709_v55, %v2394_v37 }
 0x372   : > { %13756 = vst [vmem:[#allocation8_spill] sm:$0xff] %v9719_v2  ;;  %2562 = vrot.lane.b32.xlu0 %v2426_v20, %s7605_s19  ;;  %vm2365_vm8 = vcmp.gt.f32.partialorder %v9719_v2, 0.0  ;;  %v2397_v22 = vmul.f32 0.1, %v9719_v2 }
 0x373   : > { %13757 = vst [vmem:[#allocation153_spill] sm:$0xff] %v9723_v51  ;;  %v7326_v54 = vpop.f32.mrb[30].mxu0  ;;  %vm2364_vm9 = vcmp.gt.f32.partialorder %v9723_v51, 0.0  ;;  %v2396_v42 = vmul.f32 0.1, %v9723_v51 }
 0x374   : > { %v9733_v46 = vadd.f32 %v7326_v54, %v9524_v5  ;;  %v2295_v29 = vpop.f32.mrb[31].mxu0  ;;  %v2429_v28 = vsel %vm2365_vm8, %v9719_v2, %v2397_v22 }
 0x375   : > { %v9737_v39 = vadd.f32 %v9524_v5, %v2295_v29  ;;  %2568 = vrot.lane.b32.xlu1 %v2429_v28, %s7605_s19  ;;  %v2428_v15 = vsel %vm2364_vm9, %v9723_v51, %v2396_v42 }
 0x376   : > { %13758 = vst [vmem:[#allocation28_spill] sm:$0xff] %v9733_v46  ;;  %2566 = vrot.lane.b32.xlu0 %v2428_v15, %s7605_s19  ;;  %vm2367_vm10 = vcmp.gt.f32.partialorder %v9733_v46, 0.0  ;;  %v2399_v49 = vmul.f32 0.1, %v9733_v46 }
 0x377   : > { %13759 = vst [vmem:[#allocation6_spill] sm:$0xff] %v9737_v39  ;;  %vm2366_vm12 = vcmp.gt.f32.partialorder %v9737_v39, 0.0  ;;  %v2398_v11 = vmul.f32 0.1, %v9737_v39 }
 0x378   : > { %v2431_v48 = vsel %vm2367_vm10, %v9733_v46, %v2399_v49  ;;  %v2703_v46 = vld [vmem:[#allocation3 + $0x2] sm:$0xff] }
 0x379   : > { %2572 = vrot.lane.b32.xlu1 %v2431_v48, %s7605_s19  ;;  %v2430_v5 = vsel %vm2366_vm12, %v9737_v39, %v2398_v11 }
 0x37a   : > { %2570 = vrot.lane.b32.xlu0 %v2430_v5, %s7605_s19  ;;  %s7610_s19 = smov 124  }
 0x37d   : > { %2962 = vrot.lane.b32.xlu1 %v2672_v35, %s7606_s20 }
 0x37e   : > { %2960 = vrot.lane.b32.xlu0 %v2671_v12, %s7606_s20 }
 0x3aa   : > { %v2513_v10 = vpop.permute.xlu1 %2512 }
 0x3ab   : > { %2608 = vst.msk [vmem:[#allocation3 + $0x21] sm:$0xff] %vm2432_vm11, %v2513_v10  ;;  %v2511_v4 = vpop.permute.xlu0 %2510 }
 0x3ac   : > { %2607 = vst.msk [vmem:[#allocation3 + $0x19] sm:$0xff] %vm2432_vm11, %v2511_v4 }
 0x3ae   : > { %v2517_v21 = vpop.permute.xlu1 %2516 }
 0x3af   : > { %2610 = vst.msk [vmem:[#allocation3 + $0x39] sm:$0xff] %vm2432_vm11, %v2517_v21  ;;  %v2515_v44 = vpop.permute.xlu0 %2514 }
 0x3b0   : > { %2609 = vst.msk [vmem:[#allocation3 + $0x31] sm:$0xff] %vm2432_vm11, %v2515_v44 }
 0x3b2   : > { %v2521_v26 = vpop.permute.xlu1 %2520  ;;  %v9756_v63 = vld [vmem:[#allocation3 + $0x21] sm:$0xff] }
 0x3b3   : > { %2612 = vst.msk [vmem:[#allocation3 + $0x51] sm:$0xff] %vm2432_vm11, %v2521_v26  ;;  %2966 = vrot.lane.b32.xlu1 %v9756_v63, %s7606_s20  ;;  %v2519_v27 = vpop.permute.xlu0 %2518  ;;  %v9761_v53 = vld [vmem:[#allocation3 + $0x19] sm:$0xff] }
 0x3b4   : > { %2611 = vst.msk [vmem:[#allocation3 + $0x49] sm:$0xff] %vm2432_vm11, %v2519_v27  ;;  %2964 = vrot.lane.b32.xlu0 %v9761_v53, %s7606_s20  ;;  %v9910_v39 = vld [vmem:[#allocation3 + $0x1a] sm:$0xff] }
 0x3b6   : > { %v2525_v18 = vpop.permute.xlu1 %2524  ;;  %v9766_v62 = vld [vmem:[#allocation3 + $0x39] sm:$0xff] }
 0x3b7   : > { %2614 = vst.msk [vmem:[#allocation3 + $0x69] sm:$0xff] %vm2432_vm11, %v2525_v18  ;;  %2970 = vrot.lane.b32.xlu1 %v9766_v62, %s7606_s20  ;;  %v2523_v56 = vpop.permute.xlu0 %2522  ;;  %v9771_v17 = vld [vmem:[#allocation3 + $0x31] sm:$0xff]  ;;  %v9914_v2 = vld [vmem:[#allocation3 + $0x3a] sm:$0xff] }
 0x3b8   : > { %2613 = vst.msk [vmem:[#allocation3 + $0x61] sm:$0xff] %vm2432_vm11, %v2523_v56  ;;  %2968 = vrot.lane.b32.xlu0 %v9771_v17, %s7606_s20  ;;  %v9918_v45 = vld [vmem:[#allocation3 + $0x32] sm:$0xff] }
 0x3ba   : > { %v2529_v41 = vpop.permute.xlu1 %2528  ;;  %v9776_v25 = vld [vmem:[#allocation3 + $0x51] sm:$0xff] }
 0x3bb   : > { %2616 = vst.msk [vmem:[#allocation3 + $0x81] sm:$0xff] %vm2432_vm11, %v2529_v41  ;;  %2974 = vrot.lane.b32.xlu1 %v9776_v25, %s7606_s20  ;;  %v2527_v60 = vpop.permute.xlu0 %2526  ;;  %v9781_v9 = vld [vmem:[#allocation3 + $0x49] sm:$0xff] }
 0x3bc   : > { %2615 = vst.msk [vmem:[#allocation3 + $0x79] sm:$0xff] %vm2432_vm11, %v2527_v60  ;;  %2972 = vrot.lane.b32.xlu0 %v9781_v9, %s7606_s20 }
 0x3be   : > { %v2533_v37 = vpop.permute.xlu1 %2532  ;;  %v9786_v47 = vld [vmem:[#allocation3 + $0x69] sm:$0xff] }
 0x3bf   : > { %2618 = vst.msk [vmem:[#allocation3 + $0x99] sm:$0xff] %vm2432_vm11, %v2533_v37  ;;  %2978 = vrot.lane.b32.xlu1 %v9786_v47, %s7606_s20  ;;  %v2531_v3 = vpop.permute.xlu0 %2530  ;;  %v9791_v20 = vld [vmem:[#allocation3 + $0x61] sm:$0xff]  ;;  %v9930_v51 = vld [vmem:[#allocation3 + $0x6a] sm:$0xff] }
 0x3c0   : > { %2617 = vst.msk [vmem:[#allocation3 + $0x91] sm:$0xff] %vm2432_vm11, %v2531_v3  ;;  %2976 = vrot.lane.b32.xlu0 %v9791_v20, %s7606_s20  ;;  %v9934_v14 = vld [vmem:[#allocation3 + $0x62] sm:$0xff] }
 0x3c2   : > { %v2537_v22 = vpop.permute.xlu1 %2536  ;;  %v9796_v54 = vld [vmem:[#allocation3 + $0x81] sm:$0xff] }
 0x3c3   : > { %2620 = vst.msk [vmem:[#allocation3 + $0xb1] sm:$0xff] %vm2432_vm11, %v2537_v22  ;;  %2982 = vrot.lane.b32.xlu1 %v9796_v54, %s7606_s20  ;;  %v2535_v42 = vpop.permute.xlu0 %2534  ;;  %v9801_v29 = vld [vmem:[#allocation3 + $0x79] sm:$0xff]  ;;  %v9938_v36 = vld [vmem:[#allocation3 + $0x82] sm:$0xff] }
 0x3c4   : > { %2619 = vst.msk [vmem:[#allocation3 + $0xa9] sm:$0xff] %vm2432_vm11, %v2535_v42  ;;  %2980 = vrot.lane.b32.xlu0 %v9801_v29, %s7606_s20  ;;  %v9942_v0 = vld [vmem:[#allocation3 + $0x7a] sm:$0xff] }
 0x3c6   : > { %v2541_v28 = vpop.permute.xlu1 %2540  ;;  %v9806_v15 = vld [vmem:[#allocation3 + $0x99] sm:$0xff] }
 0x3c7   : > { %2622 = vst.msk [vmem:[#allocation3 + $0xc9] sm:$0xff] %vm2432_vm11, %v2541_v28  ;;  %2986 = vrot.lane.b32.xlu1 %v9806_v15, %s7606_s20  ;;  %v2539_v49 = vpop.permute.xlu0 %2538  ;;  %v9811_v11 = vld [vmem:[#allocation3 + $0x91] sm:$0xff]  ;;  %v9946_v55 = vld [vmem:[#allocation3 + $0x9a] sm:$0xff] }
 0x3c8   : > { %2621 = vst.msk [vmem:[#allocation3 + $0xc1] sm:$0xff] %vm2432_vm11, %v2539_v49  ;;  %2984 = vrot.lane.b32.xlu0 %v9811_v11, %s7606_s20  ;;  %v9950_v50 = vld [vmem:[#allocation3 + $0x92] sm:$0xff] }
 0x3ca   : > { %v2545_v48 = vpop.permute.xlu1 %2544  ;;  %v9816_v5 = vld [vmem:[#allocation3 + $0xb1] sm:$0xff] }
 0x3cb   : > { %2624 = vst.msk [vmem:[#allocation3 + $0xe1] sm:$0xff] %vm2432_vm11, %v2545_v48  ;;  %2990 = vrot.lane.b32.xlu1 %v9816_v5, %s7606_s20  ;;  %v2543_v35 = vpop.permute.xlu0 %2542  ;;  %v9821_v12 = vld [vmem:[#allocation3 + $0xa9] sm:$0xff]  ;;  %v9954_v30 = vld [vmem:[#allocation3 + $0xb2] sm:$0xff] }
 0x3cc   : > { %2623 = vst.msk [vmem:[#allocation3 + $0xd9] sm:$0xff] %vm2432_vm11, %v2543_v35  ;;  %2988 = vrot.lane.b32.xlu0 %v9821_v12, %s7606_s20  ;;  %v9958_v8 = vld [vmem:[#allocation3 + $0xaa] sm:$0xff] }
 0x3ce   : > { %v2549_v10 = vpop.permute.xlu1 %2548  ;;  %v9826_v4 = vld [vmem:[#allocation3 + $0xc9] sm:$0xff] }
 0x3cf   : > { %2626 = vst.msk [vmem:[#allocation3 + $0xf9] sm:$0xff] %vm2432_vm11, %v2549_v10  ;;  %2994 = vrot.lane.b32.xlu1 %v9826_v4, %s7606_s20  ;;  %v2547_v21 = vpop.permute.xlu0 %2546  ;;  %v9831_v44 = vld [vmem:[#allocation3 + $0xc1] sm:$0xff]  ;;  %v9962_v1 = vld [vmem:[#allocation3 + $0xca] sm:$0xff] }
 0x3d0   : > { %2625 = vst.msk [vmem:[#allocation3 + $0xf1] sm:$0xff] %vm2432_vm11, %v2547_v21  ;;  %2992 = vrot.lane.b32.xlu0 %v9831_v44, %s7606_s20  ;;  %v9966_v57 = vld [vmem:[#allocation3 + $0xc2] sm:$0xff] }
 0x3d2   : > { %v2553_v26 = vpop.permute.xlu1 %2552  ;;  %v9836_v27 = vld [vmem:[#allocation3 + $0xe1] sm:$0xff] }
 0x3d3   : > { %2628 = vst.msk [vmem:[#allocation3 + $0x111] sm:$0xff] %vm2432_vm11, %v2553_v26  ;;  %2998 = vrot.lane.b32.xlu1 %v9836_v27, %s7606_s20  ;;  %v2551_v18 = vpop.permute.xlu0 %2550  ;;  %v9841_v56 = vld [vmem:[#allocation3 + $0xd9] sm:$0xff]  ;;  %v9970_v24 = vld [vmem:[#allocation3 + $0xe2] sm:$0xff] }
 0x3d4   : > { %2627 = vst.msk [vmem:[#allocation3 + $0x109] sm:$0xff] %vm2432_vm11, %v2551_v18  ;;  %2996 = vrot.lane.b32.xlu0 %v9841_v56, %s7606_s20  ;;  %v9974_v38 = vld [vmem:[#allocation3 + $0xda] sm:$0xff] }
 0x3d6   : > { %v9846_v60 = vld [vmem:[#allocation3 + $0xf9] sm:$0xff] }
 0x3d7   : > { %3002 = vrot.lane.b32.xlu1 %v9846_v60, %s7606_s20  ;;  %v9851_v3 = vld [vmem:[#allocation3 + $0xf1] sm:$0xff]  ;;  %v9978_v40 = vld [vmem:[#allocation3 + $0xfa] sm:$0xff] }
 0x3d8   : > { %v2557_v41 = vpop.permute.xlu1 %2556  ;;  %3000 = vrot.lane.b32.xlu0 %v9851_v3, %s7606_s20  ;;  %v9982_v34 = vld [vmem:[#allocation3 + $0xf2] sm:$0xff] }
 0x3d9   : > { %2630 = vst.msk [vmem:[#allocation3 + $0x129] sm:$0xff] %vm2432_vm11, %v2557_v41  ;;  %v2555_v37 = vpop.permute.xlu0 %2554 }
 0x3da   : > { %2629 = vst.msk [vmem:[#allocation3 + $0x121] sm:$0xff] %vm2432_vm11, %v2555_v37  ;;  %v9856_v42 = vld [vmem:[#allocation3 + $0x111] sm:$0xff] }
 0x3db   : > { %3006 = vrot.lane.b32.xlu1 %v9856_v42, %s7606_s20  ;;  %v9861_v49 = vld [vmem:[#allocation3 + $0x109] sm:$0xff]  ;;  %v9986_v61 = vld [vmem:[#allocation3 + $0x112] sm:$0xff] }
 0x3dc   : > { %3004 = vrot.lane.b32.xlu0 %v9861_v49, %s7606_s20  ;;  %v9990_v16 = vld [vmem:[#allocation3 + $0x10a] sm:$0xff] }
 0x3dd   : > { %v2561_v22 = vpop.permute.xlu1 %2560 }
 0x3de   : > { %2632 = vst.msk [vmem:[#allocation3 + $0x141] sm:$0xff] %vm2432_vm11, %v2561_v22  ;;  %v2559_v28 = vpop.permute.xlu0 %2558 }
 0x3df   : > { %2631 = vst.msk [vmem:[#allocation3 + $0x139] sm:$0xff] %vm2432_vm11, %v2559_v28 }
 0x3e0   : > { %v9866_v35 = vld [vmem:[#allocation3 + $0x129] sm:$0xff] }
 0x3e1   : > { %3010 = vrot.lane.b32.xlu1 %v9866_v35, %s7606_s20  ;;  %v9871_v21 = vld [vmem:[#allocation3 + $0x121] sm:$0xff]  ;;  %v9994_v32 = vld [vmem:[#allocation3 + $0x12a] sm:$0xff] }
 0x3e2   : > { %3008 = vrot.lane.b32.xlu0 %v9871_v21, %s7606_s20  ;;  %v9998_v59 = vld [vmem:[#allocation3 + $0x122] sm:$0xff] }
 0x3e3   : > { %v2565_v48 = vpop.permute.xlu1 %2564 }
 0x3e4   : > { %2634 = vst.msk [vmem:[#allocation3 + $0x159] sm:$0xff] %vm2432_vm11, %v2565_v48  ;;  %v2563_v10 = vpop.permute.xlu0 %2562 }
 0x3e5   : > { %2633 = vst.msk [vmem:[#allocation3 + $0x151] sm:$0xff] %vm2432_vm11, %v2563_v10  ;;  %v9876_v18 = vld [vmem:[#allocation3 + $0x141] sm:$0xff] }
 0x3e6   : > { %3014 = vrot.lane.b32.xlu1 %v9876_v18, %s7606_s20  ;;  %v9881_v37 = vld [vmem:[#allocation3 + $0x139] sm:$0xff]  ;;  %v10006_v43 = vld [vmem:[#allocation3 + $0x142] sm:$0xff] }
 0x3e7   : > { %v2569_v26 = vpop.permute.xlu1 %2568  ;;  %3012 = vrot.lane.b32.xlu0 %v9881_v37, %s7606_s20  ;;  %v10010_v13 = vld [vmem:[#allocation3 + $0x13a] sm:$0xff] }
 0x3e8   : > { %2636 = vst.msk [vmem:[#allocation3 + $0x171] sm:$0xff] %vm2432_vm11, %v2569_v26  ;;  %v2567_v41 = vpop.permute.xlu0 %2566  ;;  %13762 = vst [vmem:[#allocation77_spill] sm:$0xff] %v10010_v13 }
 0x3e9   : > { %2635 = vst.msk [vmem:[#allocation3 + $0x169] sm:$0xff] %vm2432_vm11, %v2567_v41 }
 0x3eb   : > { %v2573_v22 = vpop.permute.xlu1 %2572  ;;  %v9886_v28 = vld [vmem:[#allocation3 + $0x159] sm:$0xff] }
 0x3ec   : > { %2638 = vst.msk [vmem:[#allocation3 + $0x189] sm:$0xff] %vm2432_vm11, %v2573_v22  ;;  %3018 = vrot.lane.b32.xlu1 %v9886_v28, %s7606_s20  ;;  %v2571_v48 = vpop.permute.xlu0 %2570  ;;  %v9891_v10 = vld [vmem:[#allocation3 + $0x151] sm:$0xff]  ;;  %v10018_v58 = vld [vmem:[#allocation3 + $0x15a] sm:$0xff] }
 0x3ed   : > { %2637 = vst.msk [vmem:[#allocation3 + $0x181] sm:$0xff] %vm2432_vm11, %v2571_v48  ;;  %3016 = vrot.lane.b32.xlu0 %v9891_v10, %s7606_s20  ;;  %v2704_v22 = vld [vmem:[#allocation3 + $0xa] sm:$0xff]  ;;  %v9906_v48 = vld [vmem:[#allocation3 + $0x22] sm:$0xff]  ;;  %13765 = vst [vmem:[#allocation76_spill] sm:$0xff] %v10018_v58 }
 0x3ee   : > { %v10022_v6 = vld [vmem:[#allocation3 + $0x152] sm:$0xff] }
 0x3ef   : > { %v9896_v26 = vld [vmem:[#allocation3 + $0x171] sm:$0xff]  ;;  %v10000_v23 = vpop.permute.xlu1 %2962  ;;  %13766 = vst [vmem:[#allocation98_spill] sm:$0xff] %v10022_v6 }
 0x3f0   : > { %3022 = vrot.lane.b32.xlu1 %v9896_v26, %s7606_s20  ;;  %v9900_v41 = vld [vmem:[#allocation3 + $0x169] sm:$0xff]  ;;  %13760 = vst [vmem:[#allocation57_spill] sm:$0xff] %v10000_v23  ;;  %v10004_v33 = vpop.permute.xlu0 %2960  ;;  %v10030_v23 = vld [vmem:[#allocation3 + $0x172] sm:$0xff] }
 0x3f1   : > { %3020 = vrot.lane.b32.xlu0 %v9900_v41, %s7606_s20  ;;  %13761 = vst [vmem:[#allocation26_spill] sm:$0xff] %v10004_v33  ;;  %13769 = vst [vmem:[#allocation97_spill] sm:$0xff] %v10030_v23  ;;  %v2642_v33 = vld [vmem:[#allocation3 + $0x20] sm:$0xff] }
 0x3f4   : > { %3090 = vrot.lane.b32.xlu1 %v2704_v22, %s7597_s8  ;;  %v9926_v22 = vld [vmem:[#allocation3 + $0x4a] sm:$0xff] }
 0x3f5   : > { %3088 = vrot.lane.b32.xlu0 %v2703_v46, %s7597_s8  ;;  %v9922_v46 = vld [vmem:[#allocation3 + $0x52] sm:$0xff] }
 0x3f8   : > { %3094 = vrot.lane.b32.xlu1 %v9906_v48, %s7597_s8 }
 0x3f9   : > { %3092 = vrot.lane.b32.xlu0 %v9910_v39, %s7597_s8 }
 0x3fc   : > { %3098 = vrot.lane.b32.xlu1 %v9914_v2, %s7597_s8 }
 0x3fd   : > { %3096 = vrot.lane.b32.xlu0 %v9918_v45, %s7597_s8 }
 0x400   : > { %3102 = vrot.lane.b32.xlu1 %v9922_v46, %s7597_s8 }
 0x401   : > { %3100 = vrot.lane.b32.xlu0 %v9926_v22, %s7597_s8 }
 0x404   : > { %3106 = vrot.lane.b32.xlu1 %v9930_v51, %s7597_s8 }
 0x405   : > { %3104 = vrot.lane.b32.xlu0 %v9934_v14, %s7597_s8 }
 0x408   : > { %3110 = vrot.lane.b32.xlu1 %v9938_v36, %s7597_s8 }
 0x409   : > { %3108 = vrot.lane.b32.xlu0 %v9942_v0, %s7597_s8 }
 0x40c   : > { %3114 = vrot.lane.b32.xlu1 %v9946_v55, %s7597_s8 }
 0x40d   : > { %3112 = vrot.lane.b32.xlu0 %v9950_v50, %s7597_s8 }
 0x410   : > { %3118 = vrot.lane.b32.xlu1 %v9954_v30, %s7597_s8 }
 0x411   : > { %3116 = vrot.lane.b32.xlu0 %v9958_v8, %s7597_s8 }
 0x414   : > { %3122 = vrot.lane.b32.xlu1 %v9962_v1, %s7597_s8 }
 0x415   : > { %3120 = vrot.lane.b32.xlu0 %v9966_v57, %s7597_s8 }
 0x418   : > { %3126 = vrot.lane.b32.xlu1 %v9970_v24, %s7597_s8 }
 0x419   : > { %3124 = vrot.lane.b32.xlu0 %v9974_v38, %s7597_s8 }
 0x41c   : > { %3130 = vrot.lane.b32.xlu1 %v9978_v40, %s7597_s8 }
 0x41d   : > { %3128 = vrot.lane.b32.xlu0 %v9982_v34, %s7597_s8 }
 0x420   : > { %3134 = vrot.lane.b32.xlu1 %v9986_v61, %s7597_s8 }
 0x421   : > { %3132 = vrot.lane.b32.xlu0 %v9990_v16, %s7597_s8 }
 0x424   : > { %3138 = vrot.lane.b32.xlu1 %v9994_v32, %s7597_s8 }
 0x425   : > { %3136 = vrot.lane.b32.xlu0 %v9998_v59, %s7597_s8  ;;  %v10014_v31 = vpop.permute.xlu1 %2966 }
 0x426   : > { %13763 = vst [vmem:[#allocation55_spill] sm:$0xff] %v10014_v31  ;;  %v10016_v7 = vpop.permute.xlu0 %2964 }
 0x427   : > { %13764 = vst [vmem:[#allocation133_spill] sm:$0xff] %v10016_v7  ;;  %v10034_v7 = vld [vmem:[#allocation3 + $0x16a] sm:$0xff] }
 0x428   : > { %3142 = vrot.lane.b32.xlu1 %v10006_v43, %s7597_s8 }
 0x429   : > { %3140 = vrot.lane.b32.xlu0 %v10010_v13, %s7597_s8  ;;  %v10026_v52 = vpop.permute.xlu1 %2970  ;;  %v10050_v13 = vld [vmem:[#allocation3 + $0x30] sm:$0xff] }
 0x42a   : > { %13767 = vst [vmem:[#allocation132_spill] sm:$0xff] %v10026_v52  ;;  %v10028_v19 = vpop.permute.xlu0 %2968  ;;  %13775 = vst [vmem:[#allocation30_spill] sm:$0xff] %v10050_v13 }
 0x42b   : > { %13768 = vst [vmem:[#allocation156_spill] sm:$0xff] %v10028_v19  ;;  %v10046_v19 = vld [vmem:[#allocation3 + $0x38] sm:$0xff] }
 0x42c   : > { %3146 = vrot.lane.b32.xlu1 %v10018_v58, %s7597_s8  ;;  %13773 = vst [vmem:[#allocation10_spill] sm:$0xff] %v10046_v19 }
 0x42d   : > { %3144 = vrot.lane.b32.xlu0 %v10022_v6, %s7597_s8  ;;  %v10038_v31 = vpop.permute.xlu1 %2974  ;;  %v2641_v6 = vld [vmem:[#allocation3 + $0x18] sm:$0xff] }
 0x42e   : > { %13770 = vst [vmem:[#allocation13_spill] sm:$0xff] %v10038_v31  ;;  %v10040_v58 = vpop.permute.xlu0 %2972 }
 0x42f   : > { %13771 = vst [vmem:[#allocation155_spill] sm:$0xff] %v10040_v58  ;;  %v10058_v58 = vld [vmem:[#allocation3 + $0x50] sm:$0xff] }
 0x430   : > { %3150 = vrot.lane.b32.xlu1 %v10030_v23, %s7597_s8  ;;  %13777 = vst [vmem:[#allocation59_spill] sm:$0xff] %v10058_v58 }
 0x431   : > { %3148 = vrot.lane.b32.xlu0 %v10034_v7, %s7597_s8  ;;  %v10044_v52 = vpop.permute.xlu1 %2978 }
 0x432   : > { %13772 = vst [vmem:[#allocation32_spill] sm:$0xff] %v10044_v52  ;;  %v10048_v23 = vpop.permute.xlu0 %2976 }
 0x433   : > { %13774 = vst [vmem:[#allocation61_spill] sm:$0xff] %v10048_v23  ;;  %v10070_v23 = vld [vmem:[#allocation3 + $0x68] sm:$0xff] }
 0x434   : > { %3218 = vrot.lane.b32.xlu1 %v2642_v33, %s7607_s21  ;;  %13781 = vst [vmem:[#allocation134_spill] sm:$0xff] %v10070_v23 }
 0x435   : > { %3216 = vrot.lane.b32.xlu0 %v2641_v6, %s7607_s21  ;;  %v10056_v31 = vpop.permute.xlu1 %2982  ;;  %v10062_v6 = vld [vmem:[#allocation3 + $0x48] sm:$0xff] }
 0x436   : > { %13776 = vst [vmem:[#allocation79_spill] sm:$0xff] %v10056_v31  ;;  %v10060_v33 = vpop.permute.xlu0 %2980  ;;  %13779 = vst [vmem:[#allocation78_spill] sm:$0xff] %v10062_v6 }
 0x437   : > { %13778 = vst [vmem:[#allocation135_spill] sm:$0xff] %v10060_v33  ;;  %v10082_v33 = vld [vmem:[#allocation3 + $0x80] sm:$0xff] }
 0x438   : > { %3222 = vrot.lane.b32.xlu1 %v10046_v19, %s7607_s21  ;;  %13785 = vst [vmem:[#allocation157_spill] sm:$0xff] %v10082_v33 }
 0x439   : > { %3220 = vrot.lane.b32.xlu0 %v10050_v13, %s7607_s21  ;;  %v10068_v52 = vpop.permute.xlu1 %2986  ;;  %v10074_v13 = vld [vmem:[#allocation3 + $0x60] sm:$0xff] }
 0x43a   : > { %13780 = vst [vmem:[#allocation100_spill] sm:$0xff] %v10068_v52  ;;  %v10072_v19 = vpop.permute.xlu0 %2984  ;;  %13783 = vst [vmem:[#allocation99_spill] sm:$0xff] %v10074_v13 }
 0x43b   : > { %13782 = vst [vmem:[#allocation158_spill] sm:$0xff] %v10072_v19  ;;  %v10094_v19 = vld [vmem:[#allocation3 + $0x98] sm:$0xff] }
 0x43c   : > { %3226 = vrot.lane.b32.xlu1 %v10058_v58, %s7607_s21  ;;  %13789 = vst [vmem:[#allocation34_spill] sm:$0xff] %v10094_v19 }
 0x43d   : > { %3224 = vrot.lane.b32.xlu0 %v10062_v6, %s7607_s21  ;;  %v10080_v31 = vpop.permute.xlu1 %2990  ;;  %v10086_v6 = vld [vmem:[#allocation3 + $0x78] sm:$0xff] }
 0x43e   : > { %13784 = vst [vmem:[#allocation19_spill] sm:$0xff] %v10080_v31  ;;  %v10084_v58 = vpop.permute.xlu0 %2988  ;;  %13787 = vst [vmem:[#allocation16_spill] sm:$0xff] %v10086_v6 }
 0x43f   : > { %13786 = vst [vmem:[#allocation36_spill] sm:$0xff] %v10084_v58  ;;  %v10106_v58 = vld [vmem:[#allocation3 + $0xb0] sm:$0xff] }
 0x440   : > { %3230 = vrot.lane.b32.xlu1 %v10070_v23, %s7607_s21  ;;  %13793 = vst [vmem:[#allocation80_spill] sm:$0xff] %v10106_v58 }
 0x441   : > { %3228 = vrot.lane.b32.xlu0 %v10074_v13, %s7607_s21  ;;  %v10092_v52 = vpop.permute.xlu1 %2994  ;;  %v10098_v13 = vld [vmem:[#allocation3 + $0x90] sm:$0xff] }
 0x442   : > { %13788 = vst [vmem:[#allocation65_spill] sm:$0xff] %v10092_v52  ;;  %v10096_v23 = vpop.permute.xlu0 %2992  ;;  %13791 = vst [vmem:[#allocation63_spill] sm:$0xff] %v10098_v13 }
 0x443   : > { %13790 = vst [vmem:[#allocation81_spill] sm:$0xff] %v10096_v23  ;;  %v10118_v23 = vld [vmem:[#allocation3 + $0xc8] sm:$0xff] }
 0x444   : > { %3234 = vrot.lane.b32.xlu1 %v10082_v33, %s7607_s21  ;;  %13797 = vst [vmem:[#allocation101_spill] sm:$0xff] %v10118_v23 }
 0x445   : > { %3232 = vrot.lane.b32.xlu0 %v10086_v6, %s7607_s21  ;;  %v10104_v31 = vpop.permute.xlu1 %2998  ;;  %v10110_v6 = vld [vmem:[#allocation3 + $0xa8] sm:$0xff] }
 0x446   : > { %13792 = vst [vmem:[#allocation137_spill] sm:$0xff] %v10104_v31  ;;  %v10108_v33 = vpop.permute.xlu0 %2996  ;;  %13795 = vst [vmem:[#allocation136_spill] sm:$0xff] %v10110_v6 }
 0x447   : > { %13794 = vst [vmem:[#allocation102_spill] sm:$0xff] %v10108_v33  ;;  %v10130_v33 = vld [vmem:[#allocation3 + $0xe0] sm:$0xff] }
 0x448   : > { %3238 = vrot.lane.b32.xlu1 %v10094_v19, %s7607_s21  ;;  %13801 = vst [vmem:[#allocation21_spill] sm:$0xff] %v10130_v33 }
 0x449   : > { %3236 = vrot.lane.b32.xlu0 %v10098_v13, %s7607_s21  ;;  %v10116_v52 = vpop.permute.xlu1 %3002  ;;  %v10122_v13 = vld [vmem:[#allocation3 + $0xc0] sm:$0xff] }
 0x44a   : > { %13796 = vst [vmem:[#allocation160_spill] sm:$0xff] %v10116_v52  ;;  %v10120_v19 = vpop.permute.xlu0 %3000  ;;  %13799 = vst [vmem:[#allocation159_spill] sm:$0xff] %v10122_v13 }
 0x44b   : > { %13798 = vst [vmem:[#allocation23_spill] sm:$0xff] %v10120_v19  ;;  %v10142_v19 = vld [vmem:[#allocation3 + $0xf8] sm:$0xff] }
 0x44c   : > { %3242 = vrot.lane.b32.xlu1 %v10106_v58, %s7607_s21  ;;  %13805 = vst [vmem:[#allocation68_spill] sm:$0xff] %v10142_v19 }
 0x44d   : > { %3240 = vrot.lane.b32.xlu0 %v10110_v6, %s7607_s21  ;;  %v10128_v31 = vpop.permute.xlu1 %3006  ;;  %v10134_v6 = vld [vmem:[#allocation3 + $0xd8] sm:$0xff] }
 0x44e   : > { %13800 = vst [vmem:[#allocation40_spill] sm:$0xff] %v10128_v31  ;;  %v10132_v58 = vpop.permute.xlu0 %3004  ;;  %13803 = vst [vmem:[#allocation38_spill] sm:$0xff] %v10134_v6 }
 0x44f   : > { %13802 = vst [vmem:[#allocation116_spill] sm:$0xff] %v10132_v58  ;;  %v10154_v58 = vld [vmem:[#allocation3 + $0x110] sm:$0xff] }
 0x450   : > { %3246 = vrot.lane.b32.xlu1 %v10118_v23, %s7607_s21  ;;  %13809 = vst [vmem:[#allocation138_spill] sm:$0xff] %v10154_v58 }
 0x451   : > { %3244 = vrot.lane.b32.xlu0 %v10122_v13, %s7607_s21  ;;  %v10146_v13 = vld [vmem:[#allocation3 + $0xf0] sm:$0xff] }
 0x452   : > { %13807 = vst [vmem:[#allocation82_spill] sm:$0xff] %v10146_v13 }
 0x453   : > { %v10140_v52 = vpop.permute.xlu1 %3010 }
 0x454   : > { %3250 = vrot.lane.b32.xlu1 %v10130_v33, %s7607_s21  ;;  %13804 = vst [vmem:[#allocation83_spill] sm:$0xff] %v10140_v52  ;;  %v10144_v23 = vpop.permute.xlu0 %3008 }
 0x455   : > { %3248 = vrot.lane.b32.xlu0 %v10134_v6, %s7607_s21  ;;  %13806 = vst [vmem:[#allocation139_spill] sm:$0xff] %v10144_v23  ;;  %v10158_v6 = vld [vmem:[#allocation3 + $0x108] sm:$0xff] }
 0x456   : > { %13811 = vst [vmem:[#allocation103_spill] sm:$0xff] %v10158_v6  ;;  %v10166_v23 = vld [vmem:[#allocation3 + $0x128] sm:$0xff] }
 0x457   : > { %13813 = vst [vmem:[#allocation161_spill] sm:$0xff] %v10166_v23 }
 0x458   : > { %3254 = vrot.lane.b32.xlu1 %v10142_v19, %s7607_s21  ;;  %v10152_v31 = vpop.permute.xlu1 %3014 }
 0x459   : > { %3252 = vrot.lane.b32.xlu0 %v10146_v13, %s7607_s21  ;;  %13808 = vst [vmem:[#allocation104_spill] sm:$0xff] %v10152_v31  ;;  %v10156_v33 = vpop.permute.xlu0 %3012  ;;  %v10170_v13 = vld [vmem:[#allocation3 + $0x120] sm:$0xff] }
 0x45a   : > { %13810 = vst [vmem:[#allocation162_spill] sm:$0xff] %v10156_v33  ;;  %13815 = vst [vmem:[#allocation25_spill] sm:$0xff] %v10170_v13  ;;  %v10178_v33 = vld [vmem:[#allocation3 + $0x140] sm:$0xff] }
 0x45b   : > { %13817 = vst [vmem:[#allocation42_spill] sm:$0xff] %v10178_v33 }
 0x45c   : > { %3258 = vrot.lane.b32.xlu1 %v10154_v58, %s7607_s21 }
 0x45d   : > { %3256 = vrot.lane.b32.xlu0 %v10158_v6, %s7607_s21  ;;  %v10182_v6 = vld [vmem:[#allocation3 + $0x138] sm:$0xff] }
 0x45e   : > { %v10164_v52 = vpop.permute.xlu1 %3018  ;;  %13819 = vst [vmem:[#allocation117_spill] sm:$0xff] %v10182_v6 }
 0x45f   : > { %13812 = vst [vmem:[#allocation27_spill] sm:$0xff] %v10164_v52  ;;  %v10168_v19 = vpop.permute.xlu0 %3016 }
 0x460   : > { %13814 = vst [vmem:[#allocation44_spill] sm:$0xff] %v10168_v19  ;;  %3262 = vrot.lane.b32.xlu1 %v10166_v23, %s7607_s21  ;;  %v10190_v19 = vld [vmem:[#allocation3 + $0x158] sm:$0xff] }
 0x461   : > { %3260 = vrot.lane.b32.xlu0 %v10170_v13, %s7607_s21  ;;  %13821 = vst [vmem:[#allocation84_spill] sm:$0xff] %v10190_v19  ;;  %v10194_v13 = vld [vmem:[#allocation3 + $0x150] sm:$0xff] }
 0x462   : > { %v10176_v31 = vpop.permute.xlu1 %3022 }
 0x463   : > { %13816 = vst [vmem:[#allocation118_spill] sm:$0xff] %v10176_v31  ;;  %v10180_v58 = vpop.permute.xlu0 %3020 }
 0x464   : > { %13818 = vst [vmem:[#allocation85_spill] sm:$0xff] %v10180_v58  ;;  %3266 = vrot.lane.b32.xlu1 %v10178_v33, %s7607_s21  ;;  %v10202_v58 = vld [vmem:[#allocation3 + $0x170] sm:$0xff] }
 0x465   : > { %3264 = vrot.lane.b32.xlu0 %v10182_v6, %s7607_s21  ;;  %13824 = vst [vmem:[#allocation164_spill] sm:$0xff] %v10202_v58  ;;  %v10206_v6 = vld [vmem:[#allocation3 + $0x168] sm:$0xff] }
 0x466   : > { %v10188_v52 = vpop.permute.xlu1 %3090 }
 0x467   : > { %13820 = vst [vmem:[#allocation141_spill] sm:$0xff] %v10188_v52  ;;  %v10192_v23 = vpop.permute.xlu0 %3088 }
 0x468   : > { %13822 = vst [vmem:[#allocation106_spill] sm:$0xff] %v10192_v23  ;;  %3270 = vrot.lane.b32.xlu1 %v10190_v19, %s7607_s21  ;;  %v10216_v19 = vld [vmem:[#allocation3 + $0x188] sm:$0xff] }
 0x469   : > { %3268 = vrot.lane.b32.xlu0 %v10194_v13, %s7607_s21 }
 0x46a   : > { %v10200_v31 = vpop.permute.xlu1 %3094 }
 0x46b   : > { %13823 = vst [vmem:[#allocation140_spill] sm:$0xff] %v10200_v31  ;;  %v10204_v33 = vpop.permute.xlu0 %3092  ;;  %v10220_v31 = vld [vmem:[#allocation3 + $0x180] sm:$0xff] }
 0x46c   : > { %13825 = vst [vmem:[#allocation105_spill] sm:$0xff] %v10204_v33  ;;  %3274 = vrot.lane.b32.xlu1 %v10202_v58, %s7607_s21  ;;  %13828 = vst [vmem:[#allocation48_spill] sm:$0xff] %v10220_v31 }
 0x46d   : > { %3272 = vrot.lane.b32.xlu0 %v10206_v6, %s7607_s21 }
 0x46e   : > { %v10212_v52 = vpop.permute.xlu1 %3098 }
 0x46f   : > { %13826 = vst [vmem:[#allocation31_spill] sm:$0xff] %v10212_v52  ;;  %v10214_v23 = vpop.permute.xlu0 %3096 }
 0x470   : > { %13827 = vst [vmem:[#allocation163_spill] sm:$0xff] %v10214_v23  ;;  %3278 = vrot.lane.b32.xlu1 %v10216_v19, %s7607_s21 }
 0x471   : > { %3276 = vrot.lane.b32.xlu0 %v10220_v31, %s7607_s21 }
 0x472   : > { %v10224_v33 = vpop.permute.xlu1 %3102 }
 0x473   : > { %13829 = vst [vmem:[#allocation29_spill] sm:$0xff] %v10224_v33  ;;  %v10226_v58 = vpop.permute.xlu0 %3100 }
 0x474   : > { %3346 = vrot.lane.b32.xlu1 %v9756_v63, %s7598_s9 }
 0x475   : > { %3344 = vrot.lane.b32.xlu0 %v9761_v53, %s7598_s9 }
 0x476   : > { %v10232_v52 = vpop.permute.xlu1 %3106 }
 0x477   : > { %v10234_v23 = vpop.permute.xlu0 %3104 }
 0x478   : > { %3350 = vrot.lane.b32.xlu1 %v9766_v62, %s7598_s9 }
 0x479   : > { %3348 = vrot.lane.b32.xlu0 %v9771_v17, %s7598_s9 }
 0x47a   : > { %v10240_v31 = vpop.permute.xlu1 %3110 }
 0x47b   : > { %13830 = vst [vmem:[#allocation120_spill] sm:$0xff] %v10240_v31  ;;  %v10242_v33 = vpop.permute.xlu0 %3108 }
 0x47c   : > { %3354 = vrot.lane.b32.xlu1 %v9776_v25, %s7598_s9 }
 0x47d   : > { %3352 = vrot.lane.b32.xlu0 %v9781_v9, %s7598_s9 }
 0x47e   : > { %v10248_v63 = vpop.permute.xlu1 %3114 }
 0x47f   : > { %13831 = vst [vmem:[#allocation46_spill] sm:$0xff] %v10248_v63  ;;  %v10250_v53 = vpop.permute.xlu0 %3112  ;;  %v2905_v63 = vld [vmem:[#allocation3 + $0x9a] sm:$0xff] }
 0x480   : > { %13832 = vst [vmem:[#allocation87_spill] sm:$0xff] %v10250_v53  ;;  %3358 = vrot.lane.b32.xlu1 %v9786_v47, %s7598_s9 }
 0x481   : > { %3356 = vrot.lane.b32.xlu0 %v9791_v20, %s7598_s9 }
 0x482   : > { %v10256_v62 = vpop.permute.xlu1 %3118 }
 0x483   : > { %13833 = vst [vmem:[#allocation119_spill] sm:$0xff] %v10256_v62  ;;  %v10258_v17 = vpop.permute.xlu0 %3116 }
 0x484   : > { %13834 = vst [vmem:[#allocation143_spill] sm:$0xff] %v10258_v17  ;;  %3362 = vrot.lane.b32.xlu1 %v9796_v54, %s7598_s9 }
 0x485   : > { %3360 = vrot.lane.b32.xlu0 %v9801_v29, %s7598_s9 }
 0x486   : > { %v10264_v25 = vpop.permute.xlu1 %3122 }
 0x487   : > { %13835 = vst [vmem:[#allocation86_spill] sm:$0xff] %v10264_v25  ;;  %v10266_v9 = vpop.permute.xlu0 %3120 }
 0x488   : > { %13836 = vst [vmem:[#allocation108_spill] sm:$0xff] %v10266_v9  ;;  %3366 = vrot.lane.b32.xlu1 %v9806_v15, %s7598_s9  ;;  %v2871_v9 = vld [vmem:[#allocation3 + $0x81] sm:$0xff] }
 0x489   : > { %3364 = vrot.lane.b32.xlu0 %v9811_v11, %s7598_s9 }
 0x48a   : > { %v10272_v47 = vpop.permute.xlu1 %3126 }
 0x48b   : > { %13837 = vst [vmem:[#allocation142_spill] sm:$0xff] %v10272_v47  ;;  %v10274_v20 = vpop.permute.xlu0 %3124  ;;  %v13903_v47 = vld [vmem:[#allocation21_spill] sm:$0xff] }
 0x48c   : > { %13838 = vst [vmem:[#allocation166_spill] sm:$0xff] %v10274_v20  ;;  %3370 = vrot.lane.b32.xlu1 %v9816_v5, %s7598_s9  ;;  %v2862_v20 = vld [vmem:[#allocation3 + $0x198] sm:$0xff] }
 0x48d   : > { %3368 = vrot.lane.b32.xlu0 %v9821_v12, %s7598_s9 }
 0x48e   : > { %v10280_v54 = vpop.permute.xlu1 %3130 }
 0x48f   : > { %13839 = vst [vmem:[#allocation107_spill] sm:$0xff] %v10280_v54  ;;  %v10282_v29 = vpop.permute.xlu0 %3128  ;;  %v13895_v54 = vld [vmem:[#allocation80_spill] sm:$0xff] }
 0x490   : > { %13840 = vst [vmem:[#allocation35_spill] sm:$0xff] %v10282_v29  ;;  %3374 = vrot.lane.b32.xlu1 %v9826_v4, %s7598_s9 }
 0x491   : > { %3372 = vrot.lane.b32.xlu0 %v9831_v44, %s7598_s9 }
 0x492   : > { %v10288_v15 = vpop.permute.xlu1 %3134 }
 0x493   : > { %13841 = vst [vmem:[#allocation165_spill] sm:$0xff] %v10288_v15  ;;  %v10290_v11 = vpop.permute.xlu0 %3132  ;;  %v13887_v15 = vld [vmem:[#allocation157_spill] sm:$0xff] }
 0x494   : > { %13842 = vst [vmem:[#allocation52_spill] sm:$0xff] %v10290_v11  ;;  %3378 = vrot.lane.b32.xlu1 %v9836_v27, %s7598_s9 }
 0x495   : > { %3376 = vrot.lane.b32.xlu0 %v9841_v56, %s7598_s9 }
 0x496   : > { %v10296_v5 = vpop.permute.xlu1 %3138 }
 0x497   : > { %13843 = vst [vmem:[#allocation33_spill] sm:$0xff] %v10296_v5  ;;  %v10298_v12 = vpop.permute.xlu0 %3136 }
 0x498   : > { %13844 = vst [vmem:[#allocation122_spill] sm:$0xff] %v10298_v12  ;;  %3382 = vrot.lane.b32.xlu1 %v9846_v60, %s7598_s9 }
 0x499   : > { %3380 = vrot.lane.b32.xlu0 %v9851_v3, %s7598_s9 }
 0x49a   : > { %v10304_v4 = vpop.permute.xlu1 %3142 }
 0x49b   : > { %13845 = vst [vmem:[#allocation50_spill] sm:$0xff] %v10304_v4  ;;  %v10306_v44 = vpop.permute.xlu0 %3140 }
 0x49c   : > { %13846 = vst [vmem:[#allocation89_spill] sm:$0xff] %v10306_v44  ;;  %3386 = vrot.lane.b32.xlu1 %v9856_v42, %s7598_s9 }
 0x49d   : > { %3384 = vrot.lane.b32.xlu0 %v9861_v49, %s7598_s9 }
 0x49e   : > { %v10312_v27 = vpop.permute.xlu1 %3146 }
 0x49f   : > { %13847 = vst [vmem:[#allocation121_spill] sm:$0xff] %v10312_v27  ;;  %v10314_v56 = vpop.permute.xlu0 %3144 }
 0x4a0   : > { %13848 = vst [vmem:[#allocation145_spill] sm:$0xff] %v10314_v56  ;;  %3390 = vrot.lane.b32.xlu1 %v9866_v35, %s7598_s9 }
 0x4a1   : > { %3388 = vrot.lane.b32.xlu0 %v9871_v21, %s7598_s9 }
 0x4a2   : > { %v10320_v60 = vpop.permute.xlu1 %3150 }
 0x4a3   : > { %13849 = vst [vmem:[#allocation88_spill] sm:$0xff] %v10320_v60  ;;  %v10322_v3 = vpop.permute.xlu0 %3148  ;;  %v10348_v60 = vld [vmem:[#allocation3 + $0x189] sm:$0xff] }
 0x4a4   : > { %13850 = vst [vmem:[#allocation110_spill] sm:$0xff] %v10322_v3  ;;  %3394 = vrot.lane.b32.xlu1 %v9876_v18, %s7598_s9 }
 0x4a5   : > { %3392 = vrot.lane.b32.xlu0 %v9881_v37, %s7598_s9 }
 0x4a6   : > { %v10328_v42 = vpop.permute.xlu1 %3218 }
 0x4a7   : > { %v10330_v49 = vpop.permute.xlu0 %3216 }
 0x4a8   : > { %3398 = vrot.lane.b32.xlu1 %v9886_v28, %s7598_s9  ;;  %v10352_v28 = vld [vmem:[#allocation3 + $0x181] sm:$0xff] }
 0x4a9   : > { %3396 = vrot.lane.b32.xlu0 %v9891_v10, %s7598_s9 }
 0x4aa   : > { %v10336_v35 = vpop.permute.xlu1 %3222 }
 0x4ab   : > { %v10338_v21 = vpop.permute.xlu0 %3220 }
 0x4ac   : > { %3402 = vrot.lane.b32.xlu1 %v9896_v26, %s7598_s9 }
 0x4ad   : > { %3400 = vrot.lane.b32.xlu0 %v9900_v41, %s7598_s9 }
 0x4ae   : > { %v10344_v18 = vpop.permute.xlu1 %3226 }
 0x4af   : > { %v10346_v37 = vpop.permute.xlu0 %3224 }
 0x4b0   : > { %3406 = vrot.lane.b32.xlu1 %v10348_v60, %s7598_s9 }
 0x4b1   : > { %3404 = vrot.lane.b32.xlu0 %v10352_v28, %s7598_s9 }
 0x4b2   : > { %v10356_v10 = vpop.permute.xlu1 %3230 }
 0x4b3   : > { %v10358_v26 = vpop.permute.xlu0 %3228 }
 0x4b4   : > { %3474 = vrot.lane.b32.xlu1 %v9906_v48, %s7608_s22 }
 0x4b5   : > { %3472 = vrot.lane.b32.xlu0 %v9910_v39, %s7608_s22 }
 0x4b6   : > { %v10364_v41 = vpop.permute.xlu1 %3234 }
 0x4b7   : > { %v10366_v3 = vpop.permute.xlu0 %3232 }
 0x4b8   : > { %3478 = vrot.lane.b32.xlu1 %v9914_v2, %s7608_s22 }
 0x4b9   : > { %3476 = vrot.lane.b32.xlu0 %v9918_v45, %s7608_s22 }
 0x4ba   : > { %v10372_v27 = vpop.permute.xlu1 %3238 }
 0x4bb   : > { %13851 = vst [vmem:[#allocation144_spill] sm:$0xff] %v10372_v27  ;;  %v10374_v56 = vpop.permute.xlu0 %3236 }
 0x4bc   : > { %13852 = vst [vmem:[#allocation168_spill] sm:$0xff] %v10374_v56  ;;  %3482 = vrot.lane.b32.xlu1 %v9922_v46, %s7608_s22 }
 0x4bd   : > { %3480 = vrot.lane.b32.xlu0 %v9926_v22, %s7608_s22 }
 0x4be   : > { %v10380_v39 = vpop.permute.xlu1 %3242 }
 0x4bf   : > { %13853 = vst [vmem:[#allocation109_spill] sm:$0xff] %v10380_v39  ;;  %v10382_v48 = vpop.permute.xlu0 %3240 }
 0x4c0   : > { %13854 = vst [vmem:[#allocation39_spill] sm:$0xff] %v10382_v48  ;;  %3486 = vrot.lane.b32.xlu1 %v9930_v51, %s7608_s22  ;;  %v2903_v48 = vld [vmem:[#allocation3 + $0x82] sm:$0xff] }
 0x4c1   : > { %3484 = vrot.lane.b32.xlu0 %v9934_v14, %s7608_s22 }
 0x4c2   : > { %v10388_v45 = vpop.permute.xlu1 %3246 }
 0x4c3   : > { %13855 = vst [vmem:[#allocation167_spill] sm:$0xff] %v10388_v45  ;;  %v10390_v2 = vpop.permute.xlu0 %3244  ;;  %v2873_v45 = vld [vmem:[#allocation3 + $0x99] sm:$0xff] }
 0x4c4   : > { %13856 = vst [vmem:[#allocation56_spill] sm:$0xff] %v10390_v2  ;;  %3490 = vrot.lane.b32.xlu1 %v9938_v36, %s7608_s22  ;;  %v2872_v2 = vld [vmem:[#allocation3 + $0x91] sm:$0xff] }
 0x4c5   : > { %3488 = vrot.lane.b32.xlu0 %v9942_v0, %s7608_s22 }
 0x4c6   : > { %v10396_v46 = vpop.permute.xlu1 %3250 }
 0x4c7   : > { %13857 = vst [vmem:[#allocation37_spill] sm:$0xff] %v10396_v46  ;;  %v10398_v22 = vpop.permute.xlu0 %3248 }
 0x4c8   : > { %13858 = vst [vmem:[#allocation124_spill] sm:$0xff] %v10398_v22  ;;  %3494 = vrot.lane.b32.xlu1 %v9946_v55, %s7608_s22  ;;  %v2869_v22 = vld [vmem:[#allocation3 + $0x69] sm:$0xff] }
 0x4c9   : > { %3492 = vrot.lane.b32.xlu0 %v9950_v50, %s7608_s22 }
 0x4ca   : > { %v10404_v14 = vpop.permute.xlu1 %3254 }
 0x4cb   : > { %13859 = vst [vmem:[#allocation54_spill] sm:$0xff] %v10404_v14  ;;  %v10406_v51 = vpop.permute.xlu0 %3252  ;;  %v13899_v14 = vld [vmem:[#allocation101_spill] sm:$0xff] }
 0x4cc   : > { %13860 = vst [vmem:[#allocation91_spill] sm:$0xff] %v10406_v51  ;;  %3498 = vrot.lane.b32.xlu1 %v9954_v30, %s7608_s22 }
 0x4cd   : > { %3496 = vrot.lane.b32.xlu0 %v9958_v8, %s7608_s22 }
 0x4ce   : > { %v10412_v0 = vpop.permute.xlu1 %3258 }
 0x4cf   : > { %13861 = vst [vmem:[#allocation123_spill] sm:$0xff] %v10412_v0  ;;  %v10414_v36 = vpop.permute.xlu0 %3256  ;;  %v13891_v0 = vld [vmem:[#allocation34_spill] sm:$0xff] }
 0x4d0   : > { %13862 = vst [vmem:[#allocation147_spill] sm:$0xff] %v10414_v36  ;;  %3502 = vrot.lane.b32.xlu1 %v9962_v1, %s7608_s22 }
 0x4d1   : > { %3500 = vrot.lane.b32.xlu0 %v9966_v57, %s7608_s22 }
 0x4d2   : > { %v10420_v50 = vpop.permute.xlu1 %3262 }
 0x4d3   : > { %13863 = vst [vmem:[#allocation90_spill] sm:$0xff] %v10420_v50  ;;  %v10422_v55 = vpop.permute.xlu0 %3260  ;;  %v13883_v50 = vld [vmem:[#allocation134_spill] sm:$0xff] }
 0x4d4   : > { %13864 = vst [vmem:[#allocation112_spill] sm:$0xff] %v10422_v55  ;;  %3506 = vrot.lane.b32.xlu1 %v9970_v24, %s7608_s22 }
 0x4d5   : > { %3504 = vrot.lane.b32.xlu0 %v9974_v38, %s7608_s22 }
 0x4d6   : > { %v10428_v8 = vpop.permute.xlu1 %3266 }
 0x4d7   : > { %13865 = vst [vmem:[#allocation146_spill] sm:$0xff] %v10428_v8  ;;  %v10430_v30 = vpop.permute.xlu0 %3264  ;;  %v13879_v8 = vld [vmem:[#allocation59_spill] sm:$0xff] }
 0x4d8   : > { %13866 = vst [vmem:[#allocation170_spill] sm:$0xff] %v10430_v30  ;;  %3510 = vrot.lane.b32.xlu1 %v9978_v40, %s7608_s22  ;;  %v13880_v30 = vld [vmem:[#allocation78_spill] sm:$0xff] }
 0x4d9   : > { %3508 = vrot.lane.b32.xlu0 %v9982_v34, %s7608_s22 }
 0x4da   : > { %v10436_v57 = vpop.permute.xlu1 %3270 }
 0x4db   : > { %13867 = vst [vmem:[#allocation111_spill] sm:$0xff] %v10436_v57  ;;  %v10438_v1 = vpop.permute.xlu0 %3268  ;;  %v10480_v57 = vld [vmem:[#allocation3 + $0x18a] sm:$0xff] }
 0x4dc   : > { %13868 = vst [vmem:[#allocation43_spill] sm:$0xff] %v10438_v1  ;;  %3514 = vrot.lane.b32.xlu1 %v9986_v61, %s7608_s22  ;;  %v13873_v61 = vld [vmem:[#allocation77_spill] sm:$0xff]  ;;  %v13878_v1 = vld [vmem:[#allocation30_spill] sm:$0xff] }
 0x4dd   : > { %3512 = vrot.lane.b32.xlu0 %v9990_v16, %s7608_s22 }
 0x4de   : > { %v10444_v38 = vpop.permute.xlu1 %3274 }
 0x4df   : > { %13869 = vst [vmem:[#allocation169_spill] sm:$0xff] %v10444_v38  ;;  %v10446_v24 = vpop.permute.xlu0 %3272 }
 0x4e0   : > { %13870 = vst [vmem:[#allocation60_spill] sm:$0xff] %v10446_v24  ;;  %3518 = vrot.lane.b32.xlu1 %v9994_v32, %s7608_s22  ;;  %v13874_v24 = vld [vmem:[#allocation76_spill] sm:$0xff]  ;;  %v13875_v32 = vld [vmem:[#allocation98_spill] sm:$0xff] }
 0x4e1   : > { %3516 = vrot.lane.b32.xlu0 %v9998_v59, %s7608_s22 }
 0x4e2   : > { %v10452_v34 = vpop.permute.xlu1 %3278 }
 0x4e3   : > { %13871 = vst [vmem:[#allocation41_spill] sm:$0xff] %v10452_v34  ;;  %v10454_v40 = vpop.permute.xlu0 %3276 }
 0x4e4   : > { %13872 = vst [vmem:[#allocation126_spill] sm:$0xff] %v10454_v40  ;;  %3522 = vrot.lane.b32.xlu1 %v10006_v43, %s7608_s22  ;;  %v13876_v40 = vld [vmem:[#allocation97_spill] sm:$0xff] }
 0x4e5   : > { %3520 = vrot.lane.b32.xlu0 %v13873_v61, %s7608_s22 }
 0x4e6   : > { %v10460_v16 = vpop.permute.xlu1 %3346 }
 0x4e7   : > { %v10462_v38 = vpop.permute.xlu0 %3344 }
 0x4e8   : > { %3526 = vrot.lane.b32.xlu1 %v13874_v24, %s7608_s22  ;;  %v10484_v24 = vld [vmem:[#allocation3 + $0x182] sm:$0xff] }
 0x4e9   : > { %3524 = vrot.lane.b32.xlu0 %v13875_v32, %s7608_s22 }
 0x4ea   : > { %v10468_v59 = vpop.permute.xlu1 %3350 }
 0x4eb   : > { %v10470_v34 = vpop.permute.xlu0 %3348 }
 0x4ec   : > { %3530 = vrot.lane.b32.xlu1 %v13876_v40, %s7608_s22 }
 0x4ed   : > { %3528 = vrot.lane.b32.xlu0 %v10034_v7, %s7608_s22  ;;  %v13877_v7 = vld [vmem:[#allocation10_spill] sm:$0xff] }
 0x4ee   : > { %v10476_v43 = vpop.permute.xlu1 %3354 }
 0x4ef   : > { %v10478_v61 = vpop.permute.xlu0 %3352 }
 0x4f0   : > { %3534 = vrot.lane.b32.xlu1 %v10480_v57, %s7608_s22 }
 0x4f1   : > { %3532 = vrot.lane.b32.xlu0 %v10484_v24, %s7608_s22 }
 0x4f2   : > { %v10488_v32 = vpop.permute.xlu1 %3358 }
 0x4f3   : > { %v10490_v40 = vpop.permute.xlu0 %3356 }
 0x4f4   : > { %3602 = vrot.lane.b32.xlu1 %v13877_v7, %s7599_s10  ;;  %v13884_v7 = vld [vmem:[#allocation99_spill] sm:$0xff] }
 0x4f5   : > { %3600 = vrot.lane.b32.xlu0 %v13878_v1, %s7599_s10 }
 0x4f6   : > { %v10496_v4 = vpop.permute.xlu1 %3362 }
 0x4f7   : > { %v10498_v44 = vpop.permute.xlu0 %3360 }
 0x4f8   : > { %3606 = vrot.lane.b32.xlu1 %v13879_v8, %s7599_s10  ;;  %v13888_v8 = vld [vmem:[#allocation16_spill] sm:$0xff] }
 0x4f9   : > { %3604 = vrot.lane.b32.xlu0 %v13880_v30, %s7599_s10 }
 0x4fa   : > { %v10504_v5 = vpop.permute.xlu1 %3366 }
 0x4fb   : > { %13881 = vst [vmem:[#allocation58_spill] sm:$0xff] %v10504_v5  ;;  %v10506_v12 = vpop.permute.xlu0 %3364 }
 0x4fc   : > { %13882 = vst [vmem:[#allocation93_spill] sm:$0xff] %v10506_v12  ;;  %3610 = vrot.lane.b32.xlu1 %v13883_v50, %s7599_s10  ;;  %v13892_v50 = vld [vmem:[#allocation63_spill] sm:$0xff] }
 0x4fd   : > { %3608 = vrot.lane.b32.xlu0 %v13884_v7, %s7599_s10 }
 0x4fe   : > { %v10512_v1 = vpop.permute.xlu1 %3370 }
 0x4ff   : > { %13885 = vst [vmem:[#allocation125_spill] sm:$0xff] %v10512_v1  ;;  %v10514_v55 = vpop.permute.xlu0 %3368 }
 0x500   : > { %13886 = vst [vmem:[#allocation149_spill] sm:$0xff] %v10514_v55  ;;  %3614 = vrot.lane.b32.xlu1 %v13887_v15, %s7599_s10  ;;  %v13896_v15 = vld [vmem:[#allocation136_spill] sm:$0xff] }
 0x501   : > { %3612 = vrot.lane.b32.xlu0 %v13888_v8, %s7599_s10  ;;  %v2901_v55 = vld [vmem:[#allocation3 + $0x6a] sm:$0xff] }
 0x502   : > { %v10520_v30 = vpop.permute.xlu1 %3374 }
 0x503   : > { %13889 = vst [vmem:[#allocation92_spill] sm:$0xff] %v10520_v30  ;;  %v10522_v11 = vpop.permute.xlu0 %3372  ;;  %v2870_v30 = vld [vmem:[#allocation3 + $0x79] sm:$0xff] }
 0x504   : > { %13890 = vst [vmem:[#allocation114_spill] sm:$0xff] %v10522_v11  ;;  %3618 = vrot.lane.b32.xlu1 %v13891_v0, %s7599_s10  ;;  %v13900_v0 = vld [vmem:[#allocation159_spill] sm:$0xff] }
 0x505   : > { %3616 = vrot.lane.b32.xlu0 %v13892_v50, %s7599_s10 }
 0x506   : > { %v10528_v7 = vpop.permute.xlu1 %3378 }
 0x507   : > { %13893 = vst [vmem:[#allocation148_spill] sm:$0xff] %v10528_v7  ;;  %v10530_v36 = vpop.permute.xlu0 %3376 }
 0x508   : > { %13894 = vst [vmem:[#allocation4_spill] sm:$0xff] %v10530_v36  ;;  %3622 = vrot.lane.b32.xlu1 %v13895_v54, %s7599_s10  ;;  %v13904_v54 = vld [vmem:[#allocation38_spill] sm:$0xff]  ;;  %v2867_v36 = vld [vmem:[#allocation3 + $0x51] sm:$0xff] }
 0x509   : > { %3620 = vrot.lane.b32.xlu0 %v13896_v15, %s7599_s10 }
 0x50a   : > { %v10536_v8 = vpop.permute.xlu1 %3382 }
 0x50b   : > { %13897 = vst [vmem:[#allocation113_spill] sm:$0xff] %v10536_v8  ;;  %v10538_v29 = vpop.permute.xlu0 %3380 }
 0x50c   : > { %13898 = vst [vmem:[#allocation47_spill] sm:$0xff] %v10538_v29  ;;  %3626 = vrot.lane.b32.xlu1 %v13899_v14, %s7599_s10  ;;  %v13907_v29 = vld [vmem:[#allocation68_spill] sm:$0xff]  ;;  %v13908_v14 = vld [vmem:[#allocation82_spill] sm:$0xff] }
 0x50d   : > { %3624 = vrot.lane.b32.xlu0 %v13900_v0, %s7599_s10 }
 0x50e   : > { %v10544_v50 = vpop.permute.xlu1 %3386 }
 0x50f   : > { %13901 = vst [vmem:[#allocation171_spill] sm:$0xff] %v10544_v50  ;;  %v10546_v51 = vpop.permute.xlu0 %3384 }
 0x510   : > { %13902 = vst [vmem:[#allocation64_spill] sm:$0xff] %v10546_v51  ;;  %3630 = vrot.lane.b32.xlu1 %v13903_v47, %s7599_s10  ;;  %v13911_v51 = vld [vmem:[#allocation138_spill] sm:$0xff]  ;;  %v13912_v47 = vld [vmem:[#allocation103_spill] sm:$0xff] }
 0x511   : > { %3628 = vrot.lane.b32.xlu0 %v13904_v54, %s7599_s10 }
 0x512   : > { %v10552_v15 = vpop.permute.xlu1 %3390 }
 0x513   : > { %13905 = vst [vmem:[#allocation45_spill] sm:$0xff] %v10552_v15  ;;  %v10554_v8 = vpop.permute.xlu0 %3388 }
 0x514   : > { %13906 = vst [vmem:[#allocation128_spill] sm:$0xff] %v10554_v8  ;;  %3634 = vrot.lane.b32.xlu1 %v13907_v29, %s7599_s10  ;;  %v13915_v8 = vld [vmem:[#allocation161_spill] sm:$0xff] }
 0x515   : > { %3632 = vrot.lane.b32.xlu0 %v13908_v14, %s7599_s10  ;;  %v13916_v29 = vld [vmem:[#allocation25_spill] sm:$0xff] }
 0x516   : > { %v10560_v0 = vpop.permute.xlu1 %3394 }
 0x517   : > { %13909 = vst [vmem:[#allocation94_spill] sm:$0xff] %v10560_v0  ;;  %v10562_v50 = vpop.permute.xlu0 %3392 }
 0x518   : > { %13910 = vst [vmem:[#allocation127_spill] sm:$0xff] %v10562_v50  ;;  %3638 = vrot.lane.b32.xlu1 %v13911_v51, %s7599_s10  ;;  %v13919_v50 = vld [vmem:[#allocation42_spill] sm:$0xff]  ;;  %v13920_v51 = vld [vmem:[#allocation117_spill] sm:$0xff] }
 0x519   : > { %3636 = vrot.lane.b32.xlu0 %v13912_v47, %s7599_s10 }
 0x51a   : > { %v10568_v54 = vpop.permute.xlu1 %3398 }
 0x51b   : > { %13913 = vst [vmem:[#allocation151_spill] sm:$0xff] %v10568_v54  ;;  %v10570_v15 = vpop.permute.xlu0 %3396 }
 0x51c   : > { %13914 = vst [vmem:[#allocation115_spill] sm:$0xff] %v10570_v15  ;;  %3642 = vrot.lane.b32.xlu1 %v13915_v8, %s7599_s10  ;;  %v13923_v15 = vld [vmem:[#allocation84_spill] sm:$0xff] }
 0x51d   : > { %3640 = vrot.lane.b32.xlu0 %v13916_v29, %s7599_s10 }
 0x51e   : > { %v10576_v14 = vpop.permute.xlu1 %3402 }
 0x51f   : > { %13917 = vst [vmem:[#allocation150_spill] sm:$0xff] %v10576_v14  ;;  %v10578_v0 = vpop.permute.xlu0 %3400  ;;  %v13924_v14 = vld [vmem:[#allocation164_spill] sm:$0xff] }
 0x520   : > { %13918 = vst [vmem:[#allocation172_spill] sm:$0xff] %v10578_v0  ;;  %3646 = vrot.lane.b32.xlu1 %v13919_v50, %s7599_s10  ;;  %v4211_v50 = vld [vmem:[%s13162_s3] sm:$0xff] }
 0x521   : > { %3644 = vrot.lane.b32.xlu0 %v13920_v51, %s7599_s10  ;;  %v4212_v51 = vld [vmem:[%s13162_s3 + $0x8] sm:$0xff] }
 0x522   : > { %v10584_v47 = vpop.permute.xlu1 %3406 }
 0x523   : > { %13921 = vst [vmem:[#allocation49_spill] sm:$0xff] %v10584_v47  ;;  %v10586_v54 = vpop.permute.xlu0 %3404 }
 0x524   : > { %13922 = vst [vmem:[#allocation62_spill] sm:$0xff] %v10586_v54  ;;  %3650 = vrot.lane.b32.xlu1 %v13923_v15, %s7599_s10  ;;  %v7459_v15 = vpack.c.bf16 %v4212_v51, %v4211_v50  ;;  %v2863_v54 = vld [vmem:[#allocation3 + $0x1a0] sm:$0xff] }
 0x525   : > { %3648 = vrot.lane.b32.xlu0 %v10194_v13, %s7599_s10 }
 0x526   : > { %v10592_v8 = vpop.permute.xlu1 %3474  ;;  %7460 = vmatprep.subr.bf16.mxu0 %v7459_v15  ;;  %7475 = vmatprep.subr.bf16.mxu1 %v7459_v15 }
 0x527   : > { %v10594_v29 = vpop.permute.xlu0 %3472  ;;  %7462 = vmatpush3.bf16.msra.mxu0 %v7459_v15  ;;  %7478 = vmatpush3.bf16.msra.mxu1 %v7459_v15 }
 0x528   : > { %3654 = vrot.lane.b32.xlu1 %v13924_v14, %s7599_s10  ;;  %v13925_v14 = vld [vmem:[#allocation48_spill] sm:$0xff] }
 0x529   : > { %3652 = vrot.lane.b32.xlu0 %v10206_v6, %s7599_s10 }
 0x52a   : > { %v10606_v13 = vpop.permute.xlu1 %3478 }
 0x52b   : > { %v10608_v47 = vpop.permute.xlu0 %3476 }
 0x52c   : > { %3658 = vrot.lane.b32.xlu1 %v10216_v19, %s7599_s10  ;;  %v2865_v19 = vld [vmem:[#allocation3 + $0x39] sm:$0xff] }
 0x52d   : > { %3656 = vrot.lane.b32.xlu0 %v13925_v14, %s7599_s10  ;;  %v2864_v14 = vld [vmem:[#allocation3 + $0x31] sm:$0xff] }
 0x52e   : > { %v10614_v0 = vpop.permute.xlu1 %3482 }
 0x52f   : > { %v10616_v6 = vpop.permute.xlu0 %3480 }
 0x530   : > { %3662 = vrot.lane.b32.xlu1 %v2863_v54, %s7599_s10  ;;  %v2866_v54 = vld [vmem:[#allocation3 + $0x49] sm:$0xff] }
 0x531   : > { %3660 = vrot.lane.b32.xlu0 %v2862_v20, %s7599_s10 }
 0x532   : > { %v10620_v50 = vpop.permute.xlu1 %3486 }
 0x533   : > { %v10622_v51 = vpop.permute.xlu0 %3484 }
 0x534   : > { %3730 = vrot.lane.b32.xlu1 %v2865_v19, %s7609_s29  ;;  %v2868_v19 = vld [vmem:[#allocation3 + $0x61] sm:$0xff] }
 0x535   : > { %3728 = vrot.lane.b32.xlu0 %v2864_v14, %s7609_s29 }
 0x536   : > { %v10626_v15 = vpop.permute.xlu1 %3490 }
 0x537   : > { %v10628_v7 = vpop.permute.xlu0 %3488 }
 0x538   : > { %3734 = vrot.lane.b32.xlu1 %v2867_v36, %s7609_s29  ;;  %v4213_v36 = vld [vmem:[%s13162_s3 + $0x10] sm:$0xff] }
 0x539   : > { %3732 = vrot.lane.b32.xlu0 %v2866_v54, %s7609_s29  ;;  %v4214_v54 = vld [vmem:[%s13162_s3 + $0x18] sm:$0xff] }
 0x53a   : > { %v10632_v20 = vpop.permute.xlu1 %3494 }
 0x53b   : > { %13926 = vst [vmem:[#allocation129_spill] sm:$0xff] %v10632_v20  ;;  %v10634_v46 = vpop.permute.xlu0 %3492 }
 0x53c   : > { %13927 = vst [vmem:[#allocation152_spill] sm:$0xff] %v10634_v46  ;;  %3738 = vrot.lane.b32.xlu1 %v2869_v22, %s7609_s29  ;;  %v7463_v22 = vpack.c.bf16 %v4214_v54, %v4213_v36  ;;  %v2875_v36 = vld [vmem:[#allocation3 + $0xb1] sm:$0xff] }
 0x53d   : > { %3736 = vrot.lane.b32.xlu0 %v2868_v19, %s7609_s29 }
 0x53e   : > { %v10638_v14 = vpop.permute.xlu1 %3498  ;;  %7464 = vmatprep.subr.bf16.mxu0 %v7463_v22  ;;  %7476 = vmatprep.subr.bf16.mxu1 %v7463_v22 }
 0x53f   : > { %13928 = vst [vmem:[#allocation77_spill] sm:$0xff] %v10638_v14  ;;  %v10640_v25 = vpop.permute.xlu0 %3496  ;;  %7466 = vmatpush3.bf16.msra.mxu0 %v7463_v22  ;;  %7479 = vmatpush3.bf16.msra.mxu1 %v7463_v22  ;;  %v2877_v22 = vld [vmem:[#allocation3 + $0xc9] sm:$0xff]  ;;  %v2897_v14 = vld [vmem:[#allocation3 + $0x3a] sm:$0xff] }
 0x540   : > { %13929 = vst [vmem:[#allocation76_spill] sm:$0xff] %v10640_v25  ;;  %3742 = vrot.lane.b32.xlu1 %v2871_v9, %s7609_s29  ;;  %v2899_v25 = vld [vmem:[#allocation3 + $0x52] sm:$0xff] }
 0x541   : > { %3740 = vrot.lane.b32.xlu0 %v2870_v30, %s7609_s29  ;;  %v2874_v30 = vld [vmem:[#allocation3 + $0xa9] sm:$0xff] }
 0x542   : > { %v10650_v19 = vpop.permute.xlu1 %3502 }
 0x543   : > { %13930 = vst [vmem:[#allocation98_spill] sm:$0xff] %v10650_v19  ;;  %v10652_v11 = vpop.permute.xlu0 %3500 }
 0x544   : > { %13931 = vst [vmem:[#allocation97_spill] sm:$0xff] %v10652_v11  ;;  %3746 = vrot.lane.b32.xlu1 %v2873_v45, %s7609_s29  ;;  %v2876_v45 = vld [vmem:[#allocation3 + $0xc1] sm:$0xff] }
 0x545   : > { %3744 = vrot.lane.b32.xlu0 %v2872_v2, %s7609_s29 }
 0x546   : > { %v10656_v62 = vpop.permute.xlu1 %3506 }
 0x547   : > { %13932 = vst [vmem:[#allocation10_spill] sm:$0xff] %v10656_v62  ;;  %v10658_v9 = vpop.permute.xlu0 %3504 }
 0x548   : > { %13933 = vst [vmem:[#allocation30_spill] sm:$0xff] %v10658_v9  ;;  %3750 = vrot.lane.b32.xlu1 %v2875_v36, %s7609_s29  ;;  %v2879_v9 = vld [vmem:[#allocation3 + $0xe1] sm:$0xff]  ;;  %v2878_v36 = vld [vmem:[#allocation3 + $0xd9] sm:$0xff] }
 0x549   : > { %3748 = vrot.lane.b32.xlu0 %v2874_v30, %s7609_s29 }
 0x54a   : > { %v10662_v54 = vpop.permute.xlu1 %3510 }
 0x54b   : > { %13934 = vst [vmem:[#allocation59_spill] sm:$0xff] %v10662_v54  ;;  %v10664_v19 = vpop.permute.xlu0 %3508 }
 0x54c   : > { %13935 = vst [vmem:[#allocation78_spill] sm:$0xff] %v10664_v19  ;;  %3754 = vrot.lane.b32.xlu1 %v2877_v22, %s7609_s29  ;;  %v2881_v19 = vld [vmem:[#allocation3 + $0xf9] sm:$0xff]  ;;  %v2880_v22 = vld [vmem:[#allocation3 + $0xf1] sm:$0xff] }
 0x54d   : > { %3752 = vrot.lane.b32.xlu0 %v2876_v45, %s7609_s29  ;;  %v4215_v45 = vld [vmem:[%s13162_s3 + $0x20] sm:$0xf] }
 0x54e   : > { %v10668_v2 = vpop.permute.xlu1 %3514  ;;  %7335 = vmatprep.subr.msk.mxu0 %vm4320_vm13, %v4215_v45  ;;  %7477 = vmatprep.subr.msk.mxu1 %vm4320_vm13, %v4215_v45 }
 0x54f   : > { %13936 = vst [vmem:[#allocation134_spill] sm:$0xff] %v10668_v2  ;;  %v10670_v62 = vpop.permute.xlu0 %3512  ;;  %7336 = vmatpush3.msk.msra.mxu0 %vm4320_vm13, %v4215_v45  ;;  %7480 = vmatpush3.msk.msra.mxu1 %vm4320_vm13, %v4215_v45  ;;  %v2885_v2 = vld [vmem:[#allocation3 + $0x129] sm:$0xff]  ;;  %v2887_v45 = vld [vmem:[#allocation3 + $0x141] sm:$0xff] }
 0x550   : > { %13937 = vst [vmem:[#allocation99_spill] sm:$0xff] %v10670_v62  ;;  %3758 = vrot.lane.b32.xlu1 %v2879_v9, %s7609_s29 }
 0x551   : > { %3756 = vrot.lane.b32.xlu0 %v2878_v36, %s7609_s29 }
 0x552   : > { %v10674_v30 = vpop.permute.xlu1 %3518 }
 0x553   : > { %13938 = vst [vmem:[#allocation157_spill] sm:$0xff] %v10674_v30  ;;  %v10676_v54 = vpop.permute.xlu0 %3516  ;;  %v2883_v30 = vld [vmem:[#allocation3 + $0x111] sm:$0xff] }
 0x554   : > { %13939 = vst [vmem:[#allocation16_spill] sm:$0xff] %v10676_v54  ;;  %3762 = vrot.lane.b32.xlu1 %v2881_v19, %s7609_s29  ;;  %v2882_v19 = vld [vmem:[#allocation3 + $0x109] sm:$0xff] }
 0x555   : > { %3760 = vrot.lane.b32.xlu0 %v2880_v22, %s7609_s29 }
 0x556   : > { %v10684_v9 = vpop.permute.xlu1 %3522 }
 0x557   : > { %13940 = vst [vmem:[#allocation34_spill] sm:$0xff] %v10684_v9  ;;  %v10688_v36 = vpop.permute.xlu0 %3520  ;;  %v2884_v9 = vld [vmem:[#allocation3 + $0x121] sm:$0xff] }
 0x558   : > { %13941 = vst [vmem:[#allocation63_spill] sm:$0xff] %v10688_v36  ;;  %3766 = vrot.lane.b32.xlu1 %v2883_v30, %s7609_s29  ;;  %v2886_v30 = vld [vmem:[#allocation3 + $0x139] sm:$0xff] }
 0x559   : > { %3764 = vrot.lane.b32.xlu0 %v2882_v19, %s7609_s29 }
 0x55a   : > { %v10693_v54 = vpop.permute.xlu1 %3526 }
 0x55b   : > { %13942 = vst [vmem:[#allocation80_spill] sm:$0xff] %v10693_v54  ;;  %v10695_v22 = vpop.permute.xlu0 %3524 }
 0x55c   : > { %13943 = vst [vmem:[#allocation136_spill] sm:$0xff] %v10695_v22  ;;  %3770 = vrot.lane.b32.xlu1 %v2885_v2, %s7609_s29  ;;  %v2889_v22 = vld [vmem:[#allocation3 + $0x159] sm:$0xff]  ;;  %v2888_v2 = vld [vmem:[#allocation3 + $0x151] sm:$0xff] }
 0x55d   : > { %3768 = vrot.lane.b32.xlu0 %v2884_v9, %s7609_s29 }
 0x55e   : > { %v10699_v62 = vpop.permute.xlu1 %3530 }
 0x55f   : > { %13944 = vst [vmem:[#allocation101_spill] sm:$0xff] %v10699_v62  ;;  %v10701_v36 = vpop.permute.xlu0 %3528 }
 0x560   : > { %13945 = vst [vmem:[#allocation159_spill] sm:$0xff] %v10701_v36  ;;  %3774 = vrot.lane.b32.xlu1 %v2887_v45, %s7609_s29  ;;  %v2891_v36 = vld [vmem:[#allocation3 + $0x171] sm:$0xff]  ;;  %v2890_v45 = vld [vmem:[#allocation3 + $0x169] sm:$0xff] }
 0x561   : > { %3772 = vrot.lane.b32.xlu0 %v2886_v30, %s7609_s29 }
 0x562   : > { %v10705_v19 = vpop.permute.xlu1 %3534 }
 0x563   : > { %13946 = vst [vmem:[#allocation21_spill] sm:$0xff] %v10705_v19  ;;  %v10707_v54 = vpop.permute.xlu0 %3532 }
 0x564   : > { %13947 = vst [vmem:[#allocation38_spill] sm:$0xff] %v10707_v54  ;;  %3778 = vrot.lane.b32.xlu1 %v2889_v22, %s7609_s29  ;;  %v2895_v22 = vld [vmem:[#allocation3 + $0x1a1] sm:$0xff]  ;;  %v2894_v54 = vld [vmem:[#allocation3 + $0x199] sm:$0xff] }
 0x565   : > { %3776 = vrot.lane.b32.xlu0 %v2888_v2, %s7609_s29 }
 0x566   : > { %v10711_v9 = vpop.permute.xlu1 %3602 }
 0x567   : > { %v10713_v62 = vpop.permute.xlu0 %3600 }
 0x568   : > { %3782 = vrot.lane.b32.xlu1 %v2891_v36, %s7609_s29 }
 0x569   : > { %3780 = vrot.lane.b32.xlu0 %v2890_v45, %s7609_s29 }
 0x56a   : > { %v10717_v30 = vpop.permute.xlu1 %3606 }
 0x56b   : > { %v10719_v19 = vpop.permute.xlu0 %3604 }
 0x56c   : > { %3786 = vrot.lane.b32.xlu1 %v10348_v60, %s7609_s29  ;;  %v2896_v60 = vld [vmem:[#allocation3 + $0x32] sm:$0xff] }
 0x56d   : > { %3784 = vrot.lane.b32.xlu0 %v10352_v28, %s7609_s29 }
 0x56e   : > { %v10725_v2 = vpop.permute.xlu1 %3610 }
 0x56f   : > { %v10727_v11 = vpop.permute.xlu0 %3608 }
 0x570   : > { %3790 = vrot.lane.b32.xlu1 %v2895_v22, %s7609_s29  ;;  %v2898_v22 = vld [vmem:[#allocation3 + $0x4a] sm:$0xff] }
 0x571   : > { %3788 = vrot.lane.b32.xlu0 %v2894_v54, %s7609_s29 }
 0x572   : > { %v10731_v36 = vpop.permute.xlu1 %3614 }
 0x573   : > { %v10733_v45 = vpop.permute.xlu0 %3612 }
 0x574   : > { %3858 = vrot.lane.b32.xlu1 %v2897_v14, %s7600_s11  ;;  %v2900_v14 = vld [vmem:[#allocation3 + $0x62] sm:$0xff] }
 0x575   : > { %3856 = vrot.lane.b32.xlu0 %v2896_v60, %s7600_s11 }
 0x576   : > { %v10737_v28 = vpop.permute.xlu1 %3618 }
 0x577   : > { %13948 = vst [vmem:[#allocation68_spill] sm:$0xff] %v10737_v28  ;;  %v10739_v17 = vpop.permute.xlu0 %3616 }
 0x578   : > { %3862 = vrot.lane.b32.xlu1 %v2899_v25, %s7600_s11  ;;  %v2902_v25 = vld [vmem:[#allocation3 + $0x7a] sm:$0xff] }
 0x579   : > { %3860 = vrot.lane.b32.xlu0 %v2898_v22, %s7600_s11 }
 0x57a   : > { %v10743_v54 = vpop.permute.xlu1 %3622 }
 0x57b   : > { %13949 = vst [vmem:[#allocation82_spill] sm:$0xff] %v10743_v54  ;;  %v10745_v1 = vpop.permute.xlu0 %3620 }
 0x57c   : > { %13950 = vst [vmem:[#allocation138_spill] sm:$0xff] %v10745_v1  ;;  %3866 = vrot.lane.b32.xlu1 %v2901_v55, %s7600_s11  ;;  %v2904_v55 = vld [vmem:[#allocation3 + $0x92] sm:$0xff] }
 0x57d   : > { %3864 = vrot.lane.b32.xlu0 %v2900_v14, %s7600_s11 }
 0x57e   : > { %v10749_v60 = vpop.permute.xlu1 %3626 }
 0x57f   : > { %13951 = vst [vmem:[#allocation103_spill] sm:$0xff] %v10749_v60  ;;  %v10751_v39 = vpop.permute.xlu0 %3624 }
 0x580   : > { %13952 = vst [vmem:[#allocation161_spill] sm:$0xff] %v10751_v39  ;;  %3870 = vrot.lane.b32.xlu1 %v2903_v48, %s7600_s11  ;;  %v2907_v39 = vld [vmem:[#allocation3 + $0xb2] sm:$0xff]  ;;  %v2906_v48 = vld [vmem:[#allocation3 + $0xaa] sm:$0xff] }
 0x581   : > { %3868 = vrot.lane.b32.xlu0 %v2902_v25, %s7600_s11 }
 0x582   : > { %v10755_v22 = vpop.permute.xlu1 %3630 }
 0x583   : > { %13953 = vst [vmem:[#allocation25_spill] sm:$0xff] %v10755_v22  ;;  %v10757_v54 = vpop.permute.xlu0 %3628 }
 0x584   : > { %13954 = vst [vmem:[#allocation42_spill] sm:$0xff] %v10757_v54  ;;  %3874 = vrot.lane.b32.xlu1 %v2905_v63, %s7600_s11  ;;  %v2909_v54 = vld [vmem:[#allocation3 + $0xca] sm:$0xff]  ;;  %v2908_v63 = vld [vmem:[#allocation3 + $0xc2] sm:$0xff] }
 0x585   : > { %3872 = vrot.lane.b32.xlu0 %v2904_v55, %s7600_s11 }
 0x586   : > { %v10761_v14 = vpop.permute.xlu1 %3634 }
 0x587   : > { %13955 = vst [vmem:[#allocation117_spill] sm:$0xff] %v10761_v14  ;;  %v10763_v60 = vpop.permute.xlu0 %3632 }
 0x588   : > { %13956 = vst [vmem:[#allocation84_spill] sm:$0xff] %v10763_v60  ;;  %3878 = vrot.lane.b32.xlu1 %v2907_v39, %s7600_s11  ;;  %v2911_v60 = vld [vmem:[#allocation3 + $0xe2] sm:$0xff]  ;;  %v2910_v39 = vld [vmem:[#allocation3 + $0xda] sm:$0xff] }
 0x589   : > { %3876 = vrot.lane.b32.xlu0 %v2906_v48, %s7600_s11 }
 0x58a   : > { %v10767_v25 = vpop.permute.xlu1 %3638 }
 0x58b   : > { %13957 = vst [vmem:[#allocation164_spill] sm:$0xff] %v10767_v25  ;;  %v10769_v22 = vpop.permute.xlu0 %3636 }
 0x58c   : > { %13958 = vst [vmem:[#allocation48_spill] sm:$0xff] %v10769_v22  ;;  %3882 = vrot.lane.b32.xlu1 %v2909_v54, %s7600_s11  ;;  %v2913_v22 = vld [vmem:[#allocation3 + $0xfa] sm:$0xff]  ;;  %v2912_v54 = vld [vmem:[#allocation3 + $0xf2] sm:$0xff] }
 0x58d   : > { %3880 = vrot.lane.b32.xlu0 %v2908_v63, %s7600_s11 }
 0x58e   : > { %v10773_v55 = vpop.permute.xlu1 %3642 }
 0x58f   : > { %13959 = vst [vmem:[#allocation173_spill] sm:$0xff] %v10773_v55  ;;  %v10775_v14 = vpop.permute.xlu0 %3640 }
 0x590   : > { %13960 = vst [vmem:[#allocation174_spill] sm:$0xff] %v10775_v14  ;;  %3886 = vrot.lane.b32.xlu1 %v2911_v60, %s7600_s11  ;;  %v2915_v14 = vld [vmem:[#allocation3 + $0x112] sm:$0xff]  ;;  %v2914_v60 = vld [vmem:[#allocation3 + $0x10a] sm:$0xff] }
 0x591   : > { %3884 = vrot.lane.b32.xlu0 %v2910_v39, %s7600_s11 }
 0x592   : > { %v10779_v48 = vpop.permute.xlu1 %3646 }
 0x593   : > { %13961 = vst [vmem:[#allocation175_spill] sm:$0xff] %v10779_v48  ;;  %v10781_v25 = vpop.permute.xlu0 %3644 }
 0x594   : > { %13962 = vst [vmem:[#allocation176_spill] sm:$0xff] %v10781_v25  ;;  %3890 = vrot.lane.b32.xlu1 %v2913_v22, %s7600_s11  ;;  %v2917_v25 = vld [vmem:[#allocation3 + $0x12a] sm:$0xff]  ;;  %v2916_v22 = vld [vmem:[#allocation3 + $0x122] sm:$0xff] }
 0x595   : > { %3888 = vrot.lane.b32.xlu0 %v2912_v54, %s7600_s11 }
 0x596   : > { %v10785_v63 = vpop.permute.xlu1 %3650 }
 0x597   : > { %13963 = vst [vmem:[#allocation177_spill] sm:$0xff] %v10785_v63  ;;  %v10787_v55 = vpop.permute.xlu0 %3648 }
 0x598   : > { %13964 = vst [vmem:[#allocation178_spill] sm:$0xff] %v10787_v55  ;;  %3894 = vrot.lane.b32.xlu1 %v2915_v14, %s7600_s11  ;;  %v2919_v55 = vld [vmem:[#allocation3 + $0x142] sm:$0xff]  ;;  %v2918_v14 = vld [vmem:[#allocation3 + $0x13a] sm:$0xff] }
 0x599   : > { %3892 = vrot.lane.b32.xlu0 %v2914_v60, %s7600_s11 }
 0x59a   : > { %v10791_v39 = vpop.permute.xlu1 %3654 }
 0x59b   : > { %13965 = vst [vmem:[#allocation179_spill] sm:$0xff] %v10791_v39  ;;  %v10793_v48 = vpop.permute.xlu0 %3652 }
 0x59c   : > { %13966 = vst [vmem:[#allocation180_spill] sm:$0xff] %v10793_v48  ;;  %3898 = vrot.lane.b32.xlu1 %v2917_v25, %s7600_s11  ;;  %v2921_v48 = vld [vmem:[#allocation3 + $0x15a] sm:$0xff]  ;;  %v2920_v25 = vld [vmem:[#allocation3 + $0x152] sm:$0xff] }
 0x59d   : > { %3896 = vrot.lane.b32.xlu0 %v2916_v22, %s7600_s11 }
 0x59e   : > { %v10797_v54 = vpop.permute.xlu1 %3658 }
 0x59f   : > { %13967 = vst [vmem:[#allocation181_spill] sm:$0xff] %v10797_v54  ;;  %v10799_v63 = vpop.permute.xlu0 %3656 }
 0x5a0   : > { %13968 = vst [vmem:[#allocation182_spill] sm:$0xff] %v10799_v63  ;;  %3902 = vrot.lane.b32.xlu1 %v2919_v55, %s7600_s11  ;;  %v2923_v63 = vld [vmem:[#allocation3 + $0x172] sm:$0xff]  ;;  %v2922_v55 = vld [vmem:[#allocation3 + $0x16a] sm:$0xff] }
 0x5a1   : > { %3900 = vrot.lane.b32.xlu0 %v2918_v14, %s7600_s11 }
 0x5a2   : > { %v10803_v60 = vpop.permute.xlu1 %3662 }
 0x5a3   : > { %13969 = vst [vmem:[#allocation183_spill] sm:$0xff] %v10803_v60  ;;  %v10805_v39 = vpop.permute.xlu0 %3660 }
 0x5a4   : > { %13970 = vst [vmem:[#allocation184_spill] sm:$0xff] %v10805_v39  ;;  %3906 = vrot.lane.b32.xlu1 %v2921_v48, %s7600_s11  ;;  %v2927_v48 = vld [vmem:[#allocation3 + $0x1a2] sm:$0xff]  ;;  %v2926_v39 = vld [vmem:[#allocation3 + $0x19a] sm:$0xff] }
 0x5a5   : > { %3904 = vrot.lane.b32.xlu0 %v2920_v25, %s7600_s11 }
 0x5a6   : > { %v10809_v22 = vpop.permute.xlu1 %3730 }
 0x5a7   : > { %v10811_v54 = vpop.permute.xlu0 %3728 }
 0x5a8   : > { %3910 = vrot.lane.b32.xlu1 %v2923_v63, %s7600_s11 }
 0x5a9   : > { %3908 = vrot.lane.b32.xlu0 %v2922_v55, %s7600_s11 }
 0x5aa   : > { %v10815_v14 = vpop.permute.xlu1 %3734 }
 0x5ab   : > { %v10817_v60 = vpop.permute.xlu0 %3732 }
 0x5ac   : > { %3914 = vrot.lane.b32.xlu1 %v10480_v57, %s7600_s11 }
 0x5ad   : > { %3912 = vrot.lane.b32.xlu0 %v10484_v24, %s7600_s11 }
 0x5ae   : > { %v10823_v25 = vpop.permute.xlu1 %3738 }
 0x5af   : > { %v10825_v1 = vpop.permute.xlu0 %3736 }
 0x5b0   : > { %3918 = vrot.lane.b32.xlu1 %v2927_v48, %s7600_s11 }
 0x5b1   : > { %3916 = vrot.lane.b32.xlu0 %v2926_v39, %s7600_s11 }
 0x5b2   : > { %v10829_v63 = vpop.permute.xlu1 %3742 }
 0x5b3   : > { %v10831_v55 = vpop.permute.xlu0 %3740 }
 0x5b6   : > { %v10833_v20 = vpop.permute.xlu1 %3746 }
 0x5b7   : > { %13971 = vst [vmem:[#allocation185_spill] sm:$0xff] %v10833_v20  ;;  %v10835_v57 = vpop.permute.xlu0 %3744 }
 0x5b8   : > { %13972 = vst [vmem:[#allocation186_spill] sm:$0xff] %v10835_v57 }
 0x5ba   : > { %v10837_v53 = vpop.permute.xlu1 %3750 }
 0x5bb   : > { %13973 = vst [vmem:[#allocation187_spill] sm:$0xff] %v10837_v53  ;;  %v10839_v24 = vpop.permute.xlu0 %3748 }
 0x5bc   : > { %13974 = vst [vmem:[#allocation188_spill] sm:$0xff] %v10839_v24 }
 0x5be   : > { %v10841_v46 = vpop.permute.xlu1 %3754 }
 0x5bf   : > { %13975 = vst [vmem:[#allocation189_spill] sm:$0xff] %v10841_v46  ;;  %v10843_v5 = vpop.permute.xlu0 %3752 }
 0x5c0   : > { %13976 = vst [vmem:[#allocation190_spill] sm:$0xff] %v10843_v5 }
 0x5c2   : > { %v10845_v12 = vpop.permute.xlu1 %3758 }
 0x5c3   : > { %13977 = vst [vmem:[#allocation191_spill] sm:$0xff] %v10845_v12  ;;  %v10847_v48 = vpop.permute.xlu0 %3756 }
 0x5c4   : > { %13978 = vst [vmem:[#allocation192_spill] sm:$0xff] %v10847_v48 }
 0x5c6   : > { %v10849_v39 = vpop.permute.xlu1 %3762 }
 0x5c7   : > { %13979 = vst [vmem:[#allocation193_spill] sm:$0xff] %v10849_v39  ;;  %v10851_v27 = vpop.permute.xlu0 %3760 }
 0x5c8   : > { %13980 = vst [vmem:[#allocation194_spill] sm:$0xff] %v10851_v27  ;;  %v2639_v27 = vld [vmem:[#allocation3] sm:$0xff] }
 0x5ca   : > { %v10853_v28 = vpop.permute.xlu1 %3766 }
 0x5cb   : > { %13981 = vst [vmem:[#allocation195_spill] sm:$0xff] %v10853_v28  ;;  %v10855_v20 = vpop.permute.xlu0 %3764 }
 0x5cc   : > { %13982 = vst [vmem:[#allocation196_spill] sm:$0xff] %v10855_v20  ;;  %v2640_v20 = vld [vmem:[#allocation3 + $0x8] sm:$0xff] }
 0x5ce   : > { %v10857_v57 = vpop.permute.xlu1 %3770 }
 0x5cf   : > { %13983 = vst [vmem:[#allocation197_spill] sm:$0xff] %v10857_v57  ;;  %v10859_v53 = vpop.permute.xlu0 %3768  ;;  %v13993_v57 = vld [vmem:[#allocation26_spill] sm:$0xff] }
 0x5d0   : > { %13984 = vst [vmem:[#allocation198_spill] sm:$0xff] %v10859_v53  ;;  %v13994_v53 = vld [vmem:[#allocation57_spill] sm:$0xff] }
 0x5d2   : > { %v10861_v24 = vpop.permute.xlu1 %3774 }
 0x5d3   : > { %13985 = vst [vmem:[#allocation199_spill] sm:$0xff] %v10861_v24  ;;  %v10863_v46 = vpop.permute.xlu0 %3772  ;;  %v3952_v24 = vsel %vm2432_vm11, %v2639_v27, %v13993_v57 }
 0x5d4   : > { %13986 = vst [vmem:[#allocation200_spill] sm:$0xff] %v10863_v46  ;;  %v3953_v46 = vsel %vm2432_vm11, %v2640_v20, %v13994_v53  ;;  %v7534_v20 = vld [vmem:[#allocation3 + $0x20] sm:$0xff] }
 0x5d6   : > { %v10865_v5 = vpop.permute.xlu1 %3778 }
 0x5d7   : > { %13987 = vst [vmem:[#allocation201_spill] sm:$0xff] %v10865_v5  ;;  %v10867_v12 = vpop.permute.xlu0 %3776  ;;  %v13995_v5 = vld [vmem:[#allocation106_spill] sm:$0xff] }
 0x5d8   : > { %13988 = vst [vmem:[#allocation202_spill] sm:$0xff] %v10867_v12  ;;  %v3984_v12 = vsel %vm279_vm0, %v3952_v24, %v13995_v5  ;;  %v13998_v5 = vld [vmem:[#allocation55_spill] sm:$0xff]  ;;  %v7535_v24 = vld [vmem:[#allocation3 + $0x18] sm:$0xff] }
 0x5d9   : > { %v3955_v57 = vsel %vm2432_vm11, %v7534_v20, %v13998_v5  ;;  %v14001_v20 = vld [vmem:[#allocation140_spill] sm:$0xff] }
 0x5da   : > { %v10869_v48 = vpop.permute.xlu1 %3782 }
 0x5db   : > { %13989 = vst [vmem:[#allocation203_spill] sm:$0xff] %v10869_v48  ;;  %v10871_v39 = vpop.permute.xlu0 %3780 }
 0x5dc   : > { %13990 = vst [vmem:[#allocation204_spill] sm:$0xff] %v10871_v39  ;;  %v13997_v39 = vld [vmem:[#allocation141_spill] sm:$0xff] }
 0x5dd   : > { %v3985_v31 = vsel %vm279_vm0, %v3953_v46, %v13997_v39  ;;  %v14000_v39 = vld [vmem:[#allocation105_spill] sm:$0xff] }
 0x5de   : > { %v10873_v28 = vpop.permute.xlu1 %3786  ;;  %v4018_v27 = vsel %vm4016_vm14, %v3985_v31, %v10328_v42 }
 0x5df   : > { %13991 = vst [vmem:[#allocation205_spill] sm:$0xff] %v10873_v28  ;;  %v10875_v56 = vpop.permute.xlu0 %3784  ;;  %v4017_v28 = vsel %vm4016_vm14, %v3984_v12, %v10330_v49  ;;  %v4050_v12 = vsel %vm1735_vm3, %v4018_v27, %v10460_v16 }
 0x5e0   : > { %13992 = vst [vmem:[#allocation206_spill] sm:$0xff] %v10875_v56  ;;  %v4049_v53 = vsel %vm1735_vm3, %v4017_v28, %v10462_v38  ;;  %v4083_v42 = vsel %vm4081_vm15, %v4050_v12, %v10592_v8  ;;  %v14003_v12 = vld [vmem:[#allocation132_spill] sm:$0xff] }
 0x5e1   : > { %v4082_v49 = vsel %vm4081_vm15, %v4049_v53, %v10594_v29  ;;  %v4115_v29 = vsel %vm1768_vm4, %v4083_v42, %v10711_v9 }
 0x5e2   : > { %v10883_v48 = vpop.permute.xlu1 %3790  ;;  %v4114_v38 = vsel %vm1768_vm4, %v4082_v49, %v10713_v62  ;;  %v4148_v5 = vsel %vm4146_vm1, %v4115_v29, %v10809_v22  ;;  %v14004_v49 = vld [vmem:[#allocation163_spill] sm:$0xff] }
 0x5e3   : > { %13996 = vst [vmem:[#allocation26_spill] sm:$0xff] %v10883_v48  ;;  %v10889_v56 = vpop.permute.xlu0 %3788  ;;  %v13999_v48 = vld [vmem:[#allocation133_spill] sm:$0xff]  ;;  %v4147_v27 = vsel %vm4146_vm1, %v4114_v38, %v10811_v54 }
 0x5e4   : > { %v3954_v46 = vsel %vm2432_vm11, %v7535_v24, %v13999_v48  ;;  %v3987_v48 = vsel %vm279_vm0, %v3955_v57, %v14001_v20  ;;  %v7536_v24 = vld [vmem:[#allocation3 + $0x30] sm:$0xff] }
 0x5e5   : > { %v3986_v31 = vsel %vm279_vm0, %v3954_v46, %v14000_v39  ;;  %v4020_v8 = vsel %vm4016_vm14, %v3987_v48, %v10336_v35 }
 0x5e6   : > { %v3859_v28 = vpop.permute.xlu1 %3858  ;;  %v4019_v16 = vsel %vm4016_vm14, %v3986_v31, %v10338_v21  ;;  %v14002_v21 = vld [vmem:[#allocation156_spill] sm:$0xff]  ;;  %v4052_v9 = vsel %vm1735_vm3, %v4020_v8, %v10468_v59 }
 0x5e7   : > { %v3857_v53 = vpop.permute.xlu0 %3856  ;;  %v4051_v62 = vsel %vm1735_vm3, %v4019_v16, %v10470_v34  ;;  %v3956_v46 = vsel %vm2432_vm11, %v7536_v24, %v14002_v21  ;;  %v4180_v35 = vsel %vm1801_vm5, %v4148_v5, %v3859_v28  ;;  %v7537_v34 = vld [vmem:[#allocation3 + $0x38] sm:$0xff]  ;;  %v4085_v31 = vsel %vm4081_vm15, %v4052_v9, %v10606_v13 }
 0x5e8   : > { %v4179_v57 = vsel %vm1801_vm5, %v4147_v27, %v3857_v53  ;;  %v4084_v54 = vsel %vm4081_vm15, %v4051_v62, %v10608_v47  ;;  %v3957_v22 = vsel %vm2432_vm11, %v7537_v34, %v14003_v12  ;;  %v3988_v39 = vsel %vm279_vm0, %v3956_v46, %v14004_v49  ;;  %v14005_v47 = vld [vmem:[#allocation31_spill] sm:$0xff]  ;;  %v14007_v62 = vld [vmem:[#allocation13_spill] sm:$0xff]  ;;  %v7540_v12 = vld [vmem:[#allocation3 + $0x60] sm:$0xff] }
 0x5e9   : > { %7337 = vmatprep.mubr.msk.f32.mxu0 %vm4223_vm2, %v4179_v57  ;;  %v4116_v59 = vsel %vm1768_vm4, %v4084_v54, %v10719_v19  ;;  %v3989_v38 = vsel %vm279_vm0, %v3957_v22, %v14005_v47  ;;  %v4021_v28 = vsel %vm4016_vm14, %v3988_v39, %v10346_v37  ;;  %v4117_v20 = vsel %vm1768_vm4, %v4085_v31, %v10717_v30  ;;  %v7538_v53 = vld [vmem:[#allocation3 + $0x48] sm:$0xff]  ;;  %v14010_v49 = vld [vmem:[#allocation32_spill] sm:$0xff] }
 0x5ea   : > { %v3863_v42 = vpop.permute.xlu1 %3862  ;;  %7338 = vmatmul.mubr.msk.f32.vlgmr.msra.gmra.mrb[32].mxu0 %vm4223_vm2, %v4180_v35  ;;  %v4149_v48 = vsel %vm4146_vm1, %v4116_v59, %v10817_v60  ;;  %v4022_v13 = vsel %vm4016_vm14, %v3989_v38, %v10344_v18  ;;  %v4053_v19 = vsel %vm1735_vm3, %v4021_v28, %v10478_v61  ;;  %v4150_v29 = vsel %vm4146_vm1, %v4117_v20, %v10815_v14  ;;  %v14006_v37 = vld [vmem:[#allocation155_spill] sm:$0xff]  ;;  %v7539_v61 = vld [vmem:[#allocation3 + $0x50] sm:$0xff]  ;;  %v7542_v20 = vld [vmem:[#allocation3 + $0x78] sm:$0xff] }
 0x5eb   : > { %v3861_v16 = vpop.permute.xlu0 %3860  ;;  %v3958_v8 = vsel %vm2432_vm11, %v7538_v53, %v14006_v37  ;;  %v4054_v30 = vsel %vm1735_vm3, %v4022_v13, %v10476_v43  ;;  %v4086_v60 = vsel %vm4081_vm15, %v4053_v19, %v10616_v6  ;;  %v4182_v18 = vsel %vm1801_vm5, %v4150_v29, %v3863_v42  ;;  %v14008_v6 = vld [vmem:[#allocation29_spill] sm:$0xff]  ;;  %v14014_v53 = vld [vmem:[#allocation168_spill] sm:$0xff] }
 0x5ec   : > { %v4181_v27 = vsel %vm1801_vm5, %v4149_v48, %v3861_v16  ;;  %v3959_v14 = vsel %vm2432_vm11, %v7539_v61, %v14007_v62  ;;  %v3990_v5 = vsel %vm279_vm0, %v3958_v8, %v10226_v58  ;;  %v4087_v57 = vsel %vm4081_vm15, %v4054_v30, %v10614_v0  ;;  %v14012_v16 = vld [vmem:[#allocation79_spill] sm:$0xff]  ;;  %v14015_v8 = vld [vmem:[#allocation68_spill] sm:$0xff] }
 0x5ed   : > { %7340 = vmatprep.mubr.msk.f32.mxu0 %vm4223_vm2, %v4181_v27  ;;  %v4118_v43 = vsel %vm1768_vm4, %v4086_v60, %v10727_v11  ;;  %v3991_v21 = vsel %vm279_vm0, %v3959_v14, %v14008_v6  ;;  %v4023_v46 = vsel %vm4016_vm14, %v3990_v5, %v10358_v26  ;;  %v4119_v9 = vsel %vm1768_vm4, %v4087_v57, %v10725_v2  ;;  %v14009_v26 = vld [vmem:[#allocation61_spill] sm:$0xff]  ;;  %v14016_v60 = vld [vmem:[#allocation186_spill] sm:$0xff] }
 0x5ee   : > { %v3867_v24 = vpop.permute.xlu1 %3866  ;;  %7341 = vmatmul.mubr.msk.f32.gmra.mrb[34].mxu0 %vm4223_vm2, %v4182_v18  ;;  %v4151_v58 = vsel %vm4146_vm1, %v4118_v43, %v10825_v1  ;;  %v4024_v0 = vsel %vm4016_vm14, %v3991_v21, %v10356_v10  ;;  %v4055_v11 = vsel %vm1735_vm3, %v4023_v46, %v10490_v40  ;;  %v4152_v35 = vsel %vm4146_vm1, %v4119_v9, %v10823_v25  ;;  %v7541_v40 = vld [vmem:[#allocation3 + $0x68] sm:$0xff]  ;;  %v14019_v14 = vld [vmem:[#allocation185_spill] sm:$0xff]  ;;  %v7544_v43 = vld [vmem:[#allocation3 + $0x90] sm:$0xff] }
 0x5ef   : > { %v3865_v54 = vpop.permute.xlu0 %3864  ;;  %v3960_v22 = vsel %vm2432_vm11, %v7540_v12, %v14009_v26  ;;  %v4056_v2 = vsel %vm1735_vm3, %v4024_v0, %v10488_v32  ;;  %v4088_v1 = vsel %vm4081_vm15, %v4055_v11, %v10622_v51  ;;  %v4184_v10 = vsel %vm1801_vm5, %v4152_v35, %v3867_v24  ;;  %v14020_v24 = vld [vmem:[#allocation158_spill] sm:$0xff]  ;;  %v14022_v9 = vld [vmem:[#allocation152_spill] sm:$0xff]  ;;  %v7545_v0 = vld [vmem:[#allocation3 + $0x98] sm:$0xff] }
 0x5f0   : > { %v4183_v34 = vsel %vm1801_vm5, %v4151_v58, %v3865_v54  ;;  %v3961_v25 = vsel %vm2432_vm11, %v7541_v40, %v14010_v49  ;;  %v3992_v39 = vsel %vm279_vm0, %v3960_v22, %v10234_v23  ;;  %v4089_v31 = vsel %vm4081_vm15, %v4056_v2, %v10620_v50  ;;  %v14021_v21 = vld [vmem:[#allocation58_spill] sm:$0xff]  ;;  %v14023_v11 = vld [vmem:[#allocation100_spill] sm:$0xff]  ;;  %v14025_v26 = vld [vmem:[#allocation129_spill] sm:$0xff] }
 0x5f1   : > { %7343 = vmatprep.mubr.msk.f32.mxu0 %vm4223_vm2, %v4183_v34  ;;  %v4120_v32 = vsel %vm1768_vm4, %v4088_v1, %v10733_v45  ;;  %v3993_v51 = vsel %vm279_vm0, %v3961_v25, %v10232_v52  ;;  %v4025_v42 = vsel %vm4016_vm14, %v3992_v39, %v10366_v3  ;;  %v4121_v47 = vsel %vm1768_vm4, %v4089_v31, %v10731_v36  ;;  %v14011_v3 = vld [vmem:[#allocation135_spill] sm:$0xff]  ;;  %v14026_v2 = vld [vmem:[#allocation138_spill] sm:$0xff] }
 0x5f2   : > { %v3871_v59 = vpop.permute.xlu1 %3870  ;;  %7344 = vmatmul.mubr.msk.f32.gmra.mrb[36].mxu0 %vm4223_vm2, %v4184_v10  ;;  %v4153_v23 = vsel %vm4146_vm1, %v4120_v32, %v10831_v55  ;;  %v4026_v50 = vsel %vm4016_vm14, %v3993_v51, %v10364_v41  ;;  %v4057_v45 = vsel %vm1735_vm3, %v4025_v42, %v10498_v44  ;;  %v4154_v28 = vsel %vm4146_vm1, %v4121_v47, %v10829_v63  ;;  %v7543_v44 = vld [vmem:[#allocation3 + $0x80] sm:$0xff]  ;;  %v14024_v34 = vld [vmem:[#allocation87_spill] sm:$0xff]  ;;  %v14031_v47 = vld [vmem:[#allocation109_spill] sm:$0xff] }
 0x5f3   : > { %v3869_v38 = vpop.permute.xlu0 %3868  ;;  %v3962_v48 = vsel %vm2432_vm11, %v7542_v20, %v14011_v3  ;;  %v4058_v36 = vsel %vm1735_vm3, %v4026_v50, %v10496_v4  ;;  %v4090_v55 = vsel %vm4081_vm15, %v4057_v45, %v10628_v7  ;;  %v4186_v41 = vsel %vm1801_vm5, %v4154_v28, %v3871_v59  ;;  %v14013_v7 = vld [vmem:[#allocation120_spill] sm:$0xff]  ;;  %v14027_v40 = vld [vmem:[#allocation46_spill] sm:$0xff]  ;;  %v14028_v25 = vld [vmem:[#allocation39_spill] sm:$0xff] }
 0x5f4   : > { %v4185_v52 = vsel %vm1801_vm5, %v4153_v23, %v3869_v38  ;;  %v3963_v63 = vsel %vm2432_vm11, %v7543_v44, %v14012_v16  ;;  %v3994_v13 = vsel %vm279_vm0, %v3962_v48, %v10242_v33  ;;  %v4091_v19 = vsel %vm4081_vm15, %v4058_v36, %v10626_v15  ;;  %v14017_v15 = vld [vmem:[#allocation144_spill] sm:$0xff]  ;;  %v14029_v31 = vld [vmem:[#allocation82_spill] sm:$0xff]  ;;  %v14032_v38 = vld [vmem:[#allocation149_spill] sm:$0xff] }
 0x5f5   : > { %7346 = vmatprep.mubr.msk.f32.mxu0 %vm4223_vm2, %v4185_v52  ;;  %v4122_v4 = vsel %vm1768_vm4, %v4090_v55, %v10739_v17  ;;  %v3995_v27 = vsel %vm279_vm0, %v3963_v63, %v14013_v7  ;;  %v4027_v37 = vsel %vm4016_vm14, %v3994_v13, %v14014_v53  ;;  %v4123_v30 = vsel %vm1768_vm4, %v4091_v19, %v14015_v8  ;;  %v14018_v17 = vld [vmem:[#allocation93_spill] sm:$0xff]  ;;  %v14030_v59 = vld [vmem:[#allocation188_spill] sm:$0xff]  ;;  %v14033_v45 = vld [vmem:[#allocation187_spill] sm:$0xff] }
 0x5f6   : > { %v3875_v29 = vpop.permute.xlu1 %3874  ;;  %7347 = vmatmul.mubr.msk.f32.gmra.mrb[38].mxu0 %vm4223_vm2, %v4186_v41  ;;  %v4155_v33 = vsel %vm4146_vm1, %v4122_v4, %v14016_v60  ;;  %v4028_v61 = vsel %vm4016_vm14, %v3995_v27, %v14017_v15  ;;  %v4059_v62 = vsel %vm1735_vm3, %v4027_v37, %v14018_v17  ;;  %v4156_v5 = vsel %vm4146_vm1, %v4123_v30, %v14019_v14  ;;  %v7546_v20 = vld [vmem:[#allocation3 + $0xa8] sm:$0xff]  ;;  %v14034_v3 = vld [vmem:[#allocation36_spill] sm:$0xff]  ;;  %v14035_v36 = vld [vmem:[#allocation125_spill] sm:$0xff] }
 0x5f7   : > { %v3873_v18 = vpop.permute.xlu0 %3872  ;;  %v3964_v6 = vsel %vm2432_vm11, %v7544_v43, %v14020_v24  ;;  %v4060_v46 = vsel %vm1735_vm3, %v4028_v61, %v14021_v21  ;;  %v4092_v58 = vsel %vm4081_vm15, %v4059_v62, %v14022_v9  ;;  %v4188_v54 = vsel %vm1801_vm5, %v4156_v5, %v3875_v29  ;;  %v14036_v41 = vld [vmem:[#allocation76_spill] sm:$0xff]  ;;  %v14037_v13 = vld [vmem:[#allocation19_spill] sm:$0xff]  ;;  %v14039_v7 = vld [vmem:[#allocation77_spill] sm:$0xff] }
 0x5f8   : > { %v4187_v57 = vsel %vm1801_vm5, %v4155_v33, %v3873_v18  ;;  %v3965_v35 = vsel %vm2432_vm11, %v7545_v0, %v14023_v11  ;;  %v3996_v12 = vsel %vm279_vm0, %v3964_v6, %v14024_v34  ;;  %v4093_v22 = vsel %vm4081_vm15, %v4060_v46, %v14025_v26  ;;  %v7547_v63 = vld [vmem:[#allocation3 + $0xb0] sm:$0xff]  ;;  %v14038_v4 = vld [vmem:[#allocation143_spill] sm:$0xff]  ;;  %v14040_v53 = vld [vmem:[#allocation161_spill] sm:$0xff] }
 0x5f9   : > { %7349 = vmatprep.mubr.msk.f32.mxu0 %vm4223_vm2, %v4187_v57  ;;  %v4124_v1 = vsel %vm1768_vm4, %v4092_v58, %v14026_v2  ;;  %v3997_v49 = vsel %vm279_vm0, %v3965_v35, %v14027_v40  ;;  %v4029_v39 = vsel %vm4016_vm14, %v3996_v12, %v14028_v25  ;;  %v4125_v32 = vsel %vm1768_vm4, %v4093_v22, %v14029_v31  ;;  %v14041_v30 = vld [vmem:[#allocation119_spill] sm:$0xff]  ;;  %v14042_v33 = vld [vmem:[#allocation56_spill] sm:$0xff]  ;;  %v14044_v17 = vld [vmem:[#allocation190_spill] sm:$0xff] }
 0x5fa   : > { %v3879_v10 = vpop.permute.xlu1 %3878  ;;  %7350 = vmatmul.mubr.msk.f32.gmra.mrb[40].mxu0 %vm4223_vm2, %v4188_v54  ;;  %v4157_v51 = vsel %vm4146_vm1, %v4124_v1, %v14030_v59  ;;  %v4030_v23 = vsel %vm4016_vm14, %v3997_v49, %v14031_v47  ;;  %v4061_v50 = vsel %vm1735_vm3, %v4029_v39, %v14032_v38  ;;  %v4158_v28 = vsel %vm4146_vm1, %v4125_v32, %v14033_v45  ;;  %v14043_v15 = vld [vmem:[#allocation103_spill] sm:$0xff]  ;;  %v14046_v43 = vld [vmem:[#allocation114_spill] sm:$0xff]  ;;  %v14047_v6 = vld [vmem:[#allocation189_spill] sm:$0xff] }
 0x5fb   : > { %v3877_v42 = vpop.permute.xlu0 %3876  ;;  %v3966_v48 = vsel %vm2432_vm11, %v7546_v20, %v14034_v3  ;;  %v4062_v55 = vsel %vm1735_vm3, %v4030_v23, %v14035_v36  ;;  %v4094_v44 = vsel %vm4081_vm15, %v4061_v50, %v14036_v41  ;;  %v4190_v16 = vsel %vm1801_vm5, %v4158_v28, %v3879_v10  ;;  %v14045_v5 = vld [vmem:[#allocation167_spill] sm:$0xff]  ;;  %v7548_v9 = vld [vmem:[#allocation3 + $0xc0] sm:$0xff]  ;;  %v14048_v58 = vld [vmem:[#allocation81_spill] sm:$0xff] }
 0x5fc   : > { %v4189_v52 = vsel %vm1801_vm5, %v4157_v51, %v3877_v42  ;;  %v3967_v19 = vsel %vm2432_vm11, %v7547_v63, %v14037_v13  ;;  %v3998_v29 = vsel %vm279_vm0, %v3966_v48, %v14038_v4  ;;  %v4095_v27 = vsel %vm4081_vm15, %v4062_v55, %v14039_v7  ;;  %v14049_v0 = vld [vmem:[#allocation92_spill] sm:$0xff]  ;;  %v14050_v35 = vld [vmem:[#allocation97_spill] sm:$0xff]  ;;  %v7549_v26 = vld [vmem:[#allocation3 + $0xc8] sm:$0xff] }
 0x5fd   : > { %7352 = vmatprep.mubr.msk.f32.mxu0 %vm4223_vm2, %v4189_v52  ;;  %v4126_v37 = vsel %vm1768_vm4, %v4094_v44, %v14040_v53  ;;  %v3999_v60 = vsel %vm279_vm0, %v3967_v19, %v14041_v30  ;;  %v4031_v18 = vsel %vm4016_vm14, %v3998_v29, %v14042_v33  ;;  %v4127_v61 = vsel %vm1768_vm4, %v4095_v27, %v14043_v15  ;;  %v14051_v22 = vld [vmem:[#allocation65_spill] sm:$0xff]  ;;  %v14052_v1 = vld [vmem:[#allocation108_spill] sm:$0xff]  ;;  %v14053_v40 = vld [vmem:[#allocation98_spill] sm:$0xff] }
 0x5fe   : > { %v3883_v8 = vpop.permute.xlu1 %3882  ;;  %7353 = vmatmul.mubr.msk.f32.gmra.mrb[42].mxu0 %vm4223_vm2, %v4190_v16  ;;  %v4159_v62 = vsel %vm4146_vm1, %v4126_v37, %v14044_v17  ;;  %v4032_v57 = vsel %vm4016_vm14, %v3999_v60, %v14045_v5  ;;  %v4063_v24 = vsel %vm1735_vm3, %v4031_v18, %v14046_v43  ;;  %v4160_v21 = vsel %vm4146_vm1, %v4127_v61, %v14047_v6  ;;  %v14054_v25 = vld [vmem:[#allocation42_spill] sm:$0xff]  ;;  %v14056_v51 = vld [vmem:[#allocation124_spill] sm:$0xff]  ;;  %v14057_v47 = vld [vmem:[#allocation25_spill] sm:$0xff] }
 0x5ff   : > { %v3881_v14 = vpop.permute.xlu0 %3880  ;;  %v3968_v54 = vsel %vm2432_vm11, %v7548_v9, %v14048_v58  ;;  %v4064_v11 = vsel %vm1735_vm3, %v4032_v57, %v14049_v0  ;;  %v4096_v34 = vsel %vm4081_vm15, %v4063_v24, %v14050_v35  ;;  %v4192_v12 = vsel %vm1801_vm5, %v4160_v21, %v3883_v8  ;;  %v14055_v32 = vld [vmem:[#allocation86_spill] sm:$0xff]  ;;  %v14058_v38 = vld [vmem:[#allocation192_spill] sm:$0xff]  ;;  %v14059_v28 = vld [vmem:[#allocation37_spill] sm:$0xff] }
 0x600   : > { %v4191_v46 = vsel %vm1801_vm5, %v4159_v62, %v3881_v14  ;;  %v3969_v2 = vsel %vm2432_vm11, %v7549_v26, %v14051_v22  ;;  %v4000_v10 = vsel %vm279_vm0, %v3968_v54, %v14052_v1  ;;  %v4097_v49 = vsel %vm4081_vm15, %v4064_v11, %v14053_v40  ;;  %v14060_v20 = vld [vmem:[#allocation4_spill] sm:$0xff]  ;;  %v14061_v48 = vld [vmem:[#allocation191_spill] sm:$0xff]  ;;  %v7550_v41 = vld [vmem:[#allocation3 + $0xd8] sm:$0xff] }
 0x601   : > { %7355 = vmatprep.mubr.msk.f32.mxu0 %vm4223_vm2, %v4191_v46  ;;  %v4128_v39 = vsel %vm1768_vm4, %v4096_v34, %v14054_v25  ;;  %v4001_v59 = vsel %vm279_vm0, %v3969_v2, %v14055_v32  ;;  %v4033_v42 = vsel %vm4016_vm14, %v4000_v10, %v14056_v51  ;;  %v4129_v23 = vsel %vm1768_vm4, %v4097_v49, %v14057_v47  ;;  %v14062_v44 = vld [vmem:[#allocation102_spill] sm:$0xff]  ;;  %v14063_v63 = vld [vmem:[#allocation148_spill] sm:$0xff]  ;;  %v14065_v27 = vld [vmem:[#allocation137_spill] sm:$0xff] }
 0x602   : > { %v3887_v31 = vpop.permute.xlu1 %3886  ;;  %7356 = vmatmul.mubr.msk.f32.gmra.mrb[44].mxu0 %vm4223_vm2, %v4192_v12  ;;  %v4161_v50 = vsel %vm4146_vm1, %v4128_v39, %v14058_v38  ;;  %v4034_v52 = vsel %vm4016_vm14, %v4001_v59, %v14059_v28  ;;  %v4065_v3 = vsel %vm1735_vm3, %v4033_v42, %v14060_v20  ;;  %v4162_v36 = vsel %vm4146_vm1, %v4129_v23, %v14061_v48  ;;  %v14064_v19 = vld [vmem:[#allocation30_spill] sm:$0xff]  ;;  %v14068_v33 = vld [vmem:[#allocation84_spill] sm:$0xff]  ;;  %v14070_v62 = vld [vmem:[#allocation91_spill] sm:$0xff] }
 0x603   : > { %v3885_v45 = vpop.permute.xlu0 %3884  ;;  %v3970_v16 = vsel %vm2432_vm11, %v7550_v41, %v14062_v44  ;;  %v4066_v13 = vsel %vm1735_vm3, %v4034_v52, %v14063_v63  ;;  %v4098_v4 = vsel %vm4081_vm15, %v4065_v3, %v14064_v19  ;;  %v4194_v29 = vsel %vm1801_vm5, %v4162_v36, %v3887_v31  ;;  %v7551_v7 = vld [vmem:[#allocation3 + $0xe0] sm:$0xff]  ;;  %v14071_v5 = vld [vmem:[#allocation117_spill] sm:$0xff]  ;;  %v14074_v9 = vld [vmem:[#allocation47_spill] sm:$0xff] }
 0x604   : > { %v4193_v55 = vsel %vm1801_vm5, %v4161_v50, %v3885_v45  ;;  %v3971_v53 = vsel %vm2432_vm11, %v7551_v7, %v14065_v27  ;;  %v14066_v37 = vld [vmem:[#allocation166_spill] sm:$0xff]  ;;  %v4130_v18 = vsel %vm1768_vm4, %v4098_v4, %v14068_v33  ;;  %v14075_v54 = vld [vmem:[#allocation193_spill] sm:$0xff]  ;;  %v7552_v35 = vld [vmem:[#allocation3 + $0xf0] sm:$0xff] }
 0x605   : > { %7358 = vmatprep.mubr.msk.f32.mxu1 %vm4223_vm2, %v4193_v55  ;;  %v4002_v8 = vsel %vm279_vm0, %v3970_v16, %v14066_v37  ;;  %v14067_v30 = vld [vmem:[#allocation10_spill] sm:$0xff]  ;;  %v14076_v34 = vld [vmem:[#allocation23_spill] sm:$0xff]  ;;  %v14077_v26 = vld [vmem:[#allocation113_spill] sm:$0xff] }
 0x606   : > { %v4099_v60 = vsel %vm4081_vm15, %v4066_v13, %v14067_v30  ;;  %v3891_v15 = vpop.permute.xlu1 %3890  ;;  %7359 = vmatmul.mubr.msk.f32.vlgmr.msra.gmra.mrb[0].mxu1 %vm4223_vm2, %v4194_v29  ;;  %v14069_v61 = vld [vmem:[#allocation142_spill] sm:$0xff]  ;;  %v4035_v14 = vsel %vm4016_vm14, %v4002_v8, %v14070_v62  ;;  %v3972_v12 = vsel %vm2432_vm11, %v7552_v35, %v14076_v34  ;;  %v7553_v40 = vld [vmem:[#allocation3 + $0xf8] sm:$0xff]  ;;  %v14079_v49 = vld [vmem:[#allocation160_spill] sm:$0xff] }
 0x607   : > { %v4003_v17 = vsel %vm279_vm0, %v3971_v53, %v14069_v61  ;;  %v4131_v57 = vsel %vm1768_vm4, %v4099_v60, %v14071_v5  ;;  %v14072_v43 = vld [vmem:[#allocation194_spill] sm:$0xff]  ;;  %v3889_v6 = vpop.permute.xlu0 %3888  ;;  %v4067_v58 = vsel %vm1735_vm3, %v4035_v14, %v14074_v9  ;;  %v3973_v25 = vsel %vm2432_vm11, %v7553_v40, %v14079_v49  ;;  %v14080_v39 = vld [vmem:[#allocation35_spill] sm:$0xff]  ;;  %v14082_v51 = vld [vmem:[#allocation48_spill] sm:$0xff] }
 0x608   : > { %v4163_v24 = vsel %vm4146_vm1, %v4130_v18, %v14072_v43  ;;  %v14073_v21 = vld [vmem:[#allocation54_spill] sm:$0xff]  ;;  %v4164_v0 = vsel %vm4146_vm1, %v4131_v57, %v14075_v54  ;;  %v4004_v31 = vsel %vm279_vm0, %v3972_v12, %v14080_v39  ;;  %v14081_v32 = vld [vmem:[#allocation59_spill] sm:$0xff]  ;;  %v14085_v28 = vld [vmem:[#allocation164_spill] sm:$0xff] }
 0x609   : > { %v4036_v46 = vsel %vm4016_vm14, %v4003_v17, %v14073_v21  ;;  %v4195_v11 = vsel %vm1801_vm5, %v4163_v24, %v3889_v6  ;;  %v14078_v2 = vld [vmem:[#allocation78_spill] sm:$0xff]  ;;  %v4196_v10 = vsel %vm1801_vm5, %v4164_v0, %v3891_v15  ;;  %v14083_v23 = vld [vmem:[#allocation107_spill] sm:$0xff]  ;;  %v14086_v20 = vld [vmem:[#allocation196_spill] sm:$0xff] }
 0x60a   : > { %v4068_v22 = vsel %vm1735_vm3, %v4036_v46, %v14077_v26  ;;  %v4100_v1 = vsel %vm4081_vm15, %v4067_v58, %v14078_v2  ;;  %7361 = vmatprep.mubr.msk.f32.mxu1 %vm4223_vm2, %v4195_v11  ;;  %v3895_v47 = vpop.permute.xlu1 %3894  ;;  %v4005_v38 = vsel %vm279_vm0, %v3973_v25, %v14083_v23  ;;  %v14084_v50 = vld [vmem:[#allocation147_spill] sm:$0xff]  ;;  %v14088_v41 = vld [vmem:[#allocation64_spill] sm:$0xff]  ;;  %v14095_v61 = vld [vmem:[#allocation134_spill] sm:$0xff] }
 0x60b   : > { %v4101_v59 = vsel %vm4081_vm15, %v4068_v22, %v14081_v32  ;;  %v4132_v42 = vsel %vm1768_vm4, %v4100_v1, %v14082_v51  ;;  %7362 = vmatmul.mubr.msk.f32.gmra.mrb[2].mxu1 %vm4223_vm2, %v4196_v10  ;;  %v4037_v45 = vsel %vm4016_vm14, %v4004_v31, %v14084_v50  ;;  %v3893_v48 = vpop.permute.xlu0 %3892  ;;  %v14087_v36 = vld [vmem:[#allocation123_spill] sm:$0xff]  ;;  %v14090_v4 = vld [vmem:[#allocation116_spill] sm:$0xff]  ;;  %v14096_v62 = vld [vmem:[#allocation174_spill] sm:$0xff] }
 0x60c   : > { %v4133_v52 = vsel %vm1768_vm4, %v4101_v59, %v14085_v28  ;;  %v4165_v3 = vsel %vm4146_vm1, %v4132_v42, %v14086_v20  ;;  %v4038_v55 = vsel %vm4016_vm14, %v4005_v38, %v14087_v36  ;;  %v4069_v44 = vsel %vm1735_vm3, %v4037_v45, %v14088_v41  ;;  %v14089_v16 = vld [vmem:[#allocation195_spill] sm:$0xff]  ;;  %v7555_v30 = vld [vmem:[#allocation3 + $0x110] sm:$0xff]  ;;  %v14097_v57 = vld [vmem:[#allocation165_spill] sm:$0xff] }
 0x60d   : > { %v4166_v63 = vsel %vm4146_vm1, %v4133_v52, %v14089_v16  ;;  %v4197_v13 = vsel %vm1801_vm5, %v4165_v3, %v3893_v48  ;;  %v7554_v19 = vld [vmem:[#allocation3 + $0x108] sm:$0xff]  ;;  %v14093_v60 = vld [vmem:[#allocation40_spill] sm:$0xff]  ;;  %v14099_v21 = vld [vmem:[#allocation173_spill] sm:$0xff] }
 0x60e   : > { %v3974_v29 = vsel %vm2432_vm11, %v7554_v19, %v14090_v4  ;;  %v14091_v7 = vld [vmem:[#allocation171_spill] sm:$0xff]  ;;  %v4198_v8 = vsel %vm1801_vm5, %v4166_v63, %v3895_v47  ;;  %7364 = vmatprep.mubr.msk.f32.mxu1 %vm4223_vm2, %v4197_v13  ;;  %v3975_v33 = vsel %vm2432_vm11, %v7555_v30, %v14093_v60  ;;  %v14094_v18 = vld [vmem:[#allocation52_spill] sm:$0xff]  ;;  %v3899_v5 = vpop.permute.xlu1 %3898  ;;  %v14100_v9 = vld [vmem:[#allocation198_spill] sm:$0xff] }
 0x60f   : > { %v4070_v27 = vsel %vm1735_vm3, %v4038_v55, %v14091_v7  ;;  %v14092_v53 = vld [vmem:[#allocation99_spill] sm:$0xff]  ;;  %v4006_v15 = vsel %vm279_vm0, %v3974_v29, %v14094_v18  ;;  %7365 = vmatmul.mubr.msk.f32.gmra.mrb[4].mxu1 %vm4223_vm2, %v4198_v8  ;;  %v4007_v43 = vsel %vm279_vm0, %v3975_v33, %v14097_v57  ;;  %v14098_v24 = vld [vmem:[#allocation112_spill] sm:$0xff]  ;;  %v3897_v54 = vpop.permute.xlu0 %3896  ;;  %v14101_v0 = vld [vmem:[#allocation90_spill] sm:$0xff] }
 0x610   : > { %v4102_v37 = vsel %vm4081_vm15, %v4069_v44, %v14092_v53  ;;  %v4103_v17 = vsel %vm4081_vm15, %v4070_v27, %v14095_v61  ;;  %v4039_v6 = vsel %vm4016_vm14, %v4006_v15, %v14098_v24  ;;  %v4040_v11 = vsel %vm4016_vm14, %v4007_v43, %v14101_v0  ;;  %v14102_v35 = vld [vmem:[#allocation128_spill] sm:$0xff]  ;;  %v14103_v12 = vld [vmem:[#allocation197_spill] sm:$0xff]  ;;  %v7556_v2 = vld [vmem:[#allocation3 + $0x120] sm:$0xff] }
 0x611   : > { %v4134_v14 = vsel %vm1768_vm4, %v4102_v37, %v14096_v62  ;;  %v4135_v46 = vsel %vm1768_vm4, %v4103_v17, %v14099_v21  ;;  %v4071_v34 = vsel %vm1735_vm3, %v4039_v6, %v14102_v35  ;;  %v14104_v1 = vld [vmem:[#allocation139_spill] sm:$0xff]  ;;  %v14105_v40 = vld [vmem:[#allocation45_spill] sm:$0xff]  ;;  %v14106_v25 = vld [vmem:[#allocation16_spill] sm:$0xff] }
 0x612   : > { %v4167_v58 = vsel %vm4146_vm1, %v4134_v14, %v14100_v9  ;;  %v4168_v26 = vsel %vm4146_vm1, %v4135_v46, %v14103_v12  ;;  %v3976_v10 = vsel %vm2432_vm11, %v7556_v2, %v14104_v1  ;;  %v4072_v49 = vsel %vm1735_vm3, %v4040_v11, %v14105_v40  ;;  %v7557_v32 = vld [vmem:[#allocation3 + $0x128] sm:$0xff]  ;;  %v14108_v42 = vld [vmem:[#allocation122_spill] sm:$0xff]  ;;  %v14109_v23 = vld [vmem:[#allocation157_spill] sm:$0xff]  ;;  %v3903_v28 = vpop.permute.xlu1 %3902 }
 0x613   : > { %v4199_v22 = vsel %vm1801_vm5, %v4167_v58, %v3897_v54  ;;  %v4104_v39 = vsel %vm4081_vm15, %v4071_v34, %v14106_v25  ;;  %v4200_v31 = vsel %vm1801_vm5, %v4168_v26, %v3899_v5  ;;  %v14107_v59 = vld [vmem:[#allocation83_spill] sm:$0xff]  ;;  %v4008_v47 = vsel %vm279_vm0, %v3976_v10, %v14108_v42  ;;  %v14110_v50 = vld [vmem:[#allocation176_spill] sm:$0xff]  ;;  %v14111_v52 = vld [vmem:[#allocation33_spill] sm:$0xff]  ;;  %v3901_v16 = vpop.permute.xlu0 %3900 }
 0x614   : > { %7367 = vmatprep.mubr.msk.f32.mxu1 %vm4223_vm2, %v4199_v22  ;;  %v3977_v51 = vsel %vm2432_vm11, %v7557_v32, %v14107_v59  ;;  %v4105_v38 = vsel %vm4081_vm15, %v4072_v49, %v14109_v23  ;;  %v4136_v45 = vsel %vm1768_vm4, %v4104_v39, %v14110_v50  ;;  %v14112_v3 = vld [vmem:[#allocation170_spill] sm:$0xff]  ;;  %v14113_v36 = vld [vmem:[#allocation175_spill] sm:$0xff]  ;;  %v14114_v41 = vld [vmem:[#allocation200_spill] sm:$0xff] }
 0x615   : > { %7368 = vmatmul.mubr.msk.f32.gmra.mrb[6].mxu1 %vm4223_vm2, %v4200_v31  ;;  %v4009_v20 = vsel %vm279_vm0, %v3977_v51, %v14111_v52  ;;  %v4041_v48 = vsel %vm4016_vm14, %v4008_v47, %v14112_v3  ;;  %v4137_v55 = vsel %vm1768_vm4, %v4105_v38, %v14113_v36  ;;  %v4169_v44 = vsel %vm4146_vm1, %v4136_v45, %v14114_v41  ;;  %v14115_v63 = vld [vmem:[#allocation146_spill] sm:$0xff]  ;;  %v14116_v19 = vld [vmem:[#allocation127_spill] sm:$0xff]  ;;  %v7558_v53 = vld [vmem:[#allocation3 + $0x138] sm:$0xff] }
 0x616   : > { %v4042_v13 = vsel %vm4016_vm14, %v4009_v20, %v14115_v63  ;;  %v4073_v4 = vsel %vm1735_vm3, %v4041_v48, %v14116_v19  ;;  %v14117_v29 = vld [vmem:[#allocation199_spill] sm:$0xff]  ;;  %v4201_v27 = vsel %vm1801_vm5, %v4169_v44, %v3901_v16  ;;  %v14118_v37 = vld [vmem:[#allocation162_spill] sm:$0xff]  ;;  %v14121_v17 = vld [vmem:[#allocation104_spill] sm:$0xff]  ;;  %v3907_v21 = vpop.permute.xlu1 %3906 }
 0x617   : > { %v4170_v7 = vsel %vm4146_vm1, %v4137_v55, %v14117_v29  ;;  %v3978_v8 = vsel %vm2432_vm11, %v7558_v53, %v14118_v37  ;;  %v14119_v30 = vld [vmem:[#allocation94_spill] sm:$0xff]  ;;  %v14120_v33 = vld [vmem:[#allocation63_spill] sm:$0xff]  ;;  %7370 = vmatprep.mubr.msk.f32.mxu1 %vm4223_vm2, %v4201_v27  ;;  %v14122_v14 = vld [vmem:[#allocation89_spill] sm:$0xff]  ;;  %v3905_v12 = vpop.permute.xlu0 %3904 }
 0x618   : > { %v4074_v60 = vsel %vm1735_vm3, %v4042_v13, %v14119_v30  ;;  %v4106_v18 = vsel %vm4081_vm15, %v4073_v4, %v14120_v33  ;;  %v4202_v15 = vsel %vm1801_vm5, %v4170_v7, %v3903_v28  ;;  %v7559_v61 = vld [vmem:[#allocation3 + $0x140] sm:$0xff]  ;;  %v4010_v5 = vsel %vm279_vm0, %v3978_v8, %v14122_v14  ;;  %v14126_v58 = vld [vmem:[#allocation43_spill] sm:$0xff]  ;;  %v14127_v0 = vld [vmem:[#allocation177_spill] sm:$0xff] }
 0x619   : > { %v3979_v62 = vsel %vm2432_vm11, %v7559_v61, %v14121_v17  ;;  %v14123_v57 = vld [vmem:[#allocation34_spill] sm:$0xff]  ;;  %7371 = vmatmul.mubr.msk.f32.gmra.mrb[8].mxu1 %vm4223_vm2, %v4202_v15  ;;  %v4043_v54 = vsel %vm4016_vm14, %v4010_v5, %v14126_v58  ;;  %v14129_v26 = vld [vmem:[#allocation111_spill] sm:$0xff]  ;;  %v14131_v10 = vld [vmem:[#allocation201_spill] sm:$0xff] }
 0x61a   : > { %v4107_v43 = vsel %vm4081_vm15, %v4074_v60, %v14123_v57  ;;  %v14124_v24 = vld [vmem:[#allocation178_spill] sm:$0xff]  ;;  %v14130_v2 = vld [vmem:[#allocation115_spill] sm:$0xff]  ;;  %v7560_v25 = vld [vmem:[#allocation3 + $0x150] sm:$0xff]  ;;  %v3911_v36 = vpop.permute.xlu1 %3910 }
 0x61b   : > { %v4138_v6 = vsel %vm1768_vm4, %v4106_v18, %v14124_v24  ;;  %v14125_v46 = vld [vmem:[#allocation50_spill] sm:$0xff]  ;;  %v4139_v11 = vsel %vm1768_vm4, %v4107_v43, %v14127_v0  ;;  %v4075_v1 = vsel %vm1735_vm3, %v4043_v54, %v14130_v2  ;;  %v14132_v39 = vld [vmem:[#allocation44_spill] sm:$0xff]  ;;  %v14133_v32 = vld [vmem:[#allocation151_spill] sm:$0xff]  ;;  %v3909_v29 = vpop.permute.xlu0 %3908 }
 0x61c   : > { %v4011_v9 = vsel %vm279_vm0, %v3979_v62, %v14125_v46  ;;  %v14128_v35 = vld [vmem:[#allocation202_spill] sm:$0xff]  ;;  %v4172_v40 = vsel %vm4146_vm1, %v4139_v11, %v14131_v10  ;;  %v3980_v31 = vsel %vm2432_vm11, %v7560_v25, %v14132_v39  ;;  %v14134_v51 = vld [vmem:[#allocation136_spill] sm:$0xff]  ;;  %v7561_v23 = vld [vmem:[#allocation3 + $0x158] sm:$0xff] }
 0x61d   : > { %v4171_v34 = vsel %vm4146_vm1, %v4138_v6, %v14128_v35  ;;  %v4044_v22 = vsel %vm4016_vm14, %v4011_v9, %v14129_v26  ;;  %v4108_v42 = vsel %vm4081_vm15, %v4075_v1, %v14134_v51  ;;  %v4204_v47 = vsel %vm1801_vm5, %v4172_v40, %v3907_v21  ;;  %v14135_v38 = vld [vmem:[#allocation27_spill] sm:$0xff]  ;;  %v14136_v45 = vld [vmem:[#allocation145_spill] sm:$0xff]  ;;  %v14137_v52 = vld [vmem:[#allocation80_spill] sm:$0xff] }
 0x61e   : > { %v4203_v49 = vsel %vm1801_vm5, %v4171_v34, %v3905_v12  ;;  %v4076_v59 = vsel %vm1735_vm3, %v4044_v22, %v14133_v32  ;;  %v3981_v50 = vsel %vm2432_vm11, %v7561_v23, %v14135_v38  ;;  %v4012_v28 = vsel %vm279_vm0, %v3980_v31, %v14136_v45  ;;  %v14138_v3 = vld [vmem:[#allocation180_spill] sm:$0xff]  ;;  %v14139_v55 = vld [vmem:[#allocation121_spill] sm:$0xff]  ;;  %v14141_v63 = vld [vmem:[#allocation179_spill] sm:$0xff]  ;;  %v3915_v0 = vpop.permute.xlu1 %3914 }
 0x61f   : > { %7373 = vmatprep.mubr.msk.f32.mxu1 %vm4223_vm2, %v4203_v49  ;;  %v4109_v20 = vsel %vm4081_vm15, %v4076_v59, %v14137_v52  ;;  %v4140_v48 = vsel %vm1768_vm4, %v4108_v42, %v14138_v3  ;;  %v4013_v41 = vsel %vm279_vm0, %v3981_v50, %v14139_v55  ;;  %v14140_v44 = vld [vmem:[#allocation60_spill] sm:$0xff]  ;;  %v14143_v7 = vld [vmem:[#allocation169_spill] sm:$0xff]  ;;  %v14145_v8 = vld [vmem:[#allocation203_spill] sm:$0xff]  ;;  %v3913_v10 = vpop.permute.xlu0 %3912 }
 0x620   : > { %7374 = vmatmul.mubr.msk.f32.gmra.mrb[10].mxu1 %vm4223_vm2, %v4204_v47  ;;  %v4045_v16 = vsel %vm4016_vm14, %v4012_v28, %v14140_v44  ;;  %v4141_v13 = vsel %vm1768_vm4, %v4109_v20, %v14141_v63  ;;  %v14142_v19 = vld [vmem:[#allocation204_spill] sm:$0xff]  ;;  %v4046_v27 = vsel %vm4016_vm14, %v4013_v41, %v14143_v7  ;;  %v7562_v33 = vld [vmem:[#allocation3 + $0x168] sm:$0xff]  ;;  %v14146_v18 = vld [vmem:[#allocation85_spill] sm:$0xff] }
 0x621   : > { %v4173_v4 = vsel %vm4146_vm1, %v4140_v48, %v14142_v19  ;;  %v14144_v53 = vld [vmem:[#allocation172_spill] sm:$0xff]  ;;  %v4174_v30 = vsel %vm4146_vm1, %v4141_v13, %v14145_v8  ;;  %v3982_v15 = vsel %vm2432_vm11, %v7562_v33, %v14146_v18  ;;  %v14147_v61 = vld [vmem:[#allocation150_spill] sm:$0xff]  ;;  %v14148_v62 = vld [vmem:[#allocation159_spill] sm:$0xff] }
 0x622   : > { %v4077_v37 = vsel %vm1735_vm3, %v4045_v16, %v14144_v53  ;;  %v4205_v60 = vsel %vm1801_vm5, %v4173_v4, %v3909_v29  ;;  %v4078_v17 = vsel %vm1735_vm3, %v4046_v27, %v14147_v61  ;;  %v4206_v5 = vsel %vm1801_vm5, %v4174_v30, %v3911_v36  ;;  %v7563_v57 = vld [vmem:[#allocation3 + $0x170] sm:$0xff]  ;;  %v14149_v43 = vld [vmem:[#allocation118_spill] sm:$0xff]  ;;  %v14151_v46 = vld [vmem:[#allocation101_spill] sm:$0xff]  ;;  %v3919_v20 = vpop.permute.xlu1 %3918 }
 0x623   : > { %v4110_v14 = vsel %vm4081_vm15, %v4077_v37, %v14148_v62  ;;  %7376 = vmatprep.mubr.msk.f32.mxu1 %vm4223_vm2, %v4205_v60  ;;  %v3983_v24 = vsel %vm2432_vm11, %v7563_v57, %v14149_v43  ;;  %v14150_v6 = vld [vmem:[#allocation110_spill] sm:$0xff]  ;;  %v4111_v9 = vsel %vm4081_vm15, %v4078_v17, %v14151_v46  ;;  %v14153_v11 = vld [vmem:[#allocation88_spill] sm:$0xff]  ;;  %v14155_v26 = vld [vmem:[#allocation181_spill] sm:$0xff]  ;;  %v3917_v55 = vpop.permute.xlu0 %3916 }
 0x624   : > { %v4014_v21 = vsel %vm279_vm0, %v3982_v15, %v14150_v6  ;;  %v14152_v58 = vld [vmem:[#allocation182_spill] sm:$0xff]  ;;  %7377 = vmatmul.mubr.msk.f32.gmra.mrb[12].mxu1 %vm4223_vm2, %v4206_v5  ;;  %v4015_v35 = vsel %vm279_vm0, %v3983_v24, %v14153_v11  ;;  %v4143_v22 = vsel %vm1768_vm4, %v4111_v9, %v14155_v26  ;;  %v14157_v40 = vld [vmem:[#allocation41_spill] sm:$0xff]  ;;  %v14163_v28 = vld [vmem:[#allocation184_spill] sm:$0xff] }
 0x625   : > { %v4142_v54 = vsel %vm1768_vm4, %v4110_v14, %v14152_v58  ;;  %v14154_v34 = vld [vmem:[#allocation126_spill] sm:$0xff]  ;;  %v4048_v49 = vsel %vm4016_vm14, %v4015_v35, %v14157_v40  ;;  %v14159_v31 = vld [vmem:[#allocation205_spill] sm:$0xff]  ;;  %v14164_v3 = vld [vmem:[#allocation183_spill] sm:$0xff] }
 0x626   : > { %v4047_v12 = vsel %vm4016_vm14, %v4014_v21, %v14154_v34  ;;  %v14156_v2 = vld [vmem:[#allocation206_spill] sm:$0xff]  ;;  %v4176_v32 = vsel %vm4146_vm1, %v4143_v22, %v14159_v31  ;;  %v14160_v51 = vld [vmem:[#allocation49_spill] sm:$0xff]  ;;  %v11396_v13 = vld [vmem:[%s13163_s4] ss:$0 sm:$0xff] }
 0x627   : > { %v4175_v1 = vsel %vm4146_vm1, %v4142_v54, %v14156_v2  ;;  %v14158_v25 = vld [vmem:[#allocation62_spill] sm:$0xff]  ;;  %v4080_v42 = vsel %vm1735_vm3, %v4048_v49, %v14160_v51  ;;  %v4208_v38 = vsel %vm1801_vm5, %v4176_v32, %v3915_v0  ;;  %v14162_v50 = vld [vmem:[#allocation21_spill] sm:$0xff] }
 0x628   : > { %v4079_v39 = vsel %vm1735_vm3, %v4047_v12, %v14158_v25  ;;  %v4207_v59 = vsel %vm1801_vm5, %v4175_v1, %v3913_v10  ;;  %v14161_v47 = vld [vmem:[#allocation38_spill] sm:$0xff]  ;;  %v4113_v45 = vsel %vm4081_vm15, %v4080_v42, %v14162_v50 }
 0x629   : > { %v4112_v23 = vsel %vm4081_vm15, %v4079_v39, %v14161_v47  ;;  %7379 = vmatprep.mubr.msk.f32.mxu1 %vm4223_vm2, %v4207_v59  ;;  %v4145_v48 = vsel %vm1768_vm4, %v4113_v45, %v14164_v3  ;;  %v14165_v41 = vld [vmem:[#allocation26_spill] sm:$0xff] }
 0x62a   : > { %v4144_v52 = vsel %vm1768_vm4, %v4112_v23, %v14163_v28  ;;  %7380 = vmatmul.mubr.msk.f32.gmra.mrb[14].mxu1 %vm4223_vm2, %v4208_v38  ;;  %v4178_v44 = vsel %vm4146_vm1, %v4145_v48, %v14165_v41 }
 0x62b   : > { %v4177_v36 = vsel %vm4146_vm1, %v4144_v52, %v10889_v56  ;;  %v4210_v63 = vsel %vm1801_vm5, %v4178_v44, %v3919_v20 }
 0x62c   : > { %v4209_v16 = vsel %vm1801_vm5, %v4177_v36, %v3917_v55 }
 0x62d   : > { %7382 = vmatprep.mubr.msk.f32.mxu1 %vm4223_vm2, %v4209_v16 }
 0x62e   : > { %7383 = vmatmul.mubr.msk.f32.gmra.mrb[16].mxu1 %vm4223_vm2, %v4210_v63 }
 0x6bd   : > { %v7339_v19 = vpop.f32.mrb[32].mxu0 }
 0x6be   : > { %v11399_v56 = vadd.f32 %v7339_v19, %v11396_v13  ;;  %v4390_v4 = vpop.f32.mrb[33].mxu0 }
 0x6bf   : > { %v11402_v29 = vadd.f32 %v11396_v13, %v4390_v4 }
 0x6c0   : > { %14166 = vst [vmem:[#allocation57_spill] sm:$0xff] %v11399_v56  ;;  %vm4582_vm6 = vcmp.gt.f32.partialorder %v11399_v56, 0.0  ;;  %v4614_v7 = vmul.f32 0.1, %v11399_v56 }
 0x6c1   : > { %14167 = vst [vmem:[#allocation106_spill] sm:$0xff] %v11402_v29  ;;  %v7342_v27 = vpop.f32.mrb[34].mxu0  ;;  %vm4581_vm7 = vcmp.gt.f32.partialorder %v11402_v29, 0.0  ;;  %v4613_v53 = vmul.f32 0.1, %v11402_v29 }
 0x6c2   : > { %v11409_v37 = vadd.f32 %v7342_v27, %v11396_v13  ;;  %v4400_v8 = vpop.f32.mrb[35].mxu0  ;;  %v4646_v30 = vsel %vm4582_vm6, %v11399_v56, %v4614_v7 }
 0x6c3   : > { %v11413_v60 = vadd.f32 %v11396_v13, %v4400_v8  ;;  %4711 = vrot.lane.b32.xlu1 %v4646_v30, %s7610_s19  ;;  %v4645_v33 = vsel %vm4581_vm7, %v11402_v29, %v4613_v53 }
 0x6c4   : > { %14168 = vst [vmem:[#allocation141_spill] sm:$0xff] %v11409_v37  ;;  %4709 = vrot.lane.b32.xlu0 %v4645_v33, %s7610_s19  ;;  %vm4584_vm8 = vcmp.gt.f32.partialorder %v11409_v37, 0.0  ;;  %v4616_v18 = vmul.f32 0.1, %v11409_v37 }
 0x6c5   : > { %14169 = vst [vmem:[#allocation55_spill] sm:$0xff] %v11413_v60  ;;  %v7345_v15 = vpop.f32.mrb[36].mxu0  ;;  %vm4583_vm9 = vcmp.gt.f32.partialorder %v11413_v60, 0.0  ;;  %v4615_v61 = vmul.f32 0.1, %v11413_v60 }
 0x6c6   : > { %v11423_v17 = vadd.f32 %v7345_v15, %v11396_v13  ;;  %v4410_v62 = vpop.f32.mrb[37].mxu0  ;;  %v4648_v14 = vsel %vm4584_vm8, %v11409_v37, %v4616_v18 }
 0x6c7   : > { %v11427_v5 = vadd.f32 %v11396_v13, %v4410_v62  ;;  %4715 = vrot.lane.b32.xlu1 %v4648_v14, %s7610_s19  ;;  %v4647_v57 = vsel %vm4583_vm9, %v11413_v60, %v4615_v61 }
 0x6c8   : > { %14170 = vst [vmem:[#allocation133_spill] sm:$0xff] %v11423_v17  ;;  %4713 = vrot.lane.b32.xlu0 %v4647_v57, %s7610_s19  ;;  %vm4586_vm10 = vcmp.gt.f32.partialorder %v11423_v17, 0.0  ;;  %v4618_v43 = vmul.f32 0.1, %v11423_v17 }
 0x6c9   : > { %14171 = vst [vmem:[#allocation105_spill] sm:$0xff] %v11427_v5  ;;  %v7348_v24 = vpop.f32.mrb[38].mxu0  ;;  %vm4585_vm12 = vcmp.gt.f32.partialorder %v11427_v5, 0.0  ;;  %v4617_v6 = vmul.f32 0.1, %v11427_v5 }
 0x6ca   : > { %v11437_v21 = vadd.f32 %v7348_v24, %v11396_v13  ;;  %v4420_v46 = vpop.f32.mrb[39].mxu0  ;;  %v4650_v9 = vsel %vm4586_vm10, %v11423_v17, %v4618_v43 }
 0x6cb   : > { %v11441_v58 = vadd.f32 %v11396_v13, %v4420_v46  ;;  %4719 = vrot.lane.b32.xlu1 %v4650_v9, %s7610_s19  ;;  %v4649_v54 = vsel %vm4585_vm12, %v11427_v5, %v4617_v6 }
 0x6cc   : > { %14172 = vst [vmem:[#allocation140_spill] sm:$0xff] %v11437_v21  ;;  %4717 = vrot.lane.b32.xlu0 %v4649_v54, %s7610_s19  ;;  %vm4588_vm6 = vcmp.gt.f32.partialorder %v11437_v21, 0.0  ;;  %v4620_v0 = vmul.f32 0.1, %v11437_v21 }
 0x6cd   : > { %14173 = vst [vmem:[#allocation156_spill] sm:$0xff] %v11441_v58  ;;  %v7351_v11 = vpop.f32.mrb[40].mxu0  ;;  %vm4587_vm7 = vcmp.gt.f32.partialorder %v11441_v58, 0.0  ;;  %v4619_v35 = vmul.f32 0.1, %v11441_v58 }
 0x6ce   : > { %v11451_v34 = vadd.f32 %v7351_v11, %v11396_v13  ;;  %v4430_v12 = vpop.f32.mrb[41].mxu0  ;;  %v4652_v26 = vsel %vm4588_vm6, %v11437_v21, %v4620_v0 }
 0x6cf   : > { %v11455_v22 = vadd.f32 %v11396_v13, %v4430_v12  ;;  %4723 = vrot.lane.b32.xlu1 %v4652_v26, %s7610_s19  ;;  %v4651_v2 = vsel %vm4587_vm7, %v11441_v58, %v4619_v35 }
 0x6d0   : > { %14174 = vst [vmem:[#allocation132_spill] sm:$0xff] %v11451_v34  ;;  %4721 = vrot.lane.b32.xlu0 %v4651_v2, %s7610_s19  ;;  %vm4590_vm8 = vcmp.gt.f32.partialorder %v11451_v34, 0.0  ;;  %v4622_v1 = vmul.f32 0.1, %v11451_v34 }
 0x6d1   : > { %14175 = vst [vmem:[#allocation163_spill] sm:$0xff] %v11455_v22  ;;  %v7354_v10 = vpop.f32.mrb[42].mxu0  ;;  %vm4589_vm9 = vcmp.gt.f32.partialorder %v11455_v22, 0.0  ;;  %v4621_v40 = vmul.f32 0.1, %v11455_v22 }
 0x6d2   : > { %v11465_v49 = vadd.f32 %v7354_v10, %v11396_v13  ;;  %v4440_v25 = vpop.f32.mrb[43].mxu0  ;;  %v4654_v39 = vsel %vm4590_vm8, %v11451_v34, %v4622_v1 }
 0x6d3   : > { %v11469_v31 = vadd.f32 %v11396_v13, %v4440_v25  ;;  %4727 = vrot.lane.b32.xlu1 %v4654_v39, %s7610_s19  ;;  %v4653_v32 = vsel %vm4589_vm9, %v11455_v22, %v4621_v40 }
 0x6d4   : > { %14176 = vst [vmem:[#allocation31_spill] sm:$0xff] %v11465_v49  ;;  %4725 = vrot.lane.b32.xlu0 %v4653_v32, %s7610_s19  ;;  %vm4592_vm10 = vcmp.gt.f32.partialorder %v11465_v49, 0.0  ;;  %v4624_v59 = vmul.f32 0.1, %v11465_v49 }
 0x6d5   : > { %14177 = vst [vmem:[#allocation155_spill] sm:$0xff] %v11469_v31  ;;  %v7357_v51 = vpop.f32.mrb[44].mxu0  ;;  %vm4591_vm12 = vcmp.gt.f32.partialorder %v11469_v31, 0.0  ;;  %v4623_v42 = vmul.f32 0.1, %v11469_v31 }
 0x6d6   : > { %v11479_v47 = vadd.f32 %v7357_v51, %v11396_v13  ;;  %v4450_v23 = vpop.f32.mrb[45].mxu0  ;;  %v4656_v38 = vsel %vm4592_vm10, %v11465_v49, %v4624_v59 }
 0x6d7   : > { %v11483_v50 = vadd.f32 %v11396_v13, %v4450_v23  ;;  %4731 = vrot.lane.b32.xlu1 %v4656_v38, %s7610_s19  ;;  %v4655_v45 = vsel %vm4591_vm12, %v11469_v31, %v4623_v42 }
 0x6d8   : > { %14178 = vst [vmem:[#allocation13_spill] sm:$0xff] %v11479_v47  ;;  %4729 = vrot.lane.b32.xlu0 %v4655_v45, %s7610_s19  ;;  %vm4594_vm6 = vcmp.gt.f32.partialorder %v11479_v47, 0.0  ;;  %v4626_v28 = vmul.f32 0.1, %v11479_v47 }
 0x6d9   : > { %14179 = vst [vmem:[#allocation29_spill] sm:$0xff] %v11483_v50  ;;  %v7360_v52 = vpop.f32.mrb[0].mxu1  ;;  %vm4593_vm7 = vcmp.gt.f32.partialorder %v11483_v50, 0.0  ;;  %v4625_v20 = vmul.f32 0.1, %v11483_v50 }
 0x6da   : > { %v11493_v3 = vadd.f32 %v7360_v52, %v11396_v13  ;;  %v4460_v48 = vpop.f32.mrb[1].mxu1  ;;  %v4658_v36 = vsel %vm4594_vm6, %v11479_v47, %v4626_v28 }
 0x6db   : > { %v11497_v55 = vadd.f32 %v11396_v13, %v4460_v48  ;;  %4735 = vrot.lane.b32.xlu1 %v4658_v36, %s7610_s19  ;;  %v4657_v41 = vsel %vm4593_vm7, %v11483_v50, %v4625_v20 }
 0x6dc   : > { %14180 = vst [vmem:[#allocation61_spill] sm:$0xff] %v11493_v3  ;;  %4733 = vrot.lane.b32.xlu0 %v4657_v41, %s7610_s19  ;;  %vm4596_vm8 = vcmp.gt.f32.partialorder %v11493_v3, 0.0  ;;  %v4628_v44 = vmul.f32 0.1, %v11493_v3 }
 0x6dd   : > { %14181 = vst [vmem:[#allocation32_spill] sm:$0xff] %v11497_v55  ;;  %vm4595_vm9 = vcmp.gt.f32.partialorder %v11497_v55, 0.0  ;;  %v4627_v63 = vmul.f32 0.1, %v11497_v55 }
 0x6de   : > { %v7363_v16 = vpop.f32.mrb[2].mxu1  ;;  %v4660_v7 = vsel %vm4596_vm8, %v11493_v3, %v4628_v44 }
 0x6df   : > { %v11507_v19 = vadd.f32 %v7363_v16, %v11396_v13  ;;  %v4470_v4 = vpop.f32.mrb[3].mxu1  ;;  %4739 = vrot.lane.b32.xlu1 %v4660_v7, %s7610_s19  ;;  %v4659_v53 = vsel %vm4595_vm9, %v11497_v55, %v4627_v63 }
 0x6e0   : > { %v11511_v27 = vadd.f32 %v11396_v13, %v4470_v4  ;;  %4737 = vrot.lane.b32.xlu0 %v4659_v53, %s7610_s19 }
 0x6e1   : > { %14182 = vst [vmem:[#allocation135_spill] sm:$0xff] %v11507_v19  ;;  %vm4598_vm10 = vcmp.gt.f32.partialorder %v11507_v19, 0.0  ;;  %v4630_v8 = vmul.f32 0.1, %v11507_v19 }
 0x6e2   : > { %14183 = vst [vmem:[#allocation79_spill] sm:$0xff] %v11511_v27  ;;  %v7366_v30 = vpop.f32.mrb[4].mxu1  ;;  %vm4597_vm12 = vcmp.gt.f32.partialorder %v11511_v27, 0.0  ;;  %v4629_v33 = vmul.f32 0.1, %v11511_v27 }
 0x6e3   : > { %v11521_v18 = vadd.f32 %v7366_v30, %v11396_v13  ;;  %v4480_v15 = vpop.f32.mrb[5].mxu1  ;;  %v4662_v61 = vsel %vm4598_vm10, %v11507_v19, %v4630_v8 }
 0x6e4   : > { %v11525_v62 = vadd.f32 %v11396_v13, %v4480_v15  ;;  %4743 = vrot.lane.b32.xlu1 %v4662_v61, %s7610_s19  ;;  %v4661_v14 = vsel %vm4597_vm12, %v11511_v27, %v4629_v33 }
 0x6e5   : > { %14184 = vst [vmem:[#allocation120_spill] sm:$0xff] %v11521_v18  ;;  %4741 = vrot.lane.b32.xlu0 %v4661_v14, %s7610_s19  ;;  %vm4600_vm6 = vcmp.gt.f32.partialorder %v11521_v18, 0.0  ;;  %v4632_v57 = vmul.f32 0.1, %v11521_v18 }
 0x6e6   : > { %14185 = vst [vmem:[#allocation168_spill] sm:$0xff] %v11525_v62  ;;  %vm4599_vm7 = vcmp.gt.f32.partialorder %v11525_v62, 0.0  ;;  %v4631_v24 = vmul.f32 0.1, %v11525_v62 }
 0x6e7   : > { %v4664_v9 = vsel %vm4600_vm6, %v11521_v18, %v4632_v57 }
 0x6e8   : > { %v7369_v43 = vpop.f32.mrb[6].mxu1  ;;  %4747 = vrot.lane.b32.xlu1 %v4664_v9, %s7610_s19  ;;  %v4663_v0 = vsel %vm4599_vm7, %v11525_v62, %v4631_v24 }
 0x6e9   : > { %v11535_v6 = vadd.f32 %v7369_v43, %v11396_v13  ;;  %v4490_v46 = vpop.f32.mrb[7].mxu1  ;;  %4745 = vrot.lane.b32.xlu0 %v4663_v0, %s7610_s19 }
 0x6ea   : > { %v11539_v54 = vadd.f32 %v11396_v13, %v4490_v46 }
 0x6eb   : > { %14186 = vst [vmem:[#allocation68_spill] sm:$0xff] %v11535_v6  ;;  %vm4602_vm8 = vcmp.gt.f32.partialorder %v11535_v6, 0.0  ;;  %v4634_v11 = vmul.f32 0.1, %v11535_v6 }
 0x6ec   : > { %14187 = vst [vmem:[#allocation186_spill] sm:$0xff] %v11539_v54  ;;  %v7372_v35 = vpop.f32.mrb[8].mxu1  ;;  %vm4601_vm9 = vcmp.gt.f32.partialorder %v11539_v54, 0.0  ;;  %v4633_v12 = vmul.f32 0.1, %v11539_v54 }
 0x6ed   : > { %v11549_v26 = vadd.f32 %v7372_v35, %v11396_v13  ;;  %v4500_v2 = vpop.f32.mrb[9].mxu1  ;;  %v4666_v1 = vsel %vm4602_vm8, %v11535_v6, %v4634_v11 }
 0x6ee   : > { %v11553_v10 = vadd.f32 %v11396_v13, %v4500_v2  ;;  %4751 = vrot.lane.b32.xlu1 %v4666_v1, %s7610_s19  ;;  %v4665_v40 = vsel %vm4601_vm9, %v11539_v54, %v4633_v12  ;;  %v4870_v12 = vld [vmem:[#allocation3 + $0x9] sm:$0xff]  ;;  %v4869_v2 = vld [vmem:[#allocation3 + $0x1] sm:$0xff] }
 0x6ef   : > { %14188 = vst [vmem:[#allocation144_spill] sm:$0xff] %v11549_v26  ;;  %4749 = vrot.lane.b32.xlu0 %v4665_v40, %s7610_s19  ;;  %vm4604_vm10 = vcmp.gt.f32.partialorder %v11549_v26, 0.0  ;;  %v4636_v25 = vmul.f32 0.1, %v11549_v26 }
 0x6f0   : > { %14189 = vst [vmem:[#allocation93_spill] sm:$0xff] %v11553_v10  ;;  %vm4603_vm12 = vcmp.gt.f32.partialorder %v11553_v10, 0.0  ;;  %v4635_v32 = vmul.f32 0.1, %v11553_v10 }
 0x6f1   : > { %v4668_v42 = vsel %vm4604_vm10, %v11549_v26, %v4636_v25 }
 0x6f2   : > { %4755 = vrot.lane.b32.xlu1 %v4668_v42, %s7610_s19  ;;  %v4667_v38 = vsel %vm4603_vm12, %v11553_v10, %v4635_v32 }
 0x6f3   : > { %v7375_v39 = vpop.f32.mrb[10].mxu1  ;;  %4753 = vrot.lane.b32.xlu0 %v4667_v38, %s7610_s19 }
 0x6f4   : > { %v11563_v59 = vadd.f32 %v7375_v39, %v11396_v13  ;;  %v4510_v51 = vpop.f32.mrb[11].mxu1 }
 0x6f5   : > { %v11567_v23 = vadd.f32 %v11396_v13, %v4510_v51 }
 0x6f6   : > { %14190 = vst [vmem:[#allocation185_spill] sm:$0xff] %v11563_v59  ;;  %vm4606_vm6 = vcmp.gt.f32.partialorder %v11563_v59, 0.0  ;;  %v4638_v45 = vmul.f32 0.1, %v11563_v59 }
 0x6f7   : > { %14191 = vst [vmem:[#allocation158_spill] sm:$0xff] %v11567_v23  ;;  %v7378_v28 = vpop.f32.mrb[12].mxu1  ;;  %vm4605_vm7 = vcmp.gt.f32.partialorder %v11567_v23, 0.0  ;;  %v4637_v52 = vmul.f32 0.1, %v11567_v23 }
 0x6f8   : > { %v11577_v20 = vadd.f32 %v7378_v28, %v11396_v13  ;;  %v4520_v48 = vpop.f32.mrb[13].mxu1  ;;  %v4670_v36 = vsel %vm4606_vm6, %v11563_v59, %v4638_v45 }
 0x6f9   : > { %v11581_v41 = vadd.f32 %v11396_v13, %v4520_v48  ;;  %4759 = vrot.lane.b32.xlu1 %v4670_v36, %s7610_s19  ;;  %v4669_v44 = vsel %vm4605_vm7, %v11567_v23, %v4637_v52 }
 0x6fa   : > { %14192 = vst [vmem:[#allocation58_spill] sm:$0xff] %v11577_v20  ;;  %4757 = vrot.lane.b32.xlu0 %v4669_v44, %s7610_s19  ;;  %vm4608_vm8 = vcmp.gt.f32.partialorder %v11577_v20, 0.0  ;;  %v4640_v16 = vmul.f32 0.1, %v11577_v20 }
 0x6fb   : > { %14193 = vst [vmem:[#allocation152_spill] sm:$0xff] %v11581_v41  ;;  %vm4607_vm9 = vcmp.gt.f32.partialorder %v11581_v41, 0.0  ;;  %v4639_v4 = vmul.f32 0.1, %v11581_v41 }
 0x6fc   : > { %v4672_v8 = vsel %vm4608_vm8, %v11577_v20, %v4640_v16 }
 0x6fd   : > { %v7381_v63 = vpop.f32.mrb[14].mxu1  ;;  %4763 = vrot.lane.b32.xlu1 %v4672_v8, %s7610_s19  ;;  %v4671_v33 = vsel %vm4607_vm9, %v11581_v41, %v4639_v4 }
 0x6fe   : > { %v11591_v7 = vadd.f32 %v7381_v63, %v11396_v13  ;;  %v4530_v53 = vpop.f32.mrb[15].mxu1  ;;  %4761 = vrot.lane.b32.xlu0 %v4671_v33, %s7610_s19 }
 0x6ff   : > { %v11595_v30 = vadd.f32 %v11396_v13, %v4530_v53 }
 0x700   : > { %14194 = vst [vmem:[#allocation100_spill] sm:$0xff] %v11591_v7  ;;  %vm4610_vm10 = vcmp.gt.f32.partialorder %v11591_v7, 0.0  ;;  %v4642_v15 = vmul.f32 0.1, %v11591_v7 }
 0x701   : > { %14195 = vst [vmem:[#allocation87_spill] sm:$0xff] %v11595_v30  ;;  %v7384_v61 = vpop.f32.mrb[16].mxu1  ;;  %vm4609_vm12 = vcmp.gt.f32.partialorder %v11595_v30, 0.0  ;;  %v4641_v14 = vmul.f32 0.1, %v11595_v30 }
 0x702   : > { %v11605_v57 = vadd.f32 %v7384_v61, %v11396_v13  ;;  %v4540_v43 = vpop.f32.mrb[17].mxu1  ;;  %v4674_v24 = vsel %vm4610_vm10, %v11591_v7, %v4642_v15 }
 0x703   : > { %v11609_v46 = vadd.f32 %v11396_v13, %v4540_v43  ;;  %4767 = vrot.lane.b32.xlu1 %v4674_v24, %s7610_s19  ;;  %v4673_v9 = vsel %vm4609_vm12, %v11595_v30, %v4641_v14 }
 0x704   : > { %14196 = vst [vmem:[#allocation129_spill] sm:$0xff] %v11605_v57  ;;  %4765 = vrot.lane.b32.xlu0 %v4673_v9, %s7610_s19  ;;  %vm4612_vm6 = vcmp.gt.f32.partialorder %v11605_v57, 0.0  ;;  %v4644_v0 = vmul.f32 0.1, %v11605_v57 }
 0x705   : > { %14197 = vst [vmem:[#allocation138_spill] sm:$0xff] %v11609_v46  ;;  %vm4611_vm7 = vcmp.gt.f32.partialorder %v11609_v46, 0.0  ;;  %v4643_v11 = vmul.f32 0.1, %v11609_v46 }
 0x706   : > { %v4676_v35 = vsel %vm4612_vm6, %v11605_v57, %v4644_v0  ;;  %v4901_v57 = vld [vmem:[#allocation3 + $0x2] sm:$0xff] }
 0x707   : > { %4771 = vrot.lane.b32.xlu1 %v4676_v35, %s7610_s19  ;;  %v4675_v13 = vsel %vm4611_vm7, %v11609_v46, %v4643_v11 }
 0x708   : > { %4769 = vrot.lane.b32.xlu0 %v4675_v13, %s7610_s19 }
 0x70b   : > { %5159 = vrot.lane.b32.xlu1 %v4870_v12, %s7606_s20 }
 0x70c   : > { %5157 = vrot.lane.b32.xlu0 %v4869_v2, %s7606_s20 }
 0x735   : > { %v4712_v1 = vpop.permute.xlu1 %4711 }
 0x736   : > { %4806 = vst.msk [vmem:[#allocation3 + $0x21] sm:$0xff] %vm2432_vm11, %v4712_v1  ;;  %v4710_v40 = vpop.permute.xlu0 %4709 }
 0x737   : > { %4805 = vst.msk [vmem:[#allocation3 + $0x19] sm:$0xff] %vm2432_vm11, %v4710_v40 }
 0x739   : > { %v4716_v25 = vpop.permute.xlu1 %4715 }
 0x73a   : > { %4808 = vst.msk [vmem:[#allocation3 + $0x39] sm:$0xff] %vm2432_vm11, %v4716_v25  ;;  %v4714_v39 = vpop.permute.xlu0 %4713 }
 0x73b   : > { %4807 = vst.msk [vmem:[#allocation3 + $0x31] sm:$0xff] %vm2432_vm11, %v4714_v39 }
 0x73d   : > { %v4720_v32 = vpop.permute.xlu1 %4719  ;;  %v11628_v51 = vld [vmem:[#allocation3 + $0x21] sm:$0xff] }
 0x73e   : > { %4810 = vst.msk [vmem:[#allocation3 + $0x51] sm:$0xff] %vm2432_vm11, %v4720_v32  ;;  %5163 = vrot.lane.b32.xlu1 %v11628_v51, %s7606_s20  ;;  %v4718_v42 = vpop.permute.xlu0 %4717  ;;  %v11633_v38 = vld [vmem:[#allocation3 + $0x19] sm:$0xff] }
 0x73f   : > { %4809 = vst.msk [vmem:[#allocation3 + $0x49] sm:$0xff] %vm2432_vm11, %v4718_v42  ;;  %5161 = vrot.lane.b32.xlu0 %v11633_v38, %s7606_s20  ;;  %v11782_v46 = vld [vmem:[#allocation3 + $0x1a] sm:$0xff] }
 0x741   : > { %v4724_v45 = vpop.permute.xlu1 %4723  ;;  %v11638_v28 = vld [vmem:[#allocation3 + $0x39] sm:$0xff] }
 0x742   : > { %4812 = vst.msk [vmem:[#allocation3 + $0x69] sm:$0xff] %vm2432_vm11, %v4724_v45  ;;  %5167 = vrot.lane.b32.xlu1 %v11638_v28, %s7606_s20  ;;  %v4722_v52 = vpop.permute.xlu0 %4721  ;;  %v11643_v48 = vld [vmem:[#allocation3 + $0x31] sm:$0xff]  ;;  %v11786_v7 = vld [vmem:[#allocation3 + $0x3a] sm:$0xff] }
 0x743   : > { %4811 = vst.msk [vmem:[#allocation3 + $0x61] sm:$0xff] %vm2432_vm11, %v4722_v52  ;;  %5165 = vrot.lane.b32.xlu0 %v11643_v48, %s7606_s20  ;;  %v11790_v3 = vld [vmem:[#allocation3 + $0x32] sm:$0xff] }
 0x745   : > { %v4728_v36 = vpop.permute.xlu1 %4727  ;;  %v11648_v44 = vld [vmem:[#allocation3 + $0x51] sm:$0xff] }
 0x746   : > { %4814 = vst.msk [vmem:[#allocation3 + $0x81] sm:$0xff] %vm2432_vm11, %v4728_v36  ;;  %5171 = vrot.lane.b32.xlu1 %v11648_v44, %s7606_s20  ;;  %v4726_v16 = vpop.permute.xlu0 %4725  ;;  %v11653_v63 = vld [vmem:[#allocation3 + $0x49] sm:$0xff] }
 0x747   : > { %4813 = vst.msk [vmem:[#allocation3 + $0x79] sm:$0xff] %vm2432_vm11, %v4726_v16  ;;  %5169 = vrot.lane.b32.xlu0 %v11653_v63, %s7606_s20 }
 0x749   : > { %v4732_v4 = vpop.permute.xlu1 %4731  ;;  %v11658_v53 = vld [vmem:[#allocation3 + $0x69] sm:$0xff] }
 0x74a   : > { %4816 = vst.msk [vmem:[#allocation3 + $0x99] sm:$0xff] %vm2432_vm11, %v4732_v4  ;;  %5175 = vrot.lane.b32.xlu1 %v11658_v53, %s7606_s20  ;;  %v4730_v8 = vpop.permute.xlu0 %4729  ;;  %v11663_v33 = vld [vmem:[#allocation3 + $0x61] sm:$0xff]  ;;  %v11802_v30 = vld [vmem:[#allocation3 + $0x6a] sm:$0xff] }
 0x74b   : > { %4815 = vst.msk [vmem:[#allocation3 + $0x91] sm:$0xff] %vm2432_vm11, %v4730_v8  ;;  %5173 = vrot.lane.b32.xlu0 %v11663_v33, %s7606_s20  ;;  %v11806_v55 = vld [vmem:[#allocation3 + $0x62] sm:$0xff] }
 0x74d   : > { %v4736_v15 = vpop.permute.xlu1 %4735  ;;  %v11668_v61 = vld [vmem:[#allocation3 + $0x81] sm:$0xff] }
 0x74e   : > { %4818 = vst.msk [vmem:[#allocation3 + $0xb1] sm:$0xff] %vm2432_vm11, %v4736_v15  ;;  %5179 = vrot.lane.b32.xlu1 %v11668_v61, %s7606_s20  ;;  %v4734_v14 = vpop.permute.xlu0 %4733  ;;  %v11673_v43 = vld [vmem:[#allocation3 + $0x79] sm:$0xff]  ;;  %v11810_v20 = vld [vmem:[#allocation3 + $0x82] sm:$0xff] }
 0x74f   : > { %4817 = vst.msk [vmem:[#allocation3 + $0xa9] sm:$0xff] %vm2432_vm11, %v4734_v14  ;;  %5177 = vrot.lane.b32.xlu0 %v11673_v43, %s7606_s20  ;;  %v11814_v47 = vld [vmem:[#allocation3 + $0x7a] sm:$0xff] }
 0x751   : > { %v4740_v24 = vpop.permute.xlu1 %4739  ;;  %v11678_v9 = vld [vmem:[#allocation3 + $0x99] sm:$0xff] }
 0x752   : > { %4820 = vst.msk [vmem:[#allocation3 + $0xc9] sm:$0xff] %vm2432_vm11, %v4740_v24  ;;  %5183 = vrot.lane.b32.xlu1 %v11678_v9, %s7606_s20  ;;  %v4738_v0 = vpop.permute.xlu0 %4737  ;;  %v11683_v11 = vld [vmem:[#allocation3 + $0x91] sm:$0xff]  ;;  %v11818_v41 = vld [vmem:[#allocation3 + $0x9a] sm:$0xff] }
 0x753   : > { %4819 = vst.msk [vmem:[#allocation3 + $0xc1] sm:$0xff] %vm2432_vm11, %v4738_v0  ;;  %5181 = vrot.lane.b32.xlu0 %v11683_v11, %s7606_s20  ;;  %v11822_v50 = vld [vmem:[#allocation3 + $0x92] sm:$0xff] }
 0x755   : > { %v11688_v13 = vld [vmem:[#allocation3 + $0xb1] sm:$0xff] }
 0x756   : > { %v4744_v35 = vpop.permute.xlu1 %4743  ;;  %5187 = vrot.lane.b32.xlu1 %v11688_v13, %s7606_s20  ;;  %v11693_v2 = vld [vmem:[#allocation3 + $0xa9] sm:$0xff]  ;;  %v11826_v59 = vld [vmem:[#allocation3 + $0xb2] sm:$0xff] }
 0x757   : > { %4822 = vst.msk [vmem:[#allocation3 + $0xe1] sm:$0xff] %vm2432_vm11, %v4744_v35  ;;  %v4742_v12 = vpop.permute.xlu0 %4741  ;;  %5185 = vrot.lane.b32.xlu0 %v11693_v2, %s7606_s20  ;;  %v11830_v49 = vld [vmem:[#allocation3 + $0xaa] sm:$0xff] }
 0x758   : > { %4821 = vst.msk [vmem:[#allocation3 + $0xd9] sm:$0xff] %vm2432_vm11, %v4742_v12 }
 0x759   : > { %v11698_v40 = vld [vmem:[#allocation3 + $0xc9] sm:$0xff] }
 0x75a   : > { %v4748_v1 = vpop.permute.xlu1 %4747  ;;  %5191 = vrot.lane.b32.xlu1 %v11698_v40, %s7606_s20  ;;  %v11703_v39 = vld [vmem:[#allocation3 + $0xc1] sm:$0xff]  ;;  %v11834_v23 = vld [vmem:[#allocation3 + $0xca] sm:$0xff] }
 0x75b   : > { %4824 = vst.msk [vmem:[#allocation3 + $0xf9] sm:$0xff] %vm2432_vm11, %v4748_v1  ;;  %v4746_v25 = vpop.permute.xlu0 %4745  ;;  %5189 = vrot.lane.b32.xlu0 %v11703_v39, %s7606_s20  ;;  %v11838_v31 = vld [vmem:[#allocation3 + $0xc2] sm:$0xff] }
 0x75c   : > { %4823 = vst.msk [vmem:[#allocation3 + $0xf1] sm:$0xff] %vm2432_vm11, %v4746_v25 }
 0x75e   : > { %v11708_v42 = vld [vmem:[#allocation3 + $0xe1] sm:$0xff] }
 0x75f   : > { %5195 = vrot.lane.b32.xlu1 %v11708_v42, %s7606_s20  ;;  %v11713_v52 = vld [vmem:[#allocation3 + $0xd9] sm:$0xff]  ;;  %v11842_v26 = vld [vmem:[#allocation3 + $0xe2] sm:$0xff] }
 0x760   : > { %v4752_v32 = vpop.permute.xlu1 %4751  ;;  %5193 = vrot.lane.b32.xlu0 %v11713_v52, %s7606_s20  ;;  %v11846_v34 = vld [vmem:[#allocation3 + $0xda] sm:$0xff] }
 0x761   : > { %4826 = vst.msk [vmem:[#allocation3 + $0x111] sm:$0xff] %vm2432_vm11, %v4752_v32  ;;  %v4750_v45 = vpop.permute.xlu0 %4749 }
 0x762   : > { %4825 = vst.msk [vmem:[#allocation3 + $0x109] sm:$0xff] %vm2432_vm11, %v4750_v45  ;;  %v11718_v16 = vld [vmem:[#allocation3 + $0xf9] sm:$0xff] }
 0x763   : > { %5199 = vrot.lane.b32.xlu1 %v11718_v16, %s7606_s20  ;;  %v11723_v8 = vld [vmem:[#allocation3 + $0xf1] sm:$0xff]  ;;  %v11850_v10 = vld [vmem:[#allocation3 + $0xfa] sm:$0xff] }
 0x764   : > { %v4756_v36 = vpop.permute.xlu1 %4755  ;;  %5197 = vrot.lane.b32.xlu0 %v11723_v8, %s7606_s20  ;;  %v11854_v22 = vld [vmem:[#allocation3 + $0xf2] sm:$0xff] }
 0x765   : > { %4828 = vst.msk [vmem:[#allocation3 + $0x129] sm:$0xff] %vm2432_vm11, %v4756_v36  ;;  %v4754_v4 = vpop.permute.xlu0 %4753 }
 0x766   : > { %4827 = vst.msk [vmem:[#allocation3 + $0x121] sm:$0xff] %vm2432_vm11, %v4754_v4 }
 0x768   : > { %v11728_v14 = vld [vmem:[#allocation3 + $0x111] sm:$0xff] }
 0x769   : > { %5203 = vrot.lane.b32.xlu1 %v11728_v14, %s7606_s20  ;;  %v11733_v0 = vld [vmem:[#allocation3 + $0x109] sm:$0xff]  ;;  %v11858_v6 = vld [vmem:[#allocation3 + $0x112] sm:$0xff] }
 0x76a   : > { %5201 = vrot.lane.b32.xlu0 %v11733_v0, %s7606_s20  ;;  %v11862_v21 = vld [vmem:[#allocation3 + $0x10a] sm:$0xff] }
 0x76b   : > { %v4760_v15 = vpop.permute.xlu1 %4759 }
 0x76c   : > { %4830 = vst.msk [vmem:[#allocation3 + $0x141] sm:$0xff] %vm2432_vm11, %v4760_v15  ;;  %v4758_v24 = vpop.permute.xlu0 %4757  ;;  %v11738_v12 = vld [vmem:[#allocation3 + $0x129] sm:$0xff] }
 0x76d   : > { %4829 = vst.msk [vmem:[#allocation3 + $0x139] sm:$0xff] %vm2432_vm11, %v4758_v24  ;;  %5207 = vrot.lane.b32.xlu1 %v11738_v12, %s7606_s20  ;;  %v11743_v25 = vld [vmem:[#allocation3 + $0x121] sm:$0xff]  ;;  %v11866_v54 = vld [vmem:[#allocation3 + $0x12a] sm:$0xff] }
 0x76e   : > { %5205 = vrot.lane.b32.xlu0 %v11743_v25, %s7606_s20  ;;  %v11870_v58 = vld [vmem:[#allocation3 + $0x122] sm:$0xff] }
 0x76f   : > { %v4764_v35 = vpop.permute.xlu1 %4763 }
 0x770   : > { %4832 = vst.msk [vmem:[#allocation3 + $0x159] sm:$0xff] %vm2432_vm11, %v4764_v35  ;;  %v4762_v1 = vpop.permute.xlu0 %4761 }
 0x771   : > { %4831 = vst.msk [vmem:[#allocation3 + $0x151] sm:$0xff] %vm2432_vm11, %v4762_v1 }
 0x773   : > { %v11748_v45 = vld [vmem:[#allocation3 + $0x141] sm:$0xff] }
 0x774   : > { %5211 = vrot.lane.b32.xlu1 %v11748_v45, %s7606_s20  ;;  %v11753_v4 = vld [vmem:[#allocation3 + $0x139] sm:$0xff]  ;;  %v11878_v62 = vld [vmem:[#allocation3 + $0x142] sm:$0xff] }
 0x775   : > { %v4768_v32 = vpop.permute.xlu1 %4767  ;;  %5209 = vrot.lane.b32.xlu0 %v11753_v4, %s7606_s20  ;;  %14200 = vst [vmem:[#allocation82_spill] sm:$0xff] %v11878_v62  ;;  %v11882_v5 = vld [vmem:[#allocation3 + $0x13a] sm:$0xff] }
 0x776   : > { %4834 = vst.msk [vmem:[#allocation3 + $0x171] sm:$0xff] %vm2432_vm11, %v4768_v32  ;;  %v4766_v36 = vpop.permute.xlu0 %4765  ;;  %14201 = vst [vmem:[#allocation188_spill] sm:$0xff] %v11882_v5 }
 0x777   : > { %4833 = vst.msk [vmem:[#allocation3 + $0x169] sm:$0xff] %vm2432_vm11, %v4766_v36  ;;  %v11758_v24 = vld [vmem:[#allocation3 + $0x159] sm:$0xff] }
 0x778   : > { %5215 = vrot.lane.b32.xlu1 %v11758_v24, %s7606_s20  ;;  %v11763_v1 = vld [vmem:[#allocation3 + $0x151] sm:$0xff]  ;;  %v11890_v27 = vld [vmem:[#allocation3 + $0x15a] sm:$0xff] }
 0x779   : > { %v4772_v15 = vpop.permute.xlu1 %4771  ;;  %5213 = vrot.lane.b32.xlu0 %v11763_v1, %s7606_s20  ;;  %14204 = vst [vmem:[#allocation187_spill] sm:$0xff] %v11890_v27  ;;  %v11894_v60 = vld [vmem:[#allocation3 + $0x152] sm:$0xff] }
 0x77a   : > { %4836 = vst.msk [vmem:[#allocation3 + $0x189] sm:$0xff] %vm2432_vm11, %v4772_v15  ;;  %v4770_v35 = vpop.permute.xlu0 %4769  ;;  %v4902_v15 = vld [vmem:[#allocation3 + $0xa] sm:$0xff]  ;;  %14205 = vst [vmem:[#allocation36_spill] sm:$0xff] %v11894_v60 }
 0x77b   : > { %4835 = vst.msk [vmem:[#allocation3 + $0x181] sm:$0xff] %vm2432_vm11, %v4770_v35  ;;  %v11778_v35 = vld [vmem:[#allocation3 + $0x22] sm:$0xff] }
 0x77d   : > { %v11768_v32 = vld [vmem:[#allocation3 + $0x171] sm:$0xff]  ;;  %v11872_v18 = vpop.permute.xlu1 %5159 }
 0x77e   : > { %5219 = vrot.lane.b32.xlu1 %v11768_v32, %s7606_s20  ;;  %v11772_v36 = vld [vmem:[#allocation3 + $0x169] sm:$0xff]  ;;  %14198 = vst [vmem:[#allocation46_spill] sm:$0xff] %v11872_v18  ;;  %v11876_v17 = vpop.permute.xlu0 %5157  ;;  %v11902_v18 = vld [vmem:[#allocation3 + $0x172] sm:$0xff] }
 0x77f   : > { %5217 = vrot.lane.b32.xlu0 %v11772_v36, %s7606_s20  ;;  %14199 = vst [vmem:[#allocation39_spill] sm:$0xff] %v11876_v17  ;;  %14208 = vst [vmem:[#allocation19_spill] sm:$0xff] %v11902_v18  ;;  %v11912_v17 = vld [vmem:[#allocation3 + $0x20] sm:$0xff] }
 0x780   : > { %14211 = vst [vmem:[#allocation161_spill] sm:$0xff] %v11912_v17 }
 0x782   : > { %5287 = vrot.lane.b32.xlu1 %v4902_v15, %s7597_s8  ;;  %v11798_v15 = vld [vmem:[#allocation3 + $0x4a] sm:$0xff] }
 0x783   : > { %5285 = vrot.lane.b32.xlu0 %v4901_v57, %s7597_s8  ;;  %v11794_v57 = vld [vmem:[#allocation3 + $0x52] sm:$0xff] }
 0x786   : > { %5291 = vrot.lane.b32.xlu1 %v11778_v35, %s7597_s8 }
 0x787   : > { %5289 = vrot.lane.b32.xlu0 %v11782_v46, %s7597_s8 }
 0x78a   : > { %5295 = vrot.lane.b32.xlu1 %v11786_v7, %s7597_s8 }
 0x78b   : > { %5293 = vrot.lane.b32.xlu0 %v11790_v3, %s7597_s8 }
 0x78e   : > { %5299 = vrot.lane.b32.xlu1 %v11794_v57, %s7597_s8 }
 0x78f   : > { %5297 = vrot.lane.b32.xlu0 %v11798_v15, %s7597_s8 }
 0x792   : > { %5303 = vrot.lane.b32.xlu1 %v11802_v30, %s7597_s8 }
 0x793   : > { %5301 = vrot.lane.b32.xlu0 %v11806_v55, %s7597_s8 }
 0x796   : > { %5307 = vrot.lane.b32.xlu1 %v11810_v20, %s7597_s8 }
 0x797   : > { %5305 = vrot.lane.b32.xlu0 %v11814_v47, %s7597_s8 }
 0x79a   : > { %5311 = vrot.lane.b32.xlu1 %v11818_v41, %s7597_s8 }
 0x79b   : > { %5309 = vrot.lane.b32.xlu0 %v11822_v50, %s7597_s8 }
 0x79e   : > { %5315 = vrot.lane.b32.xlu1 %v11826_v59, %s7597_s8 }
 0x79f   : > { %5313 = vrot.lane.b32.xlu0 %v11830_v49, %s7597_s8 }
 0x7a2   : > { %5319 = vrot.lane.b32.xlu1 %v11834_v23, %s7597_s8 }
 0x7a3   : > { %5317 = vrot.lane.b32.xlu0 %v11838_v31, %s7597_s8 }
 0x7a6   : > { %5323 = vrot.lane.b32.xlu1 %v11842_v26, %s7597_s8 }
 0x7a7   : > { %5321 = vrot.lane.b32.xlu0 %v11846_v34, %s7597_s8 }
 0x7aa   : > { %5327 = vrot.lane.b32.xlu1 %v11850_v10, %s7597_s8 }
 0x7ab   : > { %5325 = vrot.lane.b32.xlu0 %v11854_v22, %s7597_s8 }
 0x7ae   : > { %5331 = vrot.lane.b32.xlu1 %v11858_v6, %s7597_s8 }
 0x7af   : > { %5329 = vrot.lane.b32.xlu0 %v11862_v21, %s7597_s8 }
 0x7b0   : > { %v11886_v19 = vpop.permute.xlu1 %5163 }
 0x7b1   : > { %14202 = vst [vmem:[#allocation109_spill] sm:$0xff] %v11886_v19  ;;  %v11888_v37 = vpop.permute.xlu0 %5161  ;;  %v11906_v19 = vld [vmem:[#allocation3 + $0x16a] sm:$0xff] }
 0x7b2   : > { %5335 = vrot.lane.b32.xlu1 %v11866_v54, %s7597_s8  ;;  %14203 = vst [vmem:[#allocation149_spill] sm:$0xff] %v11888_v37  ;;  %14209 = vst [vmem:[#allocation143_spill] sm:$0xff] %v11906_v19 }
 0x7b3   : > { %5333 = vrot.lane.b32.xlu0 %v11870_v58, %s7597_s8 }
 0x7b4   : > { %v11898_v56 = vpop.permute.xlu1 %5167 }
 0x7b5   : > { %14206 = vst [vmem:[#allocation125_spill] sm:$0xff] %v11898_v56  ;;  %v11900_v29 = vpop.permute.xlu0 %5165 }
 0x7b6   : > { %5339 = vrot.lane.b32.xlu1 %v11878_v62, %s7597_s8  ;;  %14207 = vst [vmem:[#allocation76_spill] sm:$0xff] %v11900_v29  ;;  %v11924_v29 = vld [vmem:[#allocation3 + $0x38] sm:$0xff]  ;;  %v4857_v62 = vld [vmem:[#allocation3 + $0xf0] sm:$0xff] }
 0x7b7   : > { %5337 = vrot.lane.b32.xlu0 %v11882_v5, %s7597_s8  ;;  %14215 = vst [vmem:[#allocation190_spill] sm:$0xff] %v11924_v29 }
 0x7b8   : > { %v11910_v37 = vpop.permute.xlu1 %5171 }
 0x7b9   : > { %14210 = vst [vmem:[#allocation77_spill] sm:$0xff] %v11910_v37 }
 0x7ba   : > { %5343 = vrot.lane.b32.xlu1 %v11890_v27, %s7597_s8  ;;  %v11914_v27 = vpop.permute.xlu0 %5169 }
 0x7bb   : > { %5341 = vrot.lane.b32.xlu0 %v11894_v60, %s7597_s8  ;;  %14212 = vst [vmem:[#allocation119_spill] sm:$0xff] %v11914_v27  ;;  %v11916_v60 = vld [vmem:[#allocation3 + $0x18] sm:$0xff]  ;;  %v11936_v27 = vld [vmem:[#allocation3 + $0x50] sm:$0xff] }
 0x7bc   : > { %14213 = vst [vmem:[#allocation56_spill] sm:$0xff] %v11916_v60  ;;  %v11922_v56 = vpop.permute.xlu1 %5175  ;;  %14219 = vst [vmem:[#allocation81_spill] sm:$0xff] %v11936_v27 }
 0x7bd   : > { %14214 = vst [vmem:[#allocation103_spill] sm:$0xff] %v11922_v56 }
 0x7be   : > { %5347 = vrot.lane.b32.xlu1 %v11902_v18, %s7597_s8  ;;  %v11926_v18 = vpop.permute.xlu0 %5173 }
 0x7bf   : > { %5345 = vrot.lane.b32.xlu0 %v11906_v19, %s7597_s8  ;;  %14216 = vst [vmem:[#allocation167_spill] sm:$0xff] %v11926_v18  ;;  %v11928_v19 = vld [vmem:[#allocation3 + $0x30] sm:$0xff]  ;;  %v11948_v18 = vld [vmem:[#allocation3 + $0x68] sm:$0xff] }
 0x7c0   : > { %14217 = vst [vmem:[#allocation114_spill] sm:$0xff] %v11928_v19  ;;  %v11934_v37 = vpop.permute.xlu1 %5179  ;;  %14223 = vst [vmem:[#allocation108_spill] sm:$0xff] %v11948_v18 }
 0x7c1   : > { %14218 = vst [vmem:[#allocation189_spill] sm:$0xff] %v11934_v37 }
 0x7c2   : > { %5415 = vrot.lane.b32.xlu1 %v11912_v17, %s7607_s21  ;;  %v11938_v17 = vpop.permute.xlu0 %5177 }
 0x7c3   : > { %5413 = vrot.lane.b32.xlu0 %v11916_v60, %s7607_s21  ;;  %14220 = vst [vmem:[#allocation92_spill] sm:$0xff] %v11938_v17  ;;  %v11940_v60 = vld [vmem:[#allocation3 + $0x48] sm:$0xff]  ;;  %v11960_v17 = vld [vmem:[#allocation3 + $0x80] sm:$0xff] }
 0x7c4   : > { %14221 = vst [vmem:[#allocation97_spill] sm:$0xff] %v11940_v60  ;;  %v11946_v56 = vpop.permute.xlu1 %5183  ;;  %14227 = vst [vmem:[#allocation124_spill] sm:$0xff] %v11960_v17 }
 0x7c5   : > { %14222 = vst [vmem:[#allocation65_spill] sm:$0xff] %v11946_v56 }
 0x7c6   : > { %5419 = vrot.lane.b32.xlu1 %v11924_v29, %s7607_s21  ;;  %v11950_v29 = vpop.permute.xlu0 %5181 }
 0x7c7   : > { %5417 = vrot.lane.b32.xlu0 %v11928_v19, %s7607_s21  ;;  %14224 = vst [vmem:[#allocation98_spill] sm:$0xff] %v11950_v29  ;;  %v11952_v19 = vld [vmem:[#allocation3 + $0x60] sm:$0xff]  ;;  %v11972_v29 = vld [vmem:[#allocation3 + $0x98] sm:$0xff] }
 0x7c8   : > { %14225 = vst [vmem:[#allocation42_spill] sm:$0xff] %v11952_v19  ;;  %v11958_v37 = vpop.permute.xlu1 %5187  ;;  %14231 = vst [vmem:[#allocation4_spill] sm:$0xff] %v11972_v29 }
 0x7c9   : > { %14226 = vst [vmem:[#allocation86_spill] sm:$0xff] %v11958_v37 }
 0x7ca   : > { %5423 = vrot.lane.b32.xlu1 %v11936_v27, %s7607_s21  ;;  %v11962_v27 = vpop.permute.xlu0 %5185 }
 0x7cb   : > { %5421 = vrot.lane.b32.xlu0 %v11940_v60, %s7607_s21  ;;  %14228 = vst [vmem:[#allocation25_spill] sm:$0xff] %v11962_v27  ;;  %v11964_v60 = vld [vmem:[#allocation3 + $0x78] sm:$0xff]  ;;  %v11984_v27 = vld [vmem:[#allocation3 + $0xb0] sm:$0xff] }
 0x7cc   : > { %14229 = vst [vmem:[#allocation192_spill] sm:$0xff] %v11964_v60  ;;  %v11970_v56 = vpop.permute.xlu1 %5191  ;;  %14235 = vst [vmem:[#allocation30_spill] sm:$0xff] %v11984_v27 }
 0x7cd   : > { %14230 = vst [vmem:[#allocation37_spill] sm:$0xff] %v11970_v56 }
 0x7ce   : > { %5427 = vrot.lane.b32.xlu1 %v11948_v18, %s7607_s21  ;;  %v11974_v18 = vpop.permute.xlu0 %5189 }
 0x7cf   : > { %5425 = vrot.lane.b32.xlu0 %v11952_v19, %s7607_s21  ;;  %14232 = vst [vmem:[#allocation191_spill] sm:$0xff] %v11974_v18  ;;  %v11976_v19 = vld [vmem:[#allocation3 + $0x90] sm:$0xff]  ;;  %v11996_v18 = vld [vmem:[#allocation3 + $0xc8] sm:$0xff] }
 0x7d0   : > { %14233 = vst [vmem:[#allocation102_spill] sm:$0xff] %v11976_v19  ;;  %14239 = vst [vmem:[#allocation84_spill] sm:$0xff] %v11996_v18 }
 0x7d1   : > { %v11982_v37 = vpop.permute.xlu1 %5195 }
 0x7d2   : > { %5431 = vrot.lane.b32.xlu1 %v11960_v17, %s7607_s21  ;;  %14234 = vst [vmem:[#allocation148_spill] sm:$0xff] %v11982_v37  ;;  %v11986_v17 = vpop.permute.xlu0 %5193 }
 0x7d3   : > { %5429 = vrot.lane.b32.xlu0 %v11964_v60, %s7607_s21  ;;  %14236 = vst [vmem:[#allocation137_spill] sm:$0xff] %v11986_v17  ;;  %v11988_v60 = vld [vmem:[#allocation3 + $0xa8] sm:$0xff]  ;;  %v4856_v17 = vld [vmem:[#allocation3 + $0xe0] sm:$0xff] }
 0x7d4   : > { %14237 = vst [vmem:[#allocation166_spill] sm:$0xff] %v11988_v60 }
 0x7d5   : > { %v11994_v56 = vpop.permute.xlu1 %5199 }
 0x7d6   : > { %5435 = vrot.lane.b32.xlu1 %v11972_v29, %s7607_s21  ;;  %14238 = vst [vmem:[#allocation10_spill] sm:$0xff] %v11994_v56  ;;  %v11998_v29 = vpop.permute.xlu0 %5197 }
 0x7d7   : > { %5433 = vrot.lane.b32.xlu0 %v11976_v19, %s7607_s21  ;;  %14240 = vst [vmem:[#allocation142_spill] sm:$0xff] %v11998_v29  ;;  %v12000_v19 = vld [vmem:[#allocation3 + $0xc0] sm:$0xff]  ;;  %v4858_v29 = vld [vmem:[#allocation3 + $0xf8] sm:$0xff] }
 0x7d8   : > { %14241 = vst [vmem:[#allocation91_spill] sm:$0xff] %v12000_v19 }
 0x7da   : > { %5439 = vrot.lane.b32.xlu1 %v11984_v27, %s7607_s21 }
 0x7db   : > { %5437 = vrot.lane.b32.xlu0 %v11988_v60, %s7607_s21  ;;  %v12006_v37 = vpop.permute.xlu1 %5203  ;;  %v4855_v60 = vld [vmem:[#allocation3 + $0xd8] sm:$0xff] }
 0x7dc   : > { %14242 = vst [vmem:[#allocation117_spill] sm:$0xff] %v12006_v37  ;;  %v12008_v27 = vpop.permute.xlu0 %5201  ;;  %v4860_v37 = vld [vmem:[#allocation3 + $0x110] sm:$0xff] }
 0x7dd   : > { %14243 = vst [vmem:[#allocation194_spill] sm:$0xff] %v12008_v27  ;;  %v4859_v27 = vld [vmem:[#allocation3 + $0x108] sm:$0xff] }
 0x7de   : > { %5443 = vrot.lane.b32.xlu1 %v11996_v18, %s7607_s21 }
 0x7df   : > { %5441 = vrot.lane.b32.xlu0 %v12000_v19, %s7607_s21  ;;  %v12012_v56 = vpop.permute.xlu1 %5207 }
 0x7e0   : > { %14244 = vst [vmem:[#allocation54_spill] sm:$0xff] %v12012_v56  ;;  %v12014_v5 = vpop.permute.xlu0 %5205 }
 0x7e1   : > { %14245 = vst [vmem:[#allocation47_spill] sm:$0xff] %v12014_v5  ;;  %v4861_v5 = vld [vmem:[#allocation3 + $0x120] sm:$0xff] }
 0x7e2   : > { %5447 = vrot.lane.b32.xlu1 %v4856_v17, %s7607_s21  ;;  %v4862_v17 = vld [vmem:[#allocation3 + $0x128] sm:$0xff] }
 0x7e3   : > { %5445 = vrot.lane.b32.xlu0 %v4855_v60, %s7607_s21 }
 0x7e6   : > { %5451 = vrot.lane.b32.xlu1 %v4858_v29, %s7607_s21  ;;  %v12018_v19 = vpop.permute.xlu1 %5211 }
 0x7e7   : > { %5449 = vrot.lane.b32.xlu0 %v4857_v62, %s7607_s21  ;;  %14246 = vst [vmem:[#allocation193_spill] sm:$0xff] %v12018_v19  ;;  %v12020_v18 = vpop.permute.xlu0 %5209  ;;  %v4864_v62 = vld [vmem:[#allocation3 + $0x140] sm:$0xff] }
 0x7e8   : > { %14247 = vst [vmem:[#allocation23_spill] sm:$0xff] %v12020_v18  ;;  %v4863_v18 = vld [vmem:[#allocation3 + $0x138] sm:$0xff] }
 0x7ea   : > { %5455 = vrot.lane.b32.xlu1 %v4860_v37, %s7607_s21  ;;  %v12024_v60 = vpop.permute.xlu1 %5215 }
 0x7eb   : > { %5453 = vrot.lane.b32.xlu0 %v4859_v27, %s7607_s21  ;;  %14248 = vst [vmem:[#allocation113_spill] sm:$0xff] %v12024_v60  ;;  %v12026_v56 = vpop.permute.xlu0 %5213  ;;  %v4866_v27 = vld [vmem:[#allocation3 + $0x158] sm:$0xff] }
 0x7ec   : > { %14249 = vst [vmem:[#allocation78_spill] sm:$0xff] %v12026_v56  ;;  %v4865_v56 = vld [vmem:[#allocation3 + $0x150] sm:$0xff] }
 0x7ee   : > { %5459 = vrot.lane.b32.xlu1 %v4862_v17, %s7607_s21  ;;  %v4868_v17 = vld [vmem:[#allocation3 + $0x170] sm:$0xff] }
 0x7ef   : > { %5457 = vrot.lane.b32.xlu0 %v4861_v5, %s7607_s21 }
 0x7f0   : > { %v12030_v29 = vpop.permute.xlu1 %5219 }
 0x7f1   : > { %14250 = vst [vmem:[#allocation160_spill] sm:$0xff] %v12030_v29  ;;  %v12032_v19 = vpop.permute.xlu0 %5217 }
 0x7f2   : > { %14251 = vst [vmem:[#allocation35_spill] sm:$0xff] %v12032_v19  ;;  %5463 = vrot.lane.b32.xlu1 %v4864_v62, %s7607_s21  ;;  %v4867_v19 = vld [vmem:[#allocation3 + $0x168] sm:$0xff] }
 0x7f3   : > { %5461 = vrot.lane.b32.xlu0 %v4863_v18, %s7607_s21 }
 0x7f4   : > { %v12036_v37 = vpop.permute.xlu1 %5287 }
 0x7f5   : > { %14252 = vst [vmem:[#allocation59_spill] sm:$0xff] %v12036_v37  ;;  %v12038_v60 = vpop.permute.xlu0 %5285  ;;  %v4964_v37 = vld [vmem:[#allocation3 + $0x188] sm:$0xff] }
 0x7f6   : > { %5467 = vrot.lane.b32.xlu1 %v4866_v27, %s7607_s21  ;;  %v4963_v27 = vld [vmem:[#allocation3 + $0x180] sm:$0xff] }
 0x7f7   : > { %5465 = vrot.lane.b32.xlu0 %v4865_v56, %s7607_s21 }
 0x7f8   : > { %v12042_v5 = vpop.permute.xlu1 %5291 }
 0x7f9   : > { %14253 = vst [vmem:[#allocation48_spill] sm:$0xff] %v12042_v5  ;;  %v12044_v29 = vpop.permute.xlu0 %5289 }
 0x7fa   : > { %5471 = vrot.lane.b32.xlu1 %v4868_v17, %s7607_s21 }
 0x7fb   : > { %5469 = vrot.lane.b32.xlu0 %v4867_v19, %s7607_s21 }
 0x7fc   : > { %v12048_v18 = vpop.permute.xlu1 %5295 }
 0x7fd   : > { %v12050_v62 = vpop.permute.xlu0 %5293 }
 0x7fe   : > { %5475 = vrot.lane.b32.xlu1 %v4964_v37, %s7607_s21 }
 0x7ff   : > { %5473 = vrot.lane.b32.xlu0 %v4963_v27, %s7607_s21 }
 0x800   : > { %v12054_v56 = vpop.permute.xlu1 %5299 }
 0x801   : > { %v12056_v5 = vpop.permute.xlu0 %5297 }
 0x802   : > { %5543 = vrot.lane.b32.xlu1 %v11628_v51, %s7598_s9 }
 0x803   : > { %5541 = vrot.lane.b32.xlu0 %v11633_v38, %s7598_s9 }
 0x804   : > { %v12062_v19 = vpop.permute.xlu1 %5303 }
 0x805   : > { %v12064_v17 = vpop.permute.xlu0 %5301 }
 0x806   : > { %5547 = vrot.lane.b32.xlu1 %v11638_v28, %s7598_s9 }
 0x807   : > { %5545 = vrot.lane.b32.xlu0 %v11643_v48, %s7598_s9 }
 0x808   : > { %v12070_v37 = vpop.permute.xlu1 %5307 }
 0x809   : > { %14254 = vst [vmem:[#allocation107_spill] sm:$0xff] %v12070_v37  ;;  %v12072_v27 = vpop.permute.xlu0 %5305  ;;  %v14368_v37 = vld [vmem:[#allocation39_spill] sm:$0xff] }
 0x80a   : > { %14255 = vst [vmem:[#allocation147_spill] sm:$0xff] %v12072_v27  ;;  %5551 = vrot.lane.b32.xlu1 %v11648_v44, %s7598_s9 }
 0x80b   : > { %5549 = vrot.lane.b32.xlu0 %v11653_v63, %s7598_s9 }
 0x80c   : > { %v12078_v51 = vpop.permute.xlu1 %5311 }
 0x80d   : > { %14256 = vst [vmem:[#allocation164_spill] sm:$0xff] %v12078_v51  ;;  %v12080_v38 = vpop.permute.xlu0 %5309  ;;  %v5106_v51 = vld [vmem:[#allocation3 + $0xca] sm:$0xff] }
 0x80e   : > { %14257 = vst [vmem:[#allocation196_spill] sm:$0xff] %v12080_v38  ;;  %5555 = vrot.lane.b32.xlu1 %v11658_v53, %s7598_s9  ;;  %v5112_v38 = vld [vmem:[#allocation3 + $0x112] sm:$0xff] }
 0x80f   : > { %5553 = vrot.lane.b32.xlu0 %v11663_v33, %s7598_s9 }
 0x810   : > { %v12086_v28 = vpop.permute.xlu1 %5315 }
 0x811   : > { %14258 = vst [vmem:[#allocation123_spill] sm:$0xff] %v12086_v28  ;;  %v12088_v48 = vpop.permute.xlu0 %5313  ;;  %v5104_v28 = vld [vmem:[#allocation3 + $0xb2] sm:$0xff] }
 0x812   : > { %14259 = vst [vmem:[#allocation64_spill] sm:$0xff] %v12088_v48  ;;  %5559 = vrot.lane.b32.xlu1 %v11668_v61, %s7598_s9 }
 0x813   : > { %5557 = vrot.lane.b32.xlu0 %v11673_v43, %s7598_s9 }
 0x814   : > { %v12094_v44 = vpop.permute.xlu1 %5319 }
 0x815   : > { %14260 = vst [vmem:[#allocation195_spill] sm:$0xff] %v12094_v44  ;;  %v12096_v63 = vpop.permute.xlu0 %5317 }
 0x816   : > { %14261 = vst [vmem:[#allocation116_spill] sm:$0xff] %v12096_v63  ;;  %5563 = vrot.lane.b32.xlu1 %v11678_v9, %s7598_s9 }
 0x817   : > { %5561 = vrot.lane.b32.xlu0 %v11683_v11, %s7598_s9 }
 0x818   : > { %v12102_v53 = vpop.permute.xlu1 %5323 }
 0x819   : > { %14262 = vst [vmem:[#allocation171_spill] sm:$0xff] %v12102_v53  ;;  %v12104_v33 = vpop.permute.xlu0 %5321  ;;  %v14319_v53 = vld [vmem:[#allocation192_spill] sm:$0xff] }
 0x81a   : > { %14263 = vst [vmem:[#allocation99_spill] sm:$0xff] %v12104_v33  ;;  %5567 = vrot.lane.b32.xlu1 %v11688_v13, %s7598_s9 }
 0x81b   : > { %5565 = vrot.lane.b32.xlu0 %v11693_v2, %s7598_s9 }
 0x81c   : > { %v12110_v61 = vpop.permute.xlu1 %5327 }
 0x81d   : > { %14264 = vst [vmem:[#allocation40_spill] sm:$0xff] %v12110_v61  ;;  %v12112_v43 = vpop.permute.xlu0 %5325  ;;  %v6407_v61 = vld [vmem:[%s13164_s5 + $0x10] sm:$0xff] }
 0x81e   : > { %14265 = vst [vmem:[#allocation52_spill] sm:$0xff] %v12112_v43  ;;  %5571 = vrot.lane.b32.xlu1 %v11698_v40, %s7598_s9  ;;  %v6408_v43 = vld [vmem:[%s13164_s5 + $0x18] sm:$0xff] }
 0x81f   : > { %5569 = vrot.lane.b32.xlu0 %v11703_v39, %s7598_s9 }
 0x820   : > { %v12118_v9 = vpop.permute.xlu1 %5331 }
 0x821   : > { %14266 = vst [vmem:[#allocation134_spill] sm:$0xff] %v12118_v9  ;;  %v12120_v11 = vpop.permute.xlu0 %5329 }
 0x822   : > { %14267 = vst [vmem:[#allocation174_spill] sm:$0xff] %v12120_v11  ;;  %5575 = vrot.lane.b32.xlu1 %v11708_v42, %s7598_s9 }
 0x823   : > { %5573 = vrot.lane.b32.xlu0 %v11713_v52, %s7598_s9 }
 0x824   : > { %v12126_v13 = vpop.permute.xlu1 %5335 }
 0x825   : > { %14268 = vst [vmem:[#allocation165_spill] sm:$0xff] %v12126_v13  ;;  %v12128_v2 = vpop.permute.xlu0 %5333  ;;  %v14310_v13 = vld [vmem:[#allocation81_spill] sm:$0xff] }
 0x826   : > { %14269 = vst [vmem:[#allocation112_spill] sm:$0xff] %v12128_v2  ;;  %5579 = vrot.lane.b32.xlu1 %v11718_v16, %s7598_s9  ;;  %v6405_v2 = vld [vmem:[%s13164_s5] sm:$0xff] }
 0x827   : > { %5577 = vrot.lane.b32.xlu0 %v11723_v8, %s7598_s9 }
 0x828   : > { %v12134_v40 = vpop.permute.xlu1 %5339 }
 0x829   : > { %14270 = vst [vmem:[#allocation173_spill] sm:$0xff] %v12134_v40  ;;  %v12136_v39 = vpop.permute.xlu0 %5337  ;;  %v12310_v40 = vld [vmem:[#allocation3 + $0x18a] sm:$0xff] }
 0x82a   : > { %14271 = vst [vmem:[#allocation198_spill] sm:$0xff] %v12136_v39  ;;  %5583 = vrot.lane.b32.xlu1 %v11728_v14, %s7598_s9  ;;  %14306 = vst [vmem:[#allocation111_spill] sm:$0xff] %v12310_v40  ;;  %v14309_v39 = vld [vmem:[#allocation114_spill] sm:$0xff] }
 0x82b   : > { %5581 = vrot.lane.b32.xlu0 %v11733_v0, %s7598_s9 }
 0x82c   : > { %v12142_v42 = vpop.permute.xlu1 %5343 }
 0x82d   : > { %14272 = vst [vmem:[#allocation90_spill] sm:$0xff] %v12142_v42  ;;  %v12144_v52 = vpop.permute.xlu0 %5341 }
 0x82e   : > { %14273 = vst [vmem:[#allocation128_spill] sm:$0xff] %v12144_v52  ;;  %5587 = vrot.lane.b32.xlu1 %v11738_v12, %s7598_s9 }
 0x82f   : > { %5585 = vrot.lane.b32.xlu0 %v11743_v25, %s7598_s9 }
 0x830   : > { %v12150_v16 = vpop.permute.xlu1 %5347 }
 0x831   : > { %14274 = vst [vmem:[#allocation197_spill] sm:$0xff] %v12150_v16  ;;  %v12152_v8 = vpop.permute.xlu0 %5345  ;;  %v12178_v16 = vld [vmem:[#allocation3 + $0x189] sm:$0xff] }
 0x832   : > { %14275 = vst [vmem:[#allocation139_spill] sm:$0xff] %v12152_v8  ;;  %5591 = vrot.lane.b32.xlu1 %v11748_v45, %s7598_s9  ;;  %14276 = vst [vmem:[#allocation45_spill] sm:$0xff] %v12178_v16 }
 0x833   : > { %5589 = vrot.lane.b32.xlu0 %v11753_v4, %s7598_s9 }
 0x834   : > { %v12158_v14 = vpop.permute.xlu1 %5415 }
 0x835   : > { %v12160_v0 = vpop.permute.xlu0 %5413 }
 0x836   : > { %5595 = vrot.lane.b32.xlu1 %v11758_v24, %s7598_s9  ;;  %v12182_v24 = vld [vmem:[#allocation3 + $0x181] sm:$0xff] }
 0x837   : > { %5593 = vrot.lane.b32.xlu0 %v11763_v1, %s7598_s9  ;;  %14277 = vst [vmem:[#allocation16_spill] sm:$0xff] %v12182_v24 }
 0x838   : > { %v12166_v12 = vpop.permute.xlu1 %5419 }
 0x839   : > { %v12168_v25 = vpop.permute.xlu0 %5417 }
 0x83a   : > { %5599 = vrot.lane.b32.xlu1 %v11768_v32, %s7598_s9 }
 0x83b   : > { %5597 = vrot.lane.b32.xlu0 %v11772_v36, %s7598_s9 }
 0x83c   : > { %v12174_v45 = vpop.permute.xlu1 %5423 }
 0x83d   : > { %v12176_v4 = vpop.permute.xlu0 %5421 }
 0x83e   : > { %5603 = vrot.lane.b32.xlu1 %v12178_v16, %s7598_s9 }
 0x83f   : > { %5601 = vrot.lane.b32.xlu0 %v12182_v24, %s7598_s9  ;;  %v14370_v24 = vld [vmem:[#allocation59_spill] sm:$0xff] }
 0x840   : > { %v12186_v1 = vpop.permute.xlu1 %5427 }
 0x841   : > { %v12188_v32 = vpop.permute.xlu0 %5425 }
 0x842   : > { %5671 = vrot.lane.b32.xlu1 %v11778_v35, %s7608_s22 }
 0x843   : > { %5669 = vrot.lane.b32.xlu0 %v11782_v46, %s7608_s22 }
 0x844   : > { %v12194_v36 = vpop.permute.xlu1 %5431 }
 0x845   : > { %v12196_v8 = vpop.permute.xlu0 %5429 }
 0x846   : > { %5675 = vrot.lane.b32.xlu1 %v11786_v7, %s7608_s22 }
 0x847   : > { %5673 = vrot.lane.b32.xlu0 %v11790_v3, %s7608_s22 }
 0x848   : > { %v12202_v42 = vpop.permute.xlu1 %5435 }
 0x849   : > { %14278 = vst [vmem:[#allocation83_spill] sm:$0xff] %v12202_v42  ;;  %v12204_v52 = vpop.permute.xlu0 %5433  ;;  %v4838_v42 = vld [vmem:[#allocation3 + $0x8] sm:$0xff] }
 0x84a   : > { %14279 = vst [vmem:[#allocation122_spill] sm:$0xff] %v12204_v52  ;;  %5679 = vrot.lane.b32.xlu1 %v11794_v57, %s7608_s22 }
 0x84b   : > { %5677 = vrot.lane.b32.xlu0 %v11798_v15, %s7608_s22 }
 0x84c   : > { %v12210_v46 = vpop.permute.xlu1 %5439 }
 0x84d   : > { %14280 = vst [vmem:[#allocation157_spill] sm:$0xff] %v12210_v46  ;;  %v12212_v35 = vpop.permute.xlu0 %5437  ;;  %v5074_v46 = vld [vmem:[#allocation3 + $0xc9] sm:$0xff] }
 0x84e   : > { %14281 = vst [vmem:[#allocation176_spill] sm:$0xff] %v12212_v35  ;;  %5683 = vrot.lane.b32.xlu1 %v11802_v30, %s7608_s22 }
 0x84f   : > { %5681 = vrot.lane.b32.xlu0 %v11806_v55, %s7608_s22 }
 0x850   : > { %v12218_v3 = vpop.permute.xlu1 %5443 }
 0x851   : > { %14282 = vst [vmem:[#allocation33_spill] sm:$0xff] %v12218_v3  ;;  %v12220_v7 = vpop.permute.xlu0 %5441  ;;  %v5072_v3 = vld [vmem:[#allocation3 + $0xb1] sm:$0xff] }
 0x852   : > { %14283 = vst [vmem:[#allocation170_spill] sm:$0xff] %v12220_v7  ;;  %5687 = vrot.lane.b32.xlu1 %v11810_v20, %s7608_s22 }
 0x853   : > { %5685 = vrot.lane.b32.xlu0 %v11814_v47, %s7608_s22 }
 0x854   : > { %v12226_v57 = vpop.permute.xlu1 %5447 }
 0x855   : > { %14284 = vst [vmem:[#allocation175_spill] sm:$0xff] %v12226_v57  ;;  %v12228_v15 = vpop.permute.xlu0 %5445  ;;  %v5062_v57 = vld [vmem:[#allocation3 + $0x39] sm:$0xff] }
 0x856   : > { %14285 = vst [vmem:[#allocation200_spill] sm:$0xff] %v12228_v15  ;;  %5691 = vrot.lane.b32.xlu1 %v11818_v41, %s7608_s22 }
 0x857   : > { %5689 = vrot.lane.b32.xlu0 %v11822_v50, %s7608_s22 }
 0x858   : > { %v12234_v55 = vpop.permute.xlu1 %5451 }
 0x859   : > { %14286 = vst [vmem:[#allocation146_spill] sm:$0xff] %v12234_v55  ;;  %v12236_v30 = vpop.permute.xlu0 %5449  ;;  %v14315_v55 = vld [vmem:[#allocation42_spill] sm:$0xff] }
 0x85a   : > { %14287 = vst [vmem:[#allocation127_spill] sm:$0xff] %v12236_v30  ;;  %5695 = vrot.lane.b32.xlu1 %v11826_v59, %s7608_s22 }
 0x85b   : > { %5693 = vrot.lane.b32.xlu0 %v11830_v49, %s7608_s22 }
 0x85c   : > { %v12242_v47 = vpop.permute.xlu1 %5455 }
 0x85d   : > { %14288 = vst [vmem:[#allocation199_spill] sm:$0xff] %v12242_v47  ;;  %v12244_v20 = vpop.permute.xlu0 %5453 }
 0x85e   : > { %14289 = vst [vmem:[#allocation162_spill] sm:$0xff] %v12244_v20  ;;  %5699 = vrot.lane.b32.xlu1 %v11834_v23, %s7608_s22  ;;  %v14314_v20 = vld [vmem:[#allocation108_spill] sm:$0xff] }
 0x85f   : > { %5697 = vrot.lane.b32.xlu0 %v11838_v31, %s7608_s22 }
 0x860   : > { %v12250_v50 = vpop.permute.xlu1 %5459 }
 0x861   : > { %14290 = vst [vmem:[#allocation94_spill] sm:$0xff] %v12250_v50  ;;  %v12252_v41 = vpop.permute.xlu0 %5457  ;;  %v6406_v50 = vld [vmem:[%s13164_s5 + $0x8] sm:$0xff] }
 0x862   : > { %14291 = vst [vmem:[#allocation63_spill] sm:$0xff] %v12252_v41  ;;  %5703 = vrot.lane.b32.xlu1 %v11842_v26, %s7608_s22  ;;  %v14311_v41 = vld [vmem:[#allocation97_spill] sm:$0xff]  ;;  %v7467_v9 = vpack.c.bf16 %v6406_v50, %v6405_v2  ;;  %v7471_v2 = vpack.c.bf16 %v6408_v43, %v6407_v61  ;;  %v14322_v43 = vld [vmem:[#allocation4_spill] sm:$0xff] }
 0x863   : > { %5701 = vrot.lane.b32.xlu0 %v11846_v34, %s7608_s22 }
 0x864   : > { %v12258_v49 = vpop.permute.xlu1 %5463  ;;  %7468 = vmatprep.subr.bf16.mxu1 %v7467_v9 }
 0x865   : > { %14292 = vst [vmem:[#allocation104_spill] sm:$0xff] %v12258_v49  ;;  %v12260_v59 = vpop.permute.xlu0 %5461  ;;  %7470 = vmatpush3.bf16.msra.mxu1 %v7467_v9  ;;  %v6409_v9 = vld [vmem:[%s13164_s5 + $0x20] sm:$0xf] }
 0x866   : > { %14293 = vst [vmem:[#allocation89_spill] sm:$0xff] %v12260_v59  ;;  %5707 = vrot.lane.b32.xlu1 %v11850_v10, %s7608_s22  ;;  %7472 = vmatprep.subr.bf16.mxu1 %v7471_v2 }
 0x867   : > { %5705 = vrot.lane.b32.xlu0 %v11854_v22, %s7608_s22 }
 0x868   : > { %v12266_v31 = vpop.permute.xlu1 %5467 }
 0x869   : > { %14294 = vst [vmem:[#allocation34_spill] sm:$0xff] %v12266_v31  ;;  %v12268_v23 = vpop.permute.xlu0 %5465  ;;  %v14300_v31 = vld [vmem:[#allocation82_spill] sm:$0xff]  ;;  %7474 = vmatpush3.bf16.msra.mxu1 %v7471_v2 }
 0x86a   : > { %14295 = vst [vmem:[#allocation178_spill] sm:$0xff] %v12268_v23  ;;  %5711 = vrot.lane.b32.xlu1 %v11858_v6, %s7608_s22  ;;  %v14301_v6 = vld [vmem:[#allocation188_spill] sm:$0xff]  ;;  %7393 = vmatprep.subr.msk.mxu1 %vm4320_vm13, %v6409_v9  ;;  %v14323_v2 = vld [vmem:[#allocation102_spill] sm:$0xff] }
 0x86b   : > { %5709 = vrot.lane.b32.xlu0 %v11862_v21, %s7608_s22 }
 0x86c   : > { %v12274_v34 = vpop.permute.xlu1 %5471 }
 0x86d   : > { %14296 = vst [vmem:[#allocation50_spill] sm:$0xff] %v12274_v34  ;;  %v12276_v26 = vpop.permute.xlu0 %5469  ;;  %7394 = vmatpush3.msk.msra.mxu1 %vm4320_vm13, %v6409_v9  ;;  %v5093_v9 = vld [vmem:[#allocation3 + $0x32] sm:$0xff] }
 0x86e   : > { %14297 = vst [vmem:[#allocation43_spill] sm:$0xff] %v12276_v26  ;;  %5715 = vrot.lane.b32.xlu1 %v11866_v54, %s7608_s22  ;;  %v14302_v26 = vld [vmem:[#allocation187_spill] sm:$0xff]  ;;  %v14303_v54 = vld [vmem:[#allocation36_spill] sm:$0xff] }
 0x86f   : > { %5713 = vrot.lane.b32.xlu0 %v11870_v58, %s7608_s22 }
 0x870   : > { %v12282_v22 = vpop.permute.xlu1 %5475 }
 0x871   : > { %14298 = vst [vmem:[#allocation177_spill] sm:$0xff] %v12282_v22  ;;  %v12284_v10 = vpop.permute.xlu0 %5473 }
 0x872   : > { %14299 = vst [vmem:[#allocation202_spill] sm:$0xff] %v12284_v10  ;;  %5719 = vrot.lane.b32.xlu1 %v14300_v31, %s7608_s22  ;;  %v14304_v10 = vld [vmem:[#allocation19_spill] sm:$0xff] }
 0x873   : > { %5717 = vrot.lane.b32.xlu0 %v14301_v6, %s7608_s22  ;;  %v14305_v31 = vld [vmem:[#allocation143_spill] sm:$0xff] }
 0x874   : > { %v12290_v21 = vpop.permute.xlu1 %5543 }
 0x875   : > { %v12292_v34 = vpop.permute.xlu0 %5541 }
 0x876   : > { %5723 = vrot.lane.b32.xlu1 %v14302_v26, %s7608_s22  ;;  %v12314_v26 = vld [vmem:[#allocation3 + $0x182] sm:$0xff] }
 0x877   : > { %5721 = vrot.lane.b32.xlu0 %v14303_v54, %s7608_s22  ;;  %14307 = vst [vmem:[#allocation115_spill] sm:$0xff] %v12314_v26 }
 0x878   : > { %v12298_v58 = vpop.permute.xlu1 %5547 }
 0x879   : > { %v12300_v22 = vpop.permute.xlu0 %5545 }
 0x87a   : > { %5727 = vrot.lane.b32.xlu1 %v14304_v10, %s7608_s22 }
 0x87b   : > { %5725 = vrot.lane.b32.xlu0 %v14305_v31, %s7608_s22  ;;  %v14308_v31 = vld [vmem:[#allocation190_spill] sm:$0xff] }
 0x87c   : > { %v12306_v6 = vpop.permute.xlu1 %5551 }
 0x87d   : > { %v12308_v23 = vpop.permute.xlu0 %5549 }
 0x87e   : > { %5731 = vrot.lane.b32.xlu1 %v12310_v40, %s7608_s22 }
 0x87f   : > { %5729 = vrot.lane.b32.xlu0 %v12314_v26, %s7608_s22  ;;  %v14369_v26 = vld [vmem:[#allocation46_spill] sm:$0xff] }
 0x880   : > { %v12318_v54 = vpop.permute.xlu1 %5555 }
 0x881   : > { %v12320_v10 = vpop.permute.xlu0 %5553 }
 0x882   : > { %5799 = vrot.lane.b32.xlu1 %v14308_v31, %s7599_s10 }
 0x883   : > { %5797 = vrot.lane.b32.xlu0 %v14309_v39, %s7599_s10 }
 0x884   : > { %v12326_v49 = vpop.permute.xlu1 %5559 }
 0x885   : > { %v12328_v59 = vpop.permute.xlu0 %5557 }
 0x886   : > { %5803 = vrot.lane.b32.xlu1 %v14310_v13, %s7599_s10 }
 0x887   : > { %5801 = vrot.lane.b32.xlu0 %v14311_v41, %s7599_s10 }
 0x888   : > { %v12340_v11 = vpop.permute.xlu1 %5563 }
 0x889   : > { %14312 = vst [vmem:[#allocation201_spill] sm:$0xff] %v12340_v11  ;;  %v12342_v47 = vpop.permute.xlu0 %5561  ;;  %v5114_v11 = vld [vmem:[#allocation3 + $0x12a] sm:$0xff] }
 0x88a   : > { %14313 = vst [vmem:[#allocation44_spill] sm:$0xff] %v12342_v47  ;;  %5807 = vrot.lane.b32.xlu1 %v14314_v20, %s7599_s10  ;;  %v14318_v20 = vld [vmem:[#allocation124_spill] sm:$0xff] }
 0x88b   : > { %5805 = vrot.lane.b32.xlu0 %v14315_v55, %s7599_s10 }
 0x88c   : > { %v12354_v50 = vpop.permute.xlu1 %5567 }
 0x88d   : > { %14316 = vst [vmem:[#allocation151_spill] sm:$0xff] %v12354_v50  ;;  %v12356_v30 = vpop.permute.xlu0 %5565  ;;  %v14344_v50 = vld [vmem:[#allocation84_spill] sm:$0xff] }
 0x88e   : > { %14317 = vst [vmem:[#allocation136_spill] sm:$0xff] %v12356_v30  ;;  %5811 = vrot.lane.b32.xlu1 %v14318_v20, %s7599_s10 }
 0x88f   : > { %5809 = vrot.lane.b32.xlu0 %v14319_v53, %s7599_s10  ;;  %v5061_v53 = vld [vmem:[#allocation3 + $0x31] sm:$0xff] }
 0x890   : > { %v12366_v55 = vpop.permute.xlu1 %5571 }
 0x891   : > { %14320 = vst [vmem:[#allocation27_spill] sm:$0xff] %v12366_v55  ;;  %v12368_v61 = vpop.permute.xlu0 %5569  ;;  %v14340_v55 = vld [vmem:[#allocation30_spill] sm:$0xff] }
 0x892   : > { %14321 = vst [vmem:[#allocation145_spill] sm:$0xff] %v12368_v61  ;;  %5815 = vrot.lane.b32.xlu1 %v14322_v43, %s7599_s10  ;;  %v5094_v43 = vld [vmem:[#allocation3 + $0x3a] sm:$0xff] }
 0x893   : > { %5813 = vrot.lane.b32.xlu0 %v14323_v2, %s7599_s10 }
 0x894   : > { %v12375_v20 = vpop.permute.xlu1 %5575 }
 0x895   : > { %14324 = vst [vmem:[#allocation80_spill] sm:$0xff] %v12375_v20  ;;  %v12377_v33 = vpop.permute.xlu0 %5573 }
 0x896   : > { %14325 = vst [vmem:[#allocation180_spill] sm:$0xff] %v12377_v33  ;;  %5927 = vrot.lane.b32.xlu1 %v5062_v57, %s7609_s29  ;;  %v5064_v33 = vld [vmem:[#allocation3 + $0x51] sm:$0xff]  ;;  %v5063_v57 = vld [vmem:[#allocation3 + $0x49] sm:$0xff] }
 0x897   : > { %5925 = vrot.lane.b32.xlu0 %v5061_v53, %s7609_s29 }
 0x898   : > { %v12381_v15 = vpop.permute.xlu1 %5579 }
 0x899   : > { %14326 = vst [vmem:[#allocation121_spill] sm:$0xff] %v12381_v15  ;;  %v12383_v44 = vpop.permute.xlu0 %5577 }
 0x89a   : > { %14327 = vst [vmem:[#allocation60_spill] sm:$0xff] %v12383_v44  ;;  %6055 = vrot.lane.b32.xlu1 %v5094_v43, %s7600_s11  ;;  %v5096_v44 = vld [vmem:[#allocation3 + $0x52] sm:$0xff]  ;;  %v5095_v43 = vld [vmem:[#allocation3 + $0x4a] sm:$0xff] }
 0x89b   : > { %6053 = vrot.lane.b32.xlu0 %v5093_v9, %s7600_s11 }
 0x89c   : > { %v12387_v2 = vpop.permute.xlu1 %5583 }
 0x89d   : > { %14328 = vst [vmem:[#allocation179_spill] sm:$0xff] %v12387_v2  ;;  %v12389_v20 = vpop.permute.xlu0 %5581 }
 0x89e   : > { %14329 = vst [vmem:[#allocation204_spill] sm:$0xff] %v12389_v20  ;;  %5931 = vrot.lane.b32.xlu1 %v5064_v33, %s7609_s29  ;;  %v5066_v20 = vld [vmem:[#allocation3 + $0x69] sm:$0xff]  ;;  %v5065_v33 = vld [vmem:[#allocation3 + $0x61] sm:$0xff] }
 0x89f   : > { %5929 = vrot.lane.b32.xlu0 %v5063_v57, %s7609_s29 }
 0x8a0   : > { %v12393_v53 = vpop.permute.xlu1 %5587 }
 0x8a1   : > { %14330 = vst [vmem:[#allocation169_spill] sm:$0xff] %v12393_v53  ;;  %v12395_v15 = vpop.permute.xlu0 %5585 }
 0x8a2   : > { %14331 = vst [vmem:[#allocation172_spill] sm:$0xff] %v12395_v15  ;;  %6059 = vrot.lane.b32.xlu1 %v5096_v44, %s7600_s11  ;;  %v5098_v15 = vld [vmem:[#allocation3 + $0x6a] sm:$0xff]  ;;  %v5097_v44 = vld [vmem:[#allocation3 + $0x62] sm:$0xff] }
 0x8a3   : > { %6057 = vrot.lane.b32.xlu0 %v5095_v43, %s7600_s11 }
 0x8a4   : > { %v12399_v9 = vpop.permute.xlu1 %5591 }
 0x8a5   : > { %14332 = vst [vmem:[#allocation203_spill] sm:$0xff] %v12399_v9  ;;  %v12401_v2 = vpop.permute.xlu0 %5589 }
 0x8a6   : > { %14333 = vst [vmem:[#allocation85_spill] sm:$0xff] %v12401_v2  ;;  %5935 = vrot.lane.b32.xlu1 %v5066_v20, %s7609_s29  ;;  %v5068_v2 = vld [vmem:[#allocation3 + $0x81] sm:$0xff]  ;;  %v5067_v20 = vld [vmem:[#allocation3 + $0x79] sm:$0xff] }
 0x8a7   : > { %5933 = vrot.lane.b32.xlu0 %v5065_v33, %s7609_s29 }
 0x8a8   : > { %v12405_v57 = vpop.permute.xlu1 %5595 }
 0x8a9   : > { %14334 = vst [vmem:[#allocation150_spill] sm:$0xff] %v12405_v57  ;;  %v12407_v53 = vpop.permute.xlu0 %5593 }
 0x8aa   : > { %14335 = vst [vmem:[#allocation159_spill] sm:$0xff] %v12407_v53  ;;  %6063 = vrot.lane.b32.xlu1 %v5098_v15, %s7600_s11  ;;  %v5100_v53 = vld [vmem:[#allocation3 + $0x82] sm:$0xff]  ;;  %v5099_v15 = vld [vmem:[#allocation3 + $0x7a] sm:$0xff] }
 0x8ab   : > { %6061 = vrot.lane.b32.xlu0 %v5097_v44, %s7600_s11 }
 0x8ac   : > { %v12411_v43 = vpop.permute.xlu1 %5599 }
 0x8ad   : > { %14336 = vst [vmem:[#allocation118_spill] sm:$0xff] %v12411_v43  ;;  %v12413_v9 = vpop.permute.xlu0 %5597 }
 0x8ae   : > { %14337 = vst [vmem:[#allocation110_spill] sm:$0xff] %v12413_v9  ;;  %5939 = vrot.lane.b32.xlu1 %v5068_v2, %s7609_s29  ;;  %v5070_v9 = vld [vmem:[#allocation3 + $0x99] sm:$0xff]  ;;  %v5069_v2 = vld [vmem:[#allocation3 + $0x91] sm:$0xff] }
 0x8af   : > { %5937 = vrot.lane.b32.xlu0 %v5067_v20, %s7609_s29 }
 0x8b0   : > { %v12417_v33 = vpop.permute.xlu1 %5603 }
 0x8b1   : > { %14338 = vst [vmem:[#allocation101_spill] sm:$0xff] %v12417_v33  ;;  %v12419_v57 = vpop.permute.xlu0 %5601 }
 0x8b2   : > { %14339 = vst [vmem:[#allocation182_spill] sm:$0xff] %v12419_v57  ;;  %6067 = vrot.lane.b32.xlu1 %v5100_v53, %s7600_s11  ;;  %v5102_v57 = vld [vmem:[#allocation3 + $0x9a] sm:$0xff]  ;;  %v5101_v53 = vld [vmem:[#allocation3 + $0x92] sm:$0xff] }
 0x8b3   : > { %6065 = vrot.lane.b32.xlu0 %v5099_v15, %s7600_s11 }
 0x8b4   : > { %v12423_v44 = vpop.permute.xlu1 %5671 }
 0x8b5   : > { %v12425_v43 = vpop.permute.xlu0 %5669 }
 0x8b6   : > { %5943 = vrot.lane.b32.xlu1 %v5070_v9, %s7609_s29  ;;  %v14341_v9 = vld [vmem:[#allocation166_spill] sm:$0xff] }
 0x8b7   : > { %5941 = vrot.lane.b32.xlu0 %v5069_v2, %s7609_s29 }
 0x8b8   : > { %v12429_v20 = vpop.permute.xlu1 %5675 }
 0x8b9   : > { %v12431_v33 = vpop.permute.xlu0 %5673 }
 0x8ba   : > { %6071 = vrot.lane.b32.xlu1 %v5102_v57, %s7600_s11  ;;  %v5071_v57 = vld [vmem:[#allocation3 + $0xa9] sm:$0xff] }
 0x8bb   : > { %6069 = vrot.lane.b32.xlu0 %v5101_v53, %s7600_s11 }
 0x8bc   : > { %v12435_v15 = vpop.permute.xlu1 %5679 }
 0x8bd   : > { %v12437_v63 = vpop.permute.xlu0 %5677 }
 0x8be   : > { %5819 = vrot.lane.b32.xlu1 %v14340_v55, %s7599_s10  ;;  %v5103_v55 = vld [vmem:[#allocation3 + $0xaa] sm:$0xff] }
 0x8bf   : > { %5817 = vrot.lane.b32.xlu0 %v14341_v9, %s7599_s10 }
 0x8c0   : > { %v12443_v2 = vpop.permute.xlu1 %5683 }
 0x8c1   : > { %v12445_v61 = vpop.permute.xlu0 %5681 }
 0x8c2   : > { %5947 = vrot.lane.b32.xlu1 %v5072_v3, %s7609_s29  ;;  %v14345_v3 = vld [vmem:[#allocation91_spill] sm:$0xff] }
 0x8c3   : > { %5945 = vrot.lane.b32.xlu0 %v5071_v57, %s7609_s29 }
 0x8c4   : > { %v12449_v53 = vpop.permute.xlu1 %5687 }
 0x8c5   : > { %v12451_v7 = vpop.permute.xlu0 %5685 }
 0x8c6   : > { %6075 = vrot.lane.b32.xlu1 %v5104_v28, %s7600_s11  ;;  %v5073_v28 = vld [vmem:[#allocation3 + $0xc1] sm:$0xff] }
 0x8c7   : > { %6073 = vrot.lane.b32.xlu0 %v5103_v55, %s7600_s11 }
 0x8c8   : > { %v12455_v9 = vpop.permute.xlu1 %5691 }
 0x8c9   : > { %14342 = vst [vmem:[#allocation88_spill] sm:$0xff] %v12455_v9  ;;  %v12457_v48 = vpop.permute.xlu0 %5689  ;;  %v5082_v9 = vld [vmem:[#allocation3 + $0x129] sm:$0xff] }
 0x8ca   : > { %14343 = vst [vmem:[#allocation126_spill] sm:$0xff] %v12457_v48  ;;  %5823 = vrot.lane.b32.xlu1 %v14344_v50, %s7599_s10  ;;  %v5105_v50 = vld [vmem:[#allocation3 + $0xc2] sm:$0xff] }
 0x8cb   : > { %5821 = vrot.lane.b32.xlu0 %v14345_v3, %s7599_s10 }
 0x8cc   : > { %v12463_v57 = vpop.permute.xlu1 %5695 }
 0x8cd   : > { %14346 = vst [vmem:[#allocation181_spill] sm:$0xff] %v12463_v57  ;;  %v12465_v30 = vpop.permute.xlu0 %5693 }
 0x8ce   : > { %14347 = vst [vmem:[#allocation206_spill] sm:$0xff] %v12465_v30  ;;  %5951 = vrot.lane.b32.xlu1 %v5074_v46, %s7609_s29  ;;  %v5044_v30 = vld [vmem:[#allocation3 + $0xe0] sm:$0xff]  ;;  %v5043_v46 = vld [vmem:[#allocation3 + $0xd8] sm:$0xff] }
 0x8cf   : > { %5949 = vrot.lane.b32.xlu0 %v5073_v28, %s7609_s29 }
 0x8d0   : > { %v12469_v55 = vpop.permute.xlu1 %5699 }
 0x8d1   : > { %14348 = vst [vmem:[#allocation41_spill] sm:$0xff] %v12469_v55  ;;  %v12471_v35 = vpop.permute.xlu0 %5697 }
 0x8d2   : > { %14349 = vst [vmem:[#allocation62_spill] sm:$0xff] %v12471_v35  ;;  %6079 = vrot.lane.b32.xlu1 %v5106_v51, %s7600_s11  ;;  %v5076_v35 = vld [vmem:[#allocation3 + $0xe1] sm:$0xff]  ;;  %v5075_v51 = vld [vmem:[#allocation3 + $0xd9] sm:$0xff] }
 0x8d3   : > { %6077 = vrot.lane.b32.xlu0 %v5105_v50, %s7600_s11 }
 0x8d4   : > { %v12475_v3 = vpop.permute.xlu1 %5703 }
 0x8d5   : > { %14350 = vst [vmem:[#allocation205_spill] sm:$0xff] %v12475_v3  ;;  %v12477_v57 = vpop.permute.xlu0 %5701 }
 0x8d6   : > { %14351 = vst [vmem:[#allocation49_spill] sm:$0xff] %v12477_v57  ;;  %5827 = vrot.lane.b32.xlu1 %v5044_v30, %s7599_s10  ;;  %v5108_v57 = vld [vmem:[#allocation3 + $0xe2] sm:$0xff]  ;;  %v5107_v30 = vld [vmem:[#allocation3 + $0xda] sm:$0xff] }
 0x8d7   : > { %5825 = vrot.lane.b32.xlu0 %v5043_v46, %s7599_s10 }
 0x8d8   : > { %v12481_v28 = vpop.permute.xlu1 %5707 }
 0x8d9   : > { %14352 = vst [vmem:[#allocation38_spill] sm:$0xff] %v12481_v28  ;;  %v12483_v55 = vpop.permute.xlu0 %5705 }
 0x8da   : > { %14353 = vst [vmem:[#allocation21_spill] sm:$0xff] %v12483_v55  ;;  %5955 = vrot.lane.b32.xlu1 %v5076_v35, %s7609_s29  ;;  %v5046_v55 = vld [vmem:[#allocation3 + $0xf8] sm:$0xff]  ;;  %v5045_v35 = vld [vmem:[#allocation3 + $0xf0] sm:$0xff] }
 0x8db   : > { %5953 = vrot.lane.b32.xlu0 %v5075_v51, %s7609_s29 }
 0x8dc   : > { %v12487_v50 = vpop.permute.xlu1 %5711 }
 0x8dd   : > { %14354 = vst [vmem:[#allocation184_spill] sm:$0xff] %v12487_v50  ;;  %v12489_v3 = vpop.permute.xlu0 %5709 }
 0x8de   : > { %14355 = vst [vmem:[#allocation183_spill] sm:$0xff] %v12489_v3  ;;  %6083 = vrot.lane.b32.xlu1 %v5108_v57, %s7600_s11  ;;  %v5078_v3 = vld [vmem:[#allocation3 + $0xf9] sm:$0xff]  ;;  %v5077_v57 = vld [vmem:[#allocation3 + $0xf1] sm:$0xff] }
 0x8df   : > { %6081 = vrot.lane.b32.xlu0 %v5107_v30, %s7600_s11 }
 0x8e0   : > { %v12493_v46 = vpop.permute.xlu1 %5715 }
 0x8e1   : > { %14356 = vst [vmem:[#allocation26_spill] sm:$0xff] %v12493_v46  ;;  %v12495_v28 = vpop.permute.xlu0 %5713 }
 0x8e2   : > { %14357 = vst [vmem:[#allocation82_spill] sm:$0xff] %v12495_v28  ;;  %5831 = vrot.lane.b32.xlu1 %v5046_v55, %s7599_s10  ;;  %v5110_v28 = vld [vmem:[#allocation3 + $0xfa] sm:$0xff]  ;;  %v5109_v55 = vld [vmem:[#allocation3 + $0xf2] sm:$0xff] }
 0x8e3   : > { %5829 = vrot.lane.b32.xlu0 %v5045_v35, %s7599_s10 }
 0x8e4   : > { %v12499_v51 = vpop.permute.xlu1 %5719 }
 0x8e5   : > { %14358 = vst [vmem:[#allocation188_spill] sm:$0xff] %v12499_v51  ;;  %v12501_v50 = vpop.permute.xlu0 %5717 }
 0x8e6   : > { %14359 = vst [vmem:[#allocation187_spill] sm:$0xff] %v12501_v50  ;;  %5959 = vrot.lane.b32.xlu1 %v5078_v3, %s7609_s29  ;;  %v5048_v50 = vld [vmem:[#allocation3 + $0x110] sm:$0xff]  ;;  %v5047_v3 = vld [vmem:[#allocation3 + $0x108] sm:$0xff] }
 0x8e7   : > { %5957 = vrot.lane.b32.xlu0 %v5077_v57, %s7609_s29 }
 0x8e8   : > { %v12505_v30 = vpop.permute.xlu1 %5723 }
 0x8e9   : > { %14360 = vst [vmem:[#allocation36_spill] sm:$0xff] %v12505_v30  ;;  %v12507_v46 = vpop.permute.xlu0 %5721 }
 0x8ea   : > { %14361 = vst [vmem:[#allocation19_spill] sm:$0xff] %v12507_v46  ;;  %6087 = vrot.lane.b32.xlu1 %v5110_v28, %s7600_s11  ;;  %v5080_v46 = vld [vmem:[#allocation3 + $0x111] sm:$0xff]  ;;  %v5079_v28 = vld [vmem:[#allocation3 + $0x109] sm:$0xff] }
 0x8eb   : > { %6085 = vrot.lane.b32.xlu0 %v5109_v55, %s7600_s11 }
 0x8ec   : > { %v12511_v35 = vpop.permute.xlu1 %5727 }
 0x8ed   : > { %14362 = vst [vmem:[#allocation143_spill] sm:$0xff] %v12511_v35  ;;  %v12513_v51 = vpop.permute.xlu0 %5725 }
 0x8ee   : > { %14363 = vst [vmem:[#allocation190_spill] sm:$0xff] %v12513_v51  ;;  %5835 = vrot.lane.b32.xlu1 %v5048_v50, %s7599_s10  ;;  %v5111_v51 = vld [vmem:[#allocation3 + $0x10a] sm:$0xff] }
 0x8ef   : > { %5833 = vrot.lane.b32.xlu0 %v5047_v3, %s7599_s10 }
 0x8f0   : > { %v12517_v57 = vpop.permute.xlu1 %5731 }
 0x8f1   : > { %14364 = vst [vmem:[#allocation114_spill] sm:$0xff] %v12517_v57  ;;  %v12519_v30 = vpop.permute.xlu0 %5729  ;;  %v5050_v57 = vld [vmem:[#allocation3 + $0x128] sm:$0xff] }
 0x8f2   : > { %14365 = vst [vmem:[#allocation81_spill] sm:$0xff] %v12519_v30  ;;  %5963 = vrot.lane.b32.xlu1 %v5080_v46, %s7609_s29  ;;  %v5049_v30 = vld [vmem:[#allocation3 + $0x120] sm:$0xff] }
 0x8f3   : > { %5961 = vrot.lane.b32.xlu0 %v5079_v28, %s7609_s29 }
 0x8f4   : > { %v5800_v55 = vpop.permute.xlu1 %5799 }
 0x8f5   : > { %v5798_v35 = vpop.permute.xlu0 %5797 }
 0x8f6   : > { %6091 = vrot.lane.b32.xlu1 %v5112_v38, %s7600_s11  ;;  %v5081_v38 = vld [vmem:[#allocation3 + $0x121] sm:$0xff] }
 0x8f7   : > { %6089 = vrot.lane.b32.xlu0 %v5111_v51, %s7600_s11 }
 0x8f8   : > { %v12525_v50 = vpop.permute.xlu1 %5803 }
 0x8f9   : > { %v12527_v3 = vpop.permute.xlu0 %5801 }
 0x8fa   : > { %5839 = vrot.lane.b32.xlu1 %v5050_v57, %s7599_s10  ;;  %v5113_v57 = vld [vmem:[#allocation3 + $0x122] sm:$0xff] }
 0x8fb   : > { %5837 = vrot.lane.b32.xlu0 %v5049_v30, %s7599_s10  ;;  %v4837_v30 = vld [vmem:[#allocation3] sm:$0xff] }
 0x8fc   : > { %v12531_v46 = vpop.permute.xlu1 %5807  ;;  %v6149_v27 = vsel %vm2432_vm11, %v4837_v30, %v14368_v37 }
 0x8fd   : > { %v12533_v28 = vpop.permute.xlu0 %5805 }
 0x8fe   : > { %5967 = vrot.lane.b32.xlu1 %v5082_v9, %s7609_s29  ;;  %v5052_v9 = vld [vmem:[#allocation3 + $0x140] sm:$0xff] }
 0x8ff   : > { %5965 = vrot.lane.b32.xlu0 %v5081_v38, %s7609_s29  ;;  %v5051_v38 = vld [vmem:[#allocation3 + $0x138] sm:$0xff] }
 0x900   : > { %v12537_v51 = vpop.permute.xlu1 %5811 }
 0x901   : > { %v12539_v48 = vpop.permute.xlu0 %5809 }
 0x902   : > { %6095 = vrot.lane.b32.xlu1 %v5114_v11, %s7600_s11  ;;  %v6150_v11 = vsel %vm2432_vm11, %v4838_v42, %v14369_v26  ;;  %v5083_v42 = vld [vmem:[#allocation3 + $0x139] sm:$0xff] }
 0x903   : > { %6093 = vrot.lane.b32.xlu0 %v5113_v57, %s7600_s11  ;;  %v6181_v57 = vsel %vm279_vm0, %v6149_v27, %v12038_v60  ;;  %v6182_v16 = vsel %vm279_vm0, %v6150_v11, %v14370_v24  ;;  %v14372_v11 = vld [vmem:[#allocation56_spill] sm:$0xff] }
 0x904   : > { %v12543_v47 = vpop.permute.xlu1 %5815  ;;  %v6214_v37 = vsel %vm4016_vm14, %v6182_v16, %v12158_v14 }
 0x905   : > { %14366 = vst [vmem:[#allocation97_spill] sm:$0xff] %v12543_v47  ;;  %v12545_v52 = vpop.permute.xlu0 %5813  ;;  %v6213_v47 = vsel %vm4016_vm14, %v6181_v57, %v12160_v0  ;;  %v6246_v60 = vsel %vm1735_vm3, %v6214_v37, %v12290_v21  ;;  %v14374_v57 = vld [vmem:[#allocation161_spill] sm:$0xff] }
 0x906   : > { %14367 = vst [vmem:[#allocation108_spill] sm:$0xff] %v12545_v52  ;;  %5843 = vrot.lane.b32.xlu1 %v5052_v9, %s7599_s10  ;;  %v5084_v52 = vld [vmem:[#allocation3 + $0x141] sm:$0xff]  ;;  %v6245_v30 = vsel %vm1735_vm3, %v6213_v47, %v12292_v34  ;;  %v6278_v0 = vsel %vm4081_vm15, %v6246_v60, %v12423_v44 }
 0x907   : > { %5841 = vrot.lane.b32.xlu0 %v5051_v38, %s7599_s10  ;;  %v6277_v27 = vsel %vm4081_vm15, %v6245_v30, %v12425_v43  ;;  %v6310_v14 = vsel %vm1768_vm4, %v6278_v0, %v5800_v55  ;;  %v5116_v34 = vld [vmem:[#allocation3 + $0x142] sm:$0xff]  ;;  %v5115_v43 = vld [vmem:[#allocation3 + $0x13a] sm:$0xff]  ;;  %v14375_v30 = vld [vmem:[#allocation48_spill] sm:$0xff] }
 0x908   : > { %v5928_v40 = vpop.permute.xlu1 %5927  ;;  %v6309_v24 = vsel %vm1768_vm4, %v6277_v27, %v5798_v35  ;;  %v14371_v38 = vld [vmem:[#allocation149_spill] sm:$0xff] }
 0x909   : > { %v5926_v9 = vpop.permute.xlu0 %5925  ;;  %v6342_v26 = vsel %vm4146_vm1, %v6310_v14, %v5928_v40  ;;  %v6151_v44 = vsel %vm2432_vm11, %v14372_v11, %v14371_v38  ;;  %v14373_v55 = vld [vmem:[#allocation109_spill] sm:$0xff]  ;;  %v14376_v38 = vld [vmem:[#allocation76_spill] sm:$0xff] }
 0x90a   : > { %5971 = vrot.lane.b32.xlu1 %v5084_v52, %s7609_s29  ;;  %v6341_v47 = vsel %vm4146_vm1, %v6309_v24, %v5926_v9  ;;  %v6152_v9 = vsel %vm2432_vm11, %v14374_v57, %v14373_v55  ;;  %v6183_v40 = vsel %vm279_vm0, %v6151_v44, %v12044_v29  ;;  %v5054_v0 = vld [vmem:[#allocation3 + $0x158] sm:$0xff]  ;;  %v5053_v29 = vld [vmem:[#allocation3 + $0x150] sm:$0xff] }
 0x90b   : > { %5969 = vrot.lane.b32.xlu0 %v5083_v42, %s7609_s29  ;;  %v6184_v42 = vsel %vm279_vm0, %v6152_v9, %v14375_v30  ;;  %v6215_v60 = vsel %vm4016_vm14, %v6183_v40, %v12168_v25  ;;  %v5118_v9 = vld [vmem:[#allocation3 + $0x15a] sm:$0xff] }
 0x90c   : > { %v6056_v16 = vpop.permute.xlu1 %6055  ;;  %v6216_v24 = vsel %vm4016_vm14, %v6184_v42, %v12166_v12 }
 0x90d   : > { %v6054_v52 = vpop.permute.xlu0 %6053  ;;  %v6374_v35 = vsel %vm1801_vm5, %v6342_v26, %v6056_v16  ;;  %v6247_v16 = vsel %vm1735_vm3, %v6215_v60, %v12300_v22  ;;  %v6248_v14 = vsel %vm1735_vm3, %v6216_v24, %v12298_v58  ;;  %v14378_v24 = vld [vmem:[#allocation119_spill] sm:$0xff] }
 0x90e   : > { %v6373_v21 = vsel %vm1801_vm5, %v6341_v47, %v6054_v52  ;;  %6099 = vrot.lane.b32.xlu1 %v5116_v34, %s7600_s11  ;;  %v6279_v47 = vsel %vm4081_vm15, %v6247_v16, %v12431_v33  ;;  %v6280_v25 = vsel %vm4081_vm15, %v6248_v14, %v12429_v20  ;;  %v6153_v20 = vsel %vm2432_vm11, %v14309_v39, %v14376_v38 }
 0x90f   : > { %6097 = vrot.lane.b32.xlu0 %v5115_v43, %s7600_s11  ;;  %7395 = vmatprep.mubr.msk.f32.mxu1 %vm4223_vm2, %v6373_v21  ;;  %v6311_v12 = vsel %vm1768_vm4, %v6279_v47, %v12527_v3  ;;  %v6312_v22 = vsel %vm1768_vm4, %v6280_v25, %v12525_v50  ;;  %v5086_v21 = vld [vmem:[#allocation3 + $0x159] sm:$0xff]  ;;  %v5085_v43 = vld [vmem:[#allocation3 + $0x151] sm:$0xff]  ;;  %v6185_v44 = vsel %vm279_vm0, %v6153_v20, %v12050_v62  ;;  %v14381_v20 = vld [vmem:[#allocation103_spill] sm:$0xff] }
 0x910   : > { %v5932_v37 = vpop.permute.xlu1 %5931  ;;  %7396 = vmatmul.mubr.msk.f32.vlgmr.msra.gmra.mrb[18].mxu1 %vm4223_vm2, %v6374_v35  ;;  %v14377_v50 = vld [vmem:[#allocation125_spill] sm:$0xff]  ;;  %v6217_v39 = vsel %vm4016_vm14, %v6185_v44, %v12176_v4 }
 0x911   : > { %v5930_v27 = vpop.permute.xlu0 %5929  ;;  %v6344_v58 = vsel %vm4146_vm1, %v6312_v22, %v5932_v37  ;;  %v6154_v11 = vsel %vm2432_vm11, %v14308_v31, %v14377_v50  ;;  %v6249_v31 = vsel %vm1735_vm3, %v6217_v39, %v12308_v23  ;;  %v5117_v62 = vld [vmem:[#allocation3 + $0x152] sm:$0xff]  ;;  %v5058_v39 = vld [vmem:[#allocation3 + $0x188] sm:$0xff] }
 0x912   : > { %5847 = vrot.lane.b32.xlu1 %v5054_v0, %s7599_s10  ;;  %v6343_v34 = vsel %vm4146_vm1, %v6311_v12, %v5930_v27  ;;  %v6186_v55 = vsel %vm279_vm0, %v6154_v11, %v12048_v18  ;;  %v6281_v18 = vsel %vm4081_vm15, %v6249_v31, %v12437_v63  ;;  %v5056_v27 = vld [vmem:[#allocation3 + $0x170] sm:$0xff]  ;;  %v5055_v0 = vld [vmem:[#allocation3 + $0x168] sm:$0xff] }
 0x913   : > { %5845 = vrot.lane.b32.xlu0 %v5053_v29, %s7599_s10  ;;  %v6218_v40 = vsel %vm4016_vm14, %v6186_v55, %v12174_v45  ;;  %v6313_v45 = vsel %vm1768_vm4, %v6281_v18, %v12533_v28  ;;  %v5088_v12 = vld [vmem:[#allocation3 + $0x171] sm:$0xff] }
 0x914   : > { %v6060_v52 = vpop.permute.xlu1 %6059  ;;  %v6250_v37 = vsel %vm1735_vm3, %v6218_v40, %v12306_v6  ;;  %v14382_v31 = vld [vmem:[#allocation108_spill] sm:$0xff] }
 0x915   : > { %v6058_v26 = vpop.permute.xlu0 %6057  ;;  %v6376_v3 = vsel %vm1801_vm5, %v6344_v58, %v6060_v52  ;;  %v6282_v4 = vsel %vm4081_vm15, %v6250_v37, %v12435_v15  ;;  %v6155_v15 = vsel %vm2432_vm11, %v14311_v41, %v14378_v24  ;;  %v5120_v58 = vld [vmem:[#allocation3 + $0x172] sm:$0xff]  ;;  %v5060_v24 = vld [vmem:[#allocation3 + $0x1a0] sm:$0xff] }
 0x916   : > { %v6375_v33 = vsel %vm1801_vm5, %v6343_v34, %v6058_v26  ;;  %5975 = vrot.lane.b32.xlu1 %v5086_v21, %s7609_s29  ;;  %v6314_v23 = vsel %vm1768_vm4, %v6282_v4, %v12531_v46  ;;  %v14379_v46 = vld [vmem:[#allocation77_spill] sm:$0xff]  ;;  %v6187_v29 = vsel %vm279_vm0, %v6155_v15, %v12056_v5  ;;  %v5087_v5 = vld [vmem:[#allocation3 + $0x169] sm:$0xff]  ;;  %v7567_v15 = vld [vmem:[#allocation3 + $0x80] sm:$0xff] }
 0x917   : > { %5973 = vrot.lane.b32.xlu0 %v5085_v43, %s7609_s29  ;;  %7398 = vmatprep.mubr.msk.f32.mxu1 %vm4223_vm2, %v6375_v33  ;;  %v6156_v16 = vsel %vm2432_vm11, %v14310_v13, %v14379_v46  ;;  %v6219_v41 = vsel %vm4016_vm14, %v6187_v29, %v12188_v32  ;;  %v5119_v33 = vld [vmem:[#allocation3 + $0x16a] sm:$0xff]  ;;  %v7564_v43 = vld [vmem:[#allocation3 + $0x60] sm:$0xff]  ;;  %v14383_v37 = vld [vmem:[#allocation97_spill] sm:$0xff] }
 0x918   : > { %v5936_v35 = vpop.permute.xlu1 %5935  ;;  %7399 = vmatmul.mubr.msk.f32.gmra.mrb[20].mxu1 %vm4223_vm2, %v6376_v3  ;;  %v6188_v47 = vsel %vm279_vm0, %v6156_v16, %v12054_v56  ;;  %v6251_v13 = vsel %vm1735_vm3, %v6219_v41, %v12320_v10  ;;  %v14390_v16 = vld [vmem:[#allocation147_spill] sm:$0xff] }
 0x919   : > { %v5934_v57 = vpop.permute.xlu0 %5933  ;;  %v6346_v6 = vsel %vm4146_vm1, %v6314_v23, %v5936_v35  ;;  %v6220_v52 = vsel %vm4016_vm14, %v6188_v47, %v12186_v1  ;;  %v6283_v56 = vsel %vm4081_vm15, %v6251_v13, %v12445_v61  ;;  %v5059_v47 = vld [vmem:[#allocation3 + $0x198] sm:$0xff]  ;;  %v14391_v41 = vld [vmem:[#allocation107_spill] sm:$0xff] }
 0x91a   : > { %6103 = vrot.lane.b32.xlu1 %v5118_v9, %s7600_s11  ;;  %v6345_v42 = vsel %vm4146_vm1, %v6313_v45, %v5934_v57  ;;  %v6252_v22 = vsel %vm1735_vm3, %v6220_v52, %v12318_v54  ;;  %v6315_v1 = vsel %vm1768_vm4, %v6283_v56, %v12539_v48  ;;  %v14394_v56 = vld [vmem:[#allocation44_spill] sm:$0xff] }
 0x91b   : > { %6101 = vrot.lane.b32.xlu0 %v5117_v62, %s7600_s11  ;;  %v6284_v32 = vsel %vm4081_vm15, %v6252_v22, %v12443_v2  ;;  %v14380_v2 = vld [vmem:[#allocation167_spill] sm:$0xff] }
 0x91c   : > { %v6064_v30 = vpop.permute.xlu1 %6063  ;;  %v6316_v10 = vsel %vm1768_vm4, %v6284_v32, %v12537_v51  ;;  %v6157_v38 = vsel %vm2432_vm11, %v7564_v43, %v14380_v2  ;;  %v7565_v51 = vld [vmem:[#allocation3 + $0x68] sm:$0xff]  ;;  %v5091_v43 = vld [vmem:[#allocation3 + $0x199] sm:$0xff] }
 0x91d   : > { %v6062_v60 = vpop.permute.xlu0 %6061  ;;  %v6378_v28 = vsel %vm1801_vm5, %v6346_v6, %v6064_v30  ;;  %v6158_v3 = vsel %vm2432_vm11, %v7565_v51, %v14381_v20  ;;  %v6189_v50 = vsel %vm279_vm0, %v6157_v38, %v12064_v17  ;;  %v5057_v17 = vld [vmem:[#allocation3 + $0x180] sm:$0xff]  ;;  %v14387_v6 = vld [vmem:[#allocation92_spill] sm:$0xff] }
 0x91e   : > { %v6377_v63 = vsel %vm1801_vm5, %v6345_v42, %v6062_v60  ;;  %5851 = vrot.lane.b32.xlu1 %v5056_v27, %s7599_s10  ;;  %v6190_v44 = vsel %vm279_vm0, %v6158_v3, %v12062_v19  ;;  %v6221_v35 = vsel %vm4016_vm14, %v6189_v50, %v12196_v8  ;;  %v14386_v60 = vld [vmem:[#allocation111_spill] sm:$0xff]  ;;  %v7566_v27 = vld [vmem:[#allocation3 + $0x78] sm:$0xff] }
 0x91f   : > { %5849 = vrot.lane.b32.xlu0 %v5055_v0, %s7599_s10  ;;  %7401 = vmatprep.mubr.msk.f32.mxu1 %vm4223_vm2, %v6377_v63  ;;  %v6222_v57 = vsel %vm4016_vm14, %v6190_v44, %v12194_v36  ;;  %v6253_v9 = vsel %vm1735_vm3, %v6221_v35, %v12328_v59  ;;  %v6159_v63 = vsel %vm2432_vm11, %v7566_v27, %v14387_v6  ;;  %v14388_v0 = vld [vmem:[#allocation115_spill] sm:$0xff]  ;;  %v5123_v44 = vld [vmem:[#allocation3 + $0x19a] sm:$0xff] }
 0x920   : > { %v5940_v14 = vpop.permute.xlu1 %5939  ;;  %7402 = vmatmul.mubr.msk.f32.gmra.mrb[22].mxu1 %vm4223_vm2, %v6378_v28  ;;  %v6254_v40 = vsel %vm1735_vm3, %v6222_v57, %v12326_v49  ;;  %v6285_v19 = vsel %vm4081_vm15, %v6253_v9, %v12451_v7  ;;  %v14384_v7 = vld [vmem:[#allocation45_spill] sm:$0xff]  ;;  %v6191_v29 = vsel %vm279_vm0, %v6159_v63, %v14390_v16  ;;  %v5124_v50 = vld [vmem:[#allocation3 + $0x1a2] sm:$0xff] }
 0x921   : > { %v5938_v25 = vpop.permute.xlu0 %5937  ;;  %v6348_v54 = vsel %vm4146_vm1, %v6316_v10, %v5940_v14  ;;  %v6286_v8 = vsel %vm4081_vm15, %v6254_v40, %v12449_v53  ;;  %v6317_v36 = vsel %vm1768_vm4, %v6285_v19, %v14382_v31  ;;  %v14385_v53 = vld [vmem:[#allocation16_spill] sm:$0xff]  ;;  %v14389_v28 = vld [vmem:[#allocation189_spill] sm:$0xff]  ;;  %v14396_v10 = vld [vmem:[#allocation126_spill] sm:$0xff] }
 0x922   : > { %5979 = vrot.lane.b32.xlu1 %v5088_v12, %s7609_s29  ;;  %v6347_v26 = vsel %vm4146_vm1, %v6315_v1, %v5938_v25  ;;  %v6318_v59 = vsel %vm1768_vm4, %v6286_v8, %v14383_v37  ;;  %v6160_v46 = vsel %vm2432_vm11, %v7567_v15, %v14389_v28  ;;  %v14392_v12 = vld [vmem:[#allocation122_spill] sm:$0xff]  ;;  %v14395_v1 = vld [vmem:[#allocation201_spill] sm:$0xff]  ;;  %v14400_v19 = vld [vmem:[#allocation196_spill] sm:$0xff] }
 0x923   : > { %5977 = vrot.lane.b32.xlu0 %v5087_v5, %s7609_s29  ;;  %v6192_v25 = vsel %vm279_vm0, %v6160_v46, %v14391_v41  ;;  %v6223_v52 = vsel %vm4016_vm14, %v6191_v29, %v14392_v12  ;;  %v14393_v5 = vld [vmem:[#allocation83_spill] sm:$0xff]  ;;  %v7569_v9 = vld [vmem:[#allocation3 + $0x98] sm:$0xff]  ;;  %v14402_v37 = vld [vmem:[#allocation176_spill] sm:$0xff] }
 0x924   : > { %v6068_v34 = vpop.permute.xlu1 %6067  ;;  %v6224_v22 = vsel %vm4016_vm14, %v6192_v25, %v14393_v5  ;;  %v6255_v32 = vsel %vm1735_vm3, %v6223_v52, %v14394_v56  ;;  %v14408_v41 = vld [vmem:[#allocation25_spill] sm:$0xff]  ;;  %v7571_v12 = vld [vmem:[#allocation3 + $0xb0] sm:$0xff]  ;;  %v14409_v52 = vld [vmem:[#allocation86_spill] sm:$0xff] }
 0x925   : > { %v6066_v21 = vpop.permute.xlu0 %6065  ;;  %v6380_v48 = vsel %vm1801_vm5, %v6348_v54, %v6068_v34  ;;  %v6256_v34 = vsel %vm1735_vm3, %v6224_v22, %v14395_v1  ;;  %v14410_v5 = vld [vmem:[#allocation64_spill] sm:$0xff] }
 0x926   : > { %v6379_v61 = vsel %vm1801_vm5, %v6347_v26, %v6066_v21  ;;  %6107 = vrot.lane.b32.xlu1 %v5120_v58, %s7600_s11  ;;  %v6287_v26 = vsel %vm4081_vm15, %v6255_v32, %v14396_v10  ;;  %v5092_v21 = vld [vmem:[#allocation3 + $0x1a1] sm:$0xff]  ;;  %v14397_v58 = vld [vmem:[#allocation88_spill] sm:$0xff] }
 0x927   : > { %6105 = vrot.lane.b32.xlu0 %v5119_v33, %s7600_s11  ;;  %7404 = vmatprep.mubr.msk.f32.mxu1 %vm4223_vm2, %v6379_v61  ;;  %v6288_v54 = vsel %vm4081_vm15, %v6256_v34, %v14397_v58  ;;  %v14411_v32 = vld [vmem:[#allocation123_spill] sm:$0xff]  ;;  %v14412_v34 = vld [vmem:[#allocation170_spill] sm:$0xff] }
 0x928   : > { %v5944_v11 = vpop.permute.xlu1 %5943  ;;  %7405 = vmatmul.mubr.msk.f32.gmra.mrb[24].mxu1 %vm4223_vm2, %v6380_v48 }
 0x929   : > { %v5942_v55 = vpop.permute.xlu0 %5941  ;;  %v6350_v49 = vsel %vm4146_vm1, %v6318_v59, %v5944_v11 }
 0x92a   : > { %5855 = vrot.lane.b32.xlu1 %v5058_v39, %s7599_s10  ;;  %v6349_v18 = vsel %vm4146_vm1, %v6317_v36, %v5942_v55  ;;  %v7568_v55 = vld [vmem:[#allocation3 + $0x90] sm:$0xff]  ;;  %v14398_v39 = vld [vmem:[#allocation98_spill] sm:$0xff] }
 0x92b   : > { %5853 = vrot.lane.b32.xlu0 %v5057_v17, %s7599_s10  ;;  %v6161_v57 = vsel %vm2432_vm11, %v7568_v55, %v14398_v39  ;;  %v14399_v17 = vld [vmem:[#allocation65_spill] sm:$0xff]  ;;  %v14401_v36 = vld [vmem:[#allocation164_spill] sm:$0xff] }
 0x92c   : > { %v6072_v62 = vpop.permute.xlu1 %6071  ;;  %v6162_v40 = vsel %vm2432_vm11, %v7569_v9, %v14399_v17  ;;  %v6193_v8 = vsel %vm279_vm0, %v6161_v57, %v14400_v19  ;;  %v7572_v17 = vld [vmem:[#allocation3 + $0xc0] sm:$0xff] }
 0x92d   : > { %v6070_v4 = vpop.permute.xlu0 %6069  ;;  %v6382_v30 = vsel %vm1801_vm5, %v6350_v49, %v6072_v62  ;;  %v6194_v62 = vsel %vm279_vm0, %v6162_v40, %v14401_v36  ;;  %v6225_v59 = vsel %vm4016_vm14, %v6193_v8, %v14402_v37  ;;  %v14418_v40 = vld [vmem:[#allocation191_spill] sm:$0xff] }
 0x92e   : > { %v6381_v45 = vsel %vm1801_vm5, %v6349_v18, %v6070_v4  ;;  %5983 = vrot.lane.b32.xlu1 %v14384_v7, %s7609_s29  ;;  %v14403_v4 = vld [vmem:[#allocation157_spill] sm:$0xff]  ;;  %v6165_v19 = vsel %vm2432_vm11, %v7572_v17, %v14418_v40  ;;  %v7573_v8 = vld [vmem:[#allocation3 + $0xc8] sm:$0xff] }
 0x92f   : > { %5981 = vrot.lane.b32.xlu0 %v14385_v53, %s7609_s29  ;;  %7407 = vmatprep.mubr.msk.f32.mxu1 %vm4223_vm2, %v6381_v45  ;;  %v6226_v49 = vsel %vm4016_vm14, %v6194_v62, %v14403_v4  ;;  %v14404_v45 = vld [vmem:[#allocation136_spill] sm:$0xff]  ;;  %v14441_v17 = vld [vmem:[#allocation67_spill] sm:$0xff] }
 0x930   : > { %v5820_v23 = vpop.permute.xlu1 %5819  ;;  %7408 = vmatmul.mubr.msk.f32.gmra.mrb[26].mxu1 %vm4223_vm2, %v6382_v30  ;;  %v6257_v7 = vsel %vm1735_vm3, %v6225_v59, %v14404_v45  ;;  %v14405_v30 = vld [vmem:[#allocation151_spill] sm:$0xff]  ;;  %v14420_v62 = vld [vmem:[#allocation116_spill] sm:$0xff]  ;;  %v2307_v40 = vmax.f32 %v14441_v17, 0.0 }
 0x931   : > { %v5818_v42 = vpop.permute.xlu0 %5817  ;;  %v6320_v2 = vsel %vm1768_vm4, %v6288_v54, %v5820_v23  ;;  %v6258_v53 = vsel %vm1735_vm3, %v6226_v49, %v14405_v30  ;;  %v14406_v23 = vld [vmem:[#allocation206_spill] sm:$0xff]  ;;  %v14414_v54 = vld [vmem:[#allocation145_spill] sm:$0xff]  ;;  %v6197_v37 = vsel %vm279_vm0, %v6165_v19, %v14420_v62  ;;  %v14422_v49 = vld [vmem:[#allocation200_spill] sm:$0xff] }
 0x932   : > { %6111 = vrot.lane.b32.xlu1 %v14386_v60, %s7600_s11  ;;  %v6319_v61 = vsel %vm1768_vm4, %v6287_v26, %v5818_v42  ;;  %v6289_v42 = vsel %vm4081_vm15, %v6257_v7, %v14406_v23  ;;  %v14407_v60 = vld [vmem:[#allocation181_spill] sm:$0xff]  ;;  %v6229_v45 = vsel %vm4016_vm14, %v6197_v37, %v14422_v49  ;;  %v14423_v30 = vld [vmem:[#allocation175_spill] sm:$0xff]  ;;  %v14424_v23 = vld [vmem:[#allocation180_spill] sm:$0xff] }
 0x933   : > { %6109 = vrot.lane.b32.xlu0 %v14388_v0, %s7600_s11  ;;  %v6290_v27 = vsel %vm4081_vm15, %v6258_v53, %v14407_v60  ;;  %v14425_v60 = vld [vmem:[#allocation80_spill] sm:$0xff]  ;;  %v14442_v19 = vld [vmem:[#allocation38_spill] sm:$0xff]  ;;  %v14461_v17 = vld [vmem:[#allocation75_spill] sm:$0xff] }
 0x934   : > { %v5948_v14 = vpop.permute.xlu1 %5947 }
 0x935   : > { %v5946_v13 = vpop.permute.xlu0 %5945  ;;  %v6352_v51 = vsel %vm4146_vm1, %v6320_v2, %v5948_v14  ;;  %v14416_v2 = vld [vmem:[#allocation62_spill] sm:$0xff] }
 0x936   : > { %5859 = vrot.lane.b32.xlu1 %v5060_v24, %s7599_s10  ;;  %v6351_v38 = vsel %vm4146_vm1, %v6319_v61, %v5946_v13  ;;  %v6164_v13 = vsel %vm2432_vm11, %v7571_v12, %v14409_v52  ;;  %v14429_v52 = vld [vmem:[#allocation5_spill] sm:$0xff] }
 0x937   : > { %5857 = vrot.lane.b32.xlu0 %v5059_v47, %s7599_s10  ;;  %v7570_v47 = vld [vmem:[#allocation3 + $0xa8] sm:$0xff]  ;;  %v6196_v1 = vsel %vm279_vm0, %v6164_v13, %v14411_v32  ;;  %v2305_v13 = vmax.f32 %v14429_v52, 0.0  ;;  %v14430_v32 = vld [vmem:[#allocation137_spill] sm:$0xff] }
 0x938   : > { %v6076_v33 = vpop.permute.xlu1 %6075  ;;  %v6163_v25 = vsel %vm2432_vm11, %v7570_v47, %v14408_v41 }
 0x939   : > { %v6074_v48 = vpop.permute.xlu0 %6073  ;;  %v6384_v3 = vsel %vm1801_vm5, %v6352_v51, %v6076_v33  ;;  %v6195_v22 = vsel %vm279_vm0, %v6163_v25, %v14410_v5  ;;  %v14415_v33 = vld [vmem:[#allocation27_spill] sm:$0xff] }
 0x93a   : > { %v6383_v20 = vsel %vm1801_vm5, %v6351_v38, %v6074_v48  ;;  %5987 = vrot.lane.b32.xlu1 %v5092_v21, %s7609_s29  ;;  %v6227_v10 = vsel %vm4016_vm14, %v6195_v22, %v14412_v34  ;;  %v14413_v21 = vld [vmem:[#allocation33_spill] sm:$0xff]  ;;  %v14431_v34 = vld [vmem:[#allocation66_spill] sm:$0xff] }
 0x93b   : > { %5985 = vrot.lane.b32.xlu0 %v5091_v43, %s7609_s29  ;;  %7410 = vmatprep.mubr.msk.f32.mxu1 %vm4223_vm2, %v6383_v20  ;;  %v6228_v58 = vsel %vm4016_vm14, %v6196_v1, %v14413_v21  ;;  %v6259_v61 = vsel %vm1735_vm3, %v6227_v10, %v14414_v54  ;;  %v14417_v48 = vld [vmem:[#allocation41_spill] sm:$0xff]  ;;  %v2306_v10 = vmax.f32 %v14431_v34, 0.0  ;;  %v14432_v21 = vld [vmem:[#allocation148_spill] sm:$0xff]  ;;  %v14433_v54 = vld [vmem:[#allocation99_spill] sm:$0xff]  ;;  %s7145_s29 = sshll.u32 %s14563_s25, 5 }
 0x93c   : > { %v5824_v11 = vpop.permute.xlu1 %5823  ;;  %7411 = vmatmul.mubr.msk.f32.gmra.mrb[28].mxu1 %vm4223_vm2, %v6384_v3  ;;  %v6260_v43 = vsel %vm1735_vm3, %v6228_v58, %v14415_v33  ;;  %v6291_v38 = vsel %vm4081_vm15, %v6259_v61, %v14416_v2  ;;  %s13127_s15 = scalar_lea.vmem %s13166_s7, %s7145_s29 }
 0x93d   : > { %v5822_v35 = vpop.permute.xlu0 %5821  ;;  %v6322_v0 = vsel %vm1768_vm4, %v6290_v27, %v5824_v11  ;;  %v6292_v51 = vsel %vm4081_vm15, %v6260_v43, %v14417_v48  ;;  %v14434_v43 = vld [vmem:[#allocation171_spill] sm:$0xff] }
 0x93e   : > { %6115 = vrot.lane.b32.xlu1 %v5124_v50, %s7600_s11  ;;  %v6321_v6 = vsel %vm1768_vm4, %v6289_v42, %v5822_v35  ;;  %v6261_v42 = vsel %vm1735_vm3, %v6229_v45, %v14424_v23 }
 0x93f   : > { %6113 = vrot.lane.b32.xlu0 %v5123_v44, %s7600_s11 }
 0x940   : > { %v5952_v31 = vpop.permute.xlu1 %5951 }
 0x941   : > { %v5950_v18 = vpop.permute.xlu0 %5949  ;;  %v6354_v28 = vsel %vm4146_vm1, %v6322_v0, %v5952_v31  ;;  %v14419_v31 = vld [vmem:[#allocation37_spill] sm:$0xff]  ;;  %v14427_v0 = vld [vmem:[#allocation7_spill] sm:$0xff] }
 0x942   : > { %v6353_v24 = vsel %vm4146_vm1, %v6321_v6, %v5950_v18  ;;  %v6166_v36 = vsel %vm2432_vm11, %v7573_v8, %v14419_v31  ;;  %v14421_v18 = vld [vmem:[#allocation195_spill] sm:$0xff]  ;;  %v14426_v6 = vld [vmem:[#allocation49_spill] sm:$0xff] }
 0x943   : > { %v6198_v4 = vsel %vm279_vm0, %v6166_v36, %v14421_v18  ;;  %v14443_v18 = vld [vmem:[#allocation18_spill] sm:$0xff] }
 0x944   : > { %v6080_v63 = vpop.permute.xlu1 %6079  ;;  %v6230_v53 = vsel %vm4016_vm14, %v6198_v4, %v14423_v30  ;;  %v2321_v4 = vmax.f32 %v14443_v18, 0.0  ;;  %v14444_v30 = vld [vmem:[#allocation9_spill] sm:$0xff] }
 0x945   : > { %v6078_v15 = vpop.permute.xlu0 %6077  ;;  %v6386_v16 = vsel %vm1801_vm5, %v6354_v28, %v6080_v63  ;;  %v6262_v27 = vsel %vm1735_vm3, %v6230_v53, %v14425_v60  ;;  %v6293_v63 = vsel %vm4081_vm15, %v6261_v42, %v14426_v6  ;;  %v2308_v53 = vmax.f32 %v14444_v30, 0.0  ;;  %v14445_v60 = vld [vmem:[#allocation22_spill] sm:$0xff]  ;;  %v7576_v6 = vld [vmem:[#allocation3 + $0xf0] sm:$0xff] }
 0x946   : > { %v6385_v46 = vsel %vm1801_vm5, %v6353_v24, %v6078_v15  ;;  %v2304_v24 = vmax.f32 %v14427_v0, 0.0  ;;  %v14428_v15 = vld [vmem:[#allocation205_spill] sm:$0xff] }
 0x947   : > { %7413 = vmatprep.mubr.msk.f32.mxu1 %vm4223_vm2, %v6385_v46  ;;  %v6294_v28 = vsel %vm4081_vm15, %v6262_v27, %v14428_v15  ;;  %v2322_v27 = vmax.f32 %v14445_v60, 0.0  ;;  %v14468_v60 = vld [vmem:[#allocation74_spill] sm:$0xff] }
 0x948   : > { %v5828_v29 = vpop.permute.xlu1 %5827  ;;  %7414 = vmatmul.mubr.msk.f32.gmra.mrb[30].mxu1 %vm4223_vm2, %v6386_v16 }
 0x949   : > { %v5826_v14 = vpop.permute.xlu0 %5825  ;;  %v6324_v50 = vsel %vm1768_vm4, %v6292_v51, %v5828_v29 }
 0x94a   : > { %v6323_v20 = vsel %vm1768_vm4, %v6291_v38, %v5826_v14  ;;  %v14435_v38 = vld [vmem:[#allocation127_spill] sm:$0xff] }
 0x94c   : > { %v5956_v56 = vpop.permute.xlu1 %5955 }
 0x94d   : > { %v5954_v26 = vpop.permute.xlu0 %5953  ;;  %v6356_v35 = vsel %vm4146_vm1, %v6324_v50, %v5956_v56  ;;  %v7574_v56 = vld [vmem:[#allocation3 + $0xd8] sm:$0xff]  ;;  %v14437_v50 = vld [vmem:[#allocation146_spill] sm:$0xff] }
 0x94e   : > { %v6355_v11 = vsel %vm4146_vm1, %v6323_v20, %v5954_v26  ;;  %v6167_v1 = vsel %vm2432_vm11, %v7574_v56, %v14430_v32  ;;  %v7575_v26 = vld [vmem:[#allocation3 + $0xe0] sm:$0xff]  ;;  %v14436_v20 = vld [vmem:[#allocation24_spill] sm:$0xff]  ;;  %v14453_v56 = vld [vmem:[#allocation199_spill] sm:$0xff] }
 0x94f   : > { %v6168_v58 = vsel %vm2432_vm11, %v7575_v26, %v14432_v21  ;;  %v6199_v61 = vsel %vm279_vm0, %v6167_v1, %v14433_v54  ;;  %v14454_v1 = vld [vmem:[#allocation204_spill] sm:$0xff]  ;;  %v14456_v21 = vld [vmem:[#allocation183_spill] sm:$0xff]  ;;  %v14457_v54 = vld [vmem:[#allocation69_spill] sm:$0xff] }
 0x950   : > { %v6084_v3 = vpop.permute.xlu1 %6083  ;;  %v6200_v2 = vsel %vm279_vm0, %v6168_v58, %v14434_v43  ;;  %v6231_v48 = vsel %vm4016_vm14, %v6199_v61, %v14435_v38  ;;  %v2310_v61 = vmax.f32 %v14457_v54, 0.0  ;;  %v14477_v54 = vld [vmem:[#allocation130_spill] sm:$0xff] }
 0x951   : > { %v6082_v44 = vpop.permute.xlu0 %6081  ;;  %v6388_v39 = vsel %vm1801_vm5, %v6356_v35, %v6084_v3  ;;  %v2320_v3 = vmax.f32 %v14436_v20, 0.0 }
 0x952   : > { %v6387_v55 = vsel %vm1801_vm5, %v6355_v11, %v6082_v44  ;;  %v6232_v11 = vsel %vm4016_vm14, %v6200_v2, %v14437_v50  ;;  %v14438_v44 = vld [vmem:[#allocation60_spill] sm:$0xff] }
 0x953   : > { %7416 = vmatprep.mubr.msk.f32.mxu1 %vm4223_vm2, %v6387_v55  ;;  %v6263_v35 = vsel %vm1735_vm3, %v6231_v48, %v14438_v44  ;;  %v14439_v55 = vld [vmem:[#allocation121_spill] sm:$0xff] }
 0x954   : > { %v5832_v57 = vpop.permute.xlu1 %5831  ;;  %7417 = vmatmul.mubr.msk.f32.gmra.mrb[32].mxu1 %vm4223_vm2, %v6388_v39  ;;  %v6264_v39 = vsel %vm1735_vm3, %v6232_v11, %v14439_v55  ;;  %v14460_v55 = vld [vmem:[#allocation70_spill] sm:$0xff] }
 0x955   : > { %v5830_v9 = vpop.permute.xlu0 %5829  ;;  %v6326_v29 = vsel %vm1768_vm4, %v6294_v28, %v5832_v57  ;;  %v14440_v57 = vld [vmem:[#allocation21_spill] sm:$0xff]  ;;  %v6296_v8 = vsel %vm4081_vm15, %v6264_v39, %v14442_v19  ;;  %v2311_v39 = vmax.f32 %v14460_v55, 0.0  ;;  %v7578_v19 = vld [vmem:[#allocation3 + $0x108] sm:$0xff] }
 0x956   : > { %v6325_v46 = vsel %vm1768_vm4, %v6293_v63, %v5830_v9  ;;  %v6295_v9 = vsel %vm4081_vm15, %v6263_v35, %v14440_v57  ;;  %v14446_v63 = vld [vmem:[#allocation142_spill] sm:$0xff]  ;;  %v7577_v28 = vld [vmem:[#allocation3 + $0xf8] sm:$0xff] }
 0x957   : > { %v6169_v0 = vsel %vm2432_vm11, %v7576_v6, %v14446_v63  ;;  %v14469_v6 = vld [vmem:[#allocation94_spill] sm:$0xff] }
 0x958   : > { %v5960_v59 = vpop.permute.xlu1 %5959 }
 0x959   : > { %v5958_v7 = vpop.permute.xlu0 %5957  ;;  %v6358_v41 = vsel %vm4146_vm1, %v6326_v29, %v5960_v59  ;;  %v14449_v29 = vld [vmem:[#allocation52_spill] sm:$0xff] }
 0x95a   : > { %v6357_v14 = vsel %vm4146_vm1, %v6325_v46, %v5958_v7  ;;  %v14448_v46 = vld [vmem:[#allocation10_spill] sm:$0xff] }
 0x95c   : > { %v6088_v16 = vpop.permute.xlu1 %6087 }
 0x95d   : > { %6773 = vxpose.xlu0.b32.start [1/16] (narrow) %v2304_v24, 8  ;;  %v6086_v47 = vpop.permute.xlu0 %6085  ;;  %v6390_v12 = vsel %vm1801_vm5, %v6358_v41, %v6088_v16  ;;  %v14447_v24 = vld [vmem:[#allocation11_spill] sm:$0xff]  ;;  %v6170_v16 = vsel %vm2432_vm11, %v7577_v28, %v14448_v46  ;;  %v14450_v41 = vld [vmem:[#allocation40_spill] sm:$0xff]  ;;  %v14472_v46 = vld [vmem:[#allocation82_spill] sm:$0xff] }
 0x95e   : > { %v6389_v25 = vsel %vm1801_vm5, %v6357_v14, %v6086_v47  ;;  %v2309_v15 = vmax.f32 %v14447_v24, 0.0  ;;  %v6201_v14 = vsel %vm279_vm0, %v6169_v0, %v14449_v29  ;;  %v14470_v0 = vld [vmem:[#allocation172_spill] sm:$0xff]  ;;  %v14473_v29 = vld [vmem:[#allocation14_spill] sm:$0xff] }
 0x95f   : > { %7419 = vmatprep.mubr.msk.f32.mxu1 %vm4223_vm2, %v6389_v25  ;;  %v6202_v25 = vsel %vm279_vm0, %v6170_v16, %v14450_v41 }
 0x960   : > { %v5836_v5 = vpop.permute.xlu1 %5835  ;;  %7420 = vmatmul.mubr.msk.f32.gmra.mrb[34].mxu1 %vm4223_vm2, %v6390_v12  ;;  %v14451_v12 = vld [vmem:[#allocation162_spill] sm:$0xff]  ;;  %v6234_v32 = vsel %vm4016_vm14, %v6202_v25, %v14453_v56 }
 0x961   : > { %6774 = vxpose.xlu0.b32.cont [2/16] (narrow) %v2305_v13, 8  ;;  %v5834_v22 = vpop.permute.xlu0 %5833  ;;  %v6328_v62 = vsel %vm1768_vm4, %v6296_v8, %v5836_v5  ;;  %v6233_v52 = vsel %vm4016_vm14, %v6201_v14, %v14451_v12  ;;  %v14452_v5 = vld [vmem:[#allocation53_spill] sm:$0xff]  ;;  %v14462_v8 = vld [vmem:[#allocation194_spill] sm:$0xff]  ;;  %v2313_v14 = vmax.f32 %v14473_v29, 0.0 }
 0x962   : > { %v6327_v31 = vsel %vm1768_vm4, %v6295_v9, %v5834_v22  ;;  %v2323_v22 = vmax.f32 %v14452_v5, 0.0  ;;  %v6265_v34 = vsel %vm1735_vm3, %v6233_v52, %v14454_v1  ;;  %v14493_v29 = vld [vmem:[#allocation154_spill] sm:$0xff] }
 0x963   : > { %v6297_v58 = vsel %vm4081_vm15, %v6265_v34, %v14456_v21 }
 0x964   : > { %v5964_v33 = vpop.permute.xlu1 %5963 }
 0x965   : > { %v5962_v51 = vpop.permute.xlu0 %5961  ;;  %6775 = vxpose.xlu0.b32.cont [3/16] (narrow) %v2306_v10, 8  ;;  %v6360_v49 = vsel %vm4146_vm1, %v6328_v62, %v5964_v33  ;;  %v14455_v10 = vld [vmem:[#allocation179_spill] sm:$0xff]  ;;  %v14458_v33 = vld [vmem:[#allocation184_spill] sm:$0xff] }
 0x966   : > { %v6359_v37 = vsel %vm4146_vm1, %v6327_v31, %v5962_v51  ;;  %v6266_v26 = vsel %vm1735_vm3, %v6234_v32, %v14455_v10  ;;  %v6171_v31 = vsel %vm2432_vm11, %v7578_v19, %v14462_v8  ;;  %v14476_v10 = vld [vmem:[#allocation71_spill] sm:$0xff]  ;;  %v14485_v19 = vld [vmem:[#allocation104_spill] sm:$0xff] }
 0x967   : > { %6805 = vxpose.xlu1.b32.start [1/16] (narrow) %v2320_v3, 8  ;;  %v6298_v43 = vsel %vm4081_vm15, %v6266_v26, %v14458_v33  ;;  %v14459_v3 = vld [vmem:[#allocation51_spill] sm:$0xff]  ;;  %v2314_v26 = vmax.f32 %v14476_v10, 0.0  ;;  %v7580_v33 = vld [vmem:[#allocation3 + $0x120] sm:$0xff] }
 0x968   : > { %v6092_v36 = vpop.permute.xlu1 %6091  ;;  %v2324_v50 = vmax.f32 %v14459_v3, 0.0 }
 0x969   : > { %v6090_v59 = vpop.permute.xlu0 %6089  ;;  %6776 = vxpose.xlu0.b32.cont [4/16] (narrow) %v2307_v40, 8  ;;  %v6392_v7 = vsel %vm1801_vm5, %v6360_v49, %v6092_v36  ;;  %v2325_v40 = vmax.f32 %v14461_v17, 0.0  ;;  %v14463_v36 = vld [vmem:[#allocation12_spill] sm:$0xff] }
 0x96a   : > { %v6391_v45 = vsel %vm1801_vm5, %v6359_v37, %v6090_v59  ;;  %v2312_v62 = vmax.f32 %v14463_v36, 0.0  ;;  %v7579_v37 = vld [vmem:[#allocation3 + $0x110] sm:$0xff]  ;;  %v14464_v59 = vld [vmem:[#allocation117_spill] sm:$0xff] }
 0x96b   : > { %6806 = vxpose.xlu1.b32.cont [2/16] (narrow) %v2321_v4, 8  ;;  %7422 = vmatprep.mubr.msk.f32.mxu1 %vm4223_vm2, %v6391_v45  ;;  %v6172_v18 = vsel %vm2432_vm11, %v7579_v37, %v14464_v59  ;;  %v14465_v4 = vld [vmem:[#allocation174_spill] sm:$0xff]  ;;  %v14484_v17 = vld [vmem:[#allocation96_spill] sm:$0xff]  ;;  %v14488_v59 = vld [vmem:[#allocation187_spill] sm:$0xff] }
 0x96c   : > { %v5840_v23 = vpop.permute.xlu1 %5839  ;;  %7423 = vmatmul.mubr.msk.f32.gmra.mrb[36].mxu1 %vm4223_vm2, %v6392_v7  ;;  %v6203_v49 = vsel %vm279_vm0, %v6171_v31, %v14465_v4  ;;  %v14466_v7 = vld [vmem:[#allocation134_spill] sm:$0xff]  ;;  %v14486_v31 = vld [vmem:[#allocation85_spill] sm:$0xff]  ;;  %v14489_v4 = vld [vmem:[#allocation15_spill] sm:$0xff] }
 0x96d   : > { %v5838_v42 = vpop.permute.xlu0 %5837  ;;  %6777 = vxpose.xlu0.b32.cont [5/16] (narrow) %v2308_v53, 8  ;;  %v6330_v48 = vsel %vm1768_vm4, %v6298_v43, %v5840_v23  ;;  %v6204_v30 = vsel %vm279_vm0, %v6172_v18, %v14466_v7  ;;  %v14467_v53 = vld [vmem:[#allocation63_spill] sm:$0xff] }
 0x96e   : > { %v6329_v2 = vsel %vm1768_vm4, %v6297_v58, %v5838_v42  ;;  %v6235_v23 = vsel %vm4016_vm14, %v6203_v49, %v14467_v53  ;;  %v6236_v63 = vsel %vm4016_vm14, %v6204_v30, %v14469_v6  ;;  %v14478_v43 = vld [vmem:[#allocation47_spill] sm:$0xff]  ;;  %v2316_v49 = vmax.f32 %v14489_v4, 0.0  ;;  %v14509_v4 = vld [vmem:[#allocation6_spill] sm:$0xff] }
 0x96f   : > { %6807 = vxpose.xlu1.b32.cont [3/16] (narrow) %v2322_v27, 8  ;;  %v2326_v27 = vmax.f32 %v14468_v60, 0.0  ;;  %v6267_v24 = vsel %vm1735_vm3, %v6235_v23, %v14470_v0 }
 0x970   : > { %v5968_v47 = vpop.permute.xlu1 %5967  ;;  %v6299_v16 = vsel %vm4081_vm15, %v6267_v24, %v14472_v46 }
 0x971   : > { %v5966_v13 = vpop.permute.xlu0 %5965  ;;  %6778 = vxpose.xlu0.b32.cont [6/16] (narrow) %v2309_v15, 8  ;;  %v6362_v11 = vsel %vm4146_vm1, %v6330_v48, %v5968_v47  ;;  %v14471_v15 = vld [vmem:[#allocation169_spill] sm:$0xff]  ;;  %v14474_v47 = vld [vmem:[#allocation26_spill] sm:$0xff] }
 0x972   : > { %v6361_v51 = vsel %vm4146_vm1, %v6329_v2, %v5966_v13  ;;  %v6268_v28 = vsel %vm1735_vm3, %v6236_v63, %v14471_v15  ;;  %v6173_v2 = vsel %vm2432_vm11, %v7580_v33, %v14478_v43  ;;  %v14492_v15 = vld [vmem:[#allocation17_spill] sm:$0xff]  ;;  %v14501_v33 = vld [vmem:[#allocation34_spill] sm:$0xff] }
 0x973   : > { %6808 = vxpose.xlu1.b32.cont [4/16] (narrow) %v2323_v22, 8  ;;  %v6300_v41 = vsel %vm4081_vm15, %v6268_v28, %v14474_v47  ;;  %v14475_v22 = vld [vmem:[#allocation131_spill] sm:$0xff]  ;;  %v2317_v28 = vmax.f32 %v14492_v15, 0.0  ;;  %v7582_v47 = vld [vmem:[#allocation3 + $0x138] sm:$0xff] }
 0x974   : > { %v6096_v38 = vpop.permute.xlu1 %6095  ;;  %v2327_v56 = vmax.f32 %v14475_v22, 0.0 }
 0x975   : > { %v6094_v20 = vpop.permute.xlu0 %6093  ;;  %6779 = vxpose.xlu0.b32.cont [7/16] (narrow) %v2310_v61, 8  ;;  %v6394_v35 = vsel %vm1801_vm5, %v6362_v11, %v6096_v38  ;;  %v2328_v61 = vmax.f32 %v14477_v54, 0.0  ;;  %v14479_v38 = vld [vmem:[#allocation72_spill] sm:$0xff]  ;;  %v14500_v54 = vld [vmem:[#allocation153_spill] sm:$0xff] }
 0x976   : > { %v6393_v44 = vsel %vm1801_vm5, %v6361_v51, %v6094_v20  ;;  %v2315_v48 = vmax.f32 %v14479_v38, 0.0  ;;  %v7581_v51 = vld [vmem:[#allocation3 + $0x128] sm:$0xff]  ;;  %v14480_v20 = vld [vmem:[#allocation54_spill] sm:$0xff] }
 0x977   : > { %6809 = vxpose.xlu1.b32.cont [5/16] (narrow) %v2324_v50, 8  ;;  %7425 = vmatprep.mubr.msk.f32.mxu1 %vm4223_vm2, %v6393_v44  ;;  %v6174_v3 = vsel %vm2432_vm11, %v7581_v51, %v14480_v20  ;;  %v14481_v50 = vld [vmem:[#allocation112_spill] sm:$0xff]  ;;  %v14504_v20 = vld [vmem:[#allocation19_spill] sm:$0xff] }
 0x978   : > { %v5844_v57 = vpop.permute.xlu1 %5843  ;;  %7426 = vmatmul.mubr.msk.f32.gmra.mrb[38].mxu1 %vm4223_vm2, %v6394_v35  ;;  %v6205_v11 = vsel %vm279_vm0, %v6173_v2, %v14481_v50  ;;  %v14482_v35 = vld [vmem:[#allocation165_spill] sm:$0xff]  ;;  %v14502_v2 = vld [vmem:[#allocation159_spill] sm:$0xff] }
 0x979   : > { %v5842_v9 = vpop.permute.xlu0 %5841  ;;  %6780 = vxpose.xlu0.b32.cont [8/16] (narrow) %v2311_v39, 8  ;;  %v6332_v52 = vsel %vm1768_vm4, %v6300_v41, %v5844_v57  ;;  %v6206_v55 = vsel %vm279_vm0, %v6174_v3, %v14482_v35  ;;  %v14483_v39 = vld [vmem:[#allocation89_spill] sm:$0xff]  ;;  %v14494_v41 = vld [vmem:[#allocation23_spill] sm:$0xff] }
 0x97a   : > { %v6331_v25 = vsel %vm1768_vm4, %v6299_v16, %v5842_v9  ;;  %v6237_v57 = vsel %vm4016_vm14, %v6205_v11, %v14483_v39  ;;  %v6238_v8 = vsel %vm4016_vm14, %v6206_v55, %v14485_v19  ;;  %v14505_v50 = vld [vmem:[#allocation73_spill] sm:$0xff] }
 0x97b   : > { %6810 = vxpose.xlu1.b32.cont [6/16] (narrow) %v2325_v40, 8  ;;  %v2329_v40 = vmax.f32 %v14484_v17, 0.0  ;;  %v6269_v36 = vsel %vm1735_vm3, %v6237_v57, %v14486_v31  ;;  %v2319_v11 = vmax.f32 %v14505_v50, 0.0  ;;  %v14525_v50 = vld [vmem:[#allocation135_spill] sm:$0xff] }
 0x97c   : > { %v5972_v45 = vpop.permute.xlu1 %5971  ;;  %v6301_v18 = vsel %vm4081_vm15, %v6269_v36, %v14488_v59 }
 0x97d   : > { %v5970_v42 = vpop.permute.xlu0 %5969  ;;  %6781 = vxpose.xlu0.b32.cont [9/16] (narrow) %v2312_v62, 8  ;;  %v6364_v32 = vsel %vm4146_vm1, %v6332_v52, %v5972_v45  ;;  %v14487_v62 = vld [vmem:[#allocation203_spill] sm:$0xff]  ;;  %v14490_v45 = vld [vmem:[#allocation188_spill] sm:$0xff] }
 0x97e   : > { %v6363_v13 = vsel %vm4146_vm1, %v6331_v25, %v5970_v42  ;;  %v6270_v37 = vsel %vm1735_vm3, %v6238_v8, %v14487_v62  ;;  %v6175_v25 = vsel %vm2432_vm11, %v7582_v47, %v14494_v41  ;;  %v14508_v62 = vld [vmem:[#allocation106_spill] sm:$0xff] }
 0x97f   : > { %6811 = vxpose.xlu1.b32.cont [7/16] (narrow) %v2326_v27, 8  ;;  %v6302_v7 = vsel %vm4081_vm15, %v6270_v37, %v14490_v45  ;;  %v14491_v27 = vld [vmem:[#allocation95_spill] sm:$0xff]  ;;  %v4549_v37 = vmax.f32 %v14508_v62, 0.0  ;;  %v7584_v45 = vld [vmem:[#allocation3 + $0x150] sm:$0xff]  ;;  %v14517_v47 = vld [vmem:[#allocation50_spill] sm:$0xff] }
 0x980   : > { %v6100_v12 = vpop.permute.xlu1 %6099  ;;  %v2330_v6 = vmax.f32 %v14491_v27, 0.0 }
 0x981   : > { %v6098_v5 = vpop.permute.xlu0 %6097  ;;  %6782 = vxpose.xlu0.b32.cont [10/16] (narrow) %v2313_v14, 8  ;;  %v6396_v34 = vsel %vm1801_vm5, %v6364_v32, %v6100_v12  ;;  %v2331_v14 = vmax.f32 %v14493_v29, 0.0  ;;  %v14495_v12 = vld [vmem:[#allocation20_spill] sm:$0xff] }
 0x982   : > { %v6395_v1 = vsel %vm1801_vm5, %v6363_v13, %v6098_v5  ;;  %v2318_v52 = vmax.f32 %v14495_v12, 0.0  ;;  %v7583_v13 = vld [vmem:[#allocation3 + $0x140] sm:$0xff]  ;;  %v14496_v5 = vld [vmem:[#allocation193_spill] sm:$0xff]  ;;  %v14516_v29 = vld [vmem:[#allocation28_spill] sm:$0xff] }
 0x983   : > { %6812 = vxpose.xlu1.b32.cont [8/16] (narrow) %v2327_v56, 8  ;;  %7428 = vmatprep.mubr.msk.f32.mxu1 %vm4223_vm2, %v6395_v1  ;;  %v6176_v22 = vsel %vm2432_vm11, %v7583_v13, %v14496_v5  ;;  %v14497_v56 = vld [vmem:[#allocation198_spill] sm:$0xff] }
 0x984   : > { %v5848_v21 = vpop.permute.xlu1 %5847  ;;  %7429 = vmatmul.mubr.msk.f32.gmra.mrb[40].mxu1 %vm4223_vm2, %v6396_v34  ;;  %v6207_v32 = vsel %vm279_vm0, %v6175_v25, %v14497_v56  ;;  %v14498_v34 = vld [vmem:[#allocation173_spill] sm:$0xff]  ;;  %v14518_v25 = vld [vmem:[#allocation110_spill] sm:$0xff]  ;;  %v14521_v56 = vld [vmem:[#allocation55_spill] sm:$0xff] }
 0x985   : > { %v5846_v58 = vpop.permute.xlu0 %5845  ;;  %6783 = vxpose.xlu0.b32.cont [11/16] (narrow) %v2314_v26, 8  ;;  %v6334_v23 = vsel %vm1768_vm4, %v6302_v7, %v5848_v21  ;;  %v6208_v10 = vsel %vm279_vm0, %v6176_v22, %v14498_v34  ;;  %v14499_v26 = vld [vmem:[#allocation178_spill] sm:$0xff] }
 0x986   : > { %v6333_v30 = vsel %vm1768_vm4, %v6301_v18, %v5846_v58  ;;  %v6239_v21 = vsel %vm4016_vm14, %v6207_v32, %v14499_v26  ;;  %v6240_v43 = vsel %vm4016_vm14, %v6208_v10, %v14501_v33  ;;  %v14510_v7 = vld [vmem:[#allocation78_spill] sm:$0xff]  ;;  %v4551_v32 = vmax.f32 %v14521_v56, 0.0  ;;  %v14542_v56 = vld [vmem:[#allocation140_spill] sm:$0xff] }
 0x987   : > { %6813 = vxpose.xlu1.b32.cont [9/16] (narrow) %v2328_v61, 8  ;;  %v2332_v61 = vmax.f32 %v14500_v54, 0.0  ;;  %v6271_v38 = vsel %vm1735_vm3, %v6239_v21, %v14502_v2  ;;  %v14520_v5 = vld [vmem:[#allocation190_spill] sm:$0xff] }
 0x988   : > { %v5976_v44 = vpop.permute.xlu1 %5975  ;;  %v6303_v3 = vsel %vm4081_vm15, %v6271_v38, %v14504_v20 }
 0x989   : > { %v5974_v9 = vpop.permute.xlu0 %5973  ;;  %6784 = vxpose.xlu0.b32.cont [12/16] (narrow) %v2315_v48, 8  ;;  %v6366_v63 = vsel %vm4146_vm1, %v6334_v23, %v5976_v44  ;;  %v14503_v48 = vld [vmem:[#allocation150_spill] sm:$0xff]  ;;  %v14506_v44 = vld [vmem:[#allocation36_spill] sm:$0xff] }
 0x98a   : > { %v6365_v42 = vsel %vm4146_vm1, %v6333_v30, %v5974_v9  ;;  %v6272_v51 = vsel %vm1735_vm3, %v6240_v43, %v14503_v48  ;;  %v6177_v30 = vsel %vm2432_vm11, %v7584_v45, %v14510_v7  ;;  %v14524_v48 = vld [vmem:[#allocation141_spill] sm:$0xff] }
 0x98b   : > { %6814 = vxpose.xlu1.b32.cont [10/16] (narrow) %v2329_v40, 8  ;;  %v6304_v35 = vsel %vm4081_vm15, %v6272_v51, %v14506_v44  ;;  %v14507_v40 = vld [vmem:[#allocation8_spill] sm:$0xff]  ;;  %v4552_v51 = vmax.f32 %v14524_v48, 0.0  ;;  %v7586_v44 = vld [vmem:[#allocation3 + $0x168] sm:$0xff]  ;;  %v14533_v45 = vld [vmem:[#allocation177_spill] sm:$0xff] }
 0x98c   : > { %v6104_v53 = vpop.permute.xlu1 %6103  ;;  %v2333_v19 = vmax.f32 %v14507_v40, 0.0  ;;  %v14549_v48 = vld [vmem:[#allocation158_spill] sm:$0xff] }
 0x98d   : > { %v6102_v60 = vpop.permute.xlu0 %6101  ;;  %6785 = vxpose.xlu0.b32.cont [13/16] (narrow) %v2316_v49, 8  ;;  %v6398_v24 = vsel %vm1801_vm5, %v6366_v63, %v6104_v53  ;;  %v2334_v49 = vmax.f32 %v14509_v4, 0.0  ;;  %v14511_v53 = vld [vmem:[#allocation57_spill] sm:$0xff]  ;;  %v14532_v4 = vld [vmem:[#allocation168_spill] sm:$0xff] }
 0x98e   : > { %v6397_v0 = vsel %vm1801_vm5, %v6365_v42, %v6102_v60  ;;  %v4550_v23 = vmax.f32 %v14511_v53, 0.0  ;;  %v7585_v42 = vld [vmem:[#allocation3 + $0x158] sm:$0xff] }
 0x98f   : > { %6815 = vxpose.xlu1.b32.cont [11/16] (narrow) %v2330_v6, 8  ;;  %7431 = vmatprep.mubr.msk.f32.mxu1 %vm4223_vm2, %v6397_v0  ;;  %v14512_v60 = vld [vmem:[#allocation113_spill] sm:$0xff]  ;;  %v14513_v6 = vld [vmem:[#allocation128_spill] sm:$0xff] }
 0x990   : > { %v5852_v46 = vpop.permute.xlu1 %5851  ;;  %7432 = vmatmul.mubr.msk.f32.gmra.mrb[42].mxu1 %vm4223_vm2, %v6398_v24  ;;  %v6178_v27 = vsel %vm2432_vm11, %v7585_v42, %v14512_v60  ;;  %v6209_v63 = vsel %vm279_vm0, %v6177_v30, %v14513_v6  ;;  %v14514_v24 = vld [vmem:[#allocation90_spill] sm:$0xff]  ;;  %v14536_v60 = vld [vmem:[#allocation81_spill] sm:$0xff] }
 0x991   : > { %v5850_v16 = vpop.permute.xlu0 %5849  ;;  %6786 = vxpose.xlu0.b32.cont [14/16] (narrow) %v2317_v28, 8  ;;  %v6336_v57 = vsel %vm1768_vm4, %v6304_v35, %v5852_v46  ;;  %v6210_v15 = vsel %vm279_vm0, %v6178_v27, %v14514_v24  ;;  %v14515_v28 = vld [vmem:[#allocation43_spill] sm:$0xff]  ;;  %v14534_v30 = vld [vmem:[#allocation182_spill] sm:$0xff]  ;;  %v14537_v6 = vld [vmem:[#allocation133_spill] sm:$0xff] }
 0x992   : > { %v6335_v55 = vsel %vm1768_vm4, %v6303_v3, %v5850_v16  ;;  %v6241_v46 = vsel %vm4016_vm14, %v6209_v63, %v14515_v28  ;;  %v6242_v41 = vsel %vm4016_vm14, %v6210_v15, %v14517_v47  ;;  %v14526_v35 = vld [vmem:[#allocation35_spill] sm:$0xff]  ;;  %v4554_v63 = vmax.f32 %v14537_v6, 0.0 }
 0x993   : > { %6816 = vxpose.xlu1.b32.cont [12/16] (narrow) %v2331_v14, 8  ;;  %v2335_v14 = vmax.f32 %v14516_v29, 0.0  ;;  %v6273_v12 = vsel %vm1735_vm3, %v6241_v46, %v14518_v25 }
 0x994   : > { %v5980_v1 = vpop.permute.xlu1 %5979  ;;  %v6305_v22 = vsel %vm4081_vm15, %v6273_v12, %v14520_v5  ;;  %v14541_v5 = vld [vmem:[#allocation186_spill] sm:$0xff] }
 0x995   : > { %v5978_v58 = vpop.permute.xlu0 %5977  ;;  %6787 = vxpose.xlu0.b32.cont [15/16] (narrow) %v2318_v52, 8  ;;  %v6368_v8 = vsel %vm4146_vm1, %v6336_v57, %v5980_v1  ;;  %v14519_v52 = vld [vmem:[#allocation118_spill] sm:$0xff]  ;;  %v14522_v1 = vld [vmem:[#allocation143_spill] sm:$0xff] }
 0x996   : > { %v6367_v9 = vsel %vm4146_vm1, %v6335_v55, %v5978_v58  ;;  %v6274_v13 = vsel %vm1735_vm3, %v6242_v41, %v14519_v52  ;;  %v6179_v55 = vsel %vm2432_vm11, %v7586_v44, %v14526_v35  ;;  %v14540_v52 = vld [vmem:[#allocation156_spill] sm:$0xff]  ;;  %v14552_v44 = vld [vmem:[#allocation29_spill] sm:$0xff] }
 0x997   : > { %6817 = vxpose.xlu1.b32.cont [13/16] (narrow) %v2332_v61, 8  ;;  %v6306_v34 = vsel %vm4081_vm15, %v6274_v13, %v14522_v1  ;;  %v14523_v61 = vld [vmem:[#allocation79_spill] sm:$0xff]  ;;  %v4555_v13 = vmax.f32 %v14540_v52, 0.0  ;;  %v14543_v1 = vld [vmem:[#allocation68_spill] sm:$0xff]  ;;  %v4561_v35 = vmax.f32 %v14552_v44, 0.0 }
 0x998   : > { %v6108_v39 = vpop.permute.xlu1 %6107  ;;  %v4565_v33 = vmax.f32 %v14523_v61, 0.0 }
 0x999   : > { %v6106_v17 = vpop.permute.xlu0 %6105  ;;  %6788 = vxpose.xlu0.b32.end [16/16] (narrow) %v2319_v11, 8  ;;  %v6400_v36 = vsel %vm1801_vm5, %v6368_v8, %v6108_v39  ;;  %v4566_v11 = vmax.f32 %v14525_v50, 0.0  ;;  %v14527_v39 = vld [vmem:[#allocation105_spill] sm:$0xff] }
 0x99a   : > { %v6399_v31 = vsel %vm1801_vm5, %v6367_v9, %v6106_v17  ;;  %v4553_v57 = vmax.f32 %v14527_v39, 0.0  ;;  %v7587_v9 = vld [vmem:[#allocation3 + $0x170] sm:$0xff]  ;;  %v14551_v50 = vld [vmem:[#allocation185_spill] sm:$0xff] }
 0x99b   : > { %6818 = vxpose.xlu1.b32.cont [14/16] (narrow) %v2333_v19, 8  ;;  %7434 = vmatprep.mubr.msk.f32.mxu1 %vm4223_vm2, %v6399_v31  ;;  %v14528_v17 = vld [vmem:[#allocation160_spill] sm:$0xff]  ;;  %v14529_v19 = vld [vmem:[#allocation139_spill] sm:$0xff] }
 0x99c   : > { %v5856_v59 = vpop.permute.xlu1 %5855  ;;  %7435 = vmatmul.mubr.msk.f32.gmra.mrb[44].mxu1 %vm4223_vm2, %v6400_v36  ;;  %v6180_v40 = vsel %vm2432_vm11, %v7587_v9, %v14528_v17  ;;  %v6211_v8 = vsel %vm279_vm0, %v6179_v55, %v14529_v19  ;;  %v14530_v36 = vld [vmem:[#allocation197_spill] sm:$0xff]  ;;  %v14553_v55 = vld [vmem:[#allocation152_spill] sm:$0xff]  ;;  %v14555_v17 = vld [vmem:[#allocation58_spill] sm:$0xff] }
 0x99d   : > { %v5854_v18 = vpop.permute.xlu0 %5853  ;;  %6839 = vxpose.xlu0.b32.start [1/16] (narrow) %v4549_v37, 8  ;;  %v6338_v21 = vsel %vm1768_vm4, %v6306_v34, %v5856_v59  ;;  %v6212_v62 = vsel %vm279_vm0, %v6180_v40, %v14530_v36  ;;  %v14531_v37 = vld [vmem:[#allocation202_spill] sm:$0xff]  ;;  %v4570_v34 = vmax.f32 %v14543_v1, 0.0  ;;  %v4575_v39 = vmax.f32 %v14553_v55, 0.0  ;;  %v14556_v19 = vld [vmem:[#allocation32_spill] sm:$0xff] }
 0x99e   : > { %v6337_v10 = vsel %vm1768_vm4, %v6305_v22, %v5854_v18  ;;  %v6243_v59 = vsel %vm4016_vm14, %v6211_v8, %v14531_v37  ;;  %v6244_v7 = vsel %vm4016_vm14, %v6212_v62, %v14533_v45  ;;  %v4569_v22 = vmax.f32 %v14541_v5, 0.0  ;;  %v14558_v62 = vld [vmem:[#allocation61_spill] sm:$0xff] }
 0x99f   : > { %6819 = vxpose.xlu1.b32.cont [15/16] (narrow) %v2334_v49, 8  ;;  %v4567_v49 = vmax.f32 %v14532_v4, 0.0  ;;  %v6275_v53 = vsel %vm1735_vm3, %v6243_v59, %v14534_v30  ;;  %v4576_v40 = vmax.f32 %v14555_v17, 0.0  ;;  %v4563_v8 = vmax.f32 %v14556_v19, 0.0  ;;  %v14559_v59 = vld [vmem:[#allocation100_spill] sm:$0xff]  ;;  %v14560_v4 = vld [vmem:[#allocation138_spill] sm:$0xff] }
 0x9a0   : > { %v5984_v0 = vpop.permute.xlu1 %5983  ;;  %v6307_v27 = vsel %vm4081_vm15, %v6275_v53, %v14536_v60  ;;  %v4564_v37 = vmax.f32 %v14558_v62, 0.0  ;;  %v14561_v45 = vld [vmem:[#allocation129_spill] sm:$0xff]  ;;  %v13110_v30 = vld [vmem:[%s13165_s6] ss:$0 sm:$0xff] }
 0x9a1   : > { %v5982_v16 = vpop.permute.xlu0 %5981  ;;  %6840 = vxpose.xlu0.b32.cont [2/16] (narrow) %v4550_v23, 8  ;;  %v6370_v43 = vsel %vm4146_vm1, %v6338_v21, %v5984_v0  ;;  %v14535_v23 = vld [vmem:[#allocation101_spill] sm:$0xff]  ;;  %v14538_v0 = vld [vmem:[#allocation114_spill] sm:$0xff] }
 0x9a2   : > { %v6369_v58 = vsel %vm4146_vm1, %v6337_v10, %v5982_v16  ;;  %v6276_v42 = vsel %vm1735_vm3, %v6244_v7, %v14535_v23  ;;  %v14544_v10 = vld [vmem:[#allocation163_spill] sm:$0xff]  ;;  %v14545_v21 = vld [vmem:[#allocation93_spill] sm:$0xff]  ;;  %v4580_v7 = vmax.f32 %v14561_v45, 0.0 }
 0x9a3   : > { %6820 = vxpose.xlu1.b32.end [16/16] (narrow) %v2335_v14, 8  ;;  %v6308_v24 = vsel %vm4081_vm15, %v6276_v42, %v14538_v0  ;;  %v14539_v14 = vld [vmem:[#allocation120_spill] sm:$0xff] }
 0x9a4   : > { %v6112_v26 = vpop.permute.xlu1 %6111  ;;  %v4568_v47 = vmax.f32 %v14539_v14, 0.0 }
 0x9a5   : > { %v6110_v54 = vpop.permute.xlu0 %6109  ;;  %6841 = vxpose.xlu0.b32.cont [3/16] (narrow) %v4551_v32, 8  ;;  %v6402_v38 = vsel %vm1801_vm5, %v6370_v43, %v6112_v26  ;;  %v4556_v32 = vmax.f32 %v14542_v56, 0.0  ;;  %v4557_v26 = vmax.f32 %v14544_v10, 0.0 }
 0x9a6   : > { %v6401_v2 = vsel %vm1801_vm5, %v6369_v58, %v6110_v54  ;;  %v4571_v58 = vmax.f32 %v14545_v21, 0.0  ;;  %v14546_v54 = vld [vmem:[#allocation132_spill] sm:$0xff] }
 0x9a7   : > { %6871 = vxpose.xlu1.b32.start [1/16] (narrow) %v4565_v33, 8  ;;  %7437 = vmatprep.mubr.msk.f32.mxu1 %vm4223_vm2, %v6401_v2  ;;  %v4558_v61 = vmax.f32 %v14546_v54, 0.0  ;;  %v14547_v33 = vld [vmem:[#allocation144_spill] sm:$0xff]  ;;  %v14548_v2 = vld [vmem:[#allocation155_spill] sm:$0xff] }
 0x9a8   : > { %v5860_v20 = vpop.permute.xlu1 %5859  ;;  %7438 = vmatmul.mubr.msk.f32.gmra.mrb[46].mxu1 %vm4223_vm2, %v6402_v38  ;;  %v4572_v43 = vmax.f32 %v14547_v33, 0.0  ;;  %v4559_v38 = vmax.f32 %v14548_v2, 0.0 }
 0x9a9   : > { %v5858_v3 = vpop.permute.xlu0 %5857  ;;  %6842 = vxpose.xlu0.b32.cont [4/16] (narrow) %v4552_v51, 8  ;;  %v6340_v46 = vsel %vm1768_vm4, %v6308_v24, %v5860_v20  ;;  %v4573_v51 = vmax.f32 %v14549_v48, 0.0  ;;  %v14550_v20 = vld [vmem:[#allocation31_spill] sm:$0xff] }
 0x9aa   : > { %v6339_v15 = vsel %vm1768_vm4, %v6307_v27, %v5858_v3  ;;  %v4560_v3 = vmax.f32 %v14550_v20, 0.0 }
 0x9ab   : > { %6872 = vxpose.xlu1.b32.cont [2/16] (narrow) %v4566_v11, 8  ;;  %v4574_v11 = vmax.f32 %v14551_v50, 0.0 }
 0x9ac   : > { %v5988_v31 = vpop.permute.xlu1 %5987 }
 0x9ad   : > { %v5986_v18 = vpop.permute.xlu0 %5985  ;;  %6843 = vxpose.xlu0.b32.cont [5/16] (narrow) %v4553_v57, 8  ;;  %v6372_v41 = vsel %vm4146_vm1, %v6340_v46, %v5988_v31  ;;  %v14554_v57 = vld [vmem:[#allocation13_spill] sm:$0xff]  ;;  %v14557_v31 = vld [vmem:[#allocation87_spill] sm:$0xff] }
 0x9ae   : > { %v6371_v16 = vsel %vm4146_vm1, %v6339_v15, %v5986_v18  ;;  %v4562_v9 = vmax.f32 %v14554_v57, 0.0  ;;  %v4577_v36 = vmax.f32 %v14557_v31, 0.0  ;;  %v4578_v18 = vmax.f32 %v14559_v59, 0.0 }
 0x9af   : > { %6873 = vxpose.xlu1.b32.cont [3/16] (narrow) %v4567_v49, 8  ;;  %v4579_v49 = vmax.f32 %v14560_v4, 0.0 }
 0x9b0   : > { %v6116_v28 = vpop.permute.xlu1 %6115 }
 0x9b1   : > { %v6114_v29 = vpop.permute.xlu0 %6113  ;;  %6844 = vxpose.xlu0.b32.cont [6/16] (narrow) %v4554_v63, 8  ;;  %v6404_v12 = vsel %vm1801_vm5, %v6372_v41, %v6116_v28 }
 0x9b2   : > { %v6403_v25 = vsel %vm1801_vm5, %v6371_v16, %v6114_v29 }
 0x9b3   : > { %6874 = vxpose.xlu1.b32.cont [4/16] (narrow) %v4568_v47, 8  ;;  %7440 = vmatprep.mubr.msk.f32.mxu1 %vm4223_vm2, %v6403_v25 }
 0x9b4   : > { %7441 = vmatmul.mubr.msk.f32.gmra.mrb[48].mxu1 %vm4223_vm2, %v6404_v12 }
 0x9b5   : > { %6845 = vxpose.xlu0.b32.cont [7/16] (narrow) %v4555_v13, 8 }
 0x9b7   : > { %6875 = vxpose.xlu1.b32.cont [5/16] (narrow) %v4569_v22, 8 }
 0x9b9   : > { %6846 = vxpose.xlu0.b32.cont [8/16] (narrow) %v4556_v32, 8 }
 0x9bb   : > { %6876 = vxpose.xlu1.b32.cont [6/16] (narrow) %v4570_v34, 8 }
 0x9bd   : > { %6847 = vxpose.xlu0.b32.cont [9/16] (narrow) %v4557_v26, 8 }
 0x9bf   : > { %6877 = vxpose.xlu1.b32.cont [7/16] (narrow) %v4571_v58, 8 }
 0x9c1   : > { %6848 = vxpose.xlu0.b32.cont [10/16] (narrow) %v4558_v61, 8 }
 0x9c3   : > { %6878 = vxpose.xlu1.b32.cont [8/16] (narrow) %v4572_v43, 8 }
 0x9c5   : > { %6849 = vxpose.xlu0.b32.cont [11/16] (narrow) %v4559_v38, 8 }
 0x9c7   : > { %6879 = vxpose.xlu1.b32.cont [9/16] (narrow) %v4573_v51, 8 }
 0x9c9   : > { %6850 = vxpose.xlu0.b32.cont [12/16] (narrow) %v4560_v3, 8 }
 0x9cb   : > { %6880 = vxpose.xlu1.b32.cont [10/16] (narrow) %v4574_v11, 8 }
 0x9cd   : > { %6851 = vxpose.xlu0.b32.cont [13/16] (narrow) %v4561_v35, 8 }
 0x9cf   : > { %6881 = vxpose.xlu1.b32.cont [11/16] (narrow) %v4575_v39, 8 }
 0x9d1   : > { %6852 = vxpose.xlu0.b32.cont [14/16] (narrow) %v4562_v9, 8 }
 0x9d3   : > { %6882 = vxpose.xlu1.b32.cont [12/16] (narrow) %v4576_v40, 8 }
 0x9d5   : > { %6853 = vxpose.xlu0.b32.cont [15/16] (narrow) %v4563_v8, 8 }
 0x9d7   : > { %6883 = vxpose.xlu1.b32.cont [13/16] (narrow) %v4577_v36, 8 }
 0x9d9   : > { %6854 = vxpose.xlu0.b32.end [16/16] (narrow) %v4564_v37, 8 }
 0x9db   : > { %6884 = vxpose.xlu1.b32.cont [14/16] (narrow) %v4578_v18, 8 }
 0x9dd   : > { %v6789_v43 = vpop.trf.xlu0 }
 0x9de   : > { %6837 = vst [vmem:[%s13127_s15] sm:$0xff] %v6789_v43 }
 0x9df   : > { %6885 = vxpose.xlu1.b32.cont [15/16] (narrow) %v4579_v49, 8 }
 0x9e3   : > { %6886 = vxpose.xlu1.b32.end [16/16] (narrow) %v4580_v7, 8  ;;  %v7397_v53 = vpop.f32.mrb[18].mxu1 }
 0x9e4   : > { %v6582_v23 = vpop.f32.mrb[19].mxu1  ;;  %v6588_v60 = vadd.f32 %v7397_v53, %v13110_v30 }
 0x9e5   : > { %v6583_v42 = vadd.f32 %v13110_v30, %v6582_v23 }
 0x9e6   : > { %v6742_v6 = vmax.f32 %v6588_v60, 0.0 }
 0x9e7   : > { %v6741_v27 = vmax.f32 %v6583_v42, 0.0  ;;  %v6821_v33 = vpop.trf.xlu1 }
 0x9e8   : > { %6838 = vst [vmem:[%s13127_s15 + $0x8] sm:$0xff] %v6821_v33 }
 0x9e9   : > { %6905 = vxpose.xlu0.b32.start [1/16] (narrow) %v6741_v27, 8 }
 0x9eb   : > { %v7400_v63 = vpop.f32.mrb[20].mxu1 }
 0x9ec   : > { %v6592_v0 = vpop.f32.mrb[21].mxu1  ;;  %v6598_v15 = vadd.f32 %v7400_v63, %v13110_v30 }
 0x9ed   : > { %v6593_v24 = vadd.f32 %v13110_v30, %v6592_v0  ;;  %6906 = vxpose.xlu0.b32.cont [2/16] (narrow) %v6742_v6, 8 }
 0x9ee   : > { %v6744_v46 = vmax.f32 %v6598_v15, 0.0 }
 0x9ef   : > { %v6743_v28 = vmax.f32 %v6593_v24, 0.0 }
 0x9f1   : > { %6907 = vxpose.xlu0.b32.cont [3/16] (narrow) %v6743_v28, 8 }
 0x9f3   : > { %v7403_v16 = vpop.f32.mrb[22].mxu1 }
 0x9f4   : > { %v6602_v29 = vpop.f32.mrb[23].mxu1  ;;  %v6608_v47 = vadd.f32 %v7403_v16, %v13110_v30 }
 0x9f5   : > { %v6603_v14 = vadd.f32 %v13110_v30, %v6602_v29  ;;  %6908 = vxpose.xlu0.b32.cont [4/16] (narrow) %v6744_v46, 8 }
 0x9f6   : > { %v6746_v25 = vmax.f32 %v6608_v47, 0.0 }
 0x9f7   : > { %v6745_v41 = vmax.f32 %v6603_v14, 0.0 }
 0x9f9   : > { %6909 = vxpose.xlu0.b32.cont [5/16] (narrow) %v6745_v41, 8 }
 0x9fb   : > { %v7406_v12 = vpop.f32.mrb[24].mxu1 }
 0x9fc   : > { %v6612_v52 = vpop.f32.mrb[25].mxu1  ;;  %v6618_v5 = vadd.f32 %v7406_v12, %v13110_v30 }
 0x9fd   : > { %v6613_v13 = vadd.f32 %v13110_v30, %v6612_v52  ;;  %6910 = vxpose.xlu0.b32.cont [6/16] (narrow) %v6746_v25, 8 }
 0x9fe   : > { %v6748_v56 = vmax.f32 %v6618_v5, 0.0 }
 0x9ff   : > { %v6747_v22 = vmax.f32 %v6613_v13, 0.0 }
 0xa01   : > { %6911 = vxpose.xlu0.b32.cont [7/16] (narrow) %v6747_v22, 8 }
 0xa03   : > { %v7409_v32 = vpop.f32.mrb[26].mxu1 }
 0xa04   : > { %v6622_v1 = vpop.f32.mrb[27].mxu1  ;;  %v6628_v10 = vadd.f32 %v7409_v32, %v13110_v30 }
 0xa05   : > { %v6623_v34 = vadd.f32 %v13110_v30, %v6622_v1  ;;  %6912 = vxpose.xlu0.b32.cont [8/16] (narrow) %v6748_v56, 8 }
 0xa06   : > { %v6750_v21 = vmax.f32 %v6628_v10, 0.0 }
 0xa07   : > { %v6749_v26 = vmax.f32 %v6623_v34, 0.0 }
 0xa09   : > { %6913 = vxpose.xlu0.b32.cont [9/16] (narrow) %v6749_v26, 8 }
 0xa0d   : > { %6914 = vxpose.xlu0.b32.cont [10/16] (narrow) %v6750_v21, 8 }
 0xa0f   : > { %v7412_v58 = vpop.f32.mrb[28].mxu1 }
 0xa10   : > { %v6632_v54 = vpop.f32.mrb[29].mxu1  ;;  %v6638_v2 = vadd.f32 %v7412_v58, %v13110_v30 }
 0xa11   : > { %v6633_v61 = vadd.f32 %v13110_v30, %v6632_v54 }
 0xa12   : > { %v6752_v48 = vmax.f32 %v6638_v2, 0.0 }
 0xa13   : > { %v6751_v38 = vmax.f32 %v6633_v61, 0.0 }
 0xa15   : > { %6915 = vxpose.xlu0.b32.cont [11/16] (narrow) %v6751_v38, 8 }
 0xa19   : > { %6916 = vxpose.xlu0.b32.cont [12/16] (narrow) %v6752_v48, 8 }
 0xa1b   : > { %v7415_v51 = vpop.f32.mrb[30].mxu1 }
 0xa1c   : > { %v6642_v20 = vpop.f32.mrb[31].mxu1  ;;  %v6648_v11 = vadd.f32 %v7415_v51, %v13110_v30 }
 0xa1d   : > { %v6643_v3 = vadd.f32 %v13110_v30, %v6642_v20  ;;  %v6855_v50 = vpop.trf.xlu0 }
 0xa1e   : > { %6903 = vst [vmem:[%s13127_s15 + $0x10] sm:$0xf] %v6855_v50  ;;  %v6754_v35 = vmax.f32 %v6648_v11, 0.0 }
 0xa1f   : > { %v6753_v44 = vmax.f32 %v6643_v3, 0.0 }
 0xa21   : > { %6917 = vxpose.xlu0.b32.cont [13/16] (narrow) %v6753_v44, 8 }
 0xa25   : > { %6918 = vxpose.xlu0.b32.cont [14/16] (narrow) %v6754_v35, 8 }
 0xa27   : > { %v7418_v55 = vpop.f32.mrb[32].mxu1  ;;  %v6887_v39 = vpop.trf.xlu1 }
 0xa28   : > { %v6652_v57 = vpop.f32.mrb[33].mxu1  ;;  %6904 = vst [vmem:[%s13127_s15 + $0x18] sm:$0xf] %v6887_v39  ;;  %v6658_v17 = vadd.f32 %v7418_v55, %v13110_v30 }
 0xa29   : > { %v6653_v9 = vadd.f32 %v13110_v30, %v6652_v57 }
 0xa2a   : > { %v6756_v19 = vmax.f32 %v6658_v17, 0.0 }
 0xa2b   : > { %v6755_v40 = vmax.f32 %v6653_v9, 0.0 }
 0xa2d   : > { %6919 = vxpose.xlu0.b32.cont [15/16] (narrow) %v6755_v40, 8 }
 0xa31   : > { %6920 = vxpose.xlu0.b32.end [16/16] (narrow) %v6756_v19, 8 }
 0xa33   : > { %v7421_v8 = vpop.f32.mrb[34].mxu1 }
 0xa34   : > { %v6662_v31 = vpop.f32.mrb[35].mxu1  ;;  %v6668_v62 = vadd.f32 %v7421_v8, %v13110_v30 }
 0xa35   : > { %v6663_v36 = vadd.f32 %v13110_v30, %v6662_v31 }
 0xa36   : > { %v6758_v59 = vmax.f32 %v6668_v62, 0.0 }
 0xa37   : > { %v6757_v37 = vmax.f32 %v6663_v36, 0.0 }
 0xa39   : > { %6937 = vxpose.xlu1.b32.start [1/16] (narrow) %v6757_v37, 8 }
 0xa3d   : > { %6938 = vxpose.xlu1.b32.cont [2/16] (narrow) %v6758_v59, 8 }
 0xa3f   : > { %v7424_v18 = vpop.f32.mrb[36].mxu1 }
 0xa40   : > { %v6672_v4 = vpop.f32.mrb[37].mxu1  ;;  %v6678_v45 = vadd.f32 %v7424_v18, %v13110_v30 }
 0xa41   : > { %v6673_v49 = vadd.f32 %v13110_v30, %v6672_v4 }
 0xa42   : > { %v6760_v53 = vmax.f32 %v6678_v45, 0.0 }
 0xa43   : > { %v6759_v7 = vmax.f32 %v6673_v49, 0.0 }
 0xa45   : > { %6939 = vxpose.xlu1.b32.cont [3/16] (narrow) %v6759_v7, 8 }
 0xa49   : > { %6940 = vxpose.xlu1.b32.cont [4/16] (narrow) %v6760_v53, 8 }
 0xa4b   : > { %v7427_v23 = vpop.f32.mrb[38].mxu1 }
 0xa4c   : > { %v6682_v42 = vpop.f32.mrb[39].mxu1  ;;  %v6688_v27 = vadd.f32 %v7427_v23, %v13110_v30 }
 0xa4d   : > { %v6683_v60 = vadd.f32 %v13110_v30, %v6682_v42 }
 0xa4e   : > { %v6762_v63 = vmax.f32 %v6688_v27, 0.0 }
 0xa4f   : > { %v6761_v6 = vmax.f32 %v6683_v60, 0.0 }
 0xa51   : > { %6941 = vxpose.xlu1.b32.cont [5/16] (narrow) %v6761_v6, 8 }
 0xa55   : > { %6942 = vxpose.xlu1.b32.cont [6/16] (narrow) %v6762_v63, 8 }
 0xa57   : > { %v7430_v0 = vpop.f32.mrb[40].mxu1 }
 0xa58   : > { %v6692_v24 = vpop.f32.mrb[41].mxu1  ;;  %v6698_v28 = vadd.f32 %v7430_v0, %v13110_v30 }
 0xa59   : > { %v6693_v15 = vadd.f32 %v13110_v30, %v6692_v24 }
 0xa5a   : > { %v6764_v16 = vmax.f32 %v6698_v28, 0.0 }
 0xa5b   : > { %v6763_v46 = vmax.f32 %v6693_v15, 0.0 }
 0xa5d   : > { %6943 = vxpose.xlu1.b32.cont [7/16] (narrow) %v6763_v46, 8 }
 0xa61   : > { %6944 = vxpose.xlu1.b32.cont [8/16] (narrow) %v6764_v16, 8 }
 0xa63   : > { %v7433_v29 = vpop.f32.mrb[42].mxu1 }
 0xa64   : > { %v6702_v14 = vpop.f32.mrb[43].mxu1  ;;  %v6708_v41 = vadd.f32 %v7433_v29, %v13110_v30 }
 0xa65   : > { %v6703_v47 = vadd.f32 %v13110_v30, %v6702_v14 }
 0xa66   : > { %v6766_v12 = vmax.f32 %v6708_v41, 0.0 }
 0xa67   : > { %v6765_v25 = vmax.f32 %v6703_v47, 0.0 }
 0xa69   : > { %6945 = vxpose.xlu1.b32.cont [9/16] (narrow) %v6765_v25, 8 }
 0xa6d   : > { %6946 = vxpose.xlu1.b32.cont [10/16] (narrow) %v6766_v12, 8 }
 0xa6f   : > { %v7436_v52 = vpop.f32.mrb[44].mxu1 }
 0xa70   : > { %v6712_v13 = vpop.f32.mrb[45].mxu1  ;;  %v6718_v22 = vadd.f32 %v7436_v52, %v13110_v30 }
 0xa71   : > { %v6713_v5 = vadd.f32 %v13110_v30, %v6712_v13 }
 0xa72   : > { %v6768_v34 = vmax.f32 %v6718_v22, 0.0 }
 0xa73   : > { %v6767_v56 = vmax.f32 %v6713_v5, 0.0 }
 0xa75   : > { %6947 = vxpose.xlu1.b32.cont [11/16] (narrow) %v6767_v56, 8  ;;  %v6921_v32 = vpop.trf.xlu0 }
 0xa76   : > { %v6971_v1 = vrot.slane %v6921_v32, 4 }
 0xa78   : > { %6975 = vst [vmem:[%s13127_s15 + $0x10] sm:$0xf0] %v6971_v1 }
 0xa79   : > { %6948 = vxpose.xlu1.b32.cont [12/16] (narrow) %v6768_v34, 8 }
 0xa7b   : > { %v7439_v10 = vpop.f32.mrb[46].mxu1 }
 0xa7c   : > { %v6722_v26 = vpop.f32.mrb[47].mxu1  ;;  %v6728_v58 = vadd.f32 %v7439_v10, %v13110_v30 }
 0xa7d   : > { %v6723_v21 = vadd.f32 %v13110_v30, %v6722_v26 }
 0xa7e   : > { %v6770_v61 = vmax.f32 %v6728_v58, 0.0 }
 0xa7f   : > { %v6769_v54 = vmax.f32 %v6723_v21, 0.0 }
 0xa81   : > { %6949 = vxpose.xlu1.b32.cont [13/16] (narrow) %v6769_v54, 8 }
 0xa85   : > { %6950 = vxpose.xlu1.b32.cont [14/16] (narrow) %v6770_v61, 8 }
 0xa87   : > { %v7442_v33 = vpop.f32.mrb[48].mxu1 }
 0xa88   : > { %v6732_v43 = vpop.f32.mrb[49].mxu1  ;;  %v6738_v38 = vadd.f32 %v7442_v33, %v13110_v30 }
 0xa89   : > { %v6733_v2 = vadd.f32 %v13110_v30, %v6732_v43 }
 0xa8a   : > { %v6772_v51 = vmax.f32 %v6738_v38, 0.0 }
 0xa8b   : > { %v6771_v48 = vmax.f32 %v6733_v2, 0.0 }
 0xa8d   : > { %6951 = vxpose.xlu1.b32.cont [15/16] (narrow) %v6771_v48, 8 }
 0xa91   : > { %6952 = vxpose.xlu1.b32.end [16/16] (narrow) %v6772_v51, 8 }
 0xad5   : > { %v6953_v20 = vpop.trf.xlu1 }
 0xad6   : > { %v6972_v3 = vrot.slane %v6953_v20, 4 }
 0xad8   : > { %6976 = vst [vmem:[%s13127_s15 + $0x18] sm:$0xf0] %v6972_v3 }
 0xad9 PF: > { %s17_s24 = sadd.s32 1, %s7594_s24  }
 0xada   : > { %p14_p4 = scmp.ge.s32.totalorder %s17_s24, 4  }
 0xadc   :  { %16 = sbr.rel (!%p14_p4) target bundleno = 1 (0x1), region = 84 }

</bundles_post_ra>
